<compile_context>
chip_gen: v7x
topology: tpu7x:2x2x1
jax: 0.10.0
libtpu: 0.0.40
codegen_flags: <defaults>
</compile_context>

<pallas_src>
import jax
import jax.numpy as jnp
from jax import lax
from jax.experimental import pallas as pl
from jax.experimental.pallas import tpu as pltpu

ACTION_NUM = 8  # module requires action_num + 1 == 9 (3x3 neighbourhood view)
NEW_INDEX = jnp.array([7, 0, 1, 6, 8, 2, 5, 4, 3], dtype=jnp.int32)

POS_W = 128        # lanes reserved per 3x3 spatial position in the conv1 output
CONV1_OUT = 20
CONV2_OUT = 30
POOL_WIN = ((0, 1, 3, 4), (1, 2, 4, 5), (3, 4, 6, 7), (4, 5, 7, 8))   # pooled (di,dj) windows
CONV2_TAPS = ((0, 0), (0, 1), (1, 0), (1, 1))                          # matching conv2 taps


def _round_up(a, m):
    return -(-a // m) * m


def leaky(v):
    # F.leaky_relu(v, 0.2)
    return jnp.maximum(v, 0.2 * v)


# ----------------------------------------------------------------------------- kernel

def make_kernel(gamma, slab_off, logpi_lane):
    def kernel(main_ref, w1_ref, slab_ref, out_ref):
        def ld(name):
            r, nr, nc = slab_off[name]
            return slab_ref[r:r + nr, :nc]

        dot = lambda a, w: jnp.dot(a, w, preferred_element_type=jnp.float32)
        lk = lambda v: jnp.maximum(v, 0.2 * v)

        main = main_ref[...]                                          # (TB, KW)

        # ---- conv1 (3x3, pad=1) + bias folded into ONE matmul; each 3x3 position lands
        #      in its own 128-lane-aligned slot -> later slices are free vreg views.
        h1 = lk(dot(main, w1_ref[...]))                               # (TB, 9*128)
        pos = [h1[:, POS_W * j:POS_W * (j + 1)] for j in range(9)]

        # ---- MaxPool2d(2, stride=1) + conv2 (2x2, valid): four full-tile VPU maxima and
        #      four accumulated (TB,128)@(128,30) MXU dots (zero-padded channel rows).
        w2r, _, w2c = slab_off["w2"]
        c2 = ld("b2")                                                 # (1, 30)
        for k, (a, b, c, d) in enumerate(POOL_WIN):
            pw = jnp.maximum(jnp.maximum(pos[a], pos[b]), jnp.maximum(pos[c], pos[d]))
            w2k = slab_ref[w2r + POS_W * k: w2r + POS_W * (k + 1), :w2c]
            c2 = c2 + dot(pw, w2k)
        c2 = lk(c2)                                                   # (TB, 30)

        # ---- reward head: conv part + (one-hot action + bias) folded out of `main`
        f1 = lk(dot(c2, ld("fc1_wc")) + dot(main, ld("fc1_main")))    # (TB, 120)
        f2 = lk(dot(f1, ld("fc2_w")) + ld("fc2_b"))                   # (TB, 84)
        rs = jnp.sum(f2 * ld("fc3_w"), -1, keepdims=True) + ld("fc3_b")   # (TB, 1)

        # ---- shared state-value head on current / next state features (folded out of
        #      `main` lanes; biases ride the constant-1 lane).
        a1c = lk(dot(main, ld("h1_cur")))                             # (TB, 120)
        a1n = lk(dot(main, ld("h1_nxt")))
        h2w, h2b = ld("h2_w"), ld("h2_b")
        a2c = lk(dot(a1c, h2w) + h2b)                                 # (TB, 84)
        a2n = lk(dot(a1n, h2w) + h2b)
        h3w, h3b = ld("h3_w"), ld("h3_b")
        hvc = jnp.sum(a2c * h3w, -1, keepdims=True) + h3b             # (TB, 1)
        hvn = jnp.sum(a2n * h3w, -1, keepdims=True) + h3b

        # ---- AIRL combination: rs + gamma * h(next) - h(cur) - log_pi
        logpi = main[:, logpi_lane:logpi_lane + 1]
        out_ref[...] = rs + gamma * hvn - hvc - logpi

    return kernel


def discriminator_forward_pallas(x_flat, act_onehot, xs, nxs, log_pis, weights,
                                 gamma, num_tiles=None):
    B = x_flat.shape[0]
    layout, kw = weights["layout"], weights["kw"]
    # Single fat grid step by default (the kernel is overhead-bound at these sizes); cap
    # the row tile near 1024 so h1 (TB x 1152 f32) stays a few MiB of VMEM scratch.
    nt = num_tiles if num_tiles is not None else max(1, -(-B // 1024))
    tb = _round_up(-(-B // nt), 8)
    b_pad = tb * nt

    # Lane-pack the five per-row streams into one operand (order must match the layout).
    one = jnp.ones((B, 1), jnp.float32)
    main = jnp.concatenate([log_pis, one, act_onehot, x_flat, xs, nxs], axis=1)
    main = jnp.pad(main, ((0, b_pad - B), (0, kw - main.shape[1])))

    w1_ext, slab = weights["w1_ext"], weights["slab"]

    out = pl.pallas_call(
        make_kernel(gamma, weights["slab_off"], layout["logpi"][0]),
        out_shape=jax.ShapeDtypeStruct((b_pad, 1), jnp.float32),
        grid=(nt,),
        in_specs=[
            pl.BlockSpec((tb, kw), lambda i: (i, 0)),        # packed per-row stream
            pl.BlockSpec(w1_ext.shape, lambda i: (0, 0)),    # folded conv1 (resident)
            pl.BlockSpec(slab.shape, lambda i: (0, 0)),      # all other weights (resident)
        ],
        out_specs=pl.BlockSpec((tb, 1), lambda i: (i, 0)),
        # TODO(synk): on v7x pass num_tiles=2 and dimension_semantics=(pltpu.CORE_PARALLEL,)
        # to split the batch across the two TensorCores; plain "parallel" is safe everywhere.
        compiler_params=pltpu.CompilerParams(dimension_semantics=("parallel",)),
    )(main, w1_ext, slab)
    return out[:B]


# ----------------------------------------------------------------------------- weight prep

def make_layout(an, c9, hs):
    """Lane layout of the packed `main` operand."""
    off, c = {}, 0
    for name, w in (("logpi", 1), ("one", 1), ("act", an), ("x", c9), ("xs", hs), ("nxs", hs)):
        off[name] = (c, w)
        c += w
    return off, _round_up(c, 128)


def build_conv1_rows(conv1_w):
    """Fold the 3x3 pad=1 conv on a 3x3 image into (9*C, 9*128).

    Input row layout r*C + c (r = spatial position, row-major); output column layout
    p*128 + o (each position in its own 128-lane slot, lanes o>=20 zero).
    """
    O, C, _, _ = conv1_w.shape
    rows = []
    for r in range(9):
        ri, rj = divmod(r, 3)
        cols = []
        for p in range(9):
            pi, pj = divmod(p, 3)
            di, dj = ri - pi + 1, rj - pj + 1
            if 0 <= di < 3 and 0 <= dj < 3:
                blk = conv1_w[:, :, di, dj].T                     # (C, O)
            else:
                blk = jnp.zeros((C, O), conv1_w.dtype)
            cols.append(jnp.pad(blk, ((0, 0), (0, POS_W - O))))   # (C, 128)
        rows.append(jnp.concatenate(cols, axis=1))                # (C, 9*128)
    return jnp.concatenate(rows, axis=0)                          # (9*C, 9*128)


def pack_slab(entries):
    """Pack 2D weights into one (R, 128) slab; every entry starts on an 8-row boundary."""
    parts, off, r = [], {}, 0
    for name, a in entries:
        a = jnp.asarray(a, jnp.float32)
        if a.ndim == 1:
            a = a[None, :]
        nr, nc = a.shape
        nr_p = _round_up(nr, 8)
        parts.append(jnp.pad(a, ((0, nr_p - nr), (0, 128 - nc))))
        off[name] = (r, nr, nc)
        r += nr_p
    return jnp.concatenate(parts, axis=0), off


def prepare_weights(raw, an, c9, hs):
    layout, kw = make_layout(an, c9, hs)

    def place(rows_dict, ncols):
        """Zero (KW, ncols) matrix with named lane-row ranges of `main` filled in."""
        m = jnp.zeros((kw, ncols), jnp.float32)
        for name, val in rows_dict.items():
            r0, w = layout[name]
            m = m.at[r0:r0 + w, :].set(jnp.asarray(val, jnp.float32).reshape(w, ncols))
        return m

    # conv1 folded matmul; bias rides the constant-1 lane of `main`.
    b1_row = jnp.tile(jnp.pad(raw["conv1_b"], (0, POS_W - CONV1_OUT)), 9)
    w1_ext = place({"x": build_conv1_rows(raw["conv1_w"]), "one": b1_row}, 9 * POS_W)

    # conv2: 4 taps stacked, each a 128-row block (channel rows 0:20, rest zero).
    w2 = jnp.concatenate(
        [jnp.pad(raw["conv2_w"][:, :, di, dj].T, ((0, POS_W - CONV1_OUT), (0, 0)))
         for (di, dj) in CONV2_TAPS], axis=0)                     # (512, 30)

    slab, slab_off = pack_slab([
        ("w2", w2),
        ("b2", raw["conv2_b"]),
        ("fc1_wc", raw["fc1_wc"]),
        ("fc1_main", place({"act": raw["fc1_wa"], "one": raw["fc1_b"]}, 120)),
        ("fc2_w", raw["fc2_w"]), ("fc2_b", raw["fc2_b"]),
        ("fc3_w", raw["fc3_w"].reshape(1, -1)), ("fc3_b", raw["fc3_b"].reshape(1, 1)),
        ("h1_cur", place({"xs": raw["h1_w"], "one": raw["h1_b"]}, 120)),
        ("h1_nxt", place({"nxs": raw["h1_w"], "one": raw["h1_b"]}, 120)),
        ("h2_w", raw["h2_w"]), ("h2_b", raw["h2_b"]),
        ("h3_w", raw["h3_w"].reshape(1, -1)), ("h3_b", raw["h3_b"].reshape(1, 1)),
    ])
    return {"w1_ext": w1_ext, "slab": slab, "slab_off": slab_off,
            "layout": layout, "kw": kw}


# ----------------------------------------------------------------------------- JAX glue
# Table gathers / one-hot have no clean Pallas equivalent at this scale; done in plain JAX.

def process_neigh_features(state, des, tables):
    sn = tables["action_state_pad"][state]                                 # (B, 9)
    npf = tables["path_feature"][sn, des[:, None], :]                      # (B, 9, path_dim)
    nef = tables["link_feature"][sn, :]                                    # (B, 9, link_dim)
    nmf = tables["policy_mask_pad"][state][..., None].astype(jnp.float32)  # (B, 9, 1)
    nf = jnp.concatenate([npf, nef, nmf], -1)
    return nf[:, NEW_INDEX, :]                                             # (B, 9, C) row-major 3x3


def process_state_features(state, des, tables):
    pf = tables["path_feature"][state, des, :]
    ef = tables["link_feature"][state, :]
    return jnp.concatenate([pf, ef], -1)


# ----------------------------------------------------------------------------- reference

def reference_forward(x_nchw, act_onehot, xs, nxs, log_pis, raw, gamma):
    hp = lax.Precision.HIGHEST
    mm = lambda a, w: jnp.dot(a, w, precision=hp)
    dn = ("NCHW", "OIHW", "NCHW")
    h = lax.conv_general_dilated(x_nchw, raw["conv1_w"], (1, 1), ((1, 1), (1, 1)),
                                 dimension_numbers=dn, precision=hp)
    h = leaky(h + raw["conv1_b"].reshape(1, -1, 1, 1))
    h = lax.reduce_window(h, -jnp.inf, lax.max, (1, 1, 2, 2), (1, 1, 1, 1), "VALID")
    h = lax.conv_general_dilated(h, raw["conv2_w"], (1, 1), "VALID",
                                 dimension_numbers=dn, precision=hp)
    h = leaky(h + raw["conv2_b"].reshape(1, -1, 1, 1)).reshape(x_nchw.shape[0], 30)
    f1 = leaky(mm(h, raw["fc1_wc"]) + mm(act_onehot, raw["fc1_wa"]) + raw["fc1_b"])
    f2 = leaky(mm(f1, raw["fc2_w"]) + raw["fc2_b"])
    rs = mm(f2, raw["fc3_w"]) + raw["fc3_b"]

    def hnet(v):
        a1 = leaky(mm(v, raw["h1_w"]) + raw["h1_b"])
        a2 = leaky(mm(a1, raw["h2_w"]) + raw["h2_b"])
        return mm(a2, raw["h3_w"]) + raw["h3_b"]

    return rs + gamma * hnet(nxs) - hnet(xs) - log_pis


# ----------------------------------------------------------------------------- main

if __name__ == "__main__":
    key = jax.random.PRNGKey(0)
    ks = jax.random.split(key, 32)

    B = 200                         # padded to 208 -> ONE fat grid step
    n_links, n_dest = 25, 10
    path_dim, link_dim = 5, 6
    gamma = 0.99
    hs_dim = path_dim + link_dim    # h_fc1 input dim
    rs_dim = hs_dim + 1             # conv1 input channels
    C9 = rs_dim * 9

    # ---- fixed feature tables (module buffers)
    path_feature = jax.random.normal(ks[0], (n_links, n_dest, path_dim), jnp.float32)
    link_feature = jax.random.normal(ks[1], (n_links, link_dim), jnp.float32)
    action_state = jax.random.randint(ks[2], (n_links, ACTION_NUM), 0, n_links)
    policy_mask = jax.random.randint(ks[3], (n_links, ACTION_NUM), 0, 2)
    tables = {
        "path_feature": path_feature,
        "link_feature": link_feature,
        "action_state_pad": jnp.concatenate(
            [action_state, jnp.arange(n_links, dtype=action_state.dtype)[:, None]], 1),
        "policy_mask_pad": jnp.concatenate(
            [policy_mask, jnp.zeros((n_links, 1), policy_mask.dtype)], 1),
    }

    # ---- deterministic parameters (shapes from __init__)
    def w(k, shape, scale=0.1):
        return scale * jax.random.normal(k, shape, jnp.float32)

    raw = {
        "conv1_w": w(ks[4], (20, rs_dim, 3, 3)), "conv1_b": w(ks[5], (20,)),
        "conv2_w": w(ks[6], (30, 20, 2, 2)),     "conv2_b": w(ks[7], (30,)),
        "fc1_wc": w(ks[8], (30, 120)), "fc1_wa": w(ks[9], (ACTION_NUM, 120)),
        "fc1_b": w(ks[10], (120,)),
        "fc2_w": w(ks[11], (120, 84)), "fc2_b": w(ks[12], (84,)),
        "fc3_w": w(ks[13], (84, 1)),   "fc3_b": w(ks[14], (1,)),
        "h1_w": w(ks[15], (hs_dim, 120)), "h1_b": w(ks[16], (120,)),
        "h2_w": w(ks[17], (120, 84)),     "h2_b": w(ks[18], (84,)),
        "h3_w": w(ks[19], (84, 1)),       "h3_b": w(ks[20], (1,)),
    }
    weights = prepare_weights(raw, ACTION_NUM, C9, hs_dim)

    # ---- example inputs
    states = jax.random.randint(ks[21], (B,), 0, n_links)
    des = jax.random.randint(ks[22], (B,), 0, n_dest)
    act = jax.random.randint(ks[23], (B,), 0, ACTION_NUM)
    next_states = jax.random.randint(ks[24], (B,), 0, n_links)
    log_pis = jax.random.normal(ks[25], (B, 1), jnp.float32)

    # ---- glue: table gathers + one-hot, then the Pallas hot path
    x9c = process_neigh_features(states, des, tables)                  # (B, 9, rs_dim)
    x_flat = x9c.reshape(B, C9)                                        # compact, no im2col blow-up
    act_onehot = jax.nn.one_hot(act, ACTION_NUM, dtype=jnp.float32)
    xs = process_state_features(states, des, tables)                   # (B, hs_dim)
    nxs = process_state_features(next_states, des, tables)

    out = discriminator_forward_pallas(x_flat, act_onehot, xs, nxs, log_pis, weights, gamma)
    out = jax.block_until_ready(out)

    x_nchw = x9c.reshape(B, 3, 3, rs_dim).transpose(0, 3, 1, 2)        # NCHW for the conv reference
    ref = reference_forward(x_nchw, act_onehot, xs, nxs, log_pis, raw, gamma)
    assert out.shape == (B, 1)
    err = float(jnp.max(jnp.abs(out - ref)))
    assert err < 1e-2, ("max abs err", err)

    print("KERNEL_OK")
</pallas_src>

<mosaic_0001>
module attributes {stable_mosaic.version = 11 : i64} {
  func.func @kernel(%arg0: i32, %arg1: memref<200x256xf32, #tpu.memory_space<vmem>>, %arg2: memref<256x1152xf32, #tpu.memory_space<vmem>>, %arg3: memref<1608x128xf32, #tpu.memory_space<vmem>>, %arg4: memref<200x1xf32, #tpu.memory_space<vmem>>) attributes {dimension_semantics = [#tpu.dimension_semantics<parallel>], iteration_bounds = array<i64: 1>, scalar_prefetch = 0 : i64, scratch_operands = 0 : i64, tpu.core_type = #tpu.core_type<tc>, window_params = [{transform_indices = @transform_0, window_bounds = array<i64: 200, 256>}, {pipeline_mode = #tpu.pipeline_mode<synchronous>, transform_indices = @transform_1, window_bounds = array<i64: 256, 1152>}, {pipeline_mode = #tpu.pipeline_mode<synchronous>, transform_indices = @transform_2, window_bounds = array<i64: 1608, 128>}, {transform_indices = @transform_3, window_bounds = array<i64: 200, 1>}]} {
    %c0 = arith.constant 0 : index
    %c0_0 = arith.constant 0 : index
    %0 = vector.load %arg1[%c0, %c0_0] : memref<200x256xf32, #tpu.memory_space<vmem>>, vector<200x256xf32>
    %c0_1 = arith.constant 0 : index
    %c0_2 = arith.constant 0 : index
    %1 = vector.load %arg2[%c0_1, %c0_2] : memref<256x1152xf32, #tpu.memory_space<vmem>>, vector<256x1152xf32>
    %cst = arith.constant dense<0.000000e+00> : vector<200x1152xf32>
    %2 = tpu.matmul %0, %1, %cst {dimension_numbers = #tpu.dot_dimension_numbers<[1], [0], [0], [1], [0, 0, 1, 1], [], []>} : vector<200x256xf32>, vector<256x1152xf32>, vector<200x1152xf32> -> vector<200x1152xf32>
    %cst_3 = arith.constant 2.000000e-01 : f32
    %3 = vector.broadcast %cst_3 : f32 to vector<200x1152xf32>
    %4 = arith.mulf %3, %2 : vector<200x1152xf32>
    %5 = arith.maximumf %2, %4 : vector<200x1152xf32>
    %6 = vector.extract_strided_slice %5 {offsets = [0, 0], sizes = [200, 128], strides = [1, 1]} : vector<200x1152xf32> to vector<200x128xf32>
    %7 = vector.extract_strided_slice %5 {offsets = [0, 128], sizes = [200, 128], strides = [1, 1]} : vector<200x1152xf32> to vector<200x128xf32>
    %8 = vector.extract_strided_slice %5 {offsets = [0, 256], sizes = [200, 128], strides = [1, 1]} : vector<200x1152xf32> to vector<200x128xf32>
    %9 = vector.extract_strided_slice %5 {offsets = [0, 384], sizes = [200, 128], strides = [1, 1]} : vector<200x1152xf32> to vector<200x128xf32>
    %10 = vector.extract_strided_slice %5 {offsets = [0, 512], sizes = [200, 128], strides = [1, 1]} : vector<200x1152xf32> to vector<200x128xf32>
    %11 = vector.extract_strided_slice %5 {offsets = [0, 640], sizes = [200, 128], strides = [1, 1]} : vector<200x1152xf32> to vector<200x128xf32>
    %12 = vector.extract_strided_slice %5 {offsets = [0, 768], sizes = [200, 128], strides = [1, 1]} : vector<200x1152xf32> to vector<200x128xf32>
    %13 = vector.extract_strided_slice %5 {offsets = [0, 896], sizes = [200, 128], strides = [1, 1]} : vector<200x1152xf32> to vector<200x128xf32>
    %14 = vector.extract_strided_slice %5 {offsets = [0, 1024], sizes = [200, 128], strides = [1, 1]} : vector<200x1152xf32> to vector<200x128xf32>
    %c512 = arith.constant 512 : index
    %c0_4 = arith.constant 0 : index
    %15 = vector.load %arg3[%c512, %c0_4] : memref<1608x128xf32, #tpu.memory_space<vmem>>, vector<1x30xf32>
    %16 = arith.maximumf %6, %7 : vector<200x128xf32>
    %17 = arith.maximumf %9, %10 : vector<200x128xf32>
    %18 = arith.maximumf %16, %17 : vector<200x128xf32>
    %c0_5 = arith.constant 0 : index
    %c0_6 = arith.constant 0 : index
    %19 = vector.load %arg3[%c0_5, %c0_6] : memref<1608x128xf32, #tpu.memory_space<vmem>>, vector<128x30xf32>
    %cst_7 = arith.constant dense<0.000000e+00> : vector<200x30xf32>
    %20 = tpu.matmul %18, %19, %cst_7 {dimension_numbers = #tpu.dot_dimension_numbers<[1], [0], [0], [1], [0, 0, 1, 1], [], []>} : vector<200x128xf32>, vector<128x30xf32>, vector<200x30xf32> -> vector<200x30xf32>
    %21 = vector.broadcast %15 : vector<1x30xf32> to vector<200x30xf32>
    %22 = arith.addf %21, %20 : vector<200x30xf32>
    %23 = arith.maximumf %7, %8 : vector<200x128xf32>
    %24 = arith.maximumf %10, %11 : vector<200x128xf32>
    %25 = arith.maximumf %23, %24 : vector<200x128xf32>
    %c128 = arith.constant 128 : index
    %c0_8 = arith.constant 0 : index
    %26 = vector.load %arg3[%c128, %c0_8] : memref<1608x128xf32, #tpu.memory_space<vmem>>, vector<128x30xf32>
    %cst_9 = arith.constant dense<0.000000e+00> : vector<200x30xf32>
    %27 = tpu.matmul %25, %26, %cst_9 {dimension_numbers = #tpu.dot_dimension_numbers<[1], [0], [0], [1], [0, 0, 1, 1], [], []>} : vector<200x128xf32>, vector<128x30xf32>, vector<200x30xf32> -> vector<200x30xf32>
    %28 = arith.addf %22, %27 : vector<200x30xf32>
    %29 = arith.maximumf %9, %10 : vector<200x128xf32>
    %30 = arith.maximumf %12, %13 : vector<200x128xf32>
    %31 = arith.maximumf %29, %30 : vector<200x128xf32>
    %c256 = arith.constant 256 : index
    %c0_10 = arith.constant 0 : index
    %32 = vector.load %arg3[%c256, %c0_10] : memref<1608x128xf32, #tpu.memory_space<vmem>>, vector<128x30xf32>
    %cst_11 = arith.constant dense<0.000000e+00> : vector<200x30xf32>
    %33 = tpu.matmul %31, %32, %cst_11 {dimension_numbers = #tpu.dot_dimension_numbers<[1], [0], [0], [1], [0, 0, 1, 1], [], []>} : vector<200x128xf32>, vector<128x30xf32>, vector<200x30xf32> -> vector<200x30xf32>
    %34 = arith.addf %28, %33 : vector<200x30xf32>
    %35 = arith.maximumf %10, %11 : vector<200x128xf32>
    %36 = arith.maximumf %13, %14 : vector<200x128xf32>
    %37 = arith.maximumf %35, %36 : vector<200x128xf32>
    %c384 = arith.constant 384 : index
    %c0_12 = arith.constant 0 : index
    %38 = vector.load %arg3[%c384, %c0_12] : memref<1608x128xf32, #tpu.memory_space<vmem>>, vector<128x30xf32>
    %cst_13 = arith.constant dense<0.000000e+00> : vector<200x30xf32>
    %39 = tpu.matmul %37, %38, %cst_13 {dimension_numbers = #tpu.dot_dimension_numbers<[1], [0], [0], [1], [0, 0, 1, 1], [], []>} : vector<200x128xf32>, vector<128x30xf32>, vector<200x30xf32> -> vector<200x30xf32>
    %40 = arith.addf %34, %39 : vector<200x30xf32>
    %cst_14 = arith.constant 2.000000e-01 : f32
    %41 = vector.broadcast %cst_14 : f32 to vector<200x30xf32>
    %42 = arith.mulf %41, %40 : vector<200x30xf32>
    %43 = arith.maximumf %40, %42 : vector<200x30xf32>
    %c520 = arith.constant 520 : index
    %c0_15 = arith.constant 0 : index
    %44 = vector.load %arg3[%c520, %c0_15] : memref<1608x128xf32, #tpu.memory_space<vmem>>, vector<30x120xf32>
    %cst_16 = arith.constant dense<0.000000e+00> : vector<200x120xf32>
    %45 = tpu.matmul %43, %44, %cst_16 {dimension_numbers = #tpu.dot_dimension_numbers<[1], [0], [0], [1], [0, 0, 1, 1], [], []>} : vector<200x30xf32>, vector<30x120xf32>, vector<200x120xf32> -> vector<200x120xf32>
    %c552 = arith.constant 552 : index
    %c0_17 = arith.constant 0 : index
    %46 = vector.load %arg3[%c552, %c0_17] : memref<1608x128xf32, #tpu.memory_space<vmem>>, vector<256x120xf32>
    %cst_18 = arith.constant dense<0.000000e+00> : vector<200x120xf32>
    %47 = tpu.matmul %0, %46, %cst_18 {dimension_numbers = #tpu.dot_dimension_numbers<[1], [0], [0], [1], [0, 0, 1, 1], [], []>} : vector<200x256xf32>, vector<256x120xf32>, vector<200x120xf32> -> vector<200x120xf32>
    %48 = arith.addf %45, %47 : vector<200x120xf32>
    %cst_19 = arith.constant 2.000000e-01 : f32
    %49 = vector.broadcast %cst_19 : f32 to vector<200x120xf32>
    %50 = arith.mulf %49, %48 : vector<200x120xf32>
    %51 = arith.maximumf %48, %50 : vector<200x120xf32>
    %c808 = arith.constant 808 : index
    %c0_20 = arith.constant 0 : index
    %52 = vector.load %arg3[%c808, %c0_20] : memref<1608x128xf32, #tpu.memory_space<vmem>>, vector<120x84xf32>
    %cst_21 = arith.constant dense<0.000000e+00> : vector<200x84xf32>
    %53 = tpu.matmul %51, %52, %cst_21 {dimension_numbers = #tpu.dot_dimension_numbers<[1], [0], [0], [1], [0, 0, 1, 1], [], []>} : vector<200x120xf32>, vector<120x84xf32>, vector<200x84xf32> -> vector<200x84xf32>
    %c928 = arith.constant 928 : index
    %c0_22 = arith.constant 0 : index
    %54 = vector.load %arg3[%c928, %c0_22] : memref<1608x128xf32, #tpu.memory_space<vmem>>, vector<1x84xf32>
    %55 = vector.broadcast %54 : vector<1x84xf32> to vector<200x84xf32>
    %56 = arith.addf %53, %55 : vector<200x84xf32>
    %cst_23 = arith.constant 2.000000e-01 : f32
    %57 = vector.broadcast %cst_23 : f32 to vector<200x84xf32>
    %58 = arith.mulf %57, %56 : vector<200x84xf32>
    %59 = arith.maximumf %56, %58 : vector<200x84xf32>
    %c936 = arith.constant 936 : index
    %c0_24 = arith.constant 0 : index
    %60 = vector.load %arg3[%c936, %c0_24] : memref<1608x128xf32, #tpu.memory_space<vmem>>, vector<1x84xf32>
    %61 = vector.broadcast %60 : vector<1x84xf32> to vector<200x84xf32>
    %62 = arith.mulf %59, %61 : vector<200x84xf32>
    %cst_25 = arith.constant dense<0.000000e+00> : vector<200xf32>
    %63 = vector.multi_reduction <add>, %62, %cst_25 [1] : vector<200x84xf32> to vector<200xf32>
    %64 = vector.shape_cast %63 : vector<200xf32> to vector<200x1xf32>
    %c944 = arith.constant 944 : index
    %c0_26 = arith.constant 0 : index
    %65 = vector.load %arg3[%c944, %c0_26] : memref<1608x128xf32, #tpu.memory_space<vmem>>, vector<1x1xf32>
    %66 = vector.broadcast %65 : vector<1x1xf32> to vector<200x1xf32>
    %67 = arith.addf %64, %66 : vector<200x1xf32>
    %c952 = arith.constant 952 : index
    %c0_27 = arith.constant 0 : index
    %68 = vector.load %arg3[%c952, %c0_27] : memref<1608x128xf32, #tpu.memory_space<vmem>>, vector<256x120xf32>
    %cst_28 = arith.constant dense<0.000000e+00> : vector<200x120xf32>
    %69 = tpu.matmul %0, %68, %cst_28 {dimension_numbers = #tpu.dot_dimension_numbers<[1], [0], [0], [1], [0, 0, 1, 1], [], []>} : vector<200x256xf32>, vector<256x120xf32>, vector<200x120xf32> -> vector<200x120xf32>
    %cst_29 = arith.constant 2.000000e-01 : f32
    %70 = vector.broadcast %cst_29 : f32 to vector<200x120xf32>
    %71 = arith.mulf %70, %69 : vector<200x120xf32>
    %72 = arith.maximumf %69, %71 : vector<200x120xf32>
    %c1208 = arith.constant 1208 : index
    %c0_30 = arith.constant 0 : index
    %73 = vector.load %arg3[%c1208, %c0_30] : memref<1608x128xf32, #tpu.memory_space<vmem>>, vector<256x120xf32>
    %cst_31 = arith.constant dense<0.000000e+00> : vector<200x120xf32>
    %74 = tpu.matmul %0, %73, %cst_31 {dimension_numbers = #tpu.dot_dimension_numbers<[1], [0], [0], [1], [0, 0, 1, 1], [], []>} : vector<200x256xf32>, vector<256x120xf32>, vector<200x120xf32> -> vector<200x120xf32>
    %cst_32 = arith.constant 2.000000e-01 : f32
    %75 = vector.broadcast %cst_32 : f32 to vector<200x120xf32>
    %76 = arith.mulf %75, %74 : vector<200x120xf32>
    %77 = arith.maximumf %74, %76 : vector<200x120xf32>
    %c1464 = arith.constant 1464 : index
    %c0_33 = arith.constant 0 : index
    %78 = vector.load %arg3[%c1464, %c0_33] : memref<1608x128xf32, #tpu.memory_space<vmem>>, vector<120x84xf32>
    %c1584 = arith.constant 1584 : index
    %c0_34 = arith.constant 0 : index
    %79 = vector.load %arg3[%c1584, %c0_34] : memref<1608x128xf32, #tpu.memory_space<vmem>>, vector<1x84xf32>
    %cst_35 = arith.constant dense<0.000000e+00> : vector<200x84xf32>
    %80 = tpu.matmul %72, %78, %cst_35 {dimension_numbers = #tpu.dot_dimension_numbers<[1], [0], [0], [1], [0, 0, 1, 1], [], []>} : vector<200x120xf32>, vector<120x84xf32>, vector<200x84xf32> -> vector<200x84xf32>
    %81 = vector.broadcast %79 : vector<1x84xf32> to vector<200x84xf32>
    %82 = arith.addf %80, %81 : vector<200x84xf32>
    %cst_36 = arith.constant 2.000000e-01 : f32
    %83 = vector.broadcast %cst_36 : f32 to vector<200x84xf32>
    %84 = arith.mulf %83, %82 : vector<200x84xf32>
    %85 = arith.maximumf %82, %84 : vector<200x84xf32>
    %cst_37 = arith.constant dense<0.000000e+00> : vector<200x84xf32>
    %86 = tpu.matmul %77, %78, %cst_37 {dimension_numbers = #tpu.dot_dimension_numbers<[1], [0], [0], [1], [0, 0, 1, 1], [], []>} : vector<200x120xf32>, vector<120x84xf32>, vector<200x84xf32> -> vector<200x84xf32>
    %87 = vector.broadcast %79 : vector<1x84xf32> to vector<200x84xf32>
    %88 = arith.addf %86, %87 : vector<200x84xf32>
    %cst_38 = arith.constant 2.000000e-01 : f32
    %89 = vector.broadcast %cst_38 : f32 to vector<200x84xf32>
    %90 = arith.mulf %89, %88 : vector<200x84xf32>
    %91 = arith.maximumf %88, %90 : vector<200x84xf32>
    %c1592 = arith.constant 1592 : index
    %c0_39 = arith.constant 0 : index
    %92 = vector.load %arg3[%c1592, %c0_39] : memref<1608x128xf32, #tpu.memory_space<vmem>>, vector<1x84xf32>
    %c1600 = arith.constant 1600 : index
    %c0_40 = arith.constant 0 : index
    %93 = vector.load %arg3[%c1600, %c0_40] : memref<1608x128xf32, #tpu.memory_space<vmem>>, vector<1x1xf32>
    %94 = vector.broadcast %92 : vector<1x84xf32> to vector<200x84xf32>
    %95 = arith.mulf %85, %94 : vector<200x84xf32>
    %cst_41 = arith.constant dense<0.000000e+00> : vector<200xf32>
    %96 = vector.multi_reduction <add>, %95, %cst_41 [1] : vector<200x84xf32> to vector<200xf32>
    %97 = vector.shape_cast %96 : vector<200xf32> to vector<200x1xf32>
    %98 = vector.broadcast %93 : vector<1x1xf32> to vector<200x1xf32>
    %99 = arith.addf %97, %98 : vector<200x1xf32>
    %100 = vector.broadcast %92 : vector<1x84xf32> to vector<200x84xf32>
    %101 = arith.mulf %91, %100 : vector<200x84xf32>
    %cst_42 = arith.constant dense<0.000000e+00> : vector<200xf32>
    %102 = vector.multi_reduction <add>, %101, %cst_42 [1] : vector<200x84xf32> to vector<200xf32>
    %103 = vector.shape_cast %102 : vector<200xf32> to vector<200x1xf32>
    %104 = vector.broadcast %93 : vector<1x1xf32> to vector<200x1xf32>
    %105 = arith.addf %103, %104 : vector<200x1xf32>
    %106 = vector.extract_strided_slice %0 {offsets = [0, 0], sizes = [200, 1], strides = [1, 1]} : vector<200x256xf32> to vector<200x1xf32>
    %cst_43 = arith.constant 9.900000e-01 : f32
    %107 = vector.broadcast %cst_43 : f32 to vector<200x1xf32>
    %108 = arith.mulf %107, %105 : vector<200x1xf32>
    %109 = arith.addf %67, %108 : vector<200x1xf32>
    %110 = arith.subf %109, %99 : vector<200x1xf32>
    %111 = arith.subf %110, %106 : vector<200x1xf32>
    %c0_44 = arith.constant 0 : index
    %c0_45 = arith.constant 0 : index
    %112 = vector.load %arg4[%c0_44, %c0_45] : memref<200x1xf32, #tpu.memory_space<vmem>>, vector<200x1xf32>
    tpu.vector_store %arg4[%c0_44, %c0_45], %111 {strides = array<i32>} : memref<200x1xf32, #tpu.memory_space<vmem>>, vector<200x1xf32>,
    return
  }
  func.func @transform_0(%arg0: i32) -> (i32, i32) {
    %c0_i32 = arith.constant 0 : i32
    %c0_i32_0 = arith.constant 0 : i32
    return %arg0, %c0_i32 : i32, i32
  }
  func.func @transform_1(%arg0: i32) -> (i32, i32) {
    %c0_i32 = arith.constant 0 : i32
    %c0_i32_0 = arith.constant 0 : i32
    %c0_i32_1 = arith.constant 0 : i32
    return %c0_i32, %c0_i32_0 : i32, i32
  }
  func.func @transform_2(%arg0: i32) -> (i32, i32) {
    %c0_i32 = arith.constant 0 : i32
    %c0_i32_0 = arith.constant 0 : i32
    %c0_i32_1 = arith.constant 0 : i32
    return %c0_i32, %c0_i32_0 : i32, i32
  }
  func.func @transform_3(%arg0: i32) -> (i32, i32) {
    %c0_i32 = arith.constant 0 : i32
    %c0_i32_0 = arith.constant 0 : i32
    return %arg0, %c0_i32 : i32, i32
  }
}

</mosaic_0001>

<bundles_post_ra>
// kernel: tpu_custom_call.1
= control target key start
LH: loop header
LB: loop body
LE: loop exit
PB: predicated region body
PF: predicated region fallthrough
CT: control target
= control target key end

     0   :  { %8 = vsyncpa [#allocation3], 0  ;;  %s10692_s0 = inlined_call_operand.hbm [shape: f32[200,256], index: 0, kind: input, shape index: {}]   ;;  %s10693_s1 = inlined_call_operand.hbm [shape: f32[256,1152], index: 1, kind: input, shape index: {}]   ;;  %s10694_s2 = inlined_call_operand.hbm [shape: f32[1608,128], index: 2, kind: input, shape index: {}]   ;;  %s10695_s3 = inlined_call_operand.vmem [shape: f32[200,1], index: 3, kind: output, shape index: {}]  }
   0x1   :  { %9 = vsyncpa [#allocation5], 0  ;;  %s8049_s12 = smov [#allocation4]   ;;  %s7979_s16 = scalar_lea.hbm %s10693_s1, 36864 }
   0x2   :  { %s27_s13 = sshll.u32 %s8049_s12, 4  ;;  %p7980_p0 = scmp.ne.s32.totalorder %s10693_s1, %s7979_s16  ;;  %s28_s13 = int_to_ptr.vmem [resolvable:$true] %s27_s13 }
   0x3   :  { %p7983_p1 = scmp.lt.u32.totalorder %s7979_s16, %s10693_s1 }
   0x5   :  { %p7985_p2 = pnand %p7983_p1, %p7980_p0 }
   0x7   :  { %7988 = shalt.err (!%p7985_p2)
}
   0x8   :  { %s7989_s21 = scalar_lea.vmem %s28_s13, 36864  ;;  %p7994_p4 = scmp.lt.s32.totalorder %s28_s13, %s28_s13 }
   0x9   :  { %p7990_p3 = scmp.ne.s32.totalorder %s28_s13, %s7989_s21  ;;  %p7995_p5 = scmp.lt.s32.totalorder %s7989_s21, %s7989_s21 }
   0xb   :  { %p7996_p6 = por %p7995_p5, %p7994_p4 }
   0xd   :  { %p7997_p7 = pnand %p7996_p6, %p7990_p3 }
   0xf   :  { %8000 = shalt.err (!%p7997_p7)
}
  0x10   :  { %s8050_s22 = smov 1152   ;;  %s8051_s23 = smov 72  }
  0x11   :  { %33 = dma.hbm_to_vmem [thread:$0]  %s10693_s1, 36864, %s28_s13, [#allocation5], %s8050_s22, %s8050_s22, %s8051_s23  }
  0x12   :  { %s8052_s26 = smov [#allocation2]   ;;  %s8001_s30 = scalar_lea.hbm %s10692_s0, 6400 }
  0x13   :  { %s15_s27 = sshll.u32 %s8052_s26, 4  ;;  %p8002_p8 = scmp.ne.s32.totalorder %s10692_s0, %s8001_s30  ;;  %s16_s27 = int_to_ptr.vmem [resolvable:$true] %s15_s27 }
  0x14   :  { %p8005_p9 = scmp.lt.u32.totalorder %s8001_s30, %s10692_s0 }
  0x16   :  { %p8007_p10 = pnand %p8005_p9, %p8002_p8 }
  0x18   :  { %8010 = shalt.err (!%p8007_p10)
}
  0x19   :  { %s8011_s8 = scalar_lea.vmem %s16_s27, 6400  ;;  %p8016_p12 = scmp.lt.s32.totalorder %s16_s27, %s16_s27 }
  0x1a   :  { %p8012_p11 = scmp.ne.s32.totalorder %s16_s27, %s8011_s8  ;;  %p8017_p13 = scmp.lt.s32.totalorder %s8011_s8, %s8011_s8 }
  0x1c   :  { %p8018_p0 = por %p8017_p13, %p8016_p12 }
  0x1e   :  { %p8019_p1 = pnand %p8018_p0, %p8012_p11 }
  0x20   :  { %8022 = shalt.err (!%p8019_p1)
}
  0x21   :  { %s8053_s1 = smov 256   ;;  %s8054_s9 = smov 16  }
  0x22   :  { %21 = dma.hbm_to_vmem [thread:$0]  %s10692_s0, 6400, %s16_s27, [#allocation3], %s8053_s1, %s8053_s1, %s8054_s9  }
  0x23   :  { %s8055_s12 = smov [#allocation6]   ;;  %s8023_s16 = scalar_lea.hbm %s10694_s2, 25728 }
  0x24   :  { %s39_s13 = sshll.u32 %s8055_s12, 4  ;;  %p8024_p2 = scmp.ne.s32.totalorder %s10694_s2, %s8023_s16  ;;  %s40_s13 = int_to_ptr.vmem [resolvable:$true] %s39_s13 }
  0x25   :  { %p8027_p3 = scmp.lt.u32.totalorder %s8023_s16, %s10694_s2 }
  0x27   :  { %p8029_p4 = pnand %p8027_p3, %p8024_p2 }
  0x29   :  { %8032 = shalt.err (!%p8029_p4)
}
  0x2a   :  { %s8033_s21 = scalar_lea.vmem %s40_s13, 25728  ;;  %p8038_p6 = scmp.lt.s32.totalorder %s40_s13, %s40_s13 }
  0x2b   :  { %p8034_p5 = scmp.ne.s32.totalorder %s40_s13, %s8033_s21  ;;  %p8039_p7 = scmp.lt.s32.totalorder %s8033_s21, %s8033_s21 }
  0x2d   :  { %p8040_p8 = por %p8039_p7, %p8038_p6 }
  0x2f   :  { %p8041_p9 = pnand %p8040_p8, %p8034_p5 }
  0x31   :  { %8044 = shalt.err (!%p8041_p9)
}
  0x32   :  { %s8056_s0 = smov 128   ;;  %s8057_s22 = smov 8  }
  0x33   :  { %45 = dma.hbm_to_vmem [thread:$0]  %s10694_s2, 25728, %s40_s13, [#allocation5], %s8056_s0, %s8056_s0, %s8057_s22  }
  0x34   :  { %8045 = dma.done.wait [#allocation3], 6400  }
  0x35   :  { %8046 = vsyncadd [#allocation3], 4294960896 }
  0x36   :  { %8047 = dma.done.wait [#allocation5], 62592  }
  0x37   :  { %8048 = vsyncadd [#allocation5], 4294904704  ;;  %v106_v0 = vld [vmem:[#allocation4 + $0x8] sm:$0xff]  ;;  %v115_v1 = vld [vmem:[#allocation4 + $0x50] sm:$0xff]  ;;  %vm8059_vm0 = vmmov 0   ;;  %vm3424_vm1 = vcmask 1045504  }
  0x38   :  { %v108_v2 = vld [vmem:[#allocation4 + $0x18] sm:$0xff]  ;;  %v6973_v3 = vpack.c.bf16 %v115_v1, %v106_v0  ;;  %v117_v4 = vld [vmem:[#allocation4 + $0x60] sm:$0xff]  ;;  %v114_v6 = vld [vmem:[#allocation4 + $0x48] sm:$0xff]  ;;  %vm8061_vm2 = vmmov 1   ;;  %vm3348_vm4 = vcmask 244736   ;;  %vm3688_vm5 = vcmask 982016  }
  0x39   :  { %v105_v5 = vld [vmem:[#allocation4] sm:$0xff]  ;;  %v7037_v7 = vpack.c.bf16 %v117_v4, %v108_v2  ;;  %v107_v9 = vld [vmem:[#allocation4 + $0x10] sm:$0xff]  ;;  %v116_v10 = vld [vmem:[#allocation4 + $0x58] sm:$0xff]  ;;  %vm4034_vm6 = vcmask 687104   ;;  %vm5694_vm7 = vcmask 7168  }
  0x3a   :  { %v6975_v8 = vpack.c.bf16 %v114_v6, %v105_v5  ;;  %v124_v11 = vld [vmem:[#allocation4 + $0x98] sm:$0xff]  ;;  %6974 = vmatprep.subr.bf16.mxu0 %v6973_v3  ;;  %v7039_v12 = vpack.c.bf16 %v116_v10, %v107_v9  ;;  %v133_v13 = vld [vmem:[#allocation4 + $0xe0] sm:$0xff]  ;;  %v126_v14 = vld [vmem:[#allocation4 + $0xa8] sm:$0xff] }
  0x3b   :  { %v135_v15 = vld [vmem:[#allocation4 + $0xf0] sm:$0xff]  ;;  %7038 = vmatprep.subr.bf16.mxu1 %v7037_v7  ;;  %v6977_v16 = vpack.c.bf16 %v133_v13, %v124_v11  ;;  %v132_v19 = vld [vmem:[#allocation4 + $0xd8] sm:$0xff]  ;;  %v125_v20 = vld [vmem:[#allocation4 + $0xa0] sm:$0xff] }
  0x3c   :  { %6976 = vmatpush1.bf16.msra.mxu0 %v6975_v8  ;;  %v7041_v17 = vpack.c.bf16 %v135_v15, %v126_v14  ;;  %v123_v18 = vld [vmem:[#allocation4 + $0x90] sm:$0xff]  ;;  %7040 = vmatpush1.bf16.msra.mxu1 %v7039_v12  ;;  %v134_v22 = vld [vmem:[#allocation4 + $0xe8] sm:$0xff]  ;;  %v144_v27 = vld [vmem:[#allocation4 + $0x138] sm:$0xff] }
  0x3d   :  { %v6979_v21 = vpack.c.bf16 %v132_v19, %v123_v18  ;;  %v142_v23 = vld [vmem:[#allocation4 + $0x128] sm:$0xff]  ;;  %v151_v24 = vld [vmem:[#allocation4 + $0x170] sm:$0xff]  ;;  %6978 = vmatprep.subr.bf16.mxu0 %v6977_v16  ;;  %v7043_v25 = vpack.c.bf16 %v134_v22, %v125_v20  ;;  %v153_v28 = vld [vmem:[#allocation4 + $0x180] sm:$0xff] }
  0x3e   :  { %7042 = vmatprep.subr.bf16.mxu1 %v7041_v17  ;;  %v6981_v26 = vpack.c.bf16 %v151_v24, %v142_v23  ;;  %v141_v29 = vld [vmem:[#allocation4 + $0x120] sm:$0xff]  ;;  %v7045_v30 = vpack.c.bf16 %v153_v28, %v144_v27  ;;  %v150_v31 = vld [vmem:[#allocation4 + $0x168] sm:$0xff]  ;;  %v143_v32 = vld [vmem:[#allocation4 + $0x130] sm:$0xff] }
  0x3f   :  { %v152_v33 = vld [vmem:[#allocation4 + $0x178] sm:$0xff]  ;;  %v6983_v34 = vpack.c.bf16 %v150_v31, %v141_v29  ;;  %v169_v36 = vld [vmem:[#allocation4 + $0x200] sm:$0xff]  ;;  %v162_v37 = vld [vmem:[#allocation4 + $0x1c8] sm:$0xff] }
  0x40   :  { %6980 = vmatpush1.bf16.msra.mxu0 %v6979_v21  ;;  %v160_v35 = vld [vmem:[#allocation4 + $0x1b8] sm:$0xff]  ;;  %7044 = vmatpush1.bf16.msra.mxu1 %v7043_v25  ;;  %v7047_v38 = vpack.c.bf16 %v152_v33, %v143_v32  ;;  %v171_v40 = vld [vmem:[#allocation4 + $0x210] sm:$0xff]  ;;  %v161_v44 = vld [vmem:[#allocation4 + $0x1c0] sm:$0xff] }
  0x41   :  { %6982 = vmatprep.subr.bf16.mxu0 %v6981_v26  ;;  %v6985_v39 = vpack.c.bf16 %v169_v36, %v160_v35  ;;  %v159_v41 = vld [vmem:[#allocation4 + $0x1b0] sm:$0xff]  ;;  %v168_v42 = vld [vmem:[#allocation4 + $0x1f8] sm:$0xff]  ;;  %7046 = vmatprep.subr.bf16.mxu1 %v7045_v30  ;;  %v7049_v43 = vpack.c.bf16 %v171_v40, %v162_v37  ;;  %v170_v45 = vld [vmem:[#allocation4 + $0x208] sm:$0xff] }
  0x42   :  { %v178_v46 = vld [vmem:[#allocation4 + $0x248] sm:$0xff]  ;;  %v187_v47 = vld [vmem:[#allocation4 + $0x290] sm:$0xff]  ;;  %v180_v48 = vld [vmem:[#allocation4 + $0x258] sm:$0xff]  ;;  %v6987_v50 = vpack.c.bf16 %v168_v42, %v159_v41  ;;  %v7051_v51 = vpack.c.bf16 %v170_v45, %v161_v44 }
  0x43   :  { %v189_v49 = vld [vmem:[#allocation4 + $0x2a0] sm:$0xff]  ;;  %v6989_v52 = vpack.c.bf16 %v187_v47, %v178_v46  ;;  %v186_v54 = vld [vmem:[#allocation4 + $0x288] sm:$0xff]  ;;  %v179_v55 = vld [vmem:[#allocation4 + $0x250] sm:$0xff] }
  0x44   :  { %6984 = vmatpush1.bf16.msra.mxu0 %v6983_v34  ;;  %7048 = vmatpush1.bf16.msra.mxu1 %v7047_v38  ;;  %v177_v53 = vld [vmem:[#allocation4 + $0x240] sm:$0xff]  ;;  %v7053_v56 = vpack.c.bf16 %v189_v49, %v180_v48  ;;  %v188_v57 = vld [vmem:[#allocation4 + $0x298] sm:$0xff]  ;;  %v198_v60 = vld [vmem:[#allocation4 + $0x2e8] sm:$0xff] }
  0x45   :  { %6986 = vmatprep.subr.bf16.mxu0 %v6985_v39  ;;  %7050 = vmatprep.subr.bf16.mxu1 %v7049_v43  ;;  %v196_v58 = vld [vmem:[#allocation4 + $0x2d8] sm:$0xff]  ;;  %v205_v59 = vld [vmem:[#allocation4 + $0x320] sm:$0xff]  ;;  %v207_v61 = vld [vmem:[#allocation4 + $0x330] sm:$0xff]  ;;  %v6991_v62 = vpack.c.bf16 %v186_v54, %v177_v53  ;;  %v7055_v63 = vpack.c.bf16 %v188_v57, %v179_v55 }
  0x46   :  { %v6993_v0 = vpack.c.bf16 %v205_v59, %v196_v58  ;;  %v195_v1 = vld [vmem:[#allocation4 + $0x2d0] sm:$0xff]  ;;  %v204_v2 = vld [vmem:[#allocation4 + $0x318] sm:$0xff]  ;;  %v197_v3 = vld [vmem:[#allocation4 + $0x2e0] sm:$0xff]  ;;  %v7057_v4 = vpack.c.bf16 %v207_v61, %v198_v60 }
  0x47   :  { %v206_v5 = vld [vmem:[#allocation4 + $0x328] sm:$0xff]  ;;  %v223_v7 = vld [vmem:[#allocation4 + $0x3b0] sm:$0xff]  ;;  %v216_v8 = vld [vmem:[#allocation4 + $0x378] sm:$0xff]  ;;  %v6995_v10 = vpack.c.bf16 %v204_v2, %v195_v1 }
  0x48   :  { %6988 = vmatpush1.bf16.msra.mxu0 %v6987_v50  ;;  %7052 = vmatpush1.bf16.msra.mxu1 %v7051_v51  ;;  %v214_v6 = vld [vmem:[#allocation4 + $0x368] sm:$0xff]  ;;  %v225_v9 = vld [vmem:[#allocation4 + $0x3c0] sm:$0xff]  ;;  %v7059_v11 = vpack.c.bf16 %v206_v5, %v197_v3  ;;  %v215_v15 = vld [vmem:[#allocation4 + $0x370] sm:$0xff] }
  0x49   :  { %6990 = vmatprep.subr.bf16.mxu0 %v6989_v52  ;;  %7054 = vmatprep.subr.bf16.mxu1 %v7053_v56  ;;  %v6997_v12 = vpack.c.bf16 %v223_v7, %v214_v6  ;;  %v213_v13 = vld [vmem:[#allocation4 + $0x360] sm:$0xff]  ;;  %v222_v14 = vld [vmem:[#allocation4 + $0x3a8] sm:$0xff]  ;;  %v7061_v16 = vpack.c.bf16 %v225_v9, %v216_v8  ;;  %v224_v17 = vld [vmem:[#allocation4 + $0x3b8] sm:$0xff] }
  0x4a   :  { %v232_v18 = vld [vmem:[#allocation4 + $0x3f8] sm:$0xff]  ;;  %v241_v19 = vld [vmem:[#allocation4 + $0x440] sm:$0xff]  ;;  %v234_v20 = vld [vmem:[#allocation4 + $0x408] sm:$0xff]  ;;  %v6999_v22 = vpack.c.bf16 %v222_v14, %v213_v13  ;;  %v7063_v23 = vpack.c.bf16 %v224_v17, %v215_v15 }
  0x4b   :  { %v243_v21 = vld [vmem:[#allocation4 + $0x450] sm:$0xff]  ;;  %v7001_v24 = vpack.c.bf16 %v241_v19, %v232_v18  ;;  %v240_v26 = vld [vmem:[#allocation4 + $0x438] sm:$0xff]  ;;  %v233_v27 = vld [vmem:[#allocation4 + $0x400] sm:$0xff] }
  0x4c   :  { %6992 = vmatpush1.bf16.msra.mxu0 %v6991_v62  ;;  %7056 = vmatpush1.bf16.msra.mxu1 %v7055_v63  ;;  %v231_v25 = vld [vmem:[#allocation4 + $0x3f0] sm:$0xff]  ;;  %v7065_v28 = vpack.c.bf16 %v243_v21, %v234_v20  ;;  %v242_v29 = vld [vmem:[#allocation4 + $0x448] sm:$0xff]  ;;  %v252_v32 = vld [vmem:[#allocation4 + $0x498] sm:$0xff] }
  0x4d   :  { %6994 = vmatprep.subr.bf16.mxu0 %v6993_v0  ;;  %7058 = vmatprep.subr.bf16.mxu1 %v7057_v4  ;;  %v250_v30 = vld [vmem:[#allocation4 + $0x488] sm:$0xff]  ;;  %v259_v31 = vld [vmem:[#allocation4 + $0x4d0] sm:$0xff]  ;;  %v261_v33 = vld [vmem:[#allocation4 + $0x4e0] sm:$0xff]  ;;  %v7003_v34 = vpack.c.bf16 %v240_v26, %v231_v25  ;;  %v7067_v35 = vpack.c.bf16 %v242_v29, %v233_v27 }
  0x4e   :  { %v7005_v36 = vpack.c.bf16 %v259_v31, %v250_v30  ;;  %v249_v37 = vld [vmem:[#allocation4 + $0x480] sm:$0xff]  ;;  %v258_v38 = vld [vmem:[#allocation4 + $0x4c8] sm:$0xff]  ;;  %v251_v39 = vld [vmem:[#allocation4 + $0x490] sm:$0xff]  ;;  %v7069_v40 = vpack.c.bf16 %v261_v33, %v252_v32 }
  0x4f   :  { %v260_v41 = vld [vmem:[#allocation4 + $0x4d8] sm:$0xff]  ;;  %v277_v43 = vld [vmem:[#allocation4 + $0x560] sm:$0xff]  ;;  %v270_v44 = vld [vmem:[#allocation4 + $0x528] sm:$0xff]  ;;  %v7007_v46 = vpack.c.bf16 %v258_v38, %v249_v37 }
  0x50   :  { %6996 = vmatpush1.bf16.msra.mxu0 %v6995_v10  ;;  %7060 = vmatpush1.bf16.msra.mxu1 %v7059_v11  ;;  %v268_v42 = vld [vmem:[#allocation4 + $0x518] sm:$0xff]  ;;  %v279_v45 = vld [vmem:[#allocation4 + $0x570] sm:$0xff]  ;;  %v7071_v47 = vpack.c.bf16 %v260_v41, %v251_v39  ;;  %v269_v51 = vld [vmem:[#allocation4 + $0x520] sm:$0xff] }
  0x51   :  { %6998 = vmatprep.subr.bf16.mxu0 %v6997_v12  ;;  %7062 = vmatprep.subr.bf16.mxu1 %v7061_v16  ;;  %v7009_v48 = vpack.c.bf16 %v277_v43, %v268_v42  ;;  %v267_v49 = vld [vmem:[#allocation4 + $0x510] sm:$0xff]  ;;  %v276_v50 = vld [vmem:[#allocation4 + $0x558] sm:$0xff]  ;;  %v7073_v52 = vpack.c.bf16 %v279_v45, %v270_v44  ;;  %v278_v53 = vld [vmem:[#allocation4 + $0x568] sm:$0xff] }
  0x52   :  { %v286_v54 = vld [vmem:[#allocation4 + $0x5a8] sm:$0xff]  ;;  %v295_v55 = vld [vmem:[#allocation4 + $0x5f0] sm:$0xff]  ;;  %v288_v56 = vld [vmem:[#allocation4 + $0x5b8] sm:$0xff]  ;;  %v7011_v58 = vpack.c.bf16 %v276_v50, %v267_v49  ;;  %v7075_v59 = vpack.c.bf16 %v278_v53, %v269_v51 }
  0x53   :  { %v297_v57 = vld [vmem:[#allocation4 + $0x600] sm:$0xff]  ;;  %v7013_v60 = vpack.c.bf16 %v295_v55, %v286_v54  ;;  %v294_v62 = vld [vmem:[#allocation4 + $0x5e8] sm:$0xff]  ;;  %v287_v63 = vld [vmem:[#allocation4 + $0x5b0] sm:$0xff] }
  0x54   :  { %7000 = vmatpush1.bf16.msra.mxu0 %v6999_v22  ;;  %7064 = vmatpush1.bf16.msra.mxu1 %v7063_v23  ;;  %v285_v61 = vld [vmem:[#allocation4 + $0x5a0] sm:$0xff]  ;;  %v7077_v0 = vpack.c.bf16 %v297_v57, %v288_v56  ;;  %v296_v1 = vld [vmem:[#allocation4 + $0x5f8] sm:$0xff]  ;;  %v306_v4 = vld [vmem:[#allocation4 + $0x648] sm:$0xff] }
  0x55   :  { %7002 = vmatprep.subr.bf16.mxu0 %v7001_v24  ;;  %7066 = vmatprep.subr.bf16.mxu1 %v7065_v28  ;;  %v304_v2 = vld [vmem:[#allocation4 + $0x638] sm:$0xff]  ;;  %v313_v3 = vld [vmem:[#allocation4 + $0x680] sm:$0xff]  ;;  %v315_v5 = vld [vmem:[#allocation4 + $0x690] sm:$0xff]  ;;  %v7015_v6 = vpack.c.bf16 %v294_v62, %v285_v61  ;;  %v7079_v8 = vpack.c.bf16 %v296_v1, %v287_v63 }
  0x56   :  { %v303_v7 = vld [vmem:[#allocation4 + $0x630] sm:$0xff]  ;;  %v7017_v9 = vpack.c.bf16 %v313_v3, %v304_v2  ;;  %v312_v10 = vld [vmem:[#allocation4 + $0x678] sm:$0xff]  ;;  %v305_v11 = vld [vmem:[#allocation4 + $0x640] sm:$0xff]  ;;  %v7081_v13 = vpack.c.bf16 %v315_v5, %v306_v4 }
  0x57   :  { %v314_v12 = vld [vmem:[#allocation4 + $0x688] sm:$0xff]  ;;  %v331_v15 = vld [vmem:[#allocation4 + $0x710] sm:$0xff]  ;;  %v8118_v16 = vld [vmem:[#allocation2 + $0x8] sm:$0xff]  ;;  %v7019_v19 = vpack.c.bf16 %v312_v10, %v303_v7 }
  0x58   :  { %7004 = vmatpush1.bf16.msra.mxu0 %v7003_v34  ;;  %7068 = vmatpush1.bf16.msra.mxu1 %v7067_v35  ;;  %v322_v14 = vld [vmem:[#allocation4 + $0x6c8] sm:$0xff]  ;;  %v324_v17 = vld [vmem:[#allocation4 + $0x6d8] sm:$0xff]  ;;  %v333_v18 = vld [vmem:[#allocation4 + $0x720] sm:$0xff]  ;;  %v7083_v20 = vpack.c.bf16 %v314_v12, %v305_v11 }
  0x59   :  { %7006 = vmatprep.subr.bf16.mxu0 %v7005_v36  ;;  %7070 = vmatprep.subr.bf16.mxu1 %v7069_v40  ;;  %v7021_v21 = vpack.c.bf16 %v331_v15, %v322_v14  ;;  %v321_v22 = vld [vmem:[#allocation4 + $0x6c0] sm:$0xff]  ;;  %v330_v23 = vld [vmem:[#allocation4 + $0x708] sm:$0xff]  ;;  %v323_v24 = vld [vmem:[#allocation4 + $0x6d0] sm:$0xff]  ;;  %v7085_v25 = vpack.c.bf16 %v333_v18, %v324_v17 }
  0x5a   :  { %457 = vmatprep.mubr.f32.mxu0 %v8118_v16  ;;  %672 = vmatprep.mubr.f32.mxu1 %v8118_v16  ;;  %v332_v26 = vld [vmem:[#allocation4 + $0x718] sm:$0xff]  ;;  %v349_v28 = vld [vmem:[#allocation4 + $0x7a0] sm:$0xff]  ;;  %v342_v29 = vld [vmem:[#allocation4 + $0x768] sm:$0xff]  ;;  %v7023_v31 = vpack.c.bf16 %v330_v23, %v321_v22 }
  0x5b   :  { %v340_v27 = vld [vmem:[#allocation4 + $0x758] sm:$0xff]  ;;  %v351_v30 = vld [vmem:[#allocation4 + $0x7b0] sm:$0xff]  ;;  %v7087_v32 = vpack.c.bf16 %v332_v26, %v323_v24  ;;  %v341_v36 = vld [vmem:[#allocation4 + $0x760] sm:$0xff] }
  0x5c   :  { %7008 = vmatpush1.bf16.msra.mxu0 %v7007_v46  ;;  %7072 = vmatpush1.bf16.msra.mxu1 %v7071_v47  ;;  %v7025_v33 = vpack.c.bf16 %v349_v28, %v340_v27  ;;  %v339_v34 = vld [vmem:[#allocation4 + $0x750] sm:$0xff]  ;;  %v348_v35 = vld [vmem:[#allocation4 + $0x798] sm:$0xff]  ;;  %v7089_v37 = vpack.c.bf16 %v351_v30, %v342_v29  ;;  %v350_v38 = vld [vmem:[#allocation4 + $0x7a8] sm:$0xff] }
  0x5d   :  { %7010 = vmatprep.subr.bf16.mxu0 %v7009_v48  ;;  %7074 = vmatprep.subr.bf16.mxu1 %v7073_v52  ;;  %v358_v39 = vld [vmem:[#allocation4 + $0x7e8] sm:$0xff]  ;;  %v367_v40 = vld [vmem:[#allocation4 + $0x830] sm:$0xff]  ;;  %v360_v41 = vld [vmem:[#allocation4 + $0x7f8] sm:$0xff]  ;;  %v7027_v43 = vpack.c.bf16 %v348_v35, %v339_v34  ;;  %v7091_v44 = vpack.c.bf16 %v350_v38, %v341_v36 }
  0x5e   :  { %v369_v42 = vld [vmem:[#allocation4 + $0x840] sm:$0xff]  ;;  %v7029_v45 = vpack.c.bf16 %v367_v40, %v358_v39  ;;  %v366_v47 = vld [vmem:[#allocation4 + $0x828] sm:$0xff]  ;;  %v359_v48 = vld [vmem:[#allocation4 + $0x7f0] sm:$0xff] }
  0x5f   :  { %v357_v46 = vld [vmem:[#allocation4 + $0x7e0] sm:$0xff]  ;;  %v7093_v49 = vpack.c.bf16 %v369_v42, %v360_v41  ;;  %v368_v50 = vld [vmem:[#allocation4 + $0x838] sm:$0xff]  ;;  %v378_v53 = vld [vmem:[#allocation4 + $0x888] sm:$0xff] }
  0x60   :  { %7012 = vmatpush1.bf16.msra.mxu0 %v7011_v58  ;;  %7076 = vmatpush1.bf16.msra.mxu1 %v7075_v59  ;;  %v376_v51 = vld [vmem:[#allocation4 + $0x878] sm:$0xff]  ;;  %v385_v52 = vld [vmem:[#allocation4 + $0x8c0] sm:$0xff]  ;;  %v387_v54 = vld [vmem:[#allocation4 + $0x8d0] sm:$0xff]  ;;  %v7031_v55 = vpack.c.bf16 %v366_v47, %v357_v46  ;;  %v7095_v56 = vpack.c.bf16 %v368_v50, %v359_v48 }
  0x61   :  { %7014 = vmatprep.subr.bf16.mxu0 %v7013_v60  ;;  %7078 = vmatprep.subr.bf16.mxu1 %v7077_v0  ;;  %v7033_v57 = vpack.c.bf16 %v385_v52, %v376_v51  ;;  %v375_v58 = vld [vmem:[#allocation4 + $0x870] sm:$0xff]  ;;  %v384_v59 = vld [vmem:[#allocation4 + $0x8b8] sm:$0xff]  ;;  %v377_v60 = vld [vmem:[#allocation4 + $0x880] sm:$0xff]  ;;  %v7097_v61 = vpack.c.bf16 %v387_v54, %v378_v53 }
  0x62   :  { %v386_v62 = vld [vmem:[#allocation4 + $0x8c8] sm:$0xff]  ;;  %v119_v0 = vld [vmem:[#allocation4 + $0x70] sm:$0xff]  ;;  %v112_v1 = vld [vmem:[#allocation4 + $0x38] sm:$0xff]  ;;  %v7035_v3 = vpack.c.bf16 %v384_v59, %v375_v58 }
  0x63   :  { %v110_v63 = vld [vmem:[#allocation4 + $0x28] sm:$0xff]  ;;  %v121_v2 = vld [vmem:[#allocation4 + $0x80] sm:$0xff]  ;;  %v7099_v4 = vpack.c.bf16 %v386_v62, %v377_v60  ;;  %v111_v11 = vld [vmem:[#allocation4 + $0x30] sm:$0xff] }
  0x64   :  { %7016 = vmatpush1.bf16.msra.mxu0 %v7015_v6  ;;  %7080 = vmatpush1.bf16.msra.mxu1 %v7079_v8  ;;  %v7101_v5 = vpack.c.bf16 %v119_v0, %v110_v63  ;;  %v109_v6 = vld [vmem:[#allocation4 + $0x20] sm:$0xff]  ;;  %v118_v7 = vld [vmem:[#allocation4 + $0x68] sm:$0xff]  ;;  %v128_v8 = vld [vmem:[#allocation4 + $0xb8] sm:$0xff] }
  0x65   :  { %7018 = vmatprep.subr.bf16.mxu0 %v7017_v9  ;;  %7082 = vmatprep.subr.bf16.mxu1 %v7081_v13  ;;  %v7165_v9 = vpack.c.bf16 %v121_v2, %v112_v1  ;;  %v137_v10 = vld [vmem:[#allocation4 + $0x100] sm:$0xff]  ;;  %v120_v12 = vld [vmem:[#allocation4 + $0x78] sm:$0xff]  ;;  %v8122_v13 = vld [vmem:[#allocation2] sm:$0xff]  ;;  %v7103_v14 = vpack.c.bf16 %v118_v7, %v109_v6 }
  0x66   :  { %v130_v15 = vld [vmem:[#allocation4 + $0xc8] sm:$0xff]  ;;  %v139_v17 = vld [vmem:[#allocation4 + $0x110] sm:$0xff]  ;;  %v7167_v23 = vpack.c.bf16 %v120_v12, %v111_v11  ;;  %v129_v26 = vld [vmem:[#allocation4 + $0xc0] sm:$0xff] }
  0x67   :  { %v8124_v18 = vld [vmem:[#allocation2 + $0x18] sm:$0xff]  ;;  %v155_v24 = vld [vmem:[#allocation4 + $0x190] sm:$0xff]  ;;  %v8128_v28 = vld [vmem:[#allocation2 + $0x10] sm:$0xff] }
  0x68   :  { %7020 = vmatpush1.bf16.msra.mxu0 %v7019_v19  ;;  %7084 = vmatpush1.bf16.msra.mxu1 %v7083_v20  ;;  %v7105_v19 = vpack.c.bf16 %v137_v10, %v128_v8  ;;  %v127_v20 = vld [vmem:[#allocation4 + $0xb0] sm:$0xff]  ;;  %v146_v22 = vld [vmem:[#allocation4 + $0x148] sm:$0xff]  ;;  %v148_v29 = vld [vmem:[#allocation4 + $0x158] sm:$0xff] }
  0x69   :  { %7022 = vmatprep.subr.bf16.mxu0 %v7021_v21  ;;  %7086 = vmatprep.subr.bf16.mxu1 %v7085_v25  ;;  %v136_v21 = vld [vmem:[#allocation4 + $0xf8] sm:$0xff]  ;;  %v7169_v25 = vpack.c.bf16 %v139_v17, %v130_v15  ;;  %v138_v27 = vld [vmem:[#allocation4 + $0x108] sm:$0xff]  ;;  %v157_v30 = vld [vmem:[#allocation4 + $0x1a0] sm:$0xff] }
  0x6a   :  { %v145_v34 = vld [vmem:[#allocation4 + $0x140] sm:$0xff]  ;;  %v154_v35 = vld [vmem:[#allocation4 + $0x188] sm:$0xff]  ;;  %v164_v36 = vld [vmem:[#allocation4 + $0x1d8] sm:$0xff]  ;;  %v7173_v39 = vpack.c.bf16 %v157_v30, %v148_v29 }
  0x6b   :  { %v173_v38 = vld [vmem:[#allocation4 + $0x220] sm:$0xff]  ;;  %v147_v40 = vld [vmem:[#allocation4 + $0x150] sm:$0xff]  ;;  %v156_v41 = vld [vmem:[#allocation4 + $0x198] sm:$0xff]  ;;  %v7111_v46 = vpack.c.bf16 %v154_v35, %v145_v34 }
  0x6c   :  { %7024 = vmatpush1.bf16.msra.mxu0 %v7023_v31  ;;  %7088 = vmatpush1.bf16.msra.mxu1 %v7087_v32  ;;  %v8132_v31 = vld [vmem:[#allocation2 + $0x28] sm:$0xff]  ;;  %v7107_v32 = vpack.c.bf16 %v136_v21, %v127_v20  ;;  %v8137_v42 = vld [vmem:[#allocation2 + $0x20] sm:$0xff]  ;;  %v7113_v47 = vpack.c.bf16 %v173_v38, %v164_v36  ;;  %v182_v50 = vld [vmem:[#allocation4 + $0x268] sm:$0xff]  ;;  %v7175_v51 = vpack.c.bf16 %v156_v41, %v147_v40 }
  0x6d   :  { %7026 = vmatprep.subr.bf16.mxu0 %v7025_v33  ;;  %7090 = vmatprep.subr.bf16.mxu1 %v7089_v37  ;;  %v7109_v33 = vpack.c.bf16 %v155_v24, %v146_v22  ;;  %v7171_v37 = vpack.c.bf16 %v138_v27, %v129_v26  ;;  %v163_v48 = vld [vmem:[#allocation4 + $0x1d0] sm:$0xff]  ;;  %v165_v54 = vld [vmem:[#allocation4 + $0x1e0] sm:$0xff]  ;;  %v8148_v59 = vld [vmem:[#allocation2 + $0x48] sm:$0xff] }
  0x6e   :  { %v191_v52 = vld [vmem:[#allocation4 + $0x2b0] sm:$0xff]  ;;  %v193_v58 = vld [vmem:[#allocation4 + $0x2c0] sm:$0xff]  ;;  %v190_v63 = vld [vmem:[#allocation4 + $0x2a8] sm:$0xff] }
  0x6f   :  { %v181_v62 = vld [vmem:[#allocation4 + $0x260] sm:$0xff]  ;;  %v200_v0 = vld [vmem:[#allocation4 + $0x2f8] sm:$0xff]  ;;  %v8153_v6 = vld [vmem:[#allocation2 + $0x40] sm:$0xff] }
  0x70   :  { %7028 = vmatpush1.bf16.msra.mxu0 %v7027_v43  ;;  %7092 = vmatpush1.bf16.msra.mxu1 %v7091_v44  ;;  %v166_v43 = vld [vmem:[#allocation4 + $0x1e8] sm:$0xff]  ;;  %v175_v44 = vld [vmem:[#allocation4 + $0x230] sm:$0xff]  ;;  %v209_v2 = vld [vmem:[#allocation4 + $0x340] sm:$0xff]  ;;  %v7119_v10 = vpack.c.bf16 %v190_v63, %v181_v62 }
  0x71   :  { %7030 = vmatprep.subr.bf16.mxu0 %v7029_v45  ;;  %7094 = vmatprep.subr.bf16.mxu1 %v7093_v49  ;;  %v8140_v45 = vld [vmem:[#allocation2 + $0x38] sm:$0xff]  ;;  %v172_v49 = vld [vmem:[#allocation4 + $0x218] sm:$0xff]  ;;  %v7177_v53 = vpack.c.bf16 %v175_v44, %v166_v43  ;;  %v211_v8 = vld [vmem:[#allocation4 + $0x350] sm:$0xff]  ;;  %v7121_v11 = vpack.c.bf16 %v209_v2, %v200_v0 }
  0x72   :  { %v7115_v60 = vpack.c.bf16 %v172_v49, %v163_v48  ;;  %v202_v7 = vld [vmem:[#allocation4 + $0x308] sm:$0xff]  ;;  %v199_v12 = vld [vmem:[#allocation4 + $0x2f0] sm:$0xff]  ;;  %v201_v21 = vld [vmem:[#allocation4 + $0x300] sm:$0xff] }
  0x73   :  { %v218_v15 = vld [vmem:[#allocation4 + $0x388] sm:$0xff]  ;;  %v7185_v20 = vpack.c.bf16 %v211_v8, %v202_v7  ;;  %v220_v24 = vld [vmem:[#allocation4 + $0x398] sm:$0xff]  ;;  %v217_v30 = vld [vmem:[#allocation4 + $0x380] sm:$0xff] }
  0x74   :  { %7032 = vmatpush1.bf16.msra.mxu0 %v7031_v55  ;;  %7096 = vmatpush1.bf16.msra.mxu1 %v7095_v56  ;;  %v174_v55 = vld [vmem:[#allocation4 + $0x228] sm:$0xff]  ;;  %v8145_v56 = vld [vmem:[#allocation2 + $0x30] sm:$0xff]  ;;  %v8164_v26 = vld [vmem:[#allocation2 + $0x68] sm:$0xff] }
  0x75   :  { %7034 = vmatprep.subr.bf16.mxu0 %v7033_v57  ;;  %7098 = vmatprep.subr.bf16.mxu1 %v7097_v61  ;;  %v184_v57 = vld [vmem:[#allocation4 + $0x278] sm:$0xff]  ;;  %v7117_v61 = vpack.c.bf16 %v191_v52, %v182_v50  ;;  %v7179_v1 = vpack.c.bf16 %v174_v55, %v165_v54  ;;  %v210_v22 = vld [vmem:[#allocation4 + $0x348] sm:$0xff]  ;;  %v245_v35 = vld [vmem:[#allocation4 + $0x460] sm:$0xff] }
  0x76   :  { %v7187_v34 = vpack.c.bf16 %v210_v22, %v201_v21  ;;  %v228_v38 = vld [vmem:[#allocation4 + $0x3d8] sm:$0xff]  ;;  %v238_v40 = vld [vmem:[#allocation4 + $0x428] sm:$0xff]  ;;  %v247_v41 = vld [vmem:[#allocation4 + $0x470] sm:$0xff] }
  0x77   :  { %v8172_v43 = vld [vmem:[#allocation2 + $0x78] sm:$0xff]  ;;  %v244_v48 = vld [vmem:[#allocation4 + $0x458] sm:$0xff]  ;;  %v7193_v52 = vpack.c.bf16 %v247_v41, %v238_v40  ;;  %v8177_v55 = vld [vmem:[#allocation2 + $0x70] sm:$0xff] }
  0x78   :  { %7036 = vmatpush1.bf16.msra.mxu0 %v7035_v3  ;;  %7100 = vmatpush1.bf16.msra.mxu1 %v7099_v4  ;;  %v7181_v3 = vpack.c.bf16 %v193_v58, %v184_v57  ;;  %v183_v4 = vld [vmem:[#allocation4 + $0x270] sm:$0xff]  ;;  %v254_v49 = vld [vmem:[#allocation4 + $0x4a8] sm:$0xff]  ;;  %v256_v57 = vld [vmem:[#allocation4 + $0x4b8] sm:$0xff] }
  0x79   :  { %7102 = vmatprep.subr.bf16.mxu0 %v7101_v5  ;;  %7166 = vmatprep.subr.bf16.mxu1 %v7165_v9  ;;  %v192_v5 = vld [vmem:[#allocation4 + $0x2b8] sm:$0xff]  ;;  %v8156_v9 = vld [vmem:[#allocation2 + $0x58] sm:$0xff]  ;;  %v265_v58 = vld [vmem:[#allocation4 + $0x500] sm:$0xff] }
  0x7a   :  { %v7183_v17 = vpack.c.bf16 %v192_v5, %v183_v4  ;;  %v246_v54 = vld [vmem:[#allocation4 + $0x468] sm:$0xff]  ;;  %v253_v63 = vld [vmem:[#allocation4 + $0x4a0] sm:$0xff]  ;;  %v7197_v4 = vpack.c.bf16 %v265_v58, %v256_v57  ;;  %v255_v5 = vld [vmem:[#allocation4 + $0x4b0] sm:$0xff] }
  0x7b   :  { %458 = vmatmul.mubr.f32.vlgmr.msra.gmra.mrb[0].mxu0 %v8122_v13  ;;  %673 = vmatmul.mubr.f32.vlgmr.msra.gmra.mrb[0].mxu1 %v8122_v13  ;;  %v262_v0 = vld [vmem:[#allocation4 + $0x4e8] sm:$0xff]  ;;  %v264_v7 = vld [vmem:[#allocation4 + $0x4f8] sm:$0xff]  ;;  %v8185_v8 = vld [vmem:[#allocation2 + $0x80] sm:$0xff] }
  0x7c   :  { %7104 = vmatpush1.bf16.msra.mxu0 %v7103_v14  ;;  %463 = vmatprep.mubr.f32.mxu0 %v8124_v18  ;;  %v208_v14 = vld [vmem:[#allocation4 + $0x338] sm:$0xff]  ;;  %v7199_v21 = vpack.c.bf16 %v264_v7, %v255_v5  ;;  %v299_v22 = vld [vmem:[#allocation4 + $0x610] sm:$0xff]  ;;  %v317_v41 = vld [vmem:[#allocation4 + $0x6a0] sm:$0xff] }
  0x7d   :  { %678 = vmatprep.mubr.f32.mxu1 %v8124_v18  ;;  %7106 = vmatprep.subr.bf16.mxu0 %v7105_v19  ;;  %v227_v19 = vld [vmem:[#allocation4 + $0x3d0] sm:$0xff]  ;;  %v7123_v27 = vpack.c.bf16 %v208_v14, %v199_v12  ;;  %v8188_v12 = vld [vmem:[#allocation2 + $0x98] sm:$0xff]  ;;  %v7135_v14 = vpack.c.bf16 %v262_v0, %v253_v63  ;;  %v316_v57 = vld [vmem:[#allocation4 + $0x698] sm:$0xff] }
  0x7e   :  { %7168 = vmatpush1.bf16.msra.mxu1 %v7167_v23  ;;  %v8161_v23 = vld [vmem:[#allocation2 + $0x50] sm:$0xff]  ;;  %v7125_v29 = vpack.c.bf16 %v227_v19, %v218_v15  ;;  %v280_v19 = vld [vmem:[#allocation4 + $0x578] sm:$0xff]  ;;  %v326_v58 = vld [vmem:[#allocation4 + $0x6e8] sm:$0xff] }
  0x7f   :  { %464 = vmatmul.mubr.f32.gmra.mrb[2].mxu0 %v8128_v28  ;;  %7170 = vmatprep.subr.bf16.mxu1 %v7169_v25  ;;  %v229_v25 = vld [vmem:[#allocation4 + $0x3e0] sm:$0xff]  ;;  %v8212_v5 = vld [vmem:[#allocation2 + $0xc8] sm:$0xff]  ;;  %vm7426_vm3 = vmpackc.low %vm3424_vm1, %vm8061_vm2 }
  0x80   :  { %679 = vmatmul.mubr.f32.gmra.mrb[2].mxu1 %v8128_v28  ;;  %469 = vmatprep.mubr.f32.mxu0 %v8132_v31  ;;  %v7189_v36 = vpack.c.bf16 %v229_v25, %v220_v24  ;;  %v273_v25 = vld [vmem:[#allocation4 + $0x540] sm:$0xff] }
  0x81   :  { %684 = vmatprep.mubr.f32.mxu1 %v8132_v31  ;;  %7108 = vmatpush1.bf16.msra.mxu0 %v7107_v32  ;;  %v226_v32 = vld [vmem:[#allocation4 + $0x3c8] sm:$0xff]  ;;  %v309_v0 = vld [vmem:[#allocation4 + $0x660] sm:$0xff] }
  0x82   :  { %7110 = vmatprep.subr.bf16.mxu0 %v7109_v33  ;;  %7172 = vmatpush1.bf16.msra.mxu1 %v7171_v37  ;;  %v236_v33 = vld [vmem:[#allocation4 + $0x418] sm:$0xff]  ;;  %v219_v37 = vld [vmem:[#allocation4 + $0x390] sm:$0xff]  ;;  %v7127_v44 = vpack.c.bf16 %v226_v32, %v217_v30  ;;  %v301_v32 = vld [vmem:[#allocation4 + $0x620] sm:$0xff] }
  0x83   :  { %470 = vmatmul.mubr.f32.gmra.mrb[4].mxu0 %v8137_v42  ;;  %7174 = vmatprep.subr.bf16.mxu1 %v7173_v39  ;;  %v8169_v39 = vld [vmem:[#allocation2 + $0x60] sm:$0xff]  ;;  %v7191_v50 = vpack.c.bf16 %v228_v38, %v219_v37  ;;  %v292_v30 = vld [vmem:[#allocation4 + $0x5d8] sm:$0xff]  ;;  %v298_v37 = vld [vmem:[#allocation4 + $0x608] sm:$0xff] }
  0x84   :  { %685 = vmatmul.mubr.f32.gmra.mrb[4].mxu1 %v8137_v42  ;;  %475 = vmatprep.mubr.f32.mxu0 %v8140_v45  ;;  %v308_v38 = vld [vmem:[#allocation4 + $0x658] sm:$0xff] }
  0x85   :  { %690 = vmatprep.mubr.f32.mxu1 %v8140_v45  ;;  %7112 = vmatpush1.bf16.msra.mxu0 %v7111_v46  ;;  %v7129_v46 = vpack.c.bf16 %v245_v35, %v236_v33  ;;  %v8196_v33 = vld [vmem:[#allocation2 + $0xa8] sm:$0xff] }
  0x86   :  { %7114 = vmatprep.subr.bf16.mxu0 %v7113_v47  ;;  %7176 = vmatpush1.bf16.msra.mxu1 %v7175_v51  ;;  %v235_v47 = vld [vmem:[#allocation4 + $0x410] sm:$0xff] }
  0x87   :  { %476 = vmatmul.mubr.f32.gmra.mrb[6].mxu0 %v8145_v56  ;;  %7178 = vmatprep.subr.bf16.mxu1 %v7177_v53  ;;  %v263_v51 = vld [vmem:[#allocation4 + $0x4f0] sm:$0xff]  ;;  %v237_v53 = vld [vmem:[#allocation4 + $0x420] sm:$0xff] }
  0x88   :  { %691 = vmatmul.mubr.f32.gmra.mrb[6].mxu1 %v8145_v56  ;;  %481 = vmatprep.mubr.f32.mxu0 %v8148_v59  ;;  %v7133_v62 = vpack.c.bf16 %v263_v51, %v254_v49  ;;  %v7195_v2 = vpack.c.bf16 %v246_v54, %v237_v53  ;;  %v310_v49 = vld [vmem:[#allocation4 + $0x668] sm:$0xff]  ;;  %v7145_v53 = vpack.c.bf16 %v317_v41, %v308_v38  ;;  %v307_v54 = vld [vmem:[#allocation4 + $0x650] sm:$0xff] }
  0x89   :  { %696 = vmatprep.mubr.f32.mxu1 %v8148_v59  ;;  %7116 = vmatpush1.bf16.msra.mxu0 %v7115_v60  ;;  %v8180_v60 = vld [vmem:[#allocation2 + $0x88] sm:$0xff]  ;;  %v8204_v51 = vld [vmem:[#allocation2 + $0xb8] sm:$0xff]  ;;  %v7147_v7 = vpack.c.bf16 %v316_v57, %v307_v54  ;;  %v361_v57 = vld [vmem:[#allocation4 + $0x800] sm:$0xff] }
  0x8a   :  { %7118 = vmatprep.subr.bf16.mxu0 %v7117_v61  ;;  %7180 = vmatpush1.bf16.msra.mxu1 %v7179_v1  ;;  %v7131_v61 = vpack.c.bf16 %v244_v48, %v235_v47  ;;  %v272_v1 = vld [vmem:[#allocation4 + $0x538] sm:$0xff]  ;;  %v8201_v48 = vld [vmem:[#allocation2 + $0xa0] sm:$0xff]  ;;  %v362_v38 = vld [vmem:[#allocation4 + $0x808] sm:$0xff] }
  0x8b   :  { %482 = vmatmul.mubr.f32.gmra.mrb[8].mxu0 %v8153_v6  ;;  %7182 = vmatprep.subr.bf16.mxu1 %v7181_v3  ;;  %v281_v3 = vld [vmem:[#allocation4 + $0x580] sm:$0xff]  ;;  %v300_v47 = vld [vmem:[#allocation4 + $0x618] sm:$0xff] }
  0x8c   :  { %697 = vmatmul.mubr.f32.gmra.mrb[8].mxu1 %v8153_v6  ;;  %487 = vmatprep.mubr.f32.mxu0 %v8156_v9  ;;  %v7137_v15 = vpack.c.bf16 %v281_v3, %v272_v1  ;;  %v318_v1 = vld [vmem:[#allocation4 + $0x6a8] sm:$0xff]  ;;  %v328_v3 = vld [vmem:[#allocation4 + $0x6f8] sm:$0xff] }
  0x8d   :  { %702 = vmatprep.mubr.f32.mxu1 %v8156_v9  ;;  %7120 = vmatpush1.bf16.msra.mxu0 %v7119_v10  ;;  %v274_v10 = vld [vmem:[#allocation4 + $0x548] sm:$0xff] }
  0x8e   :  { %7122 = vmatprep.subr.bf16.mxu0 %v7121_v11  ;;  %7184 = vmatpush1.bf16.msra.mxu1 %v7183_v17  ;;  %v283_v11 = vld [vmem:[#allocation4 + $0x590] sm:$0xff] }
  0x8f   :  { %488 = vmatmul.mubr.f32.gmra.mrb[10].mxu0 %v8161_v23  ;;  %7186 = vmatprep.subr.bf16.mxu1 %v7185_v20  ;;  %v271_v17 = vld [vmem:[#allocation4 + $0x530] sm:$0xff]  ;;  %v290_v20 = vld [vmem:[#allocation4 + $0x5c8] sm:$0xff]  ;;  %v7201_v24 = vpack.c.bf16 %v283_v11, %v274_v10  ;;  %v325_v11 = vld [vmem:[#allocation4 + $0x6e0] sm:$0xff] }
  0x90   :  { %703 = vmatmul.mubr.f32.gmra.mrb[10].mxu1 %v8161_v23  ;;  %493 = vmatprep.mubr.f32.mxu0 %v8164_v26  ;;  %v7141_v35 = vpack.c.bf16 %v299_v22, %v290_v20  ;;  %v336_v22 = vld [vmem:[#allocation4 + $0x738] sm:$0xff] }
  0x91   :  { %708 = vmatprep.mubr.f32.mxu1 %v8164_v26  ;;  %7124 = vmatpush1.bf16.msra.mxu0 %v7123_v27  ;;  %v282_v27 = vld [vmem:[#allocation4 + $0x588] sm:$0xff] }
  0x92   :  { %7126 = vmatprep.subr.bf16.mxu0 %v7125_v29  ;;  %7188 = vmatpush1.bf16.msra.mxu1 %v7187_v34  ;;  %v8193_v29 = vld [vmem:[#allocation2 + $0x90] sm:$0xff]  ;;  %v7139_v34 = vpack.c.bf16 %v280_v19, %v271_v17  ;;  %v7203_v40 = vpack.c.bf16 %v282_v27, %v273_v25  ;;  %v344_v17 = vld [vmem:[#allocation4 + $0x778] sm:$0xff]  ;;  %v346_v25 = vld [vmem:[#allocation4 + $0x788] sm:$0xff] }
  0x93   :  { %494 = vmatmul.mubr.f32.gmra.mrb[12].mxu0 %v8169_v39  ;;  %7190 = vmatprep.subr.bf16.mxu1 %v7189_v36  ;;  %v289_v36 = vld [vmem:[#allocation4 + $0x5c0] sm:$0xff]  ;;  %v355_v27 = vld [vmem:[#allocation4 + $0x7d0] sm:$0xff] }
  0x94   :  { %709 = vmatmul.mubr.f32.gmra.mrb[12].mxu1 %v8169_v39  ;;  %499 = vmatprep.mubr.f32.mxu0 %v8172_v43  ;;  %v353_v19 = vld [vmem:[#allocation4 + $0x7c0] sm:$0xff]  ;;  %v7217_v41 = vpack.c.bf16 %v355_v27, %v346_v25  ;;  %v390_v25 = vld [vmem:[#allocation4 + $0x8e8] sm:$0xff] }
  0x95   :  { %714 = vmatprep.mubr.f32.mxu1 %v8172_v43  ;;  %7128 = vmatpush1.bf16.msra.mxu0 %v7127_v44  ;;  %v7205_v44 = vpack.c.bf16 %v301_v32, %v292_v30  ;;  %v8220_v30 = vld [vmem:[#allocation2 + $0xd8] sm:$0xff]  ;;  %v8241_v27 = vld [vmem:[#allocation2 + $0xf0] sm:$0xff] }
  0x96   :  { %7130 = vmatprep.subr.bf16.mxu0 %v7129_v46  ;;  %7192 = vmatpush1.bf16.msra.mxu1 %v7191_v50  ;;  %v291_v46 = vld [vmem:[#allocation4 + $0x5d0] sm:$0xff] }
  0x97   :  { %500 = vmatmul.mubr.f32.gmra.mrb[14].mxu0 %v8177_v55  ;;  %7194 = vmatprep.subr.bf16.mxu1 %v7193_v52  ;;  %v319_v50 = vld [vmem:[#allocation4 + $0x6b0] sm:$0xff]  ;;  %v7143_v52 = vpack.c.bf16 %v298_v37, %v289_v36  ;;  %v352_v36 = vld [vmem:[#allocation4 + $0x7b8] sm:$0xff] }
  0x98   :  { %715 = vmatmul.mubr.f32.gmra.mrb[14].mxu1 %v8177_v55  ;;  %505 = vmatprep.mubr.f32.mxu0 %v8180_v60  ;;  %v7209_v63 = vpack.c.bf16 %v319_v50, %v310_v49  ;;  %v364_v49 = vld [vmem:[#allocation4 + $0x818] sm:$0xff]  ;;  %v373_v50 = vld [vmem:[#allocation4 + $0x860] sm:$0xff] }
  0x99   :  { %720 = vmatprep.mubr.f32.mxu1 %v8180_v60  ;;  %7132 = vmatpush1.bf16.msra.mxu0 %v7131_v61  ;;  %v7207_v61 = vpack.c.bf16 %v300_v47, %v291_v46  ;;  %v354_v46 = vld [vmem:[#allocation4 + $0x7c8] sm:$0xff]  ;;  %v8225_v47 = vld [vmem:[#allocation2 + $0xd0] sm:$0xff] }
  0x9a   :  { %7134 = vmatprep.subr.bf16.mxu0 %v7133_v62  ;;  %7196 = vmatpush1.bf16.msra.mxu1 %v7195_v2  ;;  %v335_v62 = vld [vmem:[#allocation4 + $0x730] sm:$0xff]  ;;  %v8209_v2 = vld [vmem:[#allocation2 + $0xb0] sm:$0xff] }
  0x9b   :  { %506 = vmatmul.mubr.f32.gmra.mrb[16].mxu0 %v8185_v8  ;;  %7198 = vmatprep.subr.bf16.mxu1 %v7197_v4  ;;  %v337_v4 = vld [vmem:[#allocation4 + $0x740] sm:$0xff]  ;;  %v7149_v10 = vpack.c.bf16 %v335_v62, %v326_v58  ;;  %v370_v58 = vld [vmem:[#allocation4 + $0x848] sm:$0xff]  ;;  %v363_v62 = vld [vmem:[#allocation4 + $0x810] sm:$0xff] }
  0x9c   :  { %721 = vmatmul.mubr.f32.gmra.mrb[16].mxu1 %v8185_v8  ;;  %511 = vmatprep.mubr.f32.mxu0 %v8188_v12  ;;  %v7213_v20 = vpack.c.bf16 %v337_v4, %v328_v3  ;;  %v389_v3 = vld [vmem:[#allocation4 + $0x8e0] sm:$0xff]  ;;  %v8233_v4 = vld [vmem:[#allocation2 + $0xe0] sm:$0xff] }
  0x9d   :  { %726 = vmatprep.mubr.f32.mxu1 %v8188_v12  ;;  %7136 = vmatpush1.bf16.msra.mxu0 %v7135_v14  ;;  %v334_v14 = vld [vmem:[#allocation4 + $0x728] sm:$0xff] }
  0x9e   :  { %7138 = vmatprep.subr.bf16.mxu0 %v7137_v15  ;;  %7200 = vmatpush1.bf16.msra.mxu1 %v7199_v21  ;;  %v7211_v15 = vpack.c.bf16 %v318_v1, %v309_v0  ;;  %v327_v21 = vld [vmem:[#allocation4 + $0x6f0] sm:$0xff]  ;;  %v7151_v32 = vpack.c.bf16 %v334_v14, %v325_v11  ;;  %v372_v0 = vld [vmem:[#allocation4 + $0x858] sm:$0xff]  ;;  %v8236_v11 = vld [vmem:[#allocation2 + $0xf8] sm:$0xff]  ;;  %v7159_v14 = vpack.c.bf16 %v370_v58, %v361_v57 }
  0x9f   :  { %512 = vmatmul.mubr.f32.gmra.mrb[18].mxu0 %v8193_v29  ;;  %7202 = vmatprep.subr.bf16.mxu1 %v7201_v24  ;;  %v8217_v24 = vld [vmem:[#allocation2 + $0xc0] sm:$0xff]  ;;  %v7215_v37 = vpack.c.bf16 %v336_v22, %v327_v21  ;;  %v380_v1 = vld [vmem:[#allocation4 + $0x898] sm:$0xff]  ;;  %v381_v22 = vld [vmem:[#allocation4 + $0x8a0] sm:$0xff] }
  0xa0   :  { %727 = vmatmul.mubr.f32.gmra.mrb[18].mxu1 %v8193_v29  ;;  %517 = vmatprep.mubr.f32.mxu0 %v8196_v33  ;;  %v8291_v57 = vld [vmem:[#allocation2 + $0x150] sm:$0xff]  ;;  %v8294_v58 = vld [vmem:[#allocation2 + $0x168] sm:$0xff] }
  0xa1   :  { %732 = vmatprep.mubr.f32.mxu1 %v8196_v33  ;;  %7140 = vmatpush1.bf16.msra.mxu0 %v7139_v34  ;;  %v7153_v34 = vpack.c.bf16 %v353_v19, %v344_v17  ;;  %v7161_v17 = vpack.c.bf16 %v389_v3, %v380_v1  ;;  %v379_v19 = vld [vmem:[#allocation4 + $0x890] sm:$0xff]  ;;  %v113_v3 = vld [vmem:[#allocation4 + $0x40] sm:$0xff] }
  0xa2   :  { %7142 = vmatprep.subr.bf16.mxu0 %v7141_v35  ;;  %7204 = vmatpush1.bf16.msra.mxu1 %v7203_v40  ;;  %v343_v35 = vld [vmem:[#allocation4 + $0x770] sm:$0xff] }
  0xa3   :  { %518 = vmatmul.mubr.f32.gmra.mrb[20].mxu0 %v8201_v48  ;;  %7206 = vmatprep.subr.bf16.mxu1 %v7205_v44  ;;  %v371_v40 = vld [vmem:[#allocation4 + $0x850] sm:$0xff]  ;;  %v345_v44 = vld [vmem:[#allocation4 + $0x780] sm:$0xff] }
  0xa4   :  { %733 = vmatmul.mubr.f32.gmra.mrb[20].mxu1 %v8201_v48  ;;  %523 = vmatprep.mubr.f32.mxu0 %v8204_v51  ;;  %v7157_v54 = vpack.c.bf16 %v371_v40, %v362_v38  ;;  %v10696_v38 = vmov 0.0|0.0   ;;  %v8259_v40 = vld [vmem:[#allocation2 + $0x110] sm:$0xff]  ;;  %v8315_v1 = vld [vmem:[#allocation2 + $0x180] sm:$0xff] }
  0xa5   :  { %738 = vmatprep.mubr.f32.mxu1 %v8204_v51  ;;  %7144 = vmatpush1.bf16.msra.mxu0 %v7143_v52  ;;  %v8228_v52 = vld [vmem:[#allocation2 + $0xe8] sm:$0xff] }
  0xa6   :  { %7146 = vmatprep.subr.bf16.mxu0 %v7145_v53  ;;  %7208 = vmatpush1.bf16.msra.mxu1 %v7207_v61  ;;  %v7155_v53 = vpack.c.bf16 %v352_v36, %v343_v35  ;;  %v7219_v61 = vpack.c.bf16 %v354_v46, %v345_v44  ;;  %v7227_v35 = vpack.c.bf16 %v390_v25, %v381_v22  ;;  %v8249_v36 = vld [vmem:[#allocation2 + $0x100] sm:$0xff]  ;;  %v8270_v46 = vld [vmem:[#allocation2 + $0x138] sm:$0xff]  ;;  %v149_v22 = vld [vmem:[#allocation4 + $0x160] sm:$0xff] }
  0xa7   :  { %524 = vmatmul.mubr.f32.gmra.mrb[22].mxu0 %v8209_v2  ;;  %7210 = vmatprep.subr.bf16.mxu1 %v7209_v63  ;;  %v7221_v63 = vpack.c.bf16 %v373_v50, %v364_v49  ;;  %v8267_v44 = vld [vmem:[#allocation2 + $0x120] sm:$0xff]  ;;  %v8275_v49 = vld [vmem:[#allocation2 + $0x130] sm:$0xff]  ;;  %v8278_v50 = vld [vmem:[#allocation2 + $0x148] sm:$0xff] }
  0xa8   :  { %739 = vmatmul.mubr.f32.gmra.mrb[22].mxu1 %v8209_v2  ;;  %529 = vmatprep.mubr.f32.mxu0 %v8212_v5  ;;  %v158_v25 = vld [vmem:[#allocation4 + $0x1a8] sm:$0xff] }
  0xa9   :  { %744 = vmatprep.mubr.f32.mxu1 %v8212_v5  ;;  %7148 = vmatpush1.bf16.msra.mxu0 %v7147_v7  ;;  %v382_v7 = vld [vmem:[#allocation4 + $0x8a8] sm:$0xff] }
  0xaa   :  { %7150 = vmatprep.subr.bf16.mxu0 %v7149_v10  ;;  %7212 = vmatpush1.bf16.msra.mxu1 %v7211_v15  ;;  %v391_v10 = vld [vmem:[#allocation4 + $0x8f0] sm:$0xff]  ;;  %v7223_v15 = vpack.c.bf16 %v372_v0, %v363_v62  ;;  %v8302_v62 = vld [vmem:[#allocation2 + $0x178] sm:$0xff]  ;;  %v8310_v0 = vld [vmem:[#allocation2 + $0x188] sm:$0xff] }
  0xab   :  { %530 = vmatmul.mubr.f32.gmra.mrb[24].mxu0 %v8217_v24  ;;  %7214 = vmatprep.subr.bf16.mxu1 %v7213_v20  ;;  %v388_v20 = vld [vmem:[#allocation4 + $0x8d8] sm:$0xff]  ;;  %v7225_v21 = vpack.c.bf16 %v391_v10, %v382_v7  ;;  %v122_v7 = vld [vmem:[#allocation4 + $0x88] sm:$0xff]  ;;  %v1969_v10 = vld [vmem:[#allocation6] sm:$0xff] }
  0xac   :  { %745 = vmatmul.mubr.f32.gmra.mrb[24].mxu1 %v8217_v24  ;;  %535 = vmatprep.mubr.f32.mxu0 %v8220_v30 }
  0xad   :  { %750 = vmatprep.mubr.f32.mxu1 %v8220_v30  ;;  %7152 = vmatpush1.bf16.msra.mxu0 %v7151_v32  ;;  %v8244_v32 = vld [vmem:[#allocation2 + $0x108] sm:$0xff] }
  0xae   :  { %7154 = vmatprep.subr.bf16.mxu0 %v7153_v34  ;;  %7216 = vmatpush1.bf16.msra.mxu1 %v7215_v37  ;;  %v7163_v34 = vpack.c.bf16 %v388_v20, %v379_v19  ;;  %v8252_v37 = vld [vmem:[#allocation2 + $0x118] sm:$0xff]  ;;  %v140_v19 = vld [vmem:[#allocation4 + $0x118] sm:$0xff] }
  0xaf   :  { %536 = vmatmul.mubr.f32.gmra.mrb[26].mxu0 %v8225_v47  ;;  %7218 = vmatprep.subr.bf16.mxu1 %v7217_v41  ;;  %v8262_v41 = vld [vmem:[#allocation2 + $0x128] sm:$0xff] }
  0xb0   :  { %751 = vmatmul.mubr.f32.gmra.mrb[26].mxu1 %v8225_v47  ;;  %541 = vmatprep.mubr.f32.mxu0 %v8228_v52 }
  0xb1   :  { %756 = vmatprep.mubr.f32.mxu1 %v8228_v52  ;;  %7156 = vmatpush1.bf16.msra.mxu0 %v7155_v53  ;;  %v8283_v53 = vld [vmem:[#allocation2 + $0x140] sm:$0xff] }
  0xb2   :  { %7158 = vmatprep.subr.bf16.mxu0 %v7157_v54  ;;  %7220 = vmatpush1.bf16.msra.mxu1 %v7219_v61  ;;  %v8286_v54 = vld [vmem:[#allocation2 + $0x158] sm:$0xff]  ;;  %v8299_v61 = vld [vmem:[#allocation2 + $0x160] sm:$0xff] }
  0xb3   :  { %542 = vmatmul.mubr.f32.gmra.mrb[28].mxu0 %v8233_v4  ;;  %7222 = vmatprep.subr.bf16.mxu1 %v7221_v63  ;;  %v8307_v63 = vld [vmem:[#allocation2 + $0x170] sm:$0xff] }
  0xb4   :  { %757 = vmatmul.mubr.f32.gmra.mrb[28].mxu1 %v8233_v4  ;;  %547 = vmatprep.mubr.f32.mxu0 %v8236_v11 }
  0xb5   :  { %762 = vmatprep.mubr.f32.mxu1 %v8236_v11  ;;  %7160 = vmatpush1.bf16.msra.mxu0 %v7159_v14  ;;  %v1970_v14 = vld [vmem:[#allocation6 + $0x8] sm:$0xff] }
  0xb6   :  { %7224 = vmatpush1.bf16.msra.mxu1 %v7223_v15  ;;  %7162 = vmatprep.subr.bf16.mxu0 %v7161_v17  ;;  %v7230_v15 = vpack.c.bf16 %v122_v7, %v113_v3  ;;  %v131_v17 = vld [vmem:[#allocation4 + $0xd0] sm:$0xff]  ;;  %v7278_v20 = vpack.c.bf16 %v1970_v14, %v1969_v10  ;;  %v194_v7 = vld [vmem:[#allocation4 + $0x2c8] sm:$0xff]  ;;  %v212_v10 = vld [vmem:[#allocation4 + $0x358] sm:$0xff] }
  0xb7   :  { %548 = vmatmul.mubr.f32.gmra.mrb[30].mxu0 %v8241_v27  ;;  %7226 = vmatprep.subr.bf16.mxu1 %v7225_v21  ;;  %v7233_v21 = vpack.c.bf16 %v140_v19, %v131_v17  ;;  %v230_v14 = vld [vmem:[#allocation4 + $0x3e8] sm:$0xff] }
  0xb8   :  { %763 = vmatmul.mubr.f32.gmra.mrb[30].mxu1 %v8241_v27  ;;  %553 = vmatprep.mubr.f32.mxu0 %v8244_v32  ;;  %v1974_v17 = vld [vmem:[#allocation6 + $0x28] sm:$0xff] }
  0xb9   :  { %768 = vmatprep.mubr.f32.mxu1 %v8244_v32  ;;  %7164 = vmatpush1.bf16.msra.mxu0 %v7163_v34  ;;  %v1971_v34 = vld [vmem:[#allocation6 + $0x10] sm:$0xff] }
  0xba   :  { %7228 = vmatpush1.bf16.msra.mxu1 %v7227_v35  ;;  %7229 = vmatprep.subr.bf16.mxu0 %v10696_v38  ;;  %v1972_v35 = vld [vmem:[#allocation6 + $0x18] sm:$0xff] }
  0xbb   :  { %554 = vmatmul.mubr.f32.gmra.mrb[32].mxu0 %v8249_v36  ;;  %7277 = vmatprep.subr.bf16.mxu1 %v10696_v38  ;;  %v7281_v3 = vpack.c.bf16 %v1972_v35, %v1971_v34  ;;  %v320_v34 = vld [vmem:[#allocation4 + $0x6b8] sm:$0xff]  ;;  %v338_v35 = vld [vmem:[#allocation4 + $0x748] sm:$0xff] }
  0xbc   :  { %769 = vmatmul.mubr.f32.gmra.mrb[32].mxu1 %v8249_v36  ;;  %559 = vmatprep.mubr.f32.mxu0 %v8252_v37 }
  0xbd   :  { %774 = vmatprep.mubr.f32.mxu1 %v8252_v37 }
  0xbf   :  { %560 = vmatmul.mubr.f32.gmra.mrb[34].mxu0 %v8259_v40 }
  0xc0   :  { %775 = vmatmul.mubr.f32.gmra.mrb[34].mxu1 %v8259_v40  ;;  %565 = vmatprep.mubr.f32.mxu0 %v8262_v41 }
  0xc1   :  { %780 = vmatprep.mubr.f32.mxu1 %v8262_v41 }
  0xc3   :  { %566 = vmatmul.mubr.f32.gmra.mrb[36].mxu0 %v8267_v44 }
  0xc4   :  { %781 = vmatmul.mubr.f32.gmra.mrb[36].mxu1 %v8267_v44  ;;  %571 = vmatprep.mubr.f32.mxu0 %v8270_v46 }
  0xc5   :  { %786 = vmatprep.mubr.f32.mxu1 %v8270_v46 }
  0xc7   :  { %572 = vmatmul.mubr.f32.gmra.mrb[38].mxu0 %v8275_v49 }
  0xc8   :  { %787 = vmatmul.mubr.f32.gmra.mrb[38].mxu1 %v8275_v49  ;;  %577 = vmatprep.mubr.f32.mxu0 %v8278_v50 }
  0xc9   :  { %792 = vmatprep.mubr.f32.mxu1 %v8278_v50 }
  0xcb   :  { %578 = vmatmul.mubr.f32.gmra.mrb[40].mxu0 %v8283_v53 }
  0xcc   :  { %793 = vmatmul.mubr.f32.gmra.mrb[40].mxu1 %v8283_v53  ;;  %583 = vmatprep.mubr.f32.mxu0 %v8286_v54 }
  0xcd   :  { %798 = vmatprep.mubr.f32.mxu1 %v8286_v54 }
  0xcf   :  { %584 = vmatmul.mubr.f32.gmra.mrb[42].mxu0 %v8291_v57 }
  0xd0   :  { %799 = vmatmul.mubr.f32.gmra.mrb[42].mxu1 %v8291_v57  ;;  %589 = vmatprep.mubr.f32.mxu0 %v8294_v58 }
  0xd1   :  { %804 = vmatprep.mubr.f32.mxu1 %v8294_v58 }
  0xd3   :  { %590 = vmatmul.mubr.f32.gmra.mrb[44].mxu0 %v8299_v61 }
  0xd4   :  { %805 = vmatmul.mubr.f32.gmra.mrb[44].mxu1 %v8299_v61  ;;  %595 = vmatprep.mubr.f32.mxu0 %v8302_v62 }
  0xd5   :  { %810 = vmatprep.mubr.f32.mxu1 %v8302_v62 }
  0xd7   :  { %596 = vmatmul.mubr.f32.gmra.mrb[46].mxu0 %v8307_v63 }
  0xd8   :  { %811 = vmatmul.mubr.f32.gmra.mrb[46].mxu1 %v8307_v63  ;;  %601 = vmatprep.mubr.f32.mxu0 %v8310_v0 }
  0xd9   :  { %816 = vmatprep.mubr.f32.mxu1 %v8310_v0 }
  0xdb   :  { %602 = vmatmul.mubr.f32.gmra.mrb[48].mxu0 %v8315_v1 }
  0xdc   :  { %817 = vmatmul.mubr.f32.gmra.mrb[48].mxu1 %v8315_v1  ;;  %887 = vmatprep.mubr.f32.mxu0 %v8118_v16 }
  0xdd   :  { %1102 = vmatprep.mubr.f32.mxu1 %v8118_v16  ;;  %v7236_v16 = vpack.c.bf16 %v158_v25, %v149_v22  ;;  %v284_v22 = vld [vmem:[#allocation4 + $0x598] sm:$0xff]  ;;  %v1975_v25 = vld [vmem:[#allocation6 + $0x30] sm:$0xff] }
  0xdf   :  { %888 = vmatmul.mubr.f32.vlgmr.msra.gmra.mrb[50].mxu0 %v8122_v13 }
  0xe0   :  { %1103 = vmatmul.mubr.f32.vlgmr.msra.gmra.mrb[50].mxu1 %v8122_v13  ;;  %893 = vmatprep.mubr.f32.mxu0 %v8124_v18  ;;  %v167_v13 = vld [vmem:[#allocation4 + $0x1f0] sm:$0xff] }
  0xe1   :  { %1108 = vmatprep.mubr.f32.mxu1 %v8124_v18  ;;  %7231 = vmatpush1.bf16.msra.mxu0 %v7230_v15  ;;  %v176_v18 = vld [vmem:[#allocation4 + $0x238] sm:$0xff]  ;;  %v1973_v15 = vld [vmem:[#allocation6 + $0x20] sm:$0xff] }
  0xe2   :  { %7232 = vmatprep.subr.bf16.mxu0 %v10696_v38  ;;  %7279 = vmatpush3.bf16.msra.mxu1 %v7278_v20  ;;  %v7284_v19 = vpack.c.bf16 %v1974_v17, %v1973_v15  ;;  %v248_v20 = vld [vmem:[#allocation4 + $0x478] sm:$0xff]  ;;  %v383_v15 = vld [vmem:[#allocation4 + $0x8b0] sm:$0xff] }
  0xe3   :  { %894 = vmatmul.mubr.f32.gmra.mrb[52].mxu0 %v8128_v28  ;;  %7280 = vmatprep.subr.bf16.mxu1 %v10696_v38  ;;  %v392_v17 = vld [vmem:[#allocation4 + $0x8f8] sm:$0xff] }
  0xe4   :  { %1109 = vmatmul.mubr.f32.gmra.mrb[52].mxu1 %v8128_v28  ;;  %899 = vmatprep.mubr.f32.mxu0 %v8132_v31  ;;  %v7239_v28 = vpack.c.bf16 %v176_v18, %v167_v13  ;;  %v302_v13 = vld [vmem:[#allocation4 + $0x628] sm:$0xff] }
  0xe5   :  { %1114 = vmatprep.mubr.f32.mxu1 %v8132_v31  ;;  %7234 = vmatpush1.bf16.msra.mxu0 %v7233_v21  ;;  %v185_v31 = vld [vmem:[#allocation4 + $0x280] sm:$0xff]  ;;  %v266_v21 = vld [vmem:[#allocation4 + $0x508] sm:$0xff] }
  0xe6   :  { %7235 = vmatprep.subr.bf16.mxu0 %v10696_v38  ;;  %7282 = vmatpush3.bf16.msra.mxu1 %v7281_v3  ;;  %v1977_v3 = vld [vmem:[#allocation6 + $0x40] sm:$0xff] }
  0xe7   :  { %900 = vmatmul.mubr.f32.gmra.mrb[54].mxu0 %v8137_v42  ;;  %7283 = vmatprep.subr.bf16.mxu1 %v10696_v38 }
  0xe8   :  { %1115 = vmatmul.mubr.f32.gmra.mrb[54].mxu1 %v8137_v42  ;;  %905 = vmatprep.mubr.f32.mxu0 %v8140_v45  ;;  %v7242_v42 = vpack.c.bf16 %v194_v7, %v185_v31  ;;  %v1978_v31 = vld [vmem:[#allocation6 + $0x48] sm:$0xff]  ;;  %v347_v7 = vld [vmem:[#allocation4 + $0x790] sm:$0xff] }
  0xe9   :  { %1120 = vmatprep.mubr.f32.mxu1 %v8140_v45  ;;  %7237 = vmatpush1.bf16.msra.mxu0 %v7236_v16  ;;  %v203_v45 = vld [vmem:[#allocation4 + $0x310] sm:$0xff]  ;;  %v1976_v16 = vld [vmem:[#allocation6 + $0x38] sm:$0xff] }
  0xea   :  { %7238 = vmatprep.subr.bf16.mxu0 %v10696_v38  ;;  %7285 = vmatpush3.bf16.msra.mxu1 %v7284_v19  ;;  %v7287_v18 = vpack.c.bf16 %v1976_v16, %v1975_v25  ;;  %v1979_v19 = vld [vmem:[#allocation6 + $0x50] sm:$0xff]  ;;  %v7828_v25 = vld [vmem:[#allocation2 + $0x10] sm:$0xff] }
  0xeb   :  { %906 = vmatmul.mubr.f32.gmra.mrb[56].mxu0 %v8145_v56  ;;  %7286 = vmatprep.subr.bf16.mxu1 %v10696_v38  ;;  %v7830_v16 = vld [vmem:[#allocation2 + $0x20] sm:$0xff] }
  0xec   :  { %1121 = vmatmul.mubr.f32.gmra.mrb[56].mxu1 %v8145_v56  ;;  %911 = vmatprep.mubr.f32.mxu0 %v8148_v59  ;;  %v7245_v56 = vpack.c.bf16 %v212_v10, %v203_v45  ;;  %v7290_v45 = vpack.c.bf16 %v1978_v31, %v1977_v3 }
  0xed   :  { %1126 = vmatprep.mubr.f32.mxu1 %v8148_v59  ;;  %7240 = vmatpush1.bf16.msra.mxu0 %v7239_v28  ;;  %v221_v59 = vld [vmem:[#allocation4 + $0x3a0] sm:$0xff] }
  0xee   :  { %7241 = vmatprep.subr.bf16.mxu0 %v10696_v38  ;;  %7288 = vmatpush3.bf16.msra.mxu1 %v7287_v18 }
  0xef   :  { %912 = vmatmul.mubr.f32.gmra.mrb[58].mxu0 %v8153_v6  ;;  %7289 = vmatprep.subr.bf16.mxu1 %v10696_v38 }
  0xf0   :  { %1127 = vmatmul.mubr.f32.gmra.mrb[58].mxu1 %v8153_v6  ;;  %917 = vmatprep.mubr.f32.mxu0 %v8156_v9  ;;  %v7248_v6 = vpack.c.bf16 %v230_v14, %v221_v59  ;;  %v374_v59 = vld [vmem:[#allocation4 + $0x868] sm:$0xff] }
  0xf1   :  { %1132 = vmatprep.mubr.f32.mxu1 %v8156_v9  ;;  %7243 = vmatpush1.bf16.msra.mxu0 %v7242_v42  ;;  %v239_v9 = vld [vmem:[#allocation4 + $0x430] sm:$0xff]  ;;  %v356_v42 = vld [vmem:[#allocation4 + $0x7d8] sm:$0xff] }
  0xf2   :  { %7244 = vmatprep.subr.bf16.mxu0 %v10696_v38  ;;  %v7269_v10 = vpack.c.bf16 %v356_v42, %v347_v7  ;;  %7291 = vmatpush3.bf16.msra.mxu1 %v7290_v45 }
  0xf3   :  { %918 = vmatmul.mubr.f32.gmra.mrb[60].mxu0 %v8161_v23  ;;  %7292 = vmatprep.subr.bf16.mxu1 %v10696_v38 }
  0xf4   :  { %1133 = vmatmul.mubr.f32.gmra.mrb[60].mxu1 %v8161_v23  ;;  %923 = vmatprep.mubr.f32.mxu0 %v8164_v26  ;;  %v7251_v23 = vpack.c.bf16 %v248_v20, %v239_v9  ;;  %v1980_v9 = vld [vmem:[#allocation6 + $0x58] sm:$0xff] }
  0xf5   :  { %1138 = vmatprep.mubr.f32.mxu1 %v8164_v26  ;;  %7246 = vmatpush1.bf16.msra.mxu0 %v7245_v56  ;;  %v257_v26 = vld [vmem:[#allocation4 + $0x4c0] sm:$0xff]  ;;  %v7293_v20 = vpack.c.bf16 %v1980_v9, %v1979_v19  ;;  %v7835_v19 = vld [vmem:[#allocation2 + $0x58] sm:$0xff] }
  0xf6   :  { %7247 = vmatprep.subr.bf16.mxu0 %v10696_v38  ;;  %v365_v56 = vld [vmem:[#allocation4 + $0x820] sm:$0xff] }
  0xf7   :  { %924 = vmatmul.mubr.f32.gmra.mrb[62].mxu0 %v8169_v39  ;;  %v7272_v14 = vpack.c.bf16 %v374_v59, %v365_v56  ;;  %7294 = vmatpush3.bf16.msra.mxu1 %v7293_v20  ;;  %v7834_v56 = vld [vmem:[#allocation2 + $0x40] sm:$0xff] }
  0xf8   :  { %1139 = vmatmul.mubr.f32.gmra.mrb[62].mxu1 %v8169_v39  ;;  %929 = vmatprep.mubr.f32.mxu0 %v8172_v43  ;;  %v7254_v39 = vpack.c.bf16 %v266_v21, %v257_v26  ;;  %v1982_v26 = vld [vmem:[#allocation6 + $0x68] sm:$0xff] }
  0xf9   :  { %1144 = vmatprep.mubr.f32.mxu1 %v8172_v43  ;;  %7249 = vmatpush1.bf16.msra.mxu0 %v7248_v6  ;;  %v275_v43 = vld [vmem:[#allocation4 + $0x550] sm:$0xff]  ;;  %v7275_v6 = vpack.c.bf16 %v392_v17, %v383_v15 }
  0xfa   :  { %7250 = vmatprep.subr.bf16.mxu0 %v10696_v38  ;;  %7295 = vmatprep.subr.bf16.mxu1 %v10696_v38 }
  0xfb   :  { %930 = vmatmul.mubr.f32.gmra.mrb[64].mxu0 %v8177_v55 }
  0xfc   :  { %1145 = vmatmul.mubr.f32.gmra.mrb[64].mxu1 %v8177_v55  ;;  %935 = vmatprep.mubr.f32.mxu0 %v8180_v60  ;;  %v7257_v55 = vpack.c.bf16 %v284_v22, %v275_v43  ;;  %v1984_v43 = vld [vmem:[#allocation6 + $0x78] sm:$0xff] }
  0xfd   :  { %1150 = vmatprep.mubr.f32.mxu1 %v8180_v60  ;;  %7252 = vmatpush1.bf16.msra.mxu0 %v7251_v23  ;;  %v293_v60 = vld [vmem:[#allocation4 + $0x5e0] sm:$0xff] }
  0xfe   :  { %7253 = vmatprep.subr.bf16.mxu0 %v10696_v38  ;;  %v1981_v23 = vld [vmem:[#allocation6 + $0x60] sm:$0xff] }
  0xff   :  { %936 = vmatmul.mubr.f32.gmra.mrb[66].mxu0 %v8185_v8  ;;  %v7296_v21 = vpack.c.bf16 %v1982_v26, %v1981_v23 }
 0x100   :  { %1151 = vmatmul.mubr.f32.gmra.mrb[66].mxu1 %v8185_v8  ;;  %941 = vmatprep.mubr.f32.mxu0 %v8188_v12  ;;  %v7260_v8 = vpack.c.bf16 %v302_v13, %v293_v60 }
 0x101   :  { %1156 = vmatprep.mubr.f32.mxu1 %v8188_v12  ;;  %7255 = vmatpush1.bf16.msra.mxu0 %v7254_v39  ;;  %v311_v12 = vld [vmem:[#allocation4 + $0x670] sm:$0xff] }
 0x102   :  { %7256 = vmatprep.subr.bf16.mxu0 %v10696_v38  ;;  %7297 = vmatpush3.bf16.msra.mxu1 %v7296_v21  ;;  %v1983_v39 = vld [vmem:[#allocation6 + $0x70] sm:$0xff] }
 0x103   :  { %942 = vmatmul.mubr.f32.gmra.mrb[68].mxu0 %v8193_v29  ;;  %7298 = vmatprep.subr.bf16.mxu1 %v10696_v38  ;;  %v7299_v22 = vpack.c.bf16 %v1984_v43, %v1983_v39 }
 0x104   :  { %1157 = vmatmul.mubr.f32.gmra.mrb[68].mxu1 %v8193_v29  ;;  %947 = vmatprep.mubr.f32.mxu0 %v8196_v33  ;;  %v7263_v29 = vpack.c.bf16 %v320_v34, %v311_v12  ;;  %v7832_v12 = vld [vmem:[#allocation2 + $0x30] sm:$0xff] }
 0x105   :  { %1162 = vmatprep.mubr.f32.mxu1 %v8196_v33  ;;  %7258 = vmatpush1.bf16.msra.mxu0 %v7257_v55  ;;  %v329_v33 = vld [vmem:[#allocation4 + $0x700] sm:$0xff]  ;;  %v8444_v55 = vld [vmem:[#allocation2 + $0x8] sm:$0xff] }
 0x106   :  { %7259 = vmatprep.subr.bf16.mxu0 %v10696_v38  ;;  %v7266_v28 = vpack.c.bf16 %v338_v35, %v329_v33  ;;  %7300 = vmatpush3.bf16.msra.mxu1 %v7299_v22  ;;  %v7833_v35 = vld [vmem:[#allocation2 + $0x48] sm:$0xff]  ;;  %v7836_v22 = vld [vmem:[#allocation2 + $0x50] sm:$0xff] }
 0x107   :  { %948 = vmatmul.mubr.f32.gmra.mrb[70].mxu0 %v8201_v48  ;;  %7301 = vmatprep.subr.bf16.mxu1 %v10696_v38 }
 0x108   :  { %1163 = vmatmul.mubr.f32.gmra.mrb[70].mxu1 %v8201_v48  ;;  %953 = vmatprep.mubr.f32.mxu0 %v8204_v51 }
 0x109   :  { %1168 = vmatprep.mubr.f32.mxu1 %v8204_v51  ;;  %7261 = vmatpush1.bf16.msra.mxu0 %v7260_v8 }
 0x10a   :  { %7262 = vmatprep.subr.bf16.mxu0 %v10696_v38 }
 0x10b   :  { %954 = vmatmul.mubr.f32.gmra.mrb[72].mxu0 %v8209_v2 }
 0x10c   :  { %1169 = vmatmul.mubr.f32.gmra.mrb[72].mxu1 %v8209_v2  ;;  %959 = vmatprep.mubr.f32.mxu0 %v8212_v5 }
 0x10d   :  { %1174 = vmatprep.mubr.f32.mxu1 %v8212_v5  ;;  %7264 = vmatpush1.bf16.msra.mxu0 %v7263_v29 }
 0x10e   :  { %7265 = vmatprep.subr.bf16.mxu0 %v10696_v38 }
 0x10f   :  { %960 = vmatmul.mubr.f32.gmra.mrb[74].mxu0 %v8217_v24 }
 0x110   :  { %1175 = vmatmul.mubr.f32.gmra.mrb[74].mxu1 %v8217_v24  ;;  %965 = vmatprep.mubr.f32.mxu0 %v8220_v30 }
 0x111   :  { %1180 = vmatprep.mubr.f32.mxu1 %v8220_v30  ;;  %7267 = vmatpush1.bf16.msra.mxu0 %v7266_v28 }
 0x112   :  { %7268 = vmatprep.subr.bf16.mxu0 %v10696_v38 }
 0x113   :  { %966 = vmatmul.mubr.f32.gmra.mrb[76].mxu0 %v8225_v47 }
 0x114   :  { %1181 = vmatmul.mubr.f32.gmra.mrb[76].mxu1 %v8225_v47  ;;  %971 = vmatprep.mubr.f32.mxu0 %v8228_v52 }
 0x115   :  { %1186 = vmatprep.mubr.f32.mxu1 %v8228_v52  ;;  %7270 = vmatpush1.bf16.msra.mxu0 %v7269_v10 }
 0x116   :  { %7271 = vmatprep.subr.bf16.mxu0 %v10696_v38 }
 0x117   :  { %972 = vmatmul.mubr.f32.gmra.mrb[78].mxu0 %v8233_v4 }
 0x118   :  { %1187 = vmatmul.mubr.f32.gmra.mrb[78].mxu1 %v8233_v4  ;;  %977 = vmatprep.mubr.f32.mxu0 %v8236_v11 }
 0x119   :  { %1192 = vmatprep.mubr.f32.mxu1 %v8236_v11  ;;  %7273 = vmatpush1.bf16.msra.mxu0 %v7272_v14 }
 0x11a   :  { %7274 = vmatprep.subr.bf16.mxu0 %v10696_v38 }
 0x11b   :  { %978 = vmatmul.mubr.f32.gmra.mrb[80].mxu0 %v8241_v27 }
 0x11c   :  { %1193 = vmatmul.mubr.f32.gmra.mrb[80].mxu1 %v8241_v27  ;;  %983 = vmatprep.mubr.f32.mxu0 %v8244_v32 }
 0x11d   :  { %1198 = vmatprep.mubr.f32.mxu1 %v8244_v32  ;;  %7276 = vmatpush1.bf16.msra.mxu0 %v7275_v6 }
 0x11e   :  { %7373 = vmatprep.subr.bf16.mxu0 %v10696_v38  ;;  %v7845_v38 = vld [vmem:[#allocation2 + $0xa8] sm:$0xff] }
 0x11f   :  { %984 = vmatmul.mubr.f32.gmra.mrb[82].mxu0 %v8249_v36 }
 0x120   :  { %1199 = vmatmul.mubr.f32.gmra.mrb[82].mxu1 %v8249_v36  ;;  %989 = vmatprep.mubr.f32.mxu0 %v8252_v37 }
 0x121   :  { %1204 = vmatprep.mubr.f32.mxu1 %v8252_v37 }
 0x123   :  { %990 = vmatmul.mubr.f32.gmra.mrb[84].mxu0 %v8259_v40 }
 0x124   :  { %1205 = vmatmul.mubr.f32.gmra.mrb[84].mxu1 %v8259_v40  ;;  %995 = vmatprep.mubr.f32.mxu0 %v8262_v41 }
 0x125   :  { %1210 = vmatprep.mubr.f32.mxu1 %v8262_v41 }
 0x127   :  { %996 = vmatmul.mubr.f32.gmra.mrb[86].mxu0 %v8267_v44 }
 0x128   :  { %1211 = vmatmul.mubr.f32.gmra.mrb[86].mxu1 %v8267_v44  ;;  %1001 = vmatprep.mubr.f32.mxu0 %v8270_v46 }
 0x129   :  { %1216 = vmatprep.mubr.f32.mxu1 %v8270_v46 }
 0x12b   :  { %1002 = vmatmul.mubr.f32.gmra.mrb[88].mxu0 %v8275_v49 }
 0x12c   :  { %1217 = vmatmul.mubr.f32.gmra.mrb[88].mxu1 %v8275_v49  ;;  %1007 = vmatprep.mubr.f32.mxu0 %v8278_v50 }
 0x12d   :  { %1222 = vmatprep.mubr.f32.mxu1 %v8278_v50 }
 0x12f   :  { %1008 = vmatmul.mubr.f32.gmra.mrb[90].mxu0 %v8283_v53 }
 0x130   :  { %1223 = vmatmul.mubr.f32.gmra.mrb[90].mxu1 %v8283_v53  ;;  %1013 = vmatprep.mubr.f32.mxu0 %v8286_v54 }
 0x131   :  { %1228 = vmatprep.mubr.f32.mxu1 %v8286_v54 }
 0x133   :  { %1014 = vmatmul.mubr.f32.gmra.mrb[92].mxu0 %v8291_v57 }
 0x134   :  { %1229 = vmatmul.mubr.f32.gmra.mrb[92].mxu1 %v8291_v57  ;;  %1019 = vmatprep.mubr.f32.mxu0 %v8294_v58 }
 0x135   :  { %1234 = vmatprep.mubr.f32.mxu1 %v8294_v58 }
 0x137   :  { %1020 = vmatmul.mubr.f32.gmra.mrb[94].mxu0 %v8299_v61 }
 0x138   :  { %1235 = vmatmul.mubr.f32.gmra.mrb[94].mxu1 %v8299_v61  ;;  %1025 = vmatprep.mubr.f32.mxu0 %v8302_v62  ;;  %v10698_v61 = vmov 0.0  }
 0x139   :  { %1240 = vmatprep.mubr.f32.mxu1 %v8302_v62  ;;  %v7826_v62 = vld [vmem:[#allocation2] sm:$0xff] }
 0x13b   :  { %1026 = vmatmul.mubr.f32.gmra.mrb[96].mxu0 %v8307_v63 }
 0x13c   :  { %1241 = vmatmul.mubr.f32.gmra.mrb[96].mxu1 %v8307_v63  ;;  %1031 = vmatprep.mubr.f32.mxu0 %v8310_v0  ;;  %v7827_v63 = vld [vmem:[#allocation2 + $0x18] sm:$0xff] }
 0x13d   :  { %1246 = vmatprep.mubr.f32.mxu1 %v8310_v0  ;;  %v7829_v0 = vld [vmem:[#allocation2 + $0x28] sm:$0xff] }
 0x13f   :  { %1032 = vmatmul.mubr.f32.gmra.mrb[98].mxu0 %v8315_v1 }
 0x140   :  { %1247 = vmatmul.mubr.f32.gmra.mrb[98].mxu1 %v8315_v1  ;;  %1317 = vmatprep.mubr.f32.mxu0 %v8444_v55  ;;  %v7831_v1 = vld [vmem:[#allocation2 + $0x38] sm:$0xff] }
 0x141   :  { %6179 = vmatprep.mubr.msk.f32.mxu1 %vm8059_vm0, %v10698_v61 }
 0x143   :  { %1318 = vmatmul.mubr.f32.vlgmr.msra.gmra.mrb[100].mxu0 %v7826_v62 }
 0x144   :  { %1322 = vmatprep.mubr.f32.mxu0 %v7827_v63 }
 0x147   :  { %1323 = vmatmul.mubr.f32.gmra.mrb[102].mxu0 %v7828_v25 }
 0x148   :  { %1327 = vmatprep.mubr.f32.mxu0 %v7829_v0 }
 0x14b   :  { %1328 = vmatmul.mubr.f32.gmra.mrb[104].mxu0 %v7830_v16  ;;  %v7837_v16 = vld [vmem:[#allocation2 + $0x68] sm:$0xff] }
 0x14c   :  { %1332 = vmatprep.mubr.f32.mxu0 %v7831_v1 }
 0x14e   :  { %v459_v60 = vpop.f32.mrb[0].mxu0  ;;  %v674_v8 = vpop.f32.mrb[0].mxu1 }
 0x14f   :  { %v1443_v13 = vmul.f32 0.2, %v459_v60  ;;  %v461_v18 = vpop.f32.mrb[1].mxu0  ;;  %1333 = vmatmul.mubr.f32.gmra.mrb[106].mxu0 %v7832_v12  ;;  %v1445_v29 = vmul.f32 0.2, %v674_v8  ;;  %v8449_v33 = vpop.f32.mrb[1].mxu1 }
 0x150   :  { %v1444_v34 = vmul.f32 0.2, %v461_v18  ;;  %1337 = vmatprep.mubr.f32.mxu0 %v7833_v35  ;;  %v7838_v35 = vld [vmem:[#allocation2 + $0x60] sm:$0xff] }
 0x151   :  { %v1668_v28 = vmax.f32 %v459_v60, %v1443_v13  ;;  %v1670_v31 = vmax.f32 %v674_v8, %v1445_v29 }
 0x152   :  { %v1669_v3 = vmax.f32 %v461_v18, %v1444_v34  ;;  %v465_v7 = vpop.f32.mrb[2].mxu0 }
 0x153   :  { %v1452_v42 = vmul.f32 0.2, %v465_v7  ;;  %v467_v45 = vpop.f32.mrb[3].mxu0  ;;  %v680_v10 = vpop.f32.mrb[2].mxu1  ;;  %1338 = vmatmul.mubr.f32.gmra.mrb[108].mxu0 %v7834_v56 }
 0x154   :  { %v8451_v59 = vmax.f32 %v1668_v28, %v1669_v3  ;;  %v8453_v14 = vmax.f32 %v1669_v3, %v1670_v31  ;;  %v1453_v15 = vmul.f32 0.2, %v467_v45  ;;  %v1454_v17 = vmul.f32 0.2, %v680_v10  ;;  %v8455_v6 = vpop.f32.mrb[3].mxu1  ;;  %1342 = vmatprep.mubr.f32.mxu0 %v7835_v19 }
 0x155   :  { %v1677_v9 = vmax.f32 %v465_v7, %v1452_v42  ;;  %v7839_v42 = vld [vmem:[#allocation2 + $0x78] sm:$0xff] }
 0x156   :  { %10787 = vst [vmem:[#allocation9_spill] sm:$0xff] %v8453_v14  ;;  %v1678_v20 = vmax.f32 %v467_v45, %v1453_v15  ;;  %v1679_v23 = vmax.f32 %v680_v10, %v1454_v17  ;;  %v471_v26 = vpop.f32.mrb[4].mxu0 }
 0x157   :  { %v1461_v21 = vmul.f32 0.2, %v471_v26  ;;  %v473_v39 = vpop.f32.mrb[5].mxu0  ;;  %v686_v43 = vpop.f32.mrb[4].mxu1  ;;  %1343 = vmatmul.mubr.f32.gmra.mrb[110].mxu0 %v7836_v22  ;;  %v7841_v22 = vld [vmem:[#allocation2 + $0x88] sm:$0xff] }
 0x158   :  { %v8457_v62 = vmax.f32 %v1678_v20, %v1679_v23  ;;  %v1462_v63 = vmul.f32 0.2, %v473_v39  ;;  %v1463_v25 = vmul.f32 0.2, %v686_v43  ;;  %v8459_v0 = vpop.f32.mrb[5].mxu1  ;;  %1347 = vmatprep.mubr.f32.mxu0 %v7837_v16  ;;  %v8461_v1 = vmax.f32 %v1677_v9, %v1678_v20  ;;  %v7840_v23 = vld [vmem:[#allocation2 + $0x70] sm:$0xff] }
 0x159   :  { %v1686_v60 = vmax.f32 %v471_v26, %v1461_v21 }
 0x15a   :  { %10788 = vst [vmem:[#allocation10_spill] sm:$0xff] %v8457_v62  ;;  %v1687_v13 = vmax.f32 %v473_v39, %v1462_v63  ;;  %v1688_v18 = vmax.f32 %v686_v43, %v1463_v25  ;;  %v477_v8 = vpop.f32.mrb[6].mxu0 }
 0x15b   :  { %v1470_v12 = vmul.f32 0.2, %v477_v8  ;;  %v479_v34 = vpop.f32.mrb[7].mxu0  ;;  %v692_v29 = vpop.f32.mrb[6].mxu1  ;;  %1348 = vmatmul.mubr.f32.gmra.mrb[112].mxu0 %v7838_v35 }
 0x15c   :  { %v8463_v28 = vmax.f32 %v1687_v13, %v1688_v18  ;;  %v1471_v3 = vmul.f32 0.2, %v479_v34  ;;  %v1472_v31 = vmul.f32 0.2, %v692_v29  ;;  %v8465_v7 = vpop.f32.mrb[7].mxu1  ;;  %1352 = vmatprep.mubr.f32.mxu0 %v7839_v42  ;;  %v8467_v45 = vmax.f32 %v1686_v60, %v1687_v13  ;;  %v7843_v42 = vld [vmem:[#allocation2 + $0x98] sm:$0xff] }
 0x15d   :  { %v1695_v10 = vmax.f32 %v477_v8, %v1470_v12 }
 0x15e   :  { %10789 = vst [vmem:[#allocation11_spill] sm:$0xff] %v8463_v28  ;;  %v1696_v56 = vmax.f32 %v479_v34, %v1471_v3  ;;  %v1697_v15 = vmax.f32 %v692_v29, %v1472_v31  ;;  %v483_v17 = vpop.f32.mrb[8].mxu0  ;;  %v7842_v34 = vld [vmem:[#allocation2 + $0x80] sm:$0xff]  ;;  %v7849_v28 = vld [vmem:[#allocation2 + $0x188] sm:$0xff] }
 0x15f   :  { %v1479_v19 = vmul.f32 0.2, %v483_v17  ;;  %v485_v9 = vpop.f32.mrb[9].mxu0  ;;  %v698_v20 = vpop.f32.mrb[8].mxu1  ;;  %1353 = vmatmul.mubr.f32.gmra.mrb[114].mxu0 %v7840_v23 }
 0x160   :  { %v8469_v26 = vmax.f32 %v1696_v56, %v1697_v15  ;;  %v1480_v21 = vmul.f32 0.2, %v485_v9  ;;  %v1481_v39 = vmul.f32 0.2, %v698_v20  ;;  %v8471_v43 = vpop.f32.mrb[9].mxu1  ;;  %1357 = vmatprep.mubr.f32.mxu0 %v7841_v22  ;;  %v8473_v63 = vmax.f32 %v1695_v10, %v1696_v56 }
 0x161   :  { %v1704_v25 = vmax.f32 %v483_v17, %v1479_v19 }
 0x162   :  { %10790 = vst [vmem:[#allocation12_spill] sm:$0xff] %v8469_v26  ;;  %v1705_v16 = vmax.f32 %v485_v9, %v1480_v21  ;;  %v1706_v60 = vmax.f32 %v698_v20, %v1481_v39  ;;  %v489_v13 = vpop.f32.mrb[10].mxu0  ;;  %v7844_v21 = vld [vmem:[#allocation2 + $0x90] sm:$0xff] }
 0x163   :  { %v1488_v18 = vmul.f32 0.2, %v489_v13  ;;  %v491_v8 = vpop.f32.mrb[11].mxu0  ;;  %v704_v12 = vpop.f32.mrb[10].mxu1  ;;  %1358 = vmatmul.mubr.f32.gmra.mrb[116].mxu0 %v7842_v34 }
 0x164   :  { %v8475_v29 = vmax.f32 %v1705_v16, %v1706_v60  ;;  %v1489_v35 = vmul.f32 0.2, %v491_v8  ;;  %v1490_v3 = vmul.f32 0.2, %v704_v12  ;;  %v8477_v31 = vpop.f32.mrb[11].mxu1  ;;  %1362 = vmatprep.mubr.f32.mxu0 %v7843_v42  ;;  %v8479_v15 = vmax.f32 %v1704_v25, %v1705_v16 }
 0x165   :  { %v1713_v10 = vmax.f32 %v489_v13, %v1488_v18 }
 0x166   :  { %10791 = vst [vmem:[#allocation13_spill] sm:$0xff] %v8475_v29  ;;  %v1714_v56 = vmax.f32 %v491_v8, %v1489_v35  ;;  %v1715_v17 = vmax.f32 %v704_v12, %v1490_v3  ;;  %v495_v19 = vpop.f32.mrb[12].mxu0  ;;  %v7847_v29 = vld [vmem:[#allocation2 + $0x178] sm:$0xff] }
 0x167   :  { %v1497_v9 = vmul.f32 0.2, %v495_v19  ;;  %v497_v20 = vpop.f32.mrb[13].mxu0  ;;  %v710_v23 = vpop.f32.mrb[12].mxu1  ;;  %1363 = vmatmul.mubr.f32.gmra.mrb[118].mxu0 %v7844_v21 }
 0x168   :  { %v8481_v39 = vmax.f32 %v1714_v56, %v1715_v17  ;;  %v1498_v22 = vmul.f32 0.2, %v497_v20  ;;  %v1499_v60 = vmul.f32 0.2, %v710_v23  ;;  %v8483_v34 = vpop.f32.mrb[13].mxu1  ;;  %1367 = vmatprep.mubr.f32.mxu0 %v7845_v38  ;;  %v8485_v42 = vmax.f32 %v1713_v10, %v1714_v56 }
 0x169   :  { %v1722_v25 = vmax.f32 %v495_v19, %v1497_v9 }
 0x16a   :  { %10792 = vst [vmem:[#allocation14_spill] sm:$0xff] %v8481_v39  ;;  %v1723_v16 = vmax.f32 %v497_v20, %v1498_v22  ;;  %v1724_v13 = vmax.f32 %v710_v23, %v1499_v60  ;;  %v501_v18 = vpop.f32.mrb[14].mxu0 }
 0x16b   :  { %v1506_v8 = vmul.f32 0.2, %v501_v18  ;;  %v503_v12 = vpop.f32.mrb[15].mxu0  ;;  %v716_v35 = vpop.f32.mrb[14].mxu1  ;;  %1368 = vmatmul.mubr.f32.gmra.mrb[120].mxu0 %v8201_v48 }
 0x16c   :  { %v8488_v3 = vmax.f32 %v1723_v16, %v1724_v13  ;;  %v1507_v17 = vmul.f32 0.2, %v503_v12  ;;  %v1508_v21 = vmul.f32 0.2, %v716_v35  ;;  %v8490_v61 = vpop.f32.mrb[15].mxu1  ;;  %1372 = vmatprep.mubr.f32.mxu0 %v8204_v51  ;;  %v8493_v38 = vmax.f32 %v1722_v25, %v1723_v16 }
 0x16d   :  { %v1731_v10 = vmax.f32 %v501_v18, %v1506_v8 }
 0x16e   :  { %10793 = vst [vmem:[#allocation15_spill] sm:$0xff] %v8488_v3  ;;  %v1732_v56 = vmax.f32 %v503_v12, %v1507_v17  ;;  %v1733_v19 = vmax.f32 %v716_v35, %v1508_v21  ;;  %v507_v9 = vpop.f32.mrb[16].mxu0 }
 0x16f   :  { %v1515_v20 = vmul.f32 0.2, %v507_v9  ;;  %v509_v23 = vpop.f32.mrb[17].mxu0  ;;  %v722_v22 = vpop.f32.mrb[16].mxu1  ;;  %1373 = vmatmul.mubr.f32.gmra.mrb[122].mxu0 %v8209_v2 }
 0x170   :  { %v8496_v48 = vmax.f32 %v1732_v56, %v1733_v19  ;;  %v1516_v60 = vmul.f32 0.2, %v509_v23  ;;  %v1517_v13 = vmul.f32 0.2, %v722_v22  ;;  %v8498_v3 = vpop.f32.mrb[17].mxu1  ;;  %1377 = vmatprep.mubr.f32.mxu0 %v8212_v5  ;;  %v8501_v51 = vmax.f32 %v1731_v10, %v1732_v56 }
 0x171   :  { %v1740_v25 = vmax.f32 %v507_v9, %v1515_v20 }
 0x172   :  { %10794 = vst [vmem:[#allocation16_spill] sm:$0xff] %v8496_v48  ;;  %v1741_v16 = vmax.f32 %v509_v23, %v1516_v60  ;;  %v1742_v18 = vmax.f32 %v722_v22, %v1517_v13  ;;  %v513_v8 = vpop.f32.mrb[18].mxu0 }
 0x173   :  { %v1524_v12 = vmul.f32 0.2, %v513_v8  ;;  %v515_v35 = vpop.f32.mrb[19].mxu0  ;;  %v728_v17 = vpop.f32.mrb[18].mxu1  ;;  %1378 = vmatmul.mubr.f32.gmra.mrb[124].mxu0 %v8217_v24 }
 0x174   :  { %v8504_v2 = vmax.f32 %v1741_v16, %v1742_v18  ;;  %v1525_v21 = vmul.f32 0.2, %v515_v35  ;;  %v1526_v19 = vmul.f32 0.2, %v728_v17  ;;  %v8506_v48 = vpop.f32.mrb[19].mxu1  ;;  %1382 = vmatprep.mubr.f32.mxu0 %v8220_v30  ;;  %v8509_v5 = vmax.f32 %v1740_v25, %v1741_v16 }
 0x175   :  { %v1749_v10 = vmax.f32 %v513_v8, %v1524_v12 }
 0x176   :  { %10795 = vst [vmem:[#allocation17_spill] sm:$0xff] %v8504_v2  ;;  %v1750_v56 = vmax.f32 %v515_v35, %v1525_v21  ;;  %v1751_v9 = vmax.f32 %v728_v17, %v1526_v19  ;;  %v519_v20 = vpop.f32.mrb[20].mxu0 }
 0x177   :  { %v1533_v23 = vmul.f32 0.2, %v519_v20  ;;  %v521_v22 = vpop.f32.mrb[21].mxu0  ;;  %v734_v60 = vpop.f32.mrb[20].mxu1  ;;  %1383 = vmatmul.mubr.f32.gmra.mrb[126].mxu0 %v8225_v47 }
 0x178   :  { %v8512_v24 = vmax.f32 %v1750_v56, %v1751_v9  ;;  %v1534_v13 = vmul.f32 0.2, %v521_v22  ;;  %v1535_v18 = vmul.f32 0.2, %v734_v60  ;;  %v8514_v2 = vpop.f32.mrb[21].mxu1  ;;  %1387 = vmatprep.mubr.f32.mxu0 %v8228_v52  ;;  %v8517_v30 = vmax.f32 %v1749_v10, %v1750_v56 }
 0x179   :  { %v1758_v25 = vmax.f32 %v519_v20, %v1533_v23 }
 0x17a   :  { %10796 = vst [vmem:[#allocation18_spill] sm:$0xff] %v8512_v24  ;;  %v1759_v16 = vmax.f32 %v521_v22, %v1534_v13  ;;  %v1760_v8 = vmax.f32 %v734_v60, %v1535_v18  ;;  %v525_v12 = vpop.f32.mrb[22].mxu0 }
 0x17b   :  { %v1542_v35 = vmul.f32 0.2, %v525_v12  ;;  %v527_v17 = vpop.f32.mrb[23].mxu0  ;;  %v740_v21 = vpop.f32.mrb[22].mxu1  ;;  %1388 = vmatmul.mubr.f32.gmra.mrb[128].mxu0 %v8233_v4 }
 0x17c   :  { %v8520_v47 = vmax.f32 %v1759_v16, %v1760_v8  ;;  %v1543_v19 = vmul.f32 0.2, %v527_v17  ;;  %v1544_v9 = vmul.f32 0.2, %v740_v21  ;;  %v8522_v24 = vpop.f32.mrb[23].mxu1  ;;  %1392 = vmatprep.mubr.f32.mxu0 %v8236_v11  ;;  %v8525_v52 = vmax.f32 %v1758_v25, %v1759_v16 }
 0x17d   :  { %v1767_v10 = vmax.f32 %v525_v12, %v1542_v35 }
 0x17e   :  { %10797 = vst [vmem:[#allocation19_spill] sm:$0xff] %v8520_v47  ;;  %v1768_v56 = vmax.f32 %v527_v17, %v1543_v19  ;;  %v1769_v20 = vmax.f32 %v740_v21, %v1544_v9  ;;  %v531_v23 = vpop.f32.mrb[24].mxu0 }
 0x17f   :  { %v1551_v22 = vmul.f32 0.2, %v531_v23  ;;  %v533_v60 = vpop.f32.mrb[25].mxu0  ;;  %v746_v13 = vpop.f32.mrb[24].mxu1  ;;  %1393 = vmatmul.mubr.f32.gmra.mrb[130].mxu0 %v8241_v27 }
 0x180   :  { %v8528_v4 = vmax.f32 %v1768_v56, %v1769_v20  ;;  %v1552_v18 = vmul.f32 0.2, %v533_v60  ;;  %v1553_v8 = vmul.f32 0.2, %v746_v13  ;;  %v8530_v47 = vpop.f32.mrb[25].mxu1  ;;  %1397 = vmatprep.mubr.f32.mxu0 %v8244_v32  ;;  %v8533_v11 = vmax.f32 %v1767_v10, %v1768_v56 }
 0x181   :  { %v1776_v25 = vmax.f32 %v531_v23, %v1551_v22 }
 0x182   :  { %10798 = vst [vmem:[#allocation20_spill] sm:$0xff] %v8528_v4  ;;  %v1777_v16 = vmax.f32 %v533_v60, %v1552_v18  ;;  %v1778_v12 = vmax.f32 %v746_v13, %v1553_v8  ;;  %v537_v35 = vpop.f32.mrb[26].mxu0 }
 0x183   :  { %v1560_v17 = vmul.f32 0.2, %v537_v35  ;;  %v539_v21 = vpop.f32.mrb[27].mxu0  ;;  %v752_v19 = vpop.f32.mrb[26].mxu1  ;;  %1398 = vmatmul.mubr.f32.gmra.mrb[132].mxu0 %v8249_v36 }
 0x184   :  { %v8536_v27 = vmax.f32 %v1777_v16, %v1778_v12  ;;  %v1561_v9 = vmul.f32 0.2, %v539_v21  ;;  %v1562_v20 = vmul.f32 0.2, %v752_v19  ;;  %v8538_v4 = vpop.f32.mrb[27].mxu1  ;;  %1402 = vmatprep.mubr.f32.mxu0 %v8252_v37  ;;  %v8541_v32 = vmax.f32 %v1776_v25, %v1777_v16 }
 0x185   :  { %v1785_v10 = vmax.f32 %v537_v35, %v1560_v17 }
 0x186   :  { %10799 = vst [vmem:[#allocation21_spill] sm:$0xff] %v8536_v27  ;;  %v1786_v56 = vmax.f32 %v539_v21, %v1561_v9  ;;  %v1787_v23 = vmax.f32 %v752_v19, %v1562_v20  ;;  %v543_v22 = vpop.f32.mrb[28].mxu0 }
 0x187   :  { %v1569_v60 = vmul.f32 0.2, %v543_v22  ;;  %v545_v13 = vpop.f32.mrb[29].mxu0  ;;  %v758_v18 = vpop.f32.mrb[28].mxu1  ;;  %1403 = vmatmul.mubr.f32.gmra.mrb[134].mxu0 %v8259_v40 }
 0x188   :  { %v8544_v36 = vmax.f32 %v1786_v56, %v1787_v23  ;;  %v1570_v8 = vmul.f32 0.2, %v545_v13  ;;  %v1571_v12 = vmul.f32 0.2, %v758_v18  ;;  %v8546_v27 = vpop.f32.mrb[29].mxu1  ;;  %1407 = vmatprep.mubr.f32.mxu0 %v8262_v41  ;;  %v8549_v37 = vmax.f32 %v1785_v10, %v1786_v56 }
 0x189   :  { %v1794_v25 = vmax.f32 %v543_v22, %v1569_v60 }
 0x18a   :  { %10800 = vst [vmem:[#allocation22_spill] sm:$0xff] %v8544_v36  ;;  %v1795_v16 = vmax.f32 %v545_v13, %v1570_v8  ;;  %v1796_v35 = vmax.f32 %v758_v18, %v1571_v12  ;;  %v549_v17 = vpop.f32.mrb[30].mxu0 }
 0x18b   :  { %v1578_v21 = vmul.f32 0.2, %v549_v17  ;;  %v551_v19 = vpop.f32.mrb[31].mxu0  ;;  %v764_v9 = vpop.f32.mrb[30].mxu1  ;;  %1408 = vmatmul.mubr.f32.gmra.mrb[136].mxu0 %v8267_v44 }
 0x18c   :  { %v8552_v40 = vmax.f32 %v1795_v16, %v1796_v35  ;;  %v1579_v20 = vmul.f32 0.2, %v551_v19  ;;  %v1580_v23 = vmul.f32 0.2, %v764_v9  ;;  %v8554_v36 = vpop.f32.mrb[31].mxu1  ;;  %1412 = vmatprep.mubr.f32.mxu0 %v8270_v46  ;;  %v8557_v41 = vmax.f32 %v1794_v25, %v1795_v16 }
 0x18d   :  { %v1803_v10 = vmax.f32 %v549_v17, %v1578_v21 }
 0x18e   :  { %10801 = vst [vmem:[#allocation23_spill] sm:$0xff] %v8552_v40  ;;  %v1804_v56 = vmax.f32 %v551_v19, %v1579_v20  ;;  %v1805_v22 = vmax.f32 %v764_v9, %v1580_v23  ;;  %v555_v60 = vpop.f32.mrb[32].mxu0 }
 0x18f   :  { %v1587_v13 = vmul.f32 0.2, %v555_v60  ;;  %v557_v18 = vpop.f32.mrb[33].mxu0  ;;  %v770_v8 = vpop.f32.mrb[32].mxu1  ;;  %1413 = vmatmul.mubr.f32.gmra.mrb[138].mxu0 %v8275_v49 }
 0x190   :  { %v8560_v44 = vmax.f32 %v1804_v56, %v1805_v22  ;;  %v1588_v12 = vmul.f32 0.2, %v557_v18  ;;  %v1589_v35 = vmul.f32 0.2, %v770_v8  ;;  %v8562_v40 = vpop.f32.mrb[33].mxu1  ;;  %1417 = vmatprep.mubr.f32.mxu0 %v8278_v50  ;;  %v8565_v46 = vmax.f32 %v1803_v10, %v1804_v56 }
 0x191   :  { %v1812_v25 = vmax.f32 %v555_v60, %v1587_v13 }
 0x192   :  { %10802 = vst [vmem:[#allocation24_spill] sm:$0xff] %v8560_v44  ;;  %v1813_v16 = vmax.f32 %v557_v18, %v1588_v12  ;;  %v1814_v17 = vmax.f32 %v770_v8, %v1589_v35  ;;  %v561_v21 = vpop.f32.mrb[34].mxu0 }
 0x193   :  { %v1596_v19 = vmul.f32 0.2, %v561_v21  ;;  %v563_v9 = vpop.f32.mrb[35].mxu0  ;;  %v776_v20 = vpop.f32.mrb[34].mxu1  ;;  %1418 = vmatmul.mubr.f32.gmra.mrb[140].mxu0 %v8283_v53 }
 0x194   :  { %v8568_v49 = vmax.f32 %v1813_v16, %v1814_v17  ;;  %v1597_v23 = vmul.f32 0.2, %v563_v9  ;;  %v1598_v22 = vmul.f32 0.2, %v776_v20  ;;  %v8570_v44 = vpop.f32.mrb[35].mxu1  ;;  %1422 = vmatprep.mubr.f32.mxu0 %v8286_v54  ;;  %v8573_v50 = vmax.f32 %v1812_v25, %v1813_v16 }
 0x195   :  { %v1821_v10 = vmax.f32 %v561_v21, %v1596_v19 }
 0x196   :  { %10803 = vst [vmem:[#allocation25_spill] sm:$0xff] %v8568_v49  ;;  %v1822_v56 = vmax.f32 %v563_v9, %v1597_v23  ;;  %v1823_v60 = vmax.f32 %v776_v20, %v1598_v22  ;;  %v567_v13 = vpop.f32.mrb[36].mxu0  ;;  %v7846_v22 = vld [vmem:[#allocation2 + $0x160] sm:$0xff] }
 0x197   :  { %v1605_v18 = vmul.f32 0.2, %v567_v13  ;;  %v569_v8 = vpop.f32.mrb[37].mxu0  ;;  %v782_v12 = vpop.f32.mrb[36].mxu1  ;;  %1423 = vmatmul.mubr.f32.gmra.mrb[142].mxu0 %v8291_v57 }
 0x198   :  { %v8576_v53 = vmax.f32 %v1822_v56, %v1823_v60  ;;  %v1606_v35 = vmul.f32 0.2, %v569_v8  ;;  %v1607_v17 = vmul.f32 0.2, %v782_v12  ;;  %v8578_v49 = vpop.f32.mrb[37].mxu1  ;;  %1427 = vmatprep.mubr.f32.mxu0 %v8294_v58  ;;  %v8581_v54 = vmax.f32 %v1821_v10, %v1822_v56 }
 0x199   :  { %v1830_v25 = vmax.f32 %v567_v13, %v1605_v18 }
 0x19a   :  { %10804 = vst [vmem:[#allocation26_spill] sm:$0xff] %v8576_v53  ;;  %10805 = vst [vmem:[#allocation27_spill] sm:$0xff] %v8581_v54  ;;  %v1831_v16 = vmax.f32 %v569_v8, %v1606_v35  ;;  %v1832_v21 = vmax.f32 %v782_v12, %v1607_v17  ;;  %v573_v19 = vpop.f32.mrb[38].mxu0  ;;  %v7848_v17 = vld [vmem:[#allocation2 + $0x170] sm:$0xff] }
 0x19b   :  { %v1614_v9 = vmul.f32 0.2, %v573_v19  ;;  %v575_v20 = vpop.f32.mrb[39].mxu0  ;;  %v788_v23 = vpop.f32.mrb[38].mxu1  ;;  %1428 = vmatmul.mubr.f32.gmra.mrb[144].mxu0 %v7846_v22 }
 0x19c   :  { %v8583_v57 = vmax.f32 %v1831_v16, %v1832_v21  ;;  %v1615_v60 = vmul.f32 0.2, %v575_v20  ;;  %v1616_v53 = vmul.f32 0.2, %v788_v23  ;;  %v8585_v39 = vpop.f32.mrb[39].mxu1  ;;  %1432 = vmatprep.mubr.f32.mxu0 %v7847_v29  ;;  %v8587_v58 = vmax.f32 %v1830_v25, %v1831_v16 }
 0x19d   :  { %10807 = vst [vmem:[#allocation29_spill] sm:$0xff] %v8585_v39  ;;  %v1839_v10 = vmax.f32 %v573_v19, %v1614_v9 }
 0x19e   :  { %10806 = vst [vmem:[#allocation28_spill] sm:$0xff] %v8583_v57  ;;  %10808 = vst [vmem:[#allocation30_spill] sm:$0xff] %v8587_v58  ;;  %v1840_v56 = vmax.f32 %v575_v20, %v1615_v60  ;;  %v1841_v13 = vmax.f32 %v788_v23, %v1616_v53  ;;  %v579_v18 = vpop.f32.mrb[40].mxu0  ;;  %v7850_v60 = vld [vmem:[#allocation2 + $0x180] sm:$0xff]  ;;  %v2282_v58 = vld [vmem:[#allocation6 + $0x98] sm:$0xff] }
 0x19f   :  { %v1623_v8 = vmul.f32 0.2, %v579_v18  ;;  %v581_v12 = vpop.f32.mrb[41].mxu0  ;;  %v794_v35 = vpop.f32.mrb[40].mxu1  ;;  %1433 = vmatmul.mubr.f32.gmra.mrb[146].mxu0 %v7848_v17 }
 0x1a0   :  { %v8589_v22 = vmax.f32 %v1840_v56, %v1841_v13  ;;  %v1624_v21 = vmul.f32 0.2, %v581_v12  ;;  %v1625_v57 = vmul.f32 0.2, %v794_v35  ;;  %v8591_v26 = vpop.f32.mrb[41].mxu1  ;;  %1437 = vmatprep.mubr.f32.mxu0 %v7849_v28  ;;  %v8593_v29 = vmax.f32 %v1839_v10, %v1840_v56 }
 0x1a1   :  { %10810 = vst [vmem:[#allocation32_spill] sm:$0xff] %v8591_v26  ;;  %v1848_v25 = vmax.f32 %v579_v18, %v1623_v8  ;;  %v1464_v26 = vmul.f32 0.2, %v8459_v0 }
 0x1a2   :  { %10809 = vst [vmem:[#allocation31_spill] sm:$0xff] %v8589_v22  ;;  %10811 = vst [vmem:[#allocation33_spill] sm:$0xff] %v8593_v29  ;;  %v1849_v16 = vmax.f32 %v581_v12, %v1624_v21  ;;  %v1850_v19 = vmax.f32 %v794_v35, %v1625_v57  ;;  %v585_v53 = vpop.f32.mrb[42].mxu0 }
 0x1a3   :  { %v1632_v9 = vmul.f32 0.2, %v585_v53  ;;  %v587_v20 = vpop.f32.mrb[43].mxu0  ;;  %v800_v23 = vpop.f32.mrb[42].mxu1  ;;  %1438 = vmatmul.mubr.f32.gmra.mrb[148].mxu0 %v7850_v60 }
 0x1a4   :  { %v8595_v17 = vmax.f32 %v1849_v16, %v1850_v19  ;;  %v1633_v13 = vmul.f32 0.2, %v587_v20  ;;  %v1634_v22 = vmul.f32 0.2, %v800_v23  ;;  %v8597_v62 = vpop.f32.mrb[43].mxu1  ;;  %v8599_v14 = vmax.f32 %v1848_v25, %v1849_v16  ;;  %3222 = vmatprep.mubr.f32.mxu0 %v8444_v55 }
 0x1a5   :  { %10813 = vst [vmem:[#allocation35_spill] sm:$0xff] %v8597_v62  ;;  %v1857_v28 = vmax.f32 %v585_v53, %v1632_v9 }
 0x1a6   :  { %10812 = vst [vmem:[#allocation34_spill] sm:$0xff] %v8595_v17  ;;  %10814 = vst [vmem:[#allocation36_spill] sm:$0xff] %v8599_v14  ;;  %v1858_v10 = vmax.f32 %v587_v20, %v1633_v13  ;;  %v1859_v56 = vmax.f32 %v800_v23, %v1634_v22  ;;  %v591_v57 = vpop.f32.mrb[44].mxu0 }
 0x1a7   :  { %v1641_v18 = vmul.f32 0.2, %v591_v57  ;;  %v593_v8 = vpop.f32.mrb[45].mxu0  ;;  %v806_v12 = vpop.f32.mrb[44].mxu1 }
 0x1a8   :  { %v8602_v35 = vmax.f32 %v1858_v10, %v1859_v56  ;;  %v1642_v21 = vmul.f32 0.2, %v593_v8  ;;  %v1643_v19 = vmul.f32 0.2, %v806_v12  ;;  %v8604_v60 = vpop.f32.mrb[45].mxu1  ;;  %v8606_v17 = vmax.f32 %v1857_v28, %v1858_v10 }
 0x1a9   :  { %10816 = vst [vmem:[#allocation38_spill] sm:$0xff] %v8604_v60  ;;  %v1866_v29 = vmax.f32 %v591_v57, %v1641_v18 }
 0x1aa   :  { %10815 = vst [vmem:[#allocation37_spill] sm:$0xff] %v8602_v35  ;;  %10817 = vst [vmem:[#allocation39_spill] sm:$0xff] %v8606_v17  ;;  %v1867_v25 = vmax.f32 %v593_v8, %v1642_v21  ;;  %v1868_v16 = vmax.f32 %v806_v12, %v1643_v19  ;;  %v597_v14 = vpop.f32.mrb[46].mxu0 }
 0x1ab   :  { %v1650_v55 = vmul.f32 0.2, %v597_v14  ;;  %v599_v53 = vpop.f32.mrb[47].mxu0  ;;  %v812_v9 = vpop.f32.mrb[46].mxu1 }
 0x1ac   :  { %v8608_v22 = vmax.f32 %v1867_v25, %v1868_v16  ;;  %v1651_v20 = vmul.f32 0.2, %v599_v53  ;;  %v1652_v23 = vmul.f32 0.2, %v812_v9  ;;  %v8610_v13 = vpop.f32.mrb[47].mxu1  ;;  %v8612_v56 = vmax.f32 %v1866_v29, %v1867_v25 }
 0x1ad   :  { %10819 = vst [vmem:[#allocation41_spill] sm:$0xff] %v8610_v13  ;;  %v1875_v35 = vmax.f32 %v597_v14, %v1650_v55  ;;  %v2279_v55 = vld [vmem:[#allocation6 + $0x80] sm:$0xff] }
 0x1ae   :  { %10818 = vst [vmem:[#allocation40_spill] sm:$0xff] %v8608_v22  ;;  %10820 = vst [vmem:[#allocation42_spill] sm:$0xff] %v8612_v56  ;;  %v1876_v62 = vmax.f32 %v599_v53, %v1651_v20  ;;  %v1877_v60 = vmax.f32 %v812_v9, %v1652_v23  ;;  %v603_v28 = vpop.f32.mrb[48].mxu0  ;;  %v1446_v22 = vmul.f32 0.2, %v8449_v33  ;;  %v2280_v53 = vld [vmem:[#allocation6 + $0x88] sm:$0xff] }
 0x1af   :  { %v1659_v10 = vmul.f32 0.2, %v603_v28  ;;  %v605_v57 = vpop.f32.mrb[49].mxu0  ;;  %v818_v18 = vpop.f32.mrb[48].mxu1  ;;  %v1455_v9 = vmul.f32 0.2, %v8455_v6 }
 0x1b0   :  { %v8614_v8 = vmax.f32 %v1876_v62, %v1877_v60  ;;  %v1660_v12 = vmul.f32 0.2, %v605_v57  ;;  %v1661_v21 = vmul.f32 0.2, %v818_v18  ;;  %v8616_v19 = vpop.f32.mrb[49].mxu1  ;;  %v8618_v16 = vmax.f32 %v1875_v35, %v1876_v62 }
 0x1b1   :  { %10822 = vst [vmem:[#allocation44_spill] sm:$0xff] %v8616_v19  ;;  %v1884_v17 = vmax.f32 %v603_v28, %v1659_v10  ;;  %v1671_v35 = vmax.f32 %v8449_v33, %v1446_v22 }
 0x1b2   :  { %10821 = vst [vmem:[#allocation43_spill] sm:$0xff] %v8614_v8  ;;  %10823 = vst [vmem:[#allocation45_spill] sm:$0xff] %v8618_v16  ;;  %v1885_v29 = vmax.f32 %v605_v57, %v1660_v12  ;;  %v1886_v25 = vmax.f32 %v818_v18, %v1661_v21  ;;  %v889_v14 = vpop.f32.mrb[50].mxu0  ;;  %v7302_v21 = vpack.c.bf16 %v2280_v53, %v2279_v55  ;;  %v2281_v16 = vld [vmem:[#allocation6 + $0x90] sm:$0xff] }
 0x1b3   :  { %v1447_v20 = vmul.f32 0.2, %v889_v14  ;;  %v1104_v23 = vpop.f32.mrb[50].mxu1  ;;  %v891_v60 = vpop.f32.mrb[51].mxu0 }
 0x1b4   :  { %v8622_v8 = vmax.f32 %v1885_v29, %v1886_v25  ;;  %v1449_v56 = vmul.f32 0.2, %v1104_v23  ;;  %v1448_v13 = vmul.f32 0.2, %v891_v60  ;;  %v1106_v19 = vpop.f32.mrb[51].mxu1  ;;  %v8624_v62 = vmax.f32 %v1884_v17, %v1885_v29 }
 0x1b5   :  { %v1672_v28 = vmax.f32 %v889_v14, %v1447_v20  ;;  %v1450_v10 = vmul.f32 0.2, %v1106_v19  ;;  %v1680_v29 = vmax.f32 %v8455_v6, %v1455_v9  ;;  %v8641_v20 = vmul.f32 0.2, %v8465_v7 }
 0x1b6   :  { %10824 = vst [vmem:[#allocation46_spill] sm:$0xff] %v8622_v8  ;;  %v1674_v57 = vmax.f32 %v1104_v23, %v1449_v56  ;;  %v1673_v18 = vmax.f32 %v891_v60, %v1448_v13  ;;  %v895_v12 = vpop.f32.mrb[52].mxu0  ;;  %v7305_v6 = vpack.c.bf16 %v2282_v58, %v2281_v16  ;;  %v10830_v58 = vmov 0.0  }
 0x1b7   :  { %v8628_v54 = vmax.f32 %v1106_v19, %v1450_v10  ;;  %v8630_v25 = vmax.f32 %v1671_v35, %v1672_v28  ;;  %v1456_v8 = vmul.f32 0.2, %v895_v12  ;;  %v1110_v39 = vpop.f32.mrb[52].mxu1  ;;  %v897_v17 = vpop.f32.mrb[53].mxu0 }
 0x1b8   :  { %v1458_v33 = vmul.f32 0.2, %v1110_v39  ;;  %v1457_v22 = vmul.f32 0.2, %v897_v17  ;;  %v1112_v14 = vpop.f32.mrb[53].mxu1  ;;  %v8633_v56 = vmax.f32 %v1672_v28, %v1673_v18 }
 0x1b9   :  { %10825 = vst [vmem:[#allocation47_spill] sm:$0xff] %v8628_v54  ;;  %10826 = vst [vmem:[#allocation48_spill] sm:$0xff] %v8630_v25  ;;  %v1944_v13 = vmax.f32 %v8451_v59, %v8630_v25  ;;  %v8638_v55 = vmax.f32 %v1674_v57, %v8628_v54  ;;  %v1681_v19 = vmax.f32 %v895_v12, %v1456_v8  ;;  %v1459_v53 = vmul.f32 0.2, %v1112_v14  ;;  %v2283_v8 = vld [vmem:[#allocation6 + $0xa0] sm:$0xff]  ;;  %v2284_v12 = vld [vmem:[#allocation6 + $0xa8] sm:$0xff] }
 0x1ba   :  { %10827 = vst [vmem:[#allocation49_spill] sm:$0xff] %v8633_v56  ;;  %v1683_v23 = vmax.f32 %v1110_v39, %v1458_v33  ;;  %v1682_v60 = vmax.f32 %v897_v17, %v1457_v22  ;;  %v901_v35 = vpop.f32.mrb[54].mxu0  ;;  %v1689_v54 = vmax.f32 %v8459_v0, %v1464_v26  ;;  %v8661_v0 = vmul.f32 0.2, %v8471_v43 }
 0x1bb   :  { %10828 = vst [vmem:[#allocation50_spill] sm:$0xff] %v8638_v55  ;;  %v8645_v28 = vmax.f32 %v1112_v14, %v1459_v53  ;;  %v1465_v10 = vmul.f32 0.2, %v901_v35  ;;  %v1116_v18 = vpop.f32.mrb[54].mxu1  ;;  %v903_v59 = vpop.f32.mrb[55].mxu0  ;;  %6180 = vmatmul.mubr.f32.vlgmr.msra.gmra.mrb[100].mxu1 %v1944_v13  ;;  %v8647_v57 = vmax.f32 %v1680_v29, %v1681_v19  ;;  %v10832_v13 = vmov 0.0|0.0  }
 0x1bc   :  { %v1467_v56 = vmul.f32 0.2, %v1116_v18  ;;  %v1466_v39 = vmul.f32 0.2, %v903_v59  ;;  %v1118_v17 = vpop.f32.mrb[55].mxu1  ;;  %7303 = vmatpush3.bf16.msra.mxu1 %v7302_v21  ;;  %6182 = vmatprep.mubr.msk.f32.mxu1 %vm8059_vm0, %v10830_v58  ;;  %v8652_v16 = vmax.f32 %v1681_v19, %v1682_v60  ;;  %v7308_v9 = vpack.c.bf16 %v2284_v12, %v2283_v8 }
 0x1bd   :  { %10829 = vst [vmem:[#allocation51_spill] sm:$0xff] %v8645_v28  ;;  %v8655_v33 = vmax.f32 %v1683_v23, %v8645_v28  ;;  %v1690_v22 = vmax.f32 %v901_v35, %v1465_v10  ;;  %v1468_v14 = vmul.f32 0.2, %v1118_v17  ;;  %v1945_v29 = vmax.f32 %v8461_v1, %v8647_v57  ;;  %7304 = vmatprep.subr.bf16.mxu1 %v10832_v13 }
 0x1be   :  { %v1692_v26 = vmax.f32 %v1116_v18, %v1467_v56  ;;  %v1691_v21 = vmax.f32 %v903_v59, %v1466_v39  ;;  %v907_v53 = vpop.f32.mrb[56].mxu0  ;;  %v1698_v10 = vmax.f32 %v8465_v7, %v8641_v20  ;;  %v2285_v7 = vld [vmem:[#allocation6 + $0xb0] sm:$0xff]  ;;  %v2286_v20 = vld [vmem:[#allocation6 + $0xb8] sm:$0xff]  ;;  %v1707_v39 = vmax.f32 %v8471_v43, %v8661_v0 }
 0x1bf   :  { %10831 = vst [vmem:[#allocation52_spill] sm:$0xff] %v8655_v33  ;;  %v8663_v55 = vmax.f32 %v1118_v17, %v1468_v14  ;;  %v1474_v19 = vmul.f32 0.2, %v907_v53  ;;  %v1122_v60 = vpop.f32.mrb[56].mxu1  ;;  %v909_v23 = vpop.f32.mrb[57].mxu0  ;;  %6183 = vmatmul.mubr.f32.gmra.mrb[102].mxu1 %v1945_v29  ;;  %v8665_v35 = vmax.f32 %v1689_v54, %v1690_v22  ;;  %v7311_v43 = vpack.c.bf16 %v2286_v20, %v2285_v7 }
 0x1c0   :  { %v1476_v28 = vmul.f32 0.2, %v1122_v60  ;;  %v1475_v25 = vmul.f32 0.2, %v909_v23  ;;  %v1124_v56 = vpop.f32.mrb[57].mxu1  ;;  %6185 = vmatprep.mubr.msk.f32.mxu1 %vm8059_vm0, %v10830_v58  ;;  %7306 = vmatpush3.bf16.msra.mxu1 %v7305_v6  ;;  %v8673_v18 = vmax.f32 %v1690_v22, %v1691_v21 }
 0x1c1   :  { %10833 = vst [vmem:[#allocation53_spill] sm:$0xff] %v8663_v55  ;;  %v8676_v59 = vmax.f32 %v1692_v26, %v8663_v55  ;;  %v1699_v54 = vmax.f32 %v907_v53, %v1474_v19  ;;  %v1477_v8 = vmul.f32 0.2, %v1124_v56  ;;  %v1946_v12 = vmax.f32 %v8467_v45, %v8665_v35  ;;  %7307 = vmatprep.subr.bf16.mxu1 %v10832_v13 }
 0x1c2   :  { %v1491_v17 = vmul.f32 0.2, %v8477_v31  ;;  %v1701_v6 = vmax.f32 %v1122_v60, %v1476_v28  ;;  %v1700_v22 = vmax.f32 %v909_v23, %v1475_v25  ;;  %v913_v14 = vpop.f32.mrb[58].mxu0 }
 0x1c3   :  { %10834 = vst [vmem:[#allocation54_spill] sm:$0xff] %v8676_v59  ;;  %v8684_v29 = vmax.f32 %v1124_v56, %v1477_v8  ;;  %v1483_v26 = vmul.f32 0.2, %v913_v14  ;;  %v1128_v21 = vpop.f32.mrb[58].mxu1  ;;  %v915_v53 = vpop.f32.mrb[59].mxu0  ;;  %6186 = vmatmul.mubr.f32.gmra.mrb[104].mxu1 %v1946_v12  ;;  %v8686_v19 = vmax.f32 %v1698_v10, %v1699_v54  ;;  %v2287_v10 = vld [vmem:[#allocation6 + $0xc0] sm:$0xff] }
 0x1c4   :  { %v1485_v1 = vmul.f32 0.2, %v1128_v21  ;;  %v1484_v55 = vmul.f32 0.2, %v915_v53  ;;  %v1130_v33 = vpop.f32.mrb[59].mxu1  ;;  %6188 = vmatprep.mubr.msk.f32.mxu1 %vm8059_vm0, %v10830_v58  ;;  %7309 = vmatpush3.bf16.msra.mxu1 %v7308_v9  ;;  %v8692_v25 = vmax.f32 %v1699_v54, %v1700_v22  ;;  %v2288_v56 = vld [vmem:[#allocation6 + $0xc8] sm:$0xff]  ;;  %v1716_v8 = vmax.f32 %v8477_v31, %v1491_v17 }
 0x1c5   :  { %10835 = vst [vmem:[#allocation55_spill] sm:$0xff] %v8684_v29  ;;  %v8695_v28 = vmax.f32 %v1701_v6, %v8684_v29  ;;  %v1708_v0 = vmax.f32 %v913_v14, %v1483_v26  ;;  %v1486_v60 = vmul.f32 0.2, %v1130_v33  ;;  %v1947_v23 = vmax.f32 %v8473_v63, %v8686_v19  ;;  %7310 = vmatprep.subr.bf16.mxu1 %v10832_v13 }
 0x1c6   :  { %v1500_v12 = vmul.f32 0.2, %v8483_v34  ;;  %v1710_v9 = vmax.f32 %v1128_v21, %v1485_v1  ;;  %v1709_v7 = vmax.f32 %v915_v53, %v1484_v55  ;;  %v919_v54 = vpop.f32.mrb[60].mxu0  ;;  %v7314_v31 = vpack.c.bf16 %v2288_v56, %v2287_v10  ;;  %v2289_v21 = vld [vmem:[#allocation6 + $0xd0] sm:$0xff]  ;;  %v2290_v53 = vld [vmem:[#allocation6 + $0xd8] sm:$0xff] }
 0x1c7   :  { %10836 = vst [vmem:[#allocation56_spill] sm:$0xff] %v8695_v28  ;;  %v8702_v20 = vmax.f32 %v1130_v33, %v1486_v60  ;;  %v1492_v6 = vmul.f32 0.2, %v919_v54  ;;  %v1134_v22 = vpop.f32.mrb[60].mxu1  ;;  %v921_v14 = vpop.f32.mrb[61].mxu0  ;;  %6189 = vmatmul.mubr.f32.gmra.mrb[106].mxu1 %v1947_v23  ;;  %v8704_v26 = vmax.f32 %v1707_v39, %v1708_v0 }
 0x1c8   :  { %v1494_v45 = vmul.f32 0.2, %v1134_v22  ;;  %v1493_v29 = vmul.f32 0.2, %v921_v14  ;;  %v1136_v59 = vpop.f32.mrb[61].mxu1  ;;  %6191 = vmatprep.mubr.msk.f32.mxu1 %vm8059_vm0, %v10830_v58  ;;  %7312 = vmatpush3.bf16.msra.mxu1 %v7311_v43  ;;  %v8710_v55 = vmax.f32 %v1708_v0, %v1709_v7  ;;  %v1725_v60 = vmax.f32 %v8483_v34, %v1500_v12 }
 0x1c9   :  { %10837 = vst [vmem:[#allocation57_spill] sm:$0xff] %v8702_v20  ;;  %v8713_v33 = vmax.f32 %v1710_v9, %v8702_v20  ;;  %v1717_v1 = vmax.f32 %v919_v54, %v1492_v6  ;;  %v1495_v17 = vmul.f32 0.2, %v1136_v59  ;;  %v1948_v39 = vmax.f32 %v8479_v15, %v8704_v26  ;;  %7313 = vmatprep.subr.bf16.mxu1 %v10832_v13 }
 0x1ca   :  { %10838 = vst [vmem:[#allocation58_spill] sm:$0xff] %v8710_v55  ;;  %v1509_v23 = vmul.f32 0.2, %v8490_v61  ;;  %v1719_v43 = vmax.f32 %v1134_v22, %v1494_v45  ;;  %v1718_v10 = vmax.f32 %v921_v14, %v1493_v29  ;;  %v925_v0 = vpop.f32.mrb[62].mxu0  ;;  %v7317_v34 = vpack.c.bf16 %v2290_v53, %v2289_v21  ;;  %v2291_v22 = vld [vmem:[#allocation6 + $0xe0] sm:$0xff]  ;;  %v2292_v14 = vld [vmem:[#allocation6 + $0xe8] sm:$0xff] }
 0x1cb   :  { %10839 = vst [vmem:[#allocation59_spill] sm:$0xff] %v8713_v33  ;;  %v8720_v56 = vmax.f32 %v1136_v59, %v1495_v17  ;;  %v1501_v9 = vmul.f32 0.2, %v925_v0  ;;  %v1140_v7 = vpop.f32.mrb[62].mxu1  ;;  %v927_v54 = vpop.f32.mrb[63].mxu0  ;;  %6192 = vmatmul.mubr.f32.gmra.mrb[108].mxu1 %v1948_v39  ;;  %v8722_v6 = vmax.f32 %v1716_v8, %v1717_v1 }
 0x1cc   :  { %v1503_v63 = vmul.f32 0.2, %v1140_v7  ;;  %v1502_v20 = vmul.f32 0.2, %v927_v54  ;;  %v1142_v28 = vpop.f32.mrb[63].mxu1  ;;  %6194 = vmatprep.mubr.msk.f32.mxu1 %vm8059_vm0, %v10830_v58  ;;  %7315 = vmatpush3.bf16.msra.mxu1 %v7314_v31  ;;  %v8728_v29 = vmax.f32 %v1717_v1, %v1718_v10  ;;  %v1734_v17 = vmax.f32 %v8490_v61, %v1509_v23 }
 0x1cd   :  { %10840 = vst [vmem:[#allocation60_spill] sm:$0xff] %v8720_v56  ;;  %v8731_v59 = vmax.f32 %v1719_v43, %v8720_v56  ;;  %v1726_v45 = vmax.f32 %v925_v0, %v1501_v9  ;;  %v1504_v12 = vmul.f32 0.2, %v1142_v28  ;;  %v1949_v8 = vmax.f32 %v8485_v42, %v8722_v6  ;;  %7316 = vmatprep.subr.bf16.mxu1 %v10832_v13 }
 0x1ce   :  { %10841 = vst [vmem:[#allocation61_spill] sm:$0xff] %v8728_v29  ;;  %v1518_v39 = vmul.f32 0.2, %v8498_v3  ;;  %v1728_v31 = vmax.f32 %v1140_v7, %v1503_v63  ;;  %v1727_v21 = vmax.f32 %v927_v54, %v1502_v20  ;;  %v931_v1 = vpop.f32.mrb[64].mxu0  ;;  %v7320_v61 = vpack.c.bf16 %v2292_v14, %v2291_v22  ;;  %v2293_v7 = vld [vmem:[#allocation6 + $0xf0] sm:$0xff]  ;;  %v2294_v54 = vld [vmem:[#allocation6 + $0xf8] sm:$0xff] }
 0x1cf   :  { %10842 = vst [vmem:[#allocation62_spill] sm:$0xff] %v8731_v59  ;;  %v8738_v53 = vmax.f32 %v1142_v28, %v1504_v12  ;;  %v1510_v43 = vmul.f32 0.2, %v931_v1  ;;  %v1146_v10 = vpop.f32.mrb[64].mxu1  ;;  %v933_v0 = vpop.f32.mrb[65].mxu0  ;;  %6195 = vmatmul.mubr.f32.gmra.mrb[110].mxu1 %v1949_v8  ;;  %v8740_v9 = vmax.f32 %v1725_v60, %v1726_v45 }
 0x1d0   :  { %v1512_v15 = vmul.f32 0.2, %v1146_v10  ;;  %v1511_v56 = vmul.f32 0.2, %v933_v0  ;;  %v1148_v33 = vpop.f32.mrb[65].mxu1  ;;  %6197 = vmatprep.mubr.msk.f32.mxu1 %vm8059_vm0, %v10830_v58  ;;  %7318 = vmatpush3.bf16.msra.mxu1 %v7317_v34  ;;  %v8746_v20 = vmax.f32 %v1726_v45, %v1727_v21  ;;  %v1743_v12 = vmax.f32 %v8498_v3, %v1518_v39 }
 0x1d1   :  { %10843 = vst [vmem:[#allocation63_spill] sm:$0xff] %v8738_v53  ;;  %v8749_v28 = vmax.f32 %v1728_v31, %v8738_v53  ;;  %v1735_v63 = vmax.f32 %v931_v1, %v1510_v43  ;;  %v1513_v23 = vmul.f32 0.2, %v1148_v33  ;;  %v1950_v60 = vmax.f32 %v8493_v38, %v8740_v9  ;;  %7319 = vmatprep.subr.bf16.mxu1 %v10832_v13 }
 0x1d2   :  { %v1527_v8 = vmul.f32 0.2, %v8506_v48  ;;  %v1737_v34 = vmax.f32 %v1146_v10, %v1512_v15  ;;  %v1736_v22 = vmax.f32 %v933_v0, %v1511_v56  ;;  %v937_v45 = vpop.f32.mrb[66].mxu0  ;;  %v7323_v3 = vpack.c.bf16 %v2294_v54, %v2293_v7 }
 0x1d3   :  { %v8756_v14 = vmax.f32 %v1148_v33, %v1513_v23  ;;  %v1519_v31 = vmul.f32 0.2, %v937_v45  ;;  %v1152_v21 = vpop.f32.mrb[66].mxu1  ;;  %v939_v1 = vpop.f32.mrb[67].mxu0  ;;  %6198 = vmatmul.mubr.f32.gmra.mrb[112].mxu1 %v1950_v60  ;;  %v8758_v43 = vmax.f32 %v1734_v17, %v1735_v63  ;;  %v1536_v10 = vmul.f32 0.2, %v8514_v2 }
 0x1d4   :  { %v1521_v42 = vmul.f32 0.2, %v1152_v21  ;;  %v1520_v53 = vmul.f32 0.2, %v939_v1  ;;  %v1154_v59 = vpop.f32.mrb[67].mxu1  ;;  %6200 = vmatprep.mubr.msk.f32.mxu1 %vm8059_vm0, %v10830_v58  ;;  %7321 = vmatpush3.bf16.msra.mxu1 %v7320_v61  ;;  %v8764_v56 = vmax.f32 %v1735_v63, %v1736_v22 }
 0x1d5   :  { %10844 = vst [vmem:[#allocation64_spill] sm:$0xff] %v8756_v14  ;;  %v8767_v33 = vmax.f32 %v1737_v34, %v8756_v14  ;;  %v1744_v15 = vmax.f32 %v937_v45, %v1519_v31  ;;  %v1522_v39 = vmul.f32 0.2, %v1154_v59  ;;  %v1951_v17 = vmax.f32 %v8501_v51, %v8758_v43  ;;  %7322 = vmatprep.subr.bf16.mxu1 %v10832_v13 }
 0x1d6   :  { %v1746_v0 = vmax.f32 %v1152_v21, %v1521_v42  ;;  %v1745_v23 = vmax.f32 %v939_v1, %v1520_v53  ;;  %v943_v60 = vpop.f32.mrb[68].mxu0  ;;  %v1752_v51 = vmax.f32 %v8506_v48, %v1527_v8  ;;  %v1545_v48 = vmul.f32 0.2, %v8522_v24 }
 0x1d7   :  { %v8773_v38 = vmax.f32 %v1154_v59, %v1522_v39  ;;  %v1528_v61 = vmul.f32 0.2, %v943_v60  ;;  %v1158_v63 = vpop.f32.mrb[68].mxu1  ;;  %v945_v7 = vpop.f32.mrb[69].mxu0  ;;  %6201 = vmatmul.mubr.f32.gmra.mrb[114].mxu1 %v1951_v17  ;;  %v8775_v54 = vmax.f32 %v1743_v12, %v1744_v15 }
 0x1d8   :  { %v1530_v22 = vmul.f32 0.2, %v1158_v63  ;;  %v1529_v45 = vmul.f32 0.2, %v945_v7  ;;  %v1160_v31 = vpop.f32.mrb[69].mxu1  ;;  %6203 = vmatprep.mubr.msk.f32.mxu1 %vm8059_vm0, %v10830_v58  ;;  %7324 = vmatpush3.bf16.msra.mxu1 %v7323_v3  ;;  %v8782_v59 = vmax.f32 %v1744_v15, %v1745_v23 }
 0x1d9   :  { %10845 = vst [vmem:[#allocation65_spill] sm:$0xff] %v8773_v38  ;;  %v8785_v53 = vmax.f32 %v1746_v0, %v8773_v38  ;;  %v1753_v42 = vmax.f32 %v943_v60, %v1528_v61  ;;  %v1531_v12 = vmul.f32 0.2, %v1160_v31  ;;  %v1952_v21 = vmax.f32 %v8509_v5, %v8775_v54  ;;  %7325 = vmatprep.subr.bf16.mxu1 %v10832_v13 }
 0x1da   :  { %v1755_v8 = vmax.f32 %v1158_v63, %v1530_v22  ;;  %v1754_v1 = vmax.f32 %v945_v7, %v1529_v45  ;;  %v949_v39 = vpop.f32.mrb[70].mxu0  ;;  %v1761_v5 = vmax.f32 %v8514_v2, %v1536_v10 }
 0x1db   :  { %10846 = vst [vmem:[#allocation66_spill] sm:$0xff] %v8785_v53  ;;  %v8791_v17 = vmax.f32 %v1160_v31, %v1531_v12  ;;  %v1537_v3 = vmul.f32 0.2, %v949_v39  ;;  %v1164_v15 = vpop.f32.mrb[70].mxu1  ;;  %v951_v23 = vpop.f32.mrb[71].mxu0  ;;  %6204 = vmatmul.mubr.f32.gmra.mrb[116].mxu1 %v1952_v21  ;;  %v8793_v0 = vmax.f32 %v1752_v51, %v1753_v42 }
 0x1dc   :  { %v1539_v61 = vmul.f32 0.2, %v1164_v15  ;;  %v1538_v34 = vmul.f32 0.2, %v951_v23  ;;  %v1166_v38 = vpop.f32.mrb[71].mxu1  ;;  %6206 = vmatprep.mubr.msk.f32.mxu1 %vm8059_vm0, %v10830_v58  ;;  %v8800_v63 = vmax.f32 %v1753_v42, %v1754_v1  ;;  %v1770_v1 = vmax.f32 %v8522_v24, %v1545_v48 }
 0x1dd   :  { %10847 = vst [vmem:[#allocation67_spill] sm:$0xff] %v8791_v17  ;;  %v8803_v7 = vmax.f32 %v1755_v8, %v8791_v17  ;;  %v1762_v22 = vmax.f32 %v949_v39, %v1537_v3  ;;  %v1540_v45 = vmul.f32 0.2, %v1166_v38  ;;  %v1953_v51 = vmax.f32 %v8517_v30, %v8793_v0 }
 0x1de   :  { %10848 = vst [vmem:[#allocation68_spill] sm:$0xff] %v8800_v63  ;;  %v1554_v31 = vmul.f32 0.2, %v8530_v47  ;;  %v1764_v12 = vmax.f32 %v1164_v15, %v1539_v61  ;;  %v1763_v2 = vmax.f32 %v951_v23, %v1538_v34  ;;  %v955_v10 = vpop.f32.mrb[72].mxu0  ;;  %v1563_v61 = vmul.f32 0.2, %v8538_v4 }
 0x1df   :  { %10849 = vst [vmem:[#allocation69_spill] sm:$0xff] %v8803_v7  ;;  %v8808_v21 = vmax.f32 %v1166_v38, %v1540_v45  ;;  %v1546_v60 = vmul.f32 0.2, %v955_v10  ;;  %v1170_v14 = vpop.f32.mrb[72].mxu1  ;;  %v957_v53 = vpop.f32.mrb[73].mxu0  ;;  %6207 = vmatmul.mubr.f32.gmra.mrb[118].mxu1 %v1953_v51  ;;  %v8810_v42 = vmax.f32 %v1761_v5, %v1762_v22 }
 0x1e0   :  { %v1548_v39 = vmul.f32 0.2, %v1170_v14  ;;  %v1547_v30 = vmul.f32 0.2, %v957_v53  ;;  %v1172_v3 = vpop.f32.mrb[73].mxu1  ;;  %6209 = vmatprep.mubr.msk.f32.mxu1 %vm8059_vm0, %v10830_v58  ;;  %v8817_v34 = vmax.f32 %v1762_v22, %v1763_v2 }
 0x1e1   :  { %10850 = vst [vmem:[#allocation70_spill] sm:$0xff] %v8808_v21  ;;  %v8820_v38 = vmax.f32 %v1764_v12, %v8808_v21  ;;  %v1771_v15 = vmax.f32 %v955_v10, %v1546_v60  ;;  %v1549_v23 = vmul.f32 0.2, %v1172_v3  ;;  %v1954_v5 = vmax.f32 %v8525_v52, %v8810_v42 }
 0x1e2   :  { %10851 = vst [vmem:[#allocation71_spill] sm:$0xff] %v8817_v34  ;;  %v1773_v45 = vmax.f32 %v1170_v14, %v1548_v39  ;;  %v1772_v24 = vmax.f32 %v957_v53, %v1547_v30  ;;  %v961_v48 = vpop.f32.mrb[74].mxu0  ;;  %v1779_v12 = vmax.f32 %v8530_v47, %v1554_v31 }
 0x1e3   :  { %10852 = vst [vmem:[#allocation72_spill] sm:$0xff] %v8820_v38  ;;  %v8825_v51 = vmax.f32 %v1172_v3, %v1549_v23  ;;  %v1555_v8 = vmul.f32 0.2, %v961_v48  ;;  %v1176_v17 = vpop.f32.mrb[74].mxu1  ;;  %v963_v7 = vpop.f32.mrb[75].mxu0  ;;  %6210 = vmatmul.mubr.f32.gmra.mrb[120].mxu1 %v1954_v5  ;;  %v8827_v22 = vmax.f32 %v1770_v1, %v1771_v15 }
 0x1e4   :  { %v1557_v2 = vmul.f32 0.2, %v1176_v17  ;;  %v1556_v52 = vmul.f32 0.2, %v963_v7  ;;  %v1178_v10 = vpop.f32.mrb[75].mxu1  ;;  %6212 = vmatprep.mubr.msk.f32.mxu1 %vm8059_vm0, %v10830_v58  ;;  %v8834_v14 = vmax.f32 %v1771_v15, %v1772_v24 }
 0x1e5   :  { %10853 = vst [vmem:[#allocation73_spill] sm:$0xff] %v8825_v51  ;;  %10854 = vst [vmem:[#allocation74_spill] sm:$0xff] %v8827_v22  ;;  %v8837_v53 = vmax.f32 %v1773_v45, %v8825_v51  ;;  %v1780_v39 = vmax.f32 %v961_v48, %v1555_v8  ;;  %v1558_v30 = vmul.f32 0.2, %v1178_v10  ;;  %v1955_v1 = vmax.f32 %v8533_v11, %v8827_v22 }
 0x1e6   :  { %10855 = vst [vmem:[#allocation75_spill] sm:$0xff] %v8834_v14  ;;  %v1572_v3 = vmul.f32 0.2, %v8546_v27  ;;  %v1782_v23 = vmax.f32 %v1176_v17, %v1557_v2  ;;  %v1781_v47 = vmax.f32 %v963_v7, %v1556_v52  ;;  %v967_v31 = vpop.f32.mrb[76].mxu0  ;;  %v1788_v45 = vmax.f32 %v8538_v4, %v1563_v61 }
 0x1e7   :  { %10856 = vst [vmem:[#allocation76_spill] sm:$0xff] %v8837_v53  ;;  %v8842_v5 = vmax.f32 %v1178_v10, %v1558_v30  ;;  %v1564_v60 = vmul.f32 0.2, %v967_v31  ;;  %v1182_v21 = vpop.f32.mrb[76].mxu1  ;;  %v969_v38 = vpop.f32.mrb[77].mxu0  ;;  %6213 = vmatmul.mubr.f32.gmra.mrb[122].mxu1 %v1955_v1  ;;  %v8844_v15 = vmax.f32 %v1779_v12, %v1780_v39 }
 0x1e8   :  { %v1566_v24 = vmul.f32 0.2, %v1182_v21  ;;  %v1565_v11 = vmul.f32 0.2, %v969_v38  ;;  %v1184_v48 = vpop.f32.mrb[77].mxu1  ;;  %6215 = vmatprep.mubr.msk.f32.mxu1 %vm8059_vm0, %v10830_v58  ;;  %v8851_v17 = vmax.f32 %v1780_v39, %v1781_v47 }
 0x1e9   :  { %10857 = vst [vmem:[#allocation77_spill] sm:$0xff] %v8842_v5  ;;  %10858 = vst [vmem:[#allocation78_spill] sm:$0xff] %v8844_v15  ;;  %v8854_v7 = vmax.f32 %v1782_v23, %v8842_v5  ;;  %v1789_v2 = vmax.f32 %v967_v31, %v1564_v60  ;;  %v1567_v52 = vmul.f32 0.2, %v1184_v48  ;;  %v1956_v12 = vmax.f32 %v8541_v32, %v8844_v15 }
 0x1ea   :  { %10859 = vst [vmem:[#allocation79_spill] sm:$0xff] %v8851_v17  ;;  %v1581_v10 = vmul.f32 0.2, %v8554_v36  ;;  %v1791_v30 = vmax.f32 %v1182_v21, %v1566_v24  ;;  %v1790_v4 = vmax.f32 %v969_v38, %v1565_v11  ;;  %v973_v61 = vpop.f32.mrb[78].mxu0  ;;  %v1797_v23 = vmax.f32 %v8546_v27, %v1572_v3 }
 0x1eb   :  { %10860 = vst [vmem:[#allocation80_spill] sm:$0xff] %v8854_v7  ;;  %v8859_v1 = vmax.f32 %v1184_v48, %v1567_v52  ;;  %v1573_v8 = vmul.f32 0.2, %v973_v61  ;;  %v1188_v51 = vpop.f32.mrb[78].mxu1  ;;  %v975_v53 = vpop.f32.mrb[79].mxu0  ;;  %6216 = vmatmul.mubr.f32.gmra.mrb[124].mxu1 %v1956_v12  ;;  %v8861_v39 = vmax.f32 %v1788_v45, %v1789_v2 }
 0x1ec   :  { %v1575_v47 = vmul.f32 0.2, %v1188_v51  ;;  %v1574_v32 = vmul.f32 0.2, %v975_v53  ;;  %v1190_v31 = vpop.f32.mrb[79].mxu1  ;;  %6218 = vmatprep.mubr.msk.f32.mxu1 %vm8059_vm0, %v10830_v58  ;;  %v8868_v21 = vmax.f32 %v1789_v2, %v1790_v4 }
 0x1ed   :  { %10861 = vst [vmem:[#allocation81_spill] sm:$0xff] %v8859_v1  ;;  %10862 = vst [vmem:[#allocation82_spill] sm:$0xff] %v8861_v39  ;;  %v8871_v38 = vmax.f32 %v1791_v30, %v8859_v1  ;;  %v1798_v24 = vmax.f32 %v973_v61, %v1573_v8  ;;  %v1576_v11 = vmul.f32 0.2, %v1190_v31  ;;  %v1957_v45 = vmax.f32 %v8549_v37, %v8861_v39 }
 0x1ee   :  { %10863 = vst [vmem:[#allocation83_spill] sm:$0xff] %v8868_v21  ;;  %v1590_v48 = vmul.f32 0.2, %v8562_v40  ;;  %v1800_v52 = vmax.f32 %v1188_v51, %v1575_v47  ;;  %v1799_v27 = vmax.f32 %v975_v53, %v1574_v32  ;;  %v979_v3 = vpop.f32.mrb[80].mxu0  ;;  %v1806_v30 = vmax.f32 %v8554_v36, %v1581_v10 }
 0x1ef   :  { %10864 = vst [vmem:[#allocation84_spill] sm:$0xff] %v8871_v38  ;;  %v8876_v12 = vmax.f32 %v1190_v31, %v1576_v11  ;;  %v1582_v60 = vmul.f32 0.2, %v979_v3  ;;  %v1194_v5 = vpop.f32.mrb[80].mxu1  ;;  %v981_v7 = vpop.f32.mrb[81].mxu0  ;;  %6219 = vmatmul.mubr.f32.gmra.mrb[126].mxu1 %v1957_v45  ;;  %v8878_v2 = vmax.f32 %v1797_v23, %v1798_v24 }
 0x1f0   :  { %v1584_v4 = vmul.f32 0.2, %v1194_v5  ;;  %v1583_v37 = vmul.f32 0.2, %v981_v7  ;;  %v1196_v61 = vpop.f32.mrb[81].mxu1  ;;  %6221 = vmatprep.mubr.msk.f32.mxu1 %vm8059_vm0, %v10830_v58  ;;  %v8885_v51 = vmax.f32 %v1798_v24, %v1799_v27 }
 0x1f1   :  { %10865 = vst [vmem:[#allocation85_spill] sm:$0xff] %v8876_v12  ;;  %10866 = vst [vmem:[#allocation86_spill] sm:$0xff] %v8878_v2  ;;  %v8888_v53 = vmax.f32 %v1800_v52, %v8876_v12  ;;  %v1807_v47 = vmax.f32 %v979_v3, %v1582_v60  ;;  %v1585_v32 = vmul.f32 0.2, %v1196_v61  ;;  %v1958_v23 = vmax.f32 %v8557_v41, %v8878_v2 }
 0x1f2   :  { %10867 = vst [vmem:[#allocation87_spill] sm:$0xff] %v8885_v51  ;;  %v1599_v31 = vmul.f32 0.2, %v8570_v44  ;;  %v1809_v11 = vmax.f32 %v1194_v5, %v1584_v4  ;;  %v1808_v36 = vmax.f32 %v981_v7, %v1583_v37  ;;  %v985_v10 = vpop.f32.mrb[82].mxu0  ;;  %v1815_v52 = vmax.f32 %v8562_v40, %v1590_v48 }
 0x1f3   :  { %10868 = vst [vmem:[#allocation88_spill] sm:$0xff] %v8888_v53  ;;  %v8893_v45 = vmax.f32 %v1196_v61, %v1585_v32  ;;  %v1591_v8 = vmul.f32 0.2, %v985_v10  ;;  %v1200_v1 = vpop.f32.mrb[82].mxu1  ;;  %v987_v38 = vpop.f32.mrb[83].mxu0  ;;  %6222 = vmatmul.mubr.f32.gmra.mrb[128].mxu1 %v1958_v23  ;;  %v8895_v24 = vmax.f32 %v1806_v30, %v1807_v47 }
 0x1f4   :  { %v1593_v27 = vmul.f32 0.2, %v1200_v1  ;;  %v1592_v41 = vmul.f32 0.2, %v987_v38  ;;  %v1202_v3 = vpop.f32.mrb[83].mxu1  ;;  %6224 = vmatprep.mubr.msk.f32.mxu1 %vm8059_vm0, %v10830_v58  ;;  %v8902_v5 = vmax.f32 %v1807_v47, %v1808_v36 }
 0x1f5   :  { %10869 = vst [vmem:[#allocation89_spill] sm:$0xff] %v8893_v45  ;;  %10870 = vst [vmem:[#allocation90_spill] sm:$0xff] %v8895_v24  ;;  %v8905_v7 = vmax.f32 %v1809_v11, %v8893_v45  ;;  %v1816_v4 = vmax.f32 %v985_v10, %v1591_v8  ;;  %v1594_v37 = vmul.f32 0.2, %v1202_v3  ;;  %v1959_v30 = vmax.f32 %v8565_v46, %v8895_v24 }
 0x1f6   :  { %10871 = vst [vmem:[#allocation91_spill] sm:$0xff] %v8902_v5  ;;  %v1608_v61 = vmul.f32 0.2, %v8578_v49  ;;  %v1818_v32 = vmax.f32 %v1200_v1, %v1593_v27  ;;  %v1817_v40 = vmax.f32 %v987_v38, %v1592_v41  ;;  %v991_v48 = vpop.f32.mrb[84].mxu0  ;;  %v1824_v11 = vmax.f32 %v8570_v44, %v1599_v31 }
 0x1f7   :  { %10872 = vst [vmem:[#allocation92_spill] sm:$0xff] %v8905_v7  ;;  %v8910_v23 = vmax.f32 %v1202_v3, %v1594_v37  ;;  %v1600_v60 = vmul.f32 0.2, %v991_v48  ;;  %v1206_v12 = vpop.f32.mrb[84].mxu1  ;;  %v993_v53 = vpop.f32.mrb[85].mxu0  ;;  %6225 = vmatmul.mubr.f32.gmra.mrb[130].mxu1 %v1959_v30  ;;  %v8912_v47 = vmax.f32 %v1815_v52, %v1816_v4  ;;  %v10877_v3 = vld [vmem:[#allocation29_spill] sm:$0xff] }
 0x1f8   :  { %v1602_v36 = vmul.f32 0.2, %v1206_v12  ;;  %v1601_v46 = vmul.f32 0.2, %v993_v53  ;;  %v1208_v10 = vpop.f32.mrb[85].mxu1  ;;  %6227 = vmatprep.mubr.msk.f32.mxu1 %vm8059_vm0, %v10830_v58  ;;  %v8919_v1 = vmax.f32 %v1816_v4, %v1817_v40 }
 0x1f9   :  { %10873 = vst [vmem:[#allocation93_spill] sm:$0xff] %v8910_v23  ;;  %10874 = vst [vmem:[#allocation94_spill] sm:$0xff] %v8912_v47  ;;  %v8922_v38 = vmax.f32 %v1818_v32, %v8910_v23  ;;  %v1825_v27 = vmax.f32 %v991_v48, %v1600_v60  ;;  %v1603_v41 = vmul.f32 0.2, %v1208_v10  ;;  %v1960_v52 = vmax.f32 %v8573_v50, %v8912_v47 }
 0x1fa   :  { %10875 = vst [vmem:[#allocation95_spill] sm:$0xff] %v8919_v1  ;;  %v1617_v37 = vmul.f32 0.2, %v10877_v3  ;;  %v1827_v30 = vmax.f32 %v1206_v12, %v1602_v36  ;;  %v1826_v44 = vmax.f32 %v993_v53, %v1601_v46  ;;  %v997_v31 = vpop.f32.mrb[86].mxu0  ;;  %v1833_v32 = vmax.f32 %v8578_v49, %v1608_v61 }
 0x1fb   :  { %10876 = vst [vmem:[#allocation96_spill] sm:$0xff] %v8922_v38  ;;  %v8927_v8 = vmax.f32 %v1208_v10, %v1603_v41  ;;  %v1609_v45 = vmul.f32 0.2, %v997_v31  ;;  %v1212_v7 = vpop.f32.mrb[86].mxu1  ;;  %v999_v24 = vpop.f32.mrb[87].mxu0  ;;  %6228 = vmatmul.mubr.f32.gmra.mrb[132].mxu1 %v1960_v52  ;;  %v8929_v4 = vmax.f32 %v1824_v11, %v1825_v27  ;;  %v10882_v11 = vld [vmem:[#allocation27_spill] sm:$0xff] }
 0x1fc   :  { %v1611_v40 = vmul.f32 0.2, %v1212_v7  ;;  %v1610_v50 = vmul.f32 0.2, %v999_v24  ;;  %v1214_v48 = vpop.f32.mrb[87].mxu1  ;;  %6230 = vmatprep.mubr.msk.f32.mxu1 %vm8059_vm0, %v10830_v58  ;;  %v8936_v12 = vmax.f32 %v1825_v27, %v1826_v44  ;;  %v10883_v41 = vld [vmem:[#allocation32_spill] sm:$0xff] }
 0x1fd   :  { %10878 = vst [vmem:[#allocation29_spill] sm:$0xff] %v8927_v8  ;;  %10879 = vst [vmem:[#allocation97_spill] sm:$0xff] %v8929_v4  ;;  %v8939_v53 = vmax.f32 %v1827_v30, %v8927_v8  ;;  %v1834_v36 = vmax.f32 %v997_v31, %v1609_v45  ;;  %v1612_v46 = vmul.f32 0.2, %v1214_v48  ;;  %v1961_v10 = vmax.f32 %v10882_v11, %v8929_v4 }
 0x1fe   :  { %10880 = vst [vmem:[#allocation98_spill] sm:$0xff] %v8936_v12  ;;  %v1626_v52 = vmul.f32 0.2, %v10883_v41  ;;  %v1836_v60 = vmax.f32 %v1212_v7, %v1611_v40  ;;  %v1835_v49 = vmax.f32 %v999_v24, %v1610_v50  ;;  %v1003_v61 = vpop.f32.mrb[88].mxu0  ;;  %v1842_v30 = vmax.f32 %v10877_v3, %v1617_v37 }
 0x1ff   :  { %10881 = vst [vmem:[#allocation99_spill] sm:$0xff] %v8939_v53  ;;  %v8944_v23 = vmax.f32 %v1214_v48, %v1612_v46  ;;  %v1618_v38 = vmul.f32 0.2, %v1003_v61  ;;  %v1218_v47 = vpop.f32.mrb[88].mxu1  ;;  %v1005_v2 = vpop.f32.mrb[89].mxu0  ;;  %6231 = vmatmul.mubr.f32.gmra.mrb[134].mxu1 %v1961_v10  ;;  %v8946_v27 = vmax.f32 %v1833_v32, %v1834_v36  ;;  %v10888_v32 = vld [vmem:[#allocation30_spill] sm:$0xff] }
 0x200   :  { %v1620_v44 = vmul.f32 0.2, %v1218_v47  ;;  %v1619_v31 = vmul.f32 0.2, %v1005_v2  ;;  %v1220_v11 = vpop.f32.mrb[89].mxu1  ;;  %6233 = vmatprep.mubr.msk.f32.mxu1 %vm8059_vm0, %v10830_v58  ;;  %v8953_v24 = vmax.f32 %v1834_v36, %v1835_v49  ;;  %v10889_v46 = vld [vmem:[#allocation35_spill] sm:$0xff] }
 0x201   :  { %10884 = vst [vmem:[#allocation27_spill] sm:$0xff] %v8944_v23  ;;  %10885 = vst [vmem:[#allocation32_spill] sm:$0xff] %v8946_v27  ;;  %v8956_v7 = vmax.f32 %v1836_v60, %v8944_v23  ;;  %v1843_v40 = vmax.f32 %v1003_v61, %v1618_v38  ;;  %v1621_v50 = vmul.f32 0.2, %v1220_v11  ;;  %v1962_v48 = vmax.f32 %v10888_v32, %v8946_v27 }
 0x202   :  { %10886 = vst [vmem:[#allocation100_spill] sm:$0xff] %v8953_v24  ;;  %v1635_v10 = vmul.f32 0.2, %v10889_v46  ;;  %v1845_v45 = vmax.f32 %v1218_v47, %v1620_v44  ;;  %v1844_v3 = vmax.f32 %v1005_v2, %v1619_v31  ;;  %v1009_v37 = vpop.f32.mrb[90].mxu0  ;;  %v1851_v60 = vmax.f32 %v10883_v41, %v1626_v52 }
 0x203   :  { %10887 = vst [vmem:[#allocation101_spill] sm:$0xff] %v8956_v7  ;;  %v8961_v8 = vmax.f32 %v1220_v11, %v1621_v50  ;;  %v1627_v53 = vmul.f32 0.2, %v1009_v37  ;;  %v1224_v4 = vpop.f32.mrb[90].mxu1  ;;  %v1011_v39 = vpop.f32.mrb[91].mxu0  ;;  %6234 = vmatmul.mubr.f32.gmra.mrb[136].mxu1 %v1962_v48  ;;  %v8963_v36 = vmax.f32 %v1842_v30, %v1843_v40  ;;  %v10894_v30 = vld [vmem:[#allocation33_spill] sm:$0xff] }
 0x204   :  { %v1629_v49 = vmul.f32 0.2, %v1224_v4  ;;  %v1628_v61 = vmul.f32 0.2, %v1011_v39  ;;  %v1226_v32 = vpop.f32.mrb[91].mxu1  ;;  %6236 = vmatprep.mubr.msk.f32.mxu1 %vm8059_vm0, %v10830_v58  ;;  %v8970_v2 = vmax.f32 %v1843_v40, %v1844_v3  ;;  %v10895_v50 = vld [vmem:[#allocation38_spill] sm:$0xff] }
 0x205   :  { %10890 = vst [vmem:[#allocation30_spill] sm:$0xff] %v8961_v8  ;;  %10891 = vst [vmem:[#allocation35_spill] sm:$0xff] %v8963_v36  ;;  %v8973_v47 = vmax.f32 %v1845_v45, %v8961_v8  ;;  %v1852_v44 = vmax.f32 %v1009_v37, %v1627_v53  ;;  %v1630_v31 = vmul.f32 0.2, %v1226_v32  ;;  %v1963_v11 = vmax.f32 %v10894_v30, %v8963_v36 }
 0x206   :  { %10892 = vst [vmem:[#allocation102_spill] sm:$0xff] %v8970_v2  ;;  %v1644_v48 = vmul.f32 0.2, %v10895_v50  ;;  %v1854_v38 = vmax.f32 %v1224_v4, %v1629_v49  ;;  %v1853_v41 = vmax.f32 %v1011_v39, %v1628_v61  ;;  %v1015_v52 = vpop.f32.mrb[92].mxu0  ;;  %v1860_v45 = vmax.f32 %v10889_v46, %v1635_v10 }
 0x207   :  { %10893 = vst [vmem:[#allocation103_spill] sm:$0xff] %v8973_v47  ;;  %v8978_v23 = vmax.f32 %v1226_v32, %v1630_v31  ;;  %v1636_v7 = vmul.f32 0.2, %v1015_v52  ;;  %v1230_v27 = vpop.f32.mrb[92].mxu1  ;;  %v1017_v15 = vpop.f32.mrb[93].mxu0  ;;  %6237 = vmatmul.mubr.f32.gmra.mrb[138].mxu1 %v1963_v11  ;;  %v8980_v40 = vmax.f32 %v1851_v60, %v1852_v44  ;;  %v10900_v60 = vld [vmem:[#allocation36_spill] sm:$0xff] }
 0x208   :  { %v1638_v3 = vmul.f32 0.2, %v1230_v27  ;;  %v1637_v37 = vmul.f32 0.2, %v1017_v15  ;;  %v1232_v30 = vpop.f32.mrb[93].mxu1  ;;  %6239 = vmatprep.mubr.msk.f32.mxu1 %vm8059_vm0, %v10830_v58  ;;  %v8987_v39 = vmax.f32 %v1852_v44, %v1853_v41  ;;  %v10901_v31 = vld [vmem:[#allocation41_spill] sm:$0xff] }
 0x209   :  { %10896 = vst [vmem:[#allocation33_spill] sm:$0xff] %v8978_v23  ;;  %10897 = vst [vmem:[#allocation38_spill] sm:$0xff] %v8980_v40  ;;  %v8990_v4 = vmax.f32 %v1854_v38, %v8978_v23  ;;  %v1861_v49 = vmax.f32 %v1015_v52, %v1636_v7  ;;  %v1639_v61 = vmul.f32 0.2, %v1232_v30  ;;  %v1964_v32 = vmax.f32 %v10900_v60, %v8980_v40 }
 0x20a   :  { %10898 = vst [vmem:[#allocation104_spill] sm:$0xff] %v8987_v39  ;;  %v1653_v11 = vmul.f32 0.2, %v10901_v31  ;;  %v1863_v53 = vmax.f32 %v1230_v27, %v1638_v3  ;;  %v1862_v46 = vmax.f32 %v1017_v15, %v1637_v37  ;;  %v1021_v10 = vpop.f32.mrb[94].mxu0  ;;  %v1869_v38 = vmax.f32 %v10895_v50, %v1644_v48 }
 0x20b   :  { %10899 = vst [vmem:[#allocation105_spill] sm:$0xff] %v8990_v4  ;;  %v8995_v8 = vmax.f32 %v1232_v30, %v1639_v61  ;;  %v1645_v47 = vmul.f32 0.2, %v1021_v10  ;;  %v1236_v36 = vpop.f32.mrb[94].mxu1  ;;  %v1023_v22 = vpop.f32.mrb[95].mxu0  ;;  %6240 = vmatmul.mubr.f32.gmra.mrb[140].mxu1 %v1964_v32  ;;  %v8997_v44 = vmax.f32 %v1860_v45, %v1861_v49  ;;  %v10905_v45 = vld [vmem:[#allocation39_spill] sm:$0xff] }
 0x20c   :  { %v1647_v41 = vmul.f32 0.2, %v1236_v36  ;;  %v1646_v52 = vmul.f32 0.2, %v1023_v22  ;;  %v1238_v60 = vpop.f32.mrb[95].mxu1  ;;  %6242 = vmatprep.mubr.msk.f32.mxu1 %vm8059_vm0, %v10830_v58  ;;  %v9004_v15 = vmax.f32 %v1861_v49, %v1862_v46  ;;  %v10906_v61 = vld [vmem:[#allocation44_spill] sm:$0xff] }
 0x20d   :  { %10902 = vst [vmem:[#allocation36_spill] sm:$0xff] %v8995_v8  ;;  %v9007_v27 = vmax.f32 %v1863_v53, %v8995_v8  ;;  %v1870_v3 = vmax.f32 %v1021_v10, %v1645_v47  ;;  %v1648_v37 = vmul.f32 0.2, %v1238_v60  ;;  %v1965_v30 = vmax.f32 %v10905_v45, %v8997_v44 }
 0x20e   :  { %10903 = vst [vmem:[#allocation41_spill] sm:$0xff] %v9004_v15  ;;  %v1662_v32 = vmul.f32 0.2, %v10906_v61  ;;  %v1872_v7 = vmax.f32 %v1236_v36, %v1647_v41  ;;  %v1871_v50 = vmax.f32 %v1023_v22, %v1646_v52  ;;  %v1027_v48 = vpop.f32.mrb[96].mxu0  ;;  %v1878_v53 = vmax.f32 %v10901_v31, %v1653_v11  ;;  %v10909_v52 = vld [vmem:[#allocation42_spill] sm:$0xff] }
 0x20f   :  { %10904 = vst [vmem:[#allocation106_spill] sm:$0xff] %v9007_v27  ;;  %v9012_v23 = vmax.f32 %v1869_v38, %v1870_v3  ;;  %v9014_v4 = vmax.f32 %v1238_v60, %v1648_v37  ;;  %v1654_v40 = vmul.f32 0.2, %v1027_v48  ;;  %v1242_v49 = vpop.f32.mrb[96].mxu1  ;;  %v1029_v46 = vpop.f32.mrb[97].mxu0  ;;  %6243 = vmatmul.mubr.f32.gmra.mrb[142].mxu1 %v1965_v30 }
 0x210   :  { %v9019_v10 = vmax.f32 %v1870_v3, %v1871_v50  ;;  %v1656_v45 = vmul.f32 0.2, %v1242_v49  ;;  %v1655_v8 = vmul.f32 0.2, %v1029_v46  ;;  %v1244_v36 = vpop.f32.mrb[97].mxu1  ;;  %6245 = vmatprep.mubr.msk.f32.mxu1 %vm8059_vm0, %v10830_v58 }
 0x211   :  { %10907 = vst [vmem:[#allocation39_spill] sm:$0xff] %v9014_v4  ;;  %v9024_v22 = vmax.f32 %v1872_v7, %v9014_v4  ;;  %v1879_v38 = vmax.f32 %v1027_v48, %v1654_v40  ;;  %v1657_v41 = vmul.f32 0.2, %v1244_v36  ;;  %v1966_v60 = vmax.f32 %v10909_v52, %v9012_v23 }
 0x212   :  { %10908 = vst [vmem:[#allocation44_spill] sm:$0xff] %v9019_v10  ;;  %v1881_v37 = vmax.f32 %v1242_v49, %v1656_v45  ;;  %v1880_v30 = vmax.f32 %v1029_v46, %v1655_v8  ;;  %v1033_v47 = vpop.f32.mrb[98].mxu0  ;;  %v1887_v40 = vmax.f32 %v10906_v61, %v1662_v32  ;;  %v10912_v45 = vld [vmem:[#allocation45_spill] sm:$0xff] }
 0x213   :  { %v9028_v31 = vmax.f32 %v1878_v53, %v1879_v38  ;;  %v9030_v11 = vmax.f32 %v1244_v36, %v1657_v41  ;;  %v1663_v3 = vmul.f32 0.2, %v1033_v47  ;;  %v1248_v50 = vpop.f32.mrb[98].mxu1  ;;  %v1035_v27 = vpop.f32.mrb[99].mxu0  ;;  %6246 = vmatmul.mubr.f32.gmra.mrb[144].mxu1 %v1966_v60 }
 0x214   :  { %v9035_v48 = vmax.f32 %v1879_v38, %v1880_v30  ;;  %v1665_v4 = vmul.f32 0.2, %v1248_v50  ;;  %v1664_v52 = vmul.f32 0.2, %v1035_v27  ;;  %v1250_v49 = vpop.f32.mrb[99].mxu1  ;;  %6248 = vmatprep.mubr.msk.f32.mxu1 %vm8059_vm0, %v10830_v58 }
 0x215   :  { %10910 = vst [vmem:[#allocation42_spill] sm:$0xff] %v9030_v11  ;;  %v9040_v8 = vmax.f32 %v1881_v37, %v9030_v11  ;;  %v1888_v46 = vmax.f32 %v1033_v47, %v1663_v3  ;;  %v1666_v53 = vmul.f32 0.2, %v1250_v49  ;;  %v1967_v36 = vmax.f32 %v10912_v45, %v9028_v31  ;;  %v2561_v3 = vld [vmem:[#allocation6 + $0x108] sm:$0xff] }
 0x216   :  { %10911 = vst [vmem:[#allocation107_spill] sm:$0xff] %v9035_v48  ;;  %v1890_v41 = vmax.f32 %v1248_v50, %v1665_v4  ;;  %v1889_v60 = vmax.f32 %v1035_v27, %v1664_v52  ;;  %v9044_v7 = vpop.f32.mrb[100].mxu0  ;;  %v2560_v27 = vld [vmem:[#allocation6 + $0x100] sm:$0xff] }
 0x217   :  { %v9046_v61 = vmax.f32 %v1887_v40, %v1888_v46  ;;  %v9048_v32 = vmax.f32 %v1250_v49, %v1666_v53  ;;  %6249 = vmatmul.mubr.f32.gmra.mrb[146].mxu1 %v1967_v36  ;;  %v1321_v38 = vpop.f32.mrb[101].mxu0  ;;  %v7326_v49 = vpack.c.bf16 %v2561_v3, %v2560_v27  ;;  %v10916_v53 = vld [vmem:[#allocation9_spill] sm:$0xff]  ;;  %v2562_v36 = vld [vmem:[#allocation6 + $0x110] sm:$0xff]  ;;  %v2564_v27 = vld [vmem:[#allocation6 + $0x120] sm:$0xff] }
 0x218   :  { %v9052_v37 = vmax.f32 %v1888_v46, %v1889_v60  ;;  %6251 = vmatprep.mubr.msk.f32.mxu1 %vm8059_vm0, %v10830_v58  ;;  %v10915_v46 = vld [vmem:[#allocation49_spill] sm:$0xff] }
 0x219   :  { %10913 = vst [vmem:[#allocation45_spill] sm:$0xff] %v9048_v32  ;;  %v9057_v47 = vmax.f32 %v1890_v41, %v9048_v32  ;;  %v1968_v4 = vmax.f32 %v8624_v62, %v9046_v61  ;;  %v2254_v45 = vmax.f32 %v10916_v53, %v10915_v46  ;;  %v2563_v41 = vld [vmem:[#allocation6 + $0x118] sm:$0xff]  ;;  %v2565_v3 = vld [vmem:[#allocation6 + $0x128] sm:$0xff] }
 0x21a   :  { %10914 = vst [vmem:[#allocation108_spill] sm:$0xff] %v9052_v37  ;;  %v9061_v50 = vpop.f32.mrb[102].mxu0  ;;  %v7329_v38 = vpack.c.bf16 %v2563_v41, %v2562_v36  ;;  %v2566_v36 = vld [vmem:[#allocation6 + $0x130] sm:$0xff]  ;;  %v2567_v41 = vld [vmem:[#allocation6 + $0x138] sm:$0xff] }
 0x21b   :  { %6252 = vmatmul.mubr.f32.gmra.mrb[148].mxu1 %v1968_v4  ;;  %v1326_v40 = vpop.f32.mrb[103].mxu0  ;;  %v10917_v4 = vld [vmem:[#allocation10_spill] sm:$0xff] }
 0x21c   :  { %6286 = vmatprep.mubr.msk.f32.mxu1 %vm8059_vm0, %v10830_v58  ;;  %v2255_v40 = vmax.f32 %v10917_v4, %v8652_v16 }
 0x21e   :  { %v9069_v60 = vpop.f32.mrb[104].mxu0 }
 0x21f   :  { %6287 = vmatmul.mubr.f32.vlgmr.msra.gmra.mrb[100].mxu1 %v2254_v45  ;;  %v1331_v62 = vpop.f32.mrb[105].mxu0  ;;  %v10918_v45 = vld [vmem:[#allocation11_spill] sm:$0xff] }
 0x220   :  { %7327 = vmatpush3.bf16.msra.mxu1 %v7326_v49  ;;  %6289 = vmatprep.mubr.msk.f32.mxu1 %vm8059_vm0, %v10830_v58  ;;  %v7332_v49 = vpack.c.bf16 %v2565_v3, %v2564_v27  ;;  %v2256_v62 = vmax.f32 %v10918_v45, %v8673_v18  ;;  %v2568_v27 = vld [vmem:[#allocation6 + $0x140] sm:$0xff]  ;;  %v2569_v3 = vld [vmem:[#allocation6 + $0x148] sm:$0xff] }
 0x221   :  { %7328 = vmatprep.subr.bf16.mxu1 %v10832_v13 }
 0x222   :  { %v9076_v52 = vpop.f32.mrb[106].mxu0 }
 0x223   :  { %6290 = vmatmul.mubr.f32.gmra.mrb[102].mxu1 %v2255_v40  ;;  %v1336_v53 = vpop.f32.mrb[107].mxu0  ;;  %v7335_v40 = vpack.c.bf16 %v2567_v41, %v2566_v36  ;;  %v2570_v36 = vld [vmem:[#allocation6 + $0x150] sm:$0xff]  ;;  %v2571_v41 = vld [vmem:[#allocation6 + $0x158] sm:$0xff] }
 0x224   :  { %6292 = vmatprep.mubr.msk.f32.mxu1 %vm8059_vm0, %v10830_v58  ;;  %7330 = vmatpush3.bf16.msra.mxu1 %v7329_v38  ;;  %v10919_v53 = vld [vmem:[#allocation12_spill] sm:$0xff] }
 0x225   :  { %7331 = vmatprep.subr.bf16.mxu1 %v10832_v13  ;;  %v2257_v38 = vmax.f32 %v10919_v53, %v8692_v25 }
 0x226   :  { %v9083_v4 = vpop.f32.mrb[108].mxu0 }
 0x227   :  { %6293 = vmatmul.mubr.f32.gmra.mrb[104].mxu1 %v2256_v62  ;;  %v1341_v30 = vpop.f32.mrb[109].mxu0  ;;  %v10920_v62 = vld [vmem:[#allocation13_spill] sm:$0xff] }
 0x228   :  { %6295 = vmatprep.mubr.msk.f32.mxu1 %vm8059_vm0, %v10830_v58  ;;  %7333 = vmatpush3.bf16.msra.mxu1 %v7332_v49  ;;  %v7338_v30 = vpack.c.bf16 %v2569_v3, %v2568_v27  ;;  %v2258_v49 = vmax.f32 %v10920_v62, %v8710_v55  ;;  %v2572_v27 = vld [vmem:[#allocation6 + $0x160] sm:$0xff]  ;;  %v2573_v3 = vld [vmem:[#allocation6 + $0x168] sm:$0xff] }
 0x229   :  { %7334 = vmatprep.subr.bf16.mxu1 %v10832_v13 }
 0x22a   :  { %v9090_v45 = vpop.f32.mrb[110].mxu0 }
 0x22b   :  { %6296 = vmatmul.mubr.f32.gmra.mrb[106].mxu1 %v2257_v38  ;;  %v1346_v32 = vpop.f32.mrb[111].mxu0  ;;  %v10921_v38 = vld [vmem:[#allocation14_spill] sm:$0xff] }
 0x22c   :  { %6298 = vmatprep.mubr.msk.f32.mxu1 %vm8059_vm0, %v10830_v58  ;;  %7336 = vmatpush3.bf16.msra.mxu1 %v7335_v40  ;;  %v7341_v32 = vpack.c.bf16 %v2571_v41, %v2570_v36  ;;  %v2259_v40 = vmax.f32 %v10921_v38, %v8728_v29  ;;  %v2574_v36 = vld [vmem:[#allocation6 + $0x170] sm:$0xff]  ;;  %v2575_v41 = vld [vmem:[#allocation6 + $0x178] sm:$0xff] }
 0x22d   :  { %7337 = vmatprep.subr.bf16.mxu1 %v10832_v13 }
 0x22e   :  { %v9097_v53 = vpop.f32.mrb[112].mxu0 }
 0x22f   :  { %6299 = vmatmul.mubr.f32.gmra.mrb[108].mxu1 %v2258_v49  ;;  %v1351_v11 = vpop.f32.mrb[113].mxu0  ;;  %v10922_v49 = vld [vmem:[#allocation15_spill] sm:$0xff] }
 0x230   :  { %6301 = vmatprep.mubr.msk.f32.mxu1 %vm8059_vm0, %v10830_v58  ;;  %7339 = vmatpush3.bf16.msra.mxu1 %v7338_v30  ;;  %v7344_v11 = vpack.c.bf16 %v2573_v3, %v2572_v27  ;;  %v2260_v30 = vmax.f32 %v10922_v49, %v8746_v20 }
 0x231   :  { %7340 = vmatprep.subr.bf16.mxu1 %v10832_v13 }
 0x232   :  { %v9104_v62 = vpop.f32.mrb[114].mxu0 }
 0x233   :  { %6302 = vmatmul.mubr.f32.gmra.mrb[110].mxu1 %v2259_v40  ;;  %v1356_v55 = vpop.f32.mrb[115].mxu0  ;;  %v10923_v40 = vld [vmem:[#allocation16_spill] sm:$0xff] }
 0x234   :  { %6304 = vmatprep.mubr.msk.f32.mxu1 %vm8059_vm0, %v10830_v58  ;;  %7342 = vmatpush3.bf16.msra.mxu1 %v7341_v32  ;;  %v7347_v55 = vpack.c.bf16 %v2575_v41, %v2574_v36  ;;  %v2261_v32 = vmax.f32 %v10923_v40, %v8764_v56  ;;  %v10925_v36 = vld [vmem:[#allocation18_spill] sm:$0xff] }
 0x235   :  { %7343 = vmatprep.subr.bf16.mxu1 %v10832_v13  ;;  %v2263_v41 = vmax.f32 %v10925_v36, %v8800_v63 }
 0x236   :  { %v9111_v38 = vpop.f32.mrb[116].mxu0 }
 0x237   :  { %6305 = vmatmul.mubr.f32.gmra.mrb[112].mxu1 %v2260_v30  ;;  %v1361_v29 = vpop.f32.mrb[117].mxu0 }
 0x238   :  { %6307 = vmatprep.mubr.msk.f32.mxu1 %vm8059_vm0, %v10830_v58  ;;  %7345 = vmatpush3.bf16.msra.mxu1 %v7344_v11  ;;  %v10924_v29 = vld [vmem:[#allocation17_spill] sm:$0xff] }
 0x239   :  { %7346 = vmatprep.subr.bf16.mxu1 %v10832_v13  ;;  %v2262_v49 = vmax.f32 %v10924_v29, %v8782_v59 }
 0x23a   :  { %v9118_v27 = vpop.f32.mrb[118].mxu0 }
 0x23b   :  { %6308 = vmatmul.mubr.f32.gmra.mrb[114].mxu1 %v2261_v32  ;;  %v1366_v3 = vpop.f32.mrb[119].mxu0 }
 0x23c   :  { %6310 = vmatprep.mubr.msk.f32.mxu1 %vm8059_vm0, %v10830_v58  ;;  %7348 = vmatpush3.bf16.msra.mxu1 %v7347_v55  ;;  %v10926_v55 = vld [vmem:[#allocation19_spill] sm:$0xff] }
 0x23d   :  { %7349 = vmatprep.subr.bf16.mxu1 %v10832_v13  ;;  %v2264_v3 = vmax.f32 %v10926_v55, %v8817_v34 }
 0x23e   :  { %v9125_v11 = vpop.f32.mrb[120].mxu0 }
 0x23f   :  { %6311 = vmatmul.mubr.f32.gmra.mrb[116].mxu1 %v2262_v49  ;;  %v1371_v30 = vpop.f32.mrb[121].mxu0 }
 0x240   :  { %6313 = vmatprep.mubr.msk.f32.mxu1 %vm8059_vm0, %v10830_v58  ;;  %v10927_v30 = vld [vmem:[#allocation20_spill] sm:$0xff] }
 0x241   :  { %v2265_v36 = vmax.f32 %v10927_v30, %v8834_v14 }
 0x242   :  { %v9131_v40 = vpop.f32.mrb[122].mxu0 }
 0x243   :  { %6314 = vmatmul.mubr.f32.gmra.mrb[118].mxu1 %v2263_v41  ;;  %v1376_v32 = vpop.f32.mrb[123].mxu0 }
 0x244   :  { %6316 = vmatprep.mubr.msk.f32.mxu1 %vm8059_vm0, %v10830_v58  ;;  %v10928_v32 = vld [vmem:[#allocation21_spill] sm:$0xff] }
 0x245   :  { %v2266_v55 = vmax.f32 %v10928_v32, %v8851_v17 }
 0x246   :  { %v9137_v29 = vpop.f32.mrb[124].mxu0 }
 0x247   :  { %6317 = vmatmul.mubr.f32.gmra.mrb[120].mxu1 %v2264_v3  ;;  %v1381_v49 = vpop.f32.mrb[125].mxu0 }
 0x248   :  { %6319 = vmatprep.mubr.msk.f32.mxu1 %vm8059_vm0, %v10830_v58  ;;  %v10929_v49 = vld [vmem:[#allocation22_spill] sm:$0xff] }
 0x249   :  { %v2267_v30 = vmax.f32 %v10929_v49, %v8868_v21 }
 0x24a   :  { %v9143_v63 = vpop.f32.mrb[126].mxu0 }
 0x24b   :  { %6320 = vmatmul.mubr.f32.gmra.mrb[122].mxu1 %v2265_v36  ;;  %v1386_v41 = vpop.f32.mrb[127].mxu0 }
 0x24c   :  { %6322 = vmatprep.mubr.msk.f32.mxu1 %vm8059_vm0, %v10830_v58  ;;  %v10930_v41 = vld [vmem:[#allocation23_spill] sm:$0xff] }
 0x24d   :  { %v2268_v32 = vmax.f32 %v10930_v41, %v8885_v51 }
 0x24e   :  { %v9149_v34 = vpop.f32.mrb[128].mxu0 }
 0x24f   :  { %6323 = vmatmul.mubr.f32.gmra.mrb[124].mxu1 %v2266_v55  ;;  %v1391_v3 = vpop.f32.mrb[129].mxu0 }
 0x250   :  { %6325 = vmatprep.mubr.msk.f32.mxu1 %vm8059_vm0, %v10830_v58  ;;  %v10931_v3 = vld [vmem:[#allocation24_spill] sm:$0xff] }
 0x251   :  { %v2269_v49 = vmax.f32 %v10931_v3, %v8902_v5 }
 0x252   :  { %v9155_v14 = vpop.f32.mrb[130].mxu0 }
 0x253   :  { %6326 = vmatmul.mubr.f32.gmra.mrb[126].mxu1 %v2267_v30  ;;  %v1396_v36 = vpop.f32.mrb[131].mxu0 }
 0x254   :  { %6328 = vmatprep.mubr.msk.f32.mxu1 %vm8059_vm0, %v10830_v58  ;;  %v10932_v36 = vld [vmem:[#allocation25_spill] sm:$0xff] }
 0x255   :  { %v2270_v41 = vmax.f32 %v10932_v36, %v8919_v1 }
 0x256   :  { %v9161_v17 = vpop.f32.mrb[132].mxu0 }
 0x257   :  { %6329 = vmatmul.mubr.f32.gmra.mrb[128].mxu1 %v2268_v32  ;;  %v1401_v55 = vpop.f32.mrb[133].mxu0 }
 0x258   :  { %6331 = vmatprep.mubr.msk.f32.mxu1 %vm8059_vm0, %v10830_v58  ;;  %v10933_v55 = vld [vmem:[#allocation26_spill] sm:$0xff] }
 0x259   :  { %v2271_v3 = vmax.f32 %v10933_v55, %v8936_v12 }
 0x25a   :  { %v9167_v21 = vpop.f32.mrb[134].mxu0 }
 0x25b   :  { %6332 = vmatmul.mubr.f32.gmra.mrb[130].mxu1 %v2269_v49  ;;  %v1406_v30 = vpop.f32.mrb[135].mxu0 }
 0x25c   :  { %6334 = vmatprep.mubr.msk.f32.mxu1 %vm8059_vm0, %v10830_v58  ;;  %v10934_v30 = vld [vmem:[#allocation28_spill] sm:$0xff] }
 0x25d   :  { %v2272_v36 = vmax.f32 %v10934_v30, %v8953_v24 }
 0x25e   :  { %v9173_v51 = vpop.f32.mrb[136].mxu0 }
 0x25f   :  { %6335 = vmatmul.mubr.f32.gmra.mrb[132].mxu1 %v2270_v41  ;;  %v1411_v32 = vpop.f32.mrb[137].mxu0 }
 0x260   :  { %6337 = vmatprep.mubr.msk.f32.mxu1 %vm8059_vm0, %v10830_v58  ;;  %v10935_v32 = vld [vmem:[#allocation31_spill] sm:$0xff] }
 0x261   :  { %v2273_v55 = vmax.f32 %v10935_v32, %v8970_v2 }
 0x262   :  { %v9179_v5 = vpop.f32.mrb[138].mxu0 }
 0x263   :  { %6338 = vmatmul.mubr.f32.gmra.mrb[134].mxu1 %v2271_v3  ;;  %v1416_v49 = vpop.f32.mrb[139].mxu0 }
 0x264   :  { %6340 = vmatprep.mubr.msk.f32.mxu1 %vm8059_vm0, %v10830_v58  ;;  %v10936_v49 = vld [vmem:[#allocation34_spill] sm:$0xff] }
 0x265   :  { %v2274_v30 = vmax.f32 %v10936_v49, %v8987_v39 }
 0x266   :  { %v9185_v1 = vpop.f32.mrb[140].mxu0 }
 0x267   :  { %6341 = vmatmul.mubr.f32.gmra.mrb[136].mxu1 %v2272_v36  ;;  %v1421_v41 = vpop.f32.mrb[141].mxu0 }
 0x268   :  { %6343 = vmatprep.mubr.msk.f32.mxu1 %vm8059_vm0, %v10830_v58  ;;  %v10938_v41 = vld [vmem:[#allocation37_spill] sm:$0xff] }
 0x269   :  { %v2275_v32 = vmax.f32 %v10938_v41, %v9004_v15  ;;  %v10942_v41 = vld [vmem:[#allocation43_spill] sm:$0xff] }
 0x26a   :  { %v9191_v12 = vpop.f32.mrb[142].mxu0  ;;  %v2277_v15 = vmax.f32 %v10942_v41, %v9035_v48  ;;  %v10945_v48 = vld [vmem:[#allocation50_spill] sm:$0xff] }
 0x26b   :  { %6344 = vmatmul.mubr.f32.gmra.mrb[138].mxu1 %v2273_v55  ;;  %v1426_v3 = vpop.f32.mrb[143].mxu0 }
 0x26c   :  { %6346 = vmatprep.mubr.msk.f32.mxu1 %vm8059_vm0, %v10830_v58  ;;  %v10940_v3 = vld [vmem:[#allocation40_spill] sm:$0xff] }
 0x26d   :  { %v2276_v49 = vmax.f32 %v10940_v3, %v9019_v10  ;;  %v3128_v10 = vld [vmem:[#allocation6 + $0x238] sm:$0xff] }
 0x26e   :  { %v9197_v24 = vpop.f32.mrb[144].mxu0 }
 0x26f   :  { %10937 = vst [vmem:[#allocation49_spill] sm:$0xff] %v9197_v24  ;;  %6347 = vmatmul.mubr.f32.gmra.mrb[140].mxu1 %v2274_v30  ;;  %v1431_v36 = vpop.f32.mrb[145].mxu0  ;;  %v3127_v24 = vld [vmem:[#allocation6 + $0x230] sm:$0xff] }
 0x270   :  { %6349 = vmatprep.mubr.msk.f32.mxu1 %vm8059_vm0, %v10830_v58  ;;  %v3126_v36 = vld [vmem:[#allocation6 + $0x228] sm:$0xff] }
 0x272   :  { %v9203_v2 = vpop.f32.mrb[146].mxu0 }
 0x273   :  { %10939 = vst [vmem:[#allocation9_spill] sm:$0xff] %v9203_v2  ;;  %6350 = vmatmul.mubr.f32.gmra.mrb[142].mxu1 %v2275_v32  ;;  %v1436_v55 = vpop.f32.mrb[147].mxu0  ;;  %v7374_v32 = vpack.c.bf16 %v3127_v24, %v3126_v36  ;;  %v2844_v36 = vld [vmem:[#allocation6 + $0x198] sm:$0xff] }
 0x274   :  { %6352 = vmatprep.mubr.msk.f32.mxu1 %vm8059_vm0, %v10830_v58  ;;  %v10943_v55 = vld [vmem:[#allocation46_spill] sm:$0xff] }
 0x275   :  { %7375 = vmatpush1.bf16.msra.mxu0 %v7374_v32  ;;  %v2278_v3 = vmax.f32 %v10943_v55, %v9052_v37  ;;  %v10944_v32 = vld [vmem:[#allocation48_spill] sm:$0xff]  ;;  %v2846_v37 = vld [vmem:[#allocation6 + $0x1a8] sm:$0xff] }
 0x276   :  { %v9209_v39 = vpop.f32.mrb[148].mxu0  ;;  %7376 = vmatprep.subr.bf16.mxu0 %v10832_v13  ;;  %v10946_v2 = vmax.f32 %v10944_v32, %v10945_v48  ;;  %v3133_v32 = vld [vmem:[#allocation6 + $0x260] sm:$0xff] }
 0x277   :  { %10941 = vst [vmem:[#allocation10_spill] sm:$0xff] %v9209_v39  ;;  %6353 = vmatmul.mubr.f32.gmra.mrb[144].mxu1 %v2276_v49  ;;  %v1441_v30 = vpop.f32.mrb[149].mxu0  ;;  %v2841_v49 = vld [vmem:[#allocation6 + $0x180] sm:$0xff] }
 0x278   :  { %6355 = vmatprep.mubr.msk.f32.mxu1 %vm8059_vm0, %v10830_v58  ;;  %v2842_v30 = vld [vmem:[#allocation6 + $0x188] sm:$0xff]  ;;  %v3129_v39 = vld [vmem:[#allocation6 + $0x240] sm:$0xff] }
 0x279   :  { %v7350_v41 = vpack.c.bf16 %v2842_v30, %v2841_v49  ;;  %v7377_v24 = vpack.c.bf16 %v3129_v39, %v3128_v10  ;;  %v10947_v39 = vld [vmem:[#allocation52_spill] sm:$0xff]  ;;  %v3130_v49 = vld [vmem:[#allocation6 + $0x248] sm:$0xff]  ;;  %v3131_v30 = vld [vmem:[#allocation6 + $0x250] sm:$0xff] }
 0x27a   :  { %v10948_v10 = vmax.f32 %v8647_v57, %v10947_v39  ;;  %v7380_v48 = vpack.c.bf16 %v3131_v30, %v3130_v49  ;;  %v3132_v57 = vld [vmem:[#allocation6 + $0x258] sm:$0xff]  ;;  %v2850_v39 = vld [vmem:[#allocation6 + $0x1c8] sm:$0xff]  ;;  %v2851_v30 = vld [vmem:[#allocation6 + $0x1d0] sm:$0xff] }
 0x27b   :  { %6356 = vmatmul.mubr.f32.gmra.mrb[146].mxu1 %v2277_v15  ;;  %v2843_v15 = vld [vmem:[#allocation6 + $0x190] sm:$0xff]  ;;  %7378 = vmatpush1.bf16.msra.mxu0 %v7377_v24  ;;  %v2848_v24 = vld [vmem:[#allocation6 + $0x1b8] sm:$0xff] }
 0x27c   :  { %6358 = vmatprep.mubr.msk.f32.mxu1 %vm8059_vm0, %v10830_v58  ;;  %7379 = vmatprep.subr.bf16.mxu0 %v10832_v13  ;;  %v7353_v55 = vpack.c.bf16 %v2844_v36, %v2843_v15  ;;  %v10949_v15 = vld [vmem:[#allocation54_spill] sm:$0xff] }
 0x27d   :  { %v10950_v36 = vmax.f32 %v8665_v35, %v10949_v15  ;;  %v3135_v15 = vld [vmem:[#allocation6 + $0x270] sm:$0xff] }
 0x27f   :  { %6359 = vmatmul.mubr.f32.gmra.mrb[148].mxu1 %v2278_v3  ;;  %v2845_v3 = vld [vmem:[#allocation6 + $0x1a0] sm:$0xff]  ;;  %7381 = vmatpush1.bf16.msra.mxu0 %v7380_v48  ;;  %v10953_v48 = vld [vmem:[#allocation59_spill] sm:$0xff] }
 0x280   :  { %6393 = vmatprep.mubr.msk.f32.mxu1 %vm8059_vm0, %v10830_v58  ;;  %7382 = vmatprep.subr.bf16.mxu0 %v10832_v13 }
 0x283   :  { %6394 = vmatmul.mubr.f32.vlgmr.msra.gmra.mrb[100].mxu1 %v10946_v2  ;;  %v7356_v2 = vpack.c.bf16 %v2846_v37, %v2845_v3  ;;  %v7383_v37 = vpack.c.bf16 %v3133_v32, %v3132_v57  ;;  %v2849_v3 = vld [vmem:[#allocation6 + $0x1c0] sm:$0xff]  ;;  %v2854_v32 = vld [vmem:[#allocation6 + $0x1e8] sm:$0xff] }
 0x284   :  { %7351 = vmatpush3.bf16.msra.mxu1 %v7350_v41  ;;  %6396 = vmatprep.mubr.msk.f32.mxu1 %vm8059_vm0, %v10830_v58  ;;  %v2847_v41 = vld [vmem:[#allocation6 + $0x1b0] sm:$0xff]  ;;  %v7362_v35 = vpack.c.bf16 %v2850_v39, %v2849_v3  ;;  %v2853_v57 = vld [vmem:[#allocation6 + $0x1e0] sm:$0xff]  ;;  %v3136_v3 = vld [vmem:[#allocation6 + $0x278] sm:$0xff] }
 0x285   :  { %7352 = vmatprep.subr.bf16.mxu1 %v10832_v13  ;;  %7384 = vmatpush1.bf16.msra.mxu0 %v7383_v37  ;;  %v3137_v39 = vld [vmem:[#allocation6 + $0x280] sm:$0xff] }
 0x286   :  { %7385 = vmatprep.subr.bf16.mxu0 %v10832_v13 }
 0x287   :  { %6397 = vmatmul.mubr.f32.gmra.mrb[102].mxu1 %v10948_v10  ;;  %v10951_v10 = vld [vmem:[#allocation56_spill] sm:$0xff] }
 0x288   :  { %6399 = vmatprep.mubr.msk.f32.mxu1 %vm8059_vm0, %v10830_v58  ;;  %7354 = vmatpush3.bf16.msra.mxu1 %v7353_v55  ;;  %v7359_v55 = vpack.c.bf16 %v2848_v24, %v2847_v41  ;;  %v10952_v49 = vmax.f32 %v8686_v19, %v10951_v10  ;;  %v10954_v41 = vmax.f32 %v8704_v26, %v10953_v48  ;;  %v3134_v24 = vld [vmem:[#allocation6 + $0x268] sm:$0xff]  ;;  %v2855_v10 = vld [vmem:[#allocation6 + $0x1f0] sm:$0xff] }
 0x289   :  { %7355 = vmatprep.subr.bf16.mxu1 %v10832_v13  ;;  %v7368_v26 = vpack.c.bf16 %v2854_v32, %v2853_v57  ;;  %v3138_v48 = vld [vmem:[#allocation6 + $0x288] sm:$0xff] }
 0x28a   :  { %v3142_v32 = vld [vmem:[#allocation6 + $0x2a8] sm:$0xff] }
 0x28b   :  { %6400 = vmatmul.mubr.f32.gmra.mrb[104].mxu1 %v10950_v36  ;;  %v7386_v36 = vpack.c.bf16 %v3135_v15, %v3134_v24 }
 0x28c   :  { %6402 = vmatprep.mubr.msk.f32.mxu1 %vm8059_vm0, %v10830_v58  ;;  %7357 = vmatpush3.bf16.msra.mxu1 %v7356_v2  ;;  %v2852_v2 = vld [vmem:[#allocation6 + $0x1d8] sm:$0xff] }
 0x28d   :  { %7358 = vmatprep.subr.bf16.mxu1 %v10832_v13  ;;  %v7365_v19 = vpack.c.bf16 %v2852_v2, %v2851_v30  ;;  %7387 = vmatpush1.bf16.msra.mxu0 %v7386_v36  ;;  %v10957_v30 = vmax.f32 %v8740_v9, %v8749_v28  ;;  %v10958_v2 = vmax.f32 %v8758_v43, %v8767_v33  ;;  %v10959_v28 = vld [vmem:[#allocation66_spill] sm:$0xff]  ;;  %v3140_v43 = vld [vmem:[#allocation6 + $0x298] sm:$0xff]  ;;  %v3141_v33 = vld [vmem:[#allocation6 + $0x2a0] sm:$0xff] }
 0x28e   :  { %7388 = vmatprep.subr.bf16.mxu0 %v10832_v13  ;;  %v10960_v24 = vmax.f32 %v8775_v54, %v10959_v28  ;;  %v7395_v15 = vpack.c.bf16 %v3141_v33, %v3140_v43  ;;  %v10963_v54 = vld [vmem:[#allocation72_spill] sm:$0xff] }
 0x28f   :  { %6403 = vmatmul.mubr.f32.gmra.mrb[106].mxu1 %v10952_v49  ;;  %v2856_v49 = vld [vmem:[#allocation6 + $0x1f8] sm:$0xff]  ;;  %v10964_v57 = vmax.f32 %v8810_v42, %v10963_v54  ;;  %v10975_v43 = vld [vmem:[#allocation88_spill] sm:$0xff] }
 0x290   :  { %6405 = vmatprep.mubr.msk.f32.mxu1 %vm8059_vm0, %v10830_v58  ;;  %7360 = vmatpush3.bf16.msra.mxu1 %v7359_v55  ;;  %v10955_v55 = vld [vmem:[#allocation62_spill] sm:$0xff]  ;;  %v3148_v54 = vld [vmem:[#allocation6 + $0x2d8] sm:$0xff] }
 0x291   :  { %7361 = vmatprep.subr.bf16.mxu1 %v10832_v13  ;;  %v10956_v37 = vmax.f32 %v8722_v6, %v10955_v55  ;;  %v7371_v6 = vpack.c.bf16 %v2856_v49, %v2855_v10  ;;  %v3143_v55 = vld [vmem:[#allocation6 + $0x2b0] sm:$0xff]  ;;  %v10969_v10 = vld [vmem:[#allocation80_spill] sm:$0xff]  ;;  %v3144_v49 = vld [vmem:[#allocation6 + $0x2b8] sm:$0xff] }
 0x293   :  { %6406 = vmatmul.mubr.f32.gmra.mrb[108].mxu1 %v10954_v41  ;;  %v3139_v41 = vld [vmem:[#allocation6 + $0x290] sm:$0xff] }
 0x294   :  { %6408 = vmatprep.mubr.msk.f32.mxu1 %vm8059_vm0, %v10830_v58  ;;  %7363 = vmatpush3.bf16.msra.mxu1 %v7362_v35  ;;  %v7389_v35 = vpack.c.bf16 %v3137_v39, %v3136_v3  ;;  %v7392_v9 = vpack.c.bf16 %v3139_v41, %v3138_v48  ;;  %v10968_v39 = vld [vmem:[#allocation78_spill] sm:$0xff]  ;;  %v3146_v41 = vld [vmem:[#allocation6 + $0x2c8] sm:$0xff] }
 0x295   :  { %7364 = vmatprep.subr.bf16.mxu1 %v10832_v13  ;;  %v10970_v42 = vmax.f32 %v10968_v39, %v10969_v10  ;;  %v10983_v10 = vld [vmem:[#allocation97_spill] sm:$0xff] }
 0x296   :  { %7390 = vmatpush1.bf16.msra.mxu0 %v7389_v35  ;;  %v3145_v35 = vld [vmem:[#allocation6 + $0x2c0] sm:$0xff] }
 0x297   :  { %6409 = vmatmul.mubr.f32.gmra.mrb[110].mxu1 %v10956_v37  ;;  %7391 = vmatprep.subr.bf16.mxu0 %v10832_v13  ;;  %v7398_v37 = vpack.c.bf16 %v3143_v55, %v3142_v32  ;;  %v10980_v55 = vld [vmem:[#allocation94_spill] sm:$0xff] }
 0x298   :  { %6411 = vmatprep.mubr.msk.f32.mxu1 %vm8059_vm0, %v10830_v58  ;;  %7366 = vmatpush3.bf16.msra.mxu1 %v7365_v19  ;;  %v10961_v19 = vld [vmem:[#allocation69_spill] sm:$0xff] }
 0x299   :  { %7367 = vmatprep.subr.bf16.mxu1 %v10832_v13  ;;  %v10962_v36 = vmax.f32 %v8793_v0, %v10961_v19  ;;  %v10966_v0 = vld [vmem:[#allocation76_spill] sm:$0xff] }
 0x29a   :  { %7393 = vmatpush1.bf16.msra.mxu0 %v7392_v9  ;;  %v3147_v9 = vld [vmem:[#allocation6 + $0x2d0] sm:$0xff]  ;;  %v10978_v19 = vld [vmem:[#allocation92_spill] sm:$0xff] }
 0x29b   :  { %6412 = vmatmul.mubr.f32.gmra.mrb[112].mxu1 %v10957_v30  ;;  %7394 = vmatprep.subr.bf16.mxu0 %v10832_v13  ;;  %v7401_v30 = vpack.c.bf16 %v3145_v35, %v3144_v49  ;;  %v7404_v28 = vpack.c.bf16 %v3147_v9, %v3146_v41  ;;  %v3152_v35 = vld [vmem:[#allocation6 + $0x2f8] sm:$0xff]  ;;  %v10986_v41 = vld [vmem:[#allocation32_spill] sm:$0xff]  ;;  %v10987_v9 = vld [vmem:[#allocation101_spill] sm:$0xff] }
 0x29c   :  { %6414 = vmatprep.mubr.msk.f32.mxu1 %vm8059_vm0, %v10830_v58  ;;  %7369 = vmatpush3.bf16.msra.mxu1 %v7368_v26  ;;  %v10965_v26 = vld [vmem:[#allocation74_spill] sm:$0xff] }
 0x29d   :  { %7370 = vmatprep.subr.bf16.mxu1 %v10832_v13  ;;  %v10967_v3 = vmax.f32 %v10965_v26, %v10966_v0  ;;  %v3150_v0 = vld [vmem:[#allocation6 + $0x2e8] sm:$0xff] }
 0x29e   :  { %7396 = vmatpush1.bf16.msra.mxu0 %v7395_v15  ;;  %v10977_v15 = vld [vmem:[#allocation90_spill] sm:$0xff] }
 0x29f   :  { %6415 = vmatmul.mubr.f32.gmra.mrb[114].mxu1 %v10958_v2  ;;  %7397 = vmatprep.subr.bf16.mxu0 %v10832_v13  ;;  %v10972_v2 = vld [vmem:[#allocation84_spill] sm:$0xff] }
 0x2a0   :  { %6417 = vmatprep.mubr.msk.f32.mxu1 %vm8059_vm0, %v10830_v58  ;;  %7372 = vmatpush3.bf16.msra.mxu1 %v7371_v6  ;;  %v10971_v6 = vld [vmem:[#allocation82_spill] sm:$0xff] }
 0x2a1   :  { %7497 = vmatprep.subr.bf16.mxu1 %v10832_v13  ;;  %v10973_v48 = vmax.f32 %v10971_v6, %v10972_v2  ;;  %v3154_v2 = vld [vmem:[#allocation6 + $0x308] sm:$0xff] }
 0x2a2   :  { %7399 = vmatpush1.bf16.msra.mxu0 %v7398_v37  ;;  %v10981_v37 = vld [vmem:[#allocation96_spill] sm:$0xff] }
 0x2a3   :  { %6418 = vmatmul.mubr.f32.gmra.mrb[116].mxu1 %v10960_v24  ;;  %7400 = vmatprep.subr.bf16.mxu0 %v10832_v13  ;;  %v10974_v24 = vld [vmem:[#allocation86_spill] sm:$0xff]  ;;  %v10982_v26 = vmax.f32 %v10980_v55, %v10981_v37  ;;  %v10993_v37 = vld [vmem:[#allocation105_spill] sm:$0xff] }
 0x2a4   :  { %6420 = vmatprep.mubr.msk.f32.mxu1 %vm8059_vm0, %v10830_v58  ;;  %v10976_v33 = vmax.f32 %v10974_v24, %v10975_v43  ;;  %v3156_v43 = vld [vmem:[#allocation6 + $0x318] sm:$0xff]  ;;  %v10992_v55 = vld [vmem:[#allocation38_spill] sm:$0xff] }
 0x2a6   :  { %7402 = vmatpush1.bf16.msra.mxu0 %v7401_v30  ;;  %v3153_v30 = vld [vmem:[#allocation6 + $0x300] sm:$0xff] }
 0x2a7   :  { %6421 = vmatmul.mubr.f32.gmra.mrb[118].mxu1 %v10962_v36  ;;  %7403 = vmatprep.subr.bf16.mxu0 %v10832_v13  ;;  %v10979_v36 = vmax.f32 %v10977_v15, %v10978_v19  ;;  %v7413_v6 = vpack.c.bf16 %v3153_v30, %v3152_v35  ;;  %v10989_v15 = vld [vmem:[#allocation35_spill] sm:$0xff]  ;;  %v9363_v35 = vld [vmem:[#allocation2 + $0x10] sm:$0xff] }
 0x2a8   :  { %6423 = vmatprep.mubr.msk.f32.mxu1 %vm8059_vm0, %v10830_v58  ;;  %v10990_v19 = vld [vmem:[#allocation103_spill] sm:$0xff] }
 0x2a9   :  { %v9369_v30 = vld [vmem:[#allocation2 + $0x28] sm:$0xff] }
 0x2aa   :  { %7405 = vmatpush1.bf16.msra.mxu0 %v7404_v28  ;;  %v10988_v28 = vmax.f32 %v10986_v41, %v10987_v9  ;;  %v10998_v41 = vmax.f32 %v9028_v31, %v9040_v8  ;;  %v11000_v31 = vmax.f32 %v9046_v61, %v9057_v47  ;;  %v9396_v8 = vld [vmem:[#allocation2 + $0x48] sm:$0xff]  ;;  %v9405_v61 = vld [vmem:[#allocation2 + $0x40] sm:$0xff]  ;;  %v9408_v47 = vld [vmem:[#allocation2 + $0x58] sm:$0xff] }
 0x2ab   :  { %6424 = vmatmul.mubr.f32.gmra.mrb[120].mxu1 %v10964_v57  ;;  %7406 = vmatprep.subr.bf16.mxu0 %v10832_v13  ;;  %v3149_v57 = vld [vmem:[#allocation6 + $0x2e0] sm:$0xff] }
 0x2ac   :  { %6426 = vmatprep.mubr.msk.f32.mxu1 %vm8059_vm0, %v10830_v58  ;;  %v7407_v32 = vpack.c.bf16 %v3149_v57, %v3148_v54  ;;  %v3122_v57 = vld [vmem:[#allocation6 + $0x208] sm:$0xff] }
 0x2ae   :  { %7408 = vmatpush1.bf16.msra.mxu0 %v7407_v32  ;;  %v3123_v32 = vld [vmem:[#allocation6 + $0x210] sm:$0xff] }
 0x2af   :  { %6427 = vmatmul.mubr.f32.gmra.mrb[122].mxu1 %v10967_v3  ;;  %7409 = vmatprep.subr.bf16.mxu0 %v10832_v13  ;;  %v3151_v3 = vld [vmem:[#allocation6 + $0x2f0] sm:$0xff] }
 0x2b0   :  { %6429 = vmatprep.mubr.msk.f32.mxu1 %vm8059_vm0, %v10830_v58  ;;  %v7410_v39 = vpack.c.bf16 %v3151_v3, %v3150_v0  ;;  %v7422_v0 = vpack.c.bf16 %v3123_v32, %v3122_v57  ;;  %v9350_v3 = vld [vmem:[#allocation2] sm:$0xff]  ;;  %v1478_v57 = vmul.f32 0.2, %v9076_v52  ;;  %v4414_v32 = vld [vmem:[#allocation6 + $0x4c8] sm:$0xff] }
 0x2b2   :  { %7411 = vmatpush1.bf16.msra.mxu0 %v7410_v39  ;;  %v10995_v39 = vld [vmem:[#allocation106_spill] sm:$0xff] }
 0x2b3   :  { %6430 = vmatmul.mubr.f32.gmra.mrb[124].mxu1 %v10970_v42  ;;  %v10984_v42 = vld [vmem:[#allocation99_spill] sm:$0xff]  ;;  %7412 = vmatprep.subr.bf16.mxu0 %v10832_v13 }
 0x2b4   :  { %6432 = vmatprep.mubr.msk.f32.mxu1 %vm8059_vm0, %v10830_v58  ;;  %v10985_v49 = vmax.f32 %v10983_v10, %v10984_v42  ;;  %v10996_v10 = vmax.f32 %v8997_v44, %v10995_v39  ;;  %v9358_v42 = vld [vmem:[#allocation2 + $0x18] sm:$0xff]  ;;  %v10997_v44 = vmax.f32 %v9012_v23, %v9024_v22  ;;  %v10999_v22 = vld [vmem:[#allocation47_spill] sm:$0xff] }
 0x2b5   :  { %v9382_v23 = vld [vmem:[#allocation2 + $0x38] sm:$0xff] }
 0x2b6   :  { %7414 = vmatpush1.bf16.msra.mxu0 %v7413_v6 }
 0x2b7   :  { %6433 = vmatmul.mubr.f32.gmra.mrb[126].mxu1 %v10973_v48  ;;  %v3155_v48 = vld [vmem:[#allocation6 + $0x310] sm:$0xff]  ;;  %7415 = vmatprep.subr.bf16.mxu0 %v10832_v13 }
 0x2b8   :  { %6435 = vmatprep.mubr.msk.f32.mxu1 %vm8059_vm0, %v10830_v58  ;;  %v7416_v24 = vpack.c.bf16 %v3155_v48, %v3154_v2  ;;  %v1460_v2 = vmul.f32 0.2, %v9061_v50  ;;  %v9376_v48 = vld [vmem:[#allocation2 + $0x20] sm:$0xff] }
 0x2ba   :  { %7417 = vmatpush1.bf16.msra.mxu0 %v7416_v24  ;;  %v4412_v24 = vld [vmem:[#allocation6 + $0x4b8] sm:$0xff] }
 0x2bb   :  { %6436 = vmatmul.mubr.f32.gmra.mrb[128].mxu1 %v10976_v33  ;;  %v3157_v33 = vld [vmem:[#allocation6 + $0x320] sm:$0xff]  ;;  %7418 = vmatprep.subr.bf16.mxu0 %v10832_v13 }
 0x2bc   :  { %6438 = vmatprep.mubr.msk.f32.mxu1 %vm8059_vm0, %v10830_v58  ;;  %v7419_v54 = vpack.c.bf16 %v3157_v33, %v3156_v43  ;;  %v4413_v43 = vld [vmem:[#allocation6 + $0x4c0] sm:$0xff] }
 0x2bd   :  { %v9390_v33 = vld [vmem:[#allocation2 + $0x30] sm:$0xff] }
 0x2be   :  { %7420 = vmatpush1.bf16.msra.mxu0 %v7419_v54 }
 0x2bf   :  { %6439 = vmatmul.mubr.f32.gmra.mrb[130].mxu1 %v10979_v36  ;;  %v10991_v36 = vmax.f32 %v10989_v15, %v10990_v19  ;;  %7421 = vmatprep.subr.bf16.mxu0 %v10832_v13  ;;  %v11001_v19 = vld [vmem:[#allocation51_spill] sm:$0xff] }
 0x2c0   :  { %6441 = vmatprep.mubr.msk.f32.mxu1 %vm8059_vm0, %v10830_v58 }
 0x2c1   :  { %3223 = vmatmul.mubr.f32.vlgmr.msra.gmra.mrb[150].mxu0 %v9350_v3 }
 0x2c2   :  { %7423 = vmatpush3.bf16.msra.mxu0 %v7422_v0  ;;  %3227 = vmatprep.mubr.f32.mxu0 %v9358_v42  ;;  %v1487_v0 = vmul.f32 0.2, %v9083_v4 }
 0x2c3   :  { %6442 = vmatmul.mubr.f32.gmra.mrb[132].mxu1 %v10982_v26  ;;  %v10994_v26 = vmax.f32 %v10992_v55, %v10993_v37  ;;  %7424 = vmatprep.subr.bf16.mxu0 %v10832_v13  ;;  %v4415_v55 = vld [vmem:[#allocation6 + $0x4d0] sm:$0xff]  ;;  %v11002_v37 = vld [vmem:[#allocation53_spill] sm:$0xff] }
 0x2c4   :  { %6444 = vmatprep.mubr.msk.f32.mxu1 %vm8059_vm0, %v10830_v58 }
 0x2c5   :  { %3228 = vmatmul.mubr.f32.gmra.mrb[152].mxu0 %v9363_v35 }
 0x2c6   :  { %3232 = vmatprep.mubr.f32.mxu0 %v9369_v30 }
 0x2c7   :  { %6445 = vmatmul.mubr.f32.gmra.mrb[134].mxu1 %v10985_v49  ;;  %v1451_v49 = vmul.f32 0.2, %v9044_v7 }
 0x2c8   :  { %6447 = vmatprep.mubr.msk.f32.mxu1 %vm8059_vm0, %v10830_v58 }
 0x2c9   :  { %v1676_v6 = vmax.f32 %v9044_v7, %v1451_v49  ;;  %3233 = vmatmul.mubr.f32.gmra.mrb[154].mxu0 %v9376_v48  ;;  %v1685_v7 = vmax.f32 %v9061_v50, %v1460_v2  ;;  %v7498_v50 = vpack.c.bf16 %v4413_v43, %v4412_v24  ;;  %v4417_v49 = vld [vmem:[#allocation6 + $0x4e0] sm:$0xff]  ;;  %v11003_v2 = vld [vmem:[#allocation55_spill] sm:$0xff]  ;;  %v9431_v24 = vld [vmem:[#allocation2 + $0x60] sm:$0xff] }
 0x2ca   :  { %3237 = vmatprep.mubr.f32.mxu0 %v9382_v23  ;;  %v9434_v43 = vld [vmem:[#allocation2 + $0x78] sm:$0xff] }
 0x2cb   :  { %6448 = vmatmul.mubr.f32.gmra.mrb[136].mxu1 %v10988_v28  ;;  %v2791_v9 = vmax.f32 %v10999_v22, %v1676_v6  ;;  %v1469_v28 = vmul.f32 0.2, %v9069_v60  ;;  %v9421_v6 = vld [vmem:[#allocation2 + $0x68] sm:$0xff]  ;;  %v1496_v22 = vmul.f32 0.2, %v9090_v45 }
 0x2cc   :  { %6450 = vmatprep.mubr.msk.f32.mxu1 %vm8059_vm0, %v10830_v58 }
 0x2cd   :  { %3238 = vmatmul.mubr.f32.gmra.mrb[156].mxu0 %v9390_v33  ;;  %v2816_v15 = vmax.f32 %v10915_v46, %v2791_v9  ;;  %v1694_v54 = vmax.f32 %v9069_v60, %v1469_v28  ;;  %v7501_v46 = vpack.c.bf16 %v4415_v55, %v4414_v32  ;;  %v4419_v28 = vld [vmem:[#allocation6 + $0x4f0] sm:$0xff]  ;;  %v9447_v32 = vld [vmem:[#allocation2 + $0x88] sm:$0xff] }
 0x2ce   :  { %3242 = vmatprep.mubr.f32.mxu0 %v9396_v8 }
 0x2cf   :  { %6451 = vmatmul.mubr.f32.gmra.mrb[138].mxu1 %v10991_v36  ;;  %v2792_v36 = vmax.f32 %v11001_v19, %v1685_v7  ;;  %v2793_v60 = vmax.f32 %v11002_v37, %v1694_v54  ;;  %v4418_v7 = vld [vmem:[#allocation6 + $0x4e8] sm:$0xff]  ;;  %v4421_v54 = vld [vmem:[#allocation6 + $0x500] sm:$0xff]  ;;  %v1514_v37 = vmul.f32 0.2, %v9104_v62 }
 0x2d0   :  { %6453 = vmatprep.mubr.msk.f32.mxu1 %vm8059_vm0, %v10830_v58 }
 0x2d1   :  { %3243 = vmatmul.mubr.f32.gmra.mrb[158].mxu0 %v9405_v61  ;;  %v2817_v39 = vmax.f32 %v8652_v16, %v2792_v36  ;;  %v2818_v9 = vmax.f32 %v8673_v18, %v2793_v60  ;;  %v7507_v18 = vpack.c.bf16 %v4419_v28, %v4418_v7  ;;  %v4420_v36 = vld [vmem:[#allocation6 + $0x4f8] sm:$0xff]  ;;  %v11006_v60 = vld [vmem:[#allocation58_spill] sm:$0xff]  ;;  %v4425_v28 = vld [vmem:[#allocation6 + $0x520] sm:$0xff] }
 0x2d2   :  { %3247 = vmatprep.mubr.f32.mxu0 %v9408_v47  ;;  %v4424_v7 = vld [vmem:[#allocation6 + $0x518] sm:$0xff] }
 0x2d3   :  { %6454 = vmatmul.mubr.f32.gmra.mrb[140].mxu1 %v10994_v26  ;;  %v1703_v26 = vmax.f32 %v9076_v52, %v1478_v57  ;;  %v9444_v57 = vld [vmem:[#allocation2 + $0x70] sm:$0xff] }
 0x2d4   :  { %6456 = vmatprep.mubr.msk.f32.mxu1 %vm8059_vm0, %v10830_v58 }
 0x2d5   :  { %v2794_v16 = vmax.f32 %v11003_v2, %v1703_v26 }
 0x2d7   :  { %6457 = vmatmul.mubr.f32.gmra.mrb[142].mxu1 %v10996_v10  ;;  %v4416_v10 = vld [vmem:[#allocation6 + $0x4d8] sm:$0xff]  ;;  %v2819_v19 = vmax.f32 %v8692_v25, %v2794_v16  ;;  %v7510_v25 = vpack.c.bf16 %v4421_v54, %v4420_v36  ;;  %v1739_v16 = vmax.f32 %v9104_v62, %v1514_v37  ;;  %v9483_v37 = vld [vmem:[#allocation2 + $0xa0] sm:$0xff] }
 0x2d8   :  { %6459 = vmatprep.mubr.msk.f32.mxu1 %vm8059_vm0, %v10830_v58  ;;  %v7504_v52 = vpack.c.bf16 %v4417_v49, %v4416_v10  ;;  %v9457_v10 = vld [vmem:[#allocation2 + $0x80] sm:$0xff]  ;;  %v11007_v49 = vld [vmem:[#allocation63_spill] sm:$0xff] }
 0x2db   :  { %6460 = vmatmul.mubr.f32.gmra.mrb[144].mxu1 %v10997_v44  ;;  %v9418_v44 = vld [vmem:[#allocation2 + $0x50] sm:$0xff] }
 0x2dc   :  { %6462 = vmatprep.mubr.msk.f32.mxu1 %vm8059_vm0, %v10830_v58  ;;  %3248 = vmatmul.mubr.f32.gmra.mrb[160].mxu0 %v9418_v44 }
 0x2dd   :  { %3252 = vmatprep.mubr.f32.mxu0 %v9421_v6 }
 0x2df   :  { %6463 = vmatmul.mubr.f32.gmra.mrb[146].mxu1 %v10998_v41  ;;  %v1712_v41 = vmax.f32 %v9083_v4, %v1487_v0  ;;  %v11004_v4 = vld [vmem:[#allocation57_spill] sm:$0xff] }
 0x2e0   :  { %6465 = vmatprep.mubr.msk.f32.mxu1 %vm8059_vm0, %v10830_v58  ;;  %3253 = vmatmul.mubr.f32.gmra.mrb[162].mxu0 %v9431_v24  ;;  %v4422_v0 = vld [vmem:[#allocation6 + $0x508] sm:$0xff] }
 0x2e1   :  { %3257 = vmatprep.mubr.f32.mxu0 %v9434_v43 }
 0x2e3   :  { %6466 = vmatmul.mubr.f32.gmra.mrb[148].mxu1 %v11000_v31  ;;  %v1505_v31 = vmul.f32 0.2, %v9097_v53 }
 0x2e4   :  { %6500 = vmatprep.mubr.msk.f32.mxu1 %vm8059_vm0, %v10830_v58  ;;  %3258 = vmatmul.mubr.f32.gmra.mrb[164].mxu0 %v9444_v57 }
 0x2e5   :  { %3262 = vmatprep.mubr.f32.mxu0 %v9447_v32  ;;  %v1730_v55 = vmax.f32 %v9097_v53, %v1505_v31  ;;  %v9460_v53 = vld [vmem:[#allocation2 + $0x98] sm:$0xff]  ;;  %v9470_v31 = vld [vmem:[#allocation2 + $0x90] sm:$0xff] }
 0x2e7   :  { %6501 = vmatmul.mubr.f32.vlgmr.msra.gmra.mrb[100].mxu1 %v2816_v15  ;;  %v1721_v15 = vmax.f32 %v9090_v45, %v1496_v22  ;;  %v11005_v45 = vld [vmem:[#allocation60_spill] sm:$0xff]  ;;  %v11008_v22 = vld [vmem:[#allocation61_spill] sm:$0xff] }
 0x2e8   :  { %6503 = vmatprep.mubr.msk.f32.mxu1 %vm8059_vm0, %v10830_v58  ;;  %7499 = vmatpush1.bf16.msra.mxu1 %v7498_v50  ;;  %v2795_v50 = vmax.f32 %v11004_v4, %v1712_v41  ;;  %v1523_v41 = vmul.f32 0.2, %v9111_v38  ;;  %v3124_v4 = vld [vmem:[#allocation6 + $0x218] sm:$0xff] }
 0x2e9   :  { %7500 = vmatprep.subr.bf16.mxu1 %v10832_v13  ;;  %3263 = vmatmul.mubr.f32.gmra.mrb[166].mxu0 %v9457_v10 }
 0x2ea   :  { %v2820_v26 = vmax.f32 %v11006_v60, %v2795_v50  ;;  %3267 = vmatprep.mubr.f32.mxu0 %v9460_v53  ;;  %v3125_v50 = vld [vmem:[#allocation6 + $0x220] sm:$0x3f]  ;;  %v1748_v54 = vmax.f32 %v9111_v38, %v1523_v41  ;;  %v11010_v60 = vld [vmem:[#allocation65_spill] sm:$0xff]  ;;  %v9501_v41 = vld [vmem:[#allocation2 + $0xc8] sm:$0xff] }
 0x2eb   :  { %6504 = vmatmul.mubr.f32.gmra.mrb[102].mxu1 %v2817_v39  ;;  %v4423_v39 = vld [vmem:[#allocation6 + $0x510] sm:$0xff] }
 0x2ec   :  { %6506 = vmatprep.mubr.msk.f32.mxu1 %vm8059_vm0, %v10830_v58  ;;  %7502 = vmatpush1.bf16.msra.mxu1 %v7501_v46  ;;  %v2796_v46 = vmax.f32 %v11005_v45, %v1721_v15  ;;  %v7513_v2 = vpack.c.bf16 %v4423_v39, %v4422_v0  ;;  %v7516_v15 = vpack.c.bf16 %v4425_v28, %v4424_v7  ;;  %v4427_v45 = vld [vmem:[#allocation6 + $0x530] sm:$0xff]  ;;  %v1541_v39 = vmul.f32 0.2, %v9125_v11 }
 0x2ed   :  { %7503 = vmatprep.subr.bf16.mxu1 %v10832_v13  ;;  %3268 = vmatmul.mubr.f32.gmra.mrb[168].mxu0 %v9470_v31  ;;  %v1550_v7 = vmul.f32 0.2, %v9131_v40 }
 0x2ef   :  { %6507 = vmatmul.mubr.f32.gmra.mrb[104].mxu1 %v2818_v9  ;;  %v2821_v9 = vmax.f32 %v11008_v22, %v2796_v46  ;;  %v7425_v46 = vpack.c.bf16 %v3125_v50, %v3124_v4  ;;  %v4430_v4 = vld [vmem:[#allocation6 + $0x548] sm:$0xff]  ;;  %v4431_v50 = vld [vmem:[#allocation6 + $0x550] sm:$0xff] }
 0x2f0   :  { %6509 = vmatprep.mubr.msk.f32.mxu1 %vm8059_vm0, %v10830_v58  ;;  %7505 = vmatpush1.bf16.msra.mxu1 %v7504_v52  ;;  %v2797_v52 = vmax.f32 %v11007_v49, %v1730_v55  ;;  %v1532_v55 = vmul.f32 0.2, %v9118_v27 }
 0x2f1   :  { %7506 = vmatprep.subr.bf16.mxu1 %v10832_v13  ;;  %7427 = vmatpush3.bf16.msk.msra.mxu0 %vm7426_vm3, %v7425_v46  ;;  %v4433_v46 = vld [vmem:[#allocation6 + $0x560] sm:$0xff] }
 0x2f2   :  { %v2822_v62 = vmax.f32 %v8746_v20, %v2797_v52  ;;  %v9487_v20 = vld [vmem:[#allocation2 + $0xb8] sm:$0xff]  ;;  %v1757_v0 = vmax.f32 %v9118_v27, %v1532_v55  ;;  %v4428_v52 = vld [vmem:[#allocation6 + $0x538] sm:$0xff]  ;;  %7428 = vmatprep.subr.bf16.mxu0 %v10832_v13  ;;  %v11013_v55 = vld [vmem:[#allocation68_spill] sm:$0xff] }
 0x2f3   :  { %6510 = vmatmul.mubr.f32.gmra.mrb[106].mxu1 %v2819_v19  ;;  %v11009_v19 = vld [vmem:[#allocation64_spill] sm:$0xff]  ;;  %v11011_v27 = vld [vmem:[#allocation67_spill] sm:$0xff] }
 0x2f4   :  { %6512 = vmatprep.mubr.msk.f32.mxu1 %vm8059_vm0, %v10830_v58  ;;  %7508 = vmatpush1.bf16.msra.mxu1 %v7507_v18  ;;  %v9473_v18 = vld [vmem:[#allocation2 + $0xa8] sm:$0xff]  ;;  %v2798_v36 = vmax.f32 %v11009_v19, %v1739_v16  ;;  %v9497_v16 = vld [vmem:[#allocation2 + $0xb0] sm:$0xff]  ;;  %v2800_v22 = vmax.f32 %v11011_v27, %v1757_v0  ;;  %v11012_v19 = vld [vmem:[#allocation70_spill] sm:$0xff] }
 0x2f5   :  { %7509 = vmatprep.subr.bf16.mxu1 %v10832_v13  ;;  %3272 = vmatprep.mubr.f32.mxu0 %v9473_v18  ;;  %v4435_v27 = vld [vmem:[#allocation6 + $0x570] sm:$0xff] }
 0x2f6   :  { %3273 = vmatmul.mubr.f32.gmra.mrb[170].mxu0 %v9483_v37  ;;  %v2823_v49 = vmax.f32 %v8764_v56, %v2798_v36  ;;  %v1775_v36 = vmax.f32 %v9131_v40, %v1550_v7  ;;  %v11016_v7 = vld [vmem:[#allocation77_spill] sm:$0xff] }
 0x2f7   :  { %6513 = vmatmul.mubr.f32.gmra.mrb[108].mxu1 %v2820_v26  ;;  %3277 = vmatprep.mubr.f32.mxu0 %v9487_v20  ;;  %v2799_v26 = vmax.f32 %v11010_v60, %v1748_v54  ;;  %v1559_v54 = vmul.f32 0.2, %v9137_v29  ;;  %v9527_v60 = vld [vmem:[#allocation2 + $0xe8] sm:$0xff] }
 0x2f8   :  { %6515 = vmatprep.mubr.msk.f32.mxu1 %vm8059_vm0, %v10830_v58  ;;  %7511 = vmatpush1.bf16.msra.mxu1 %v7510_v25  ;;  %v4426_v25 = vld [vmem:[#allocation6 + $0x528] sm:$0xff] }
 0x2f9   :  { %7512 = vmatprep.subr.bf16.mxu1 %v10832_v13  ;;  %v7519_v38 = vpack.c.bf16 %v4427_v45, %v4426_v25  ;;  %v2824_v28 = vmax.f32 %v8782_v59, %v2799_v26  ;;  %v2825_v25 = vmax.f32 %v11013_v55, %v2800_v22  ;;  %v4432_v45 = vld [vmem:[#allocation6 + $0x558] sm:$0xff]  ;;  %v11014_v26 = vld [vmem:[#allocation73_spill] sm:$0xff]  ;;  %v9537_v22 = vld [vmem:[#allocation2 + $0xe0] sm:$0xff] }
 0x2fa   :  { %3278 = vmatmul.mubr.f32.gmra.mrb[172].mxu0 %v9497_v16  ;;  %v7528_v40 = vpack.c.bf16 %v4433_v46, %v4432_v45  ;;  %v2802_v0 = vmax.f32 %v11014_v26, %v1775_v36  ;;  %v4437_v36 = vld [vmem:[#allocation6 + $0x580] sm:$0xff]  ;;  %v9553_v55 = vld [vmem:[#allocation2 + $0x108] sm:$0xff] }
 0x2fb   :  { %6516 = vmatmul.mubr.f32.gmra.mrb[110].mxu1 %v2821_v9  ;;  %3282 = vmatprep.mubr.f32.mxu0 %v9501_v41  ;;  %v1766_v9 = vmax.f32 %v9125_v11, %v1541_v39  ;;  %v7525_v11 = vpack.c.bf16 %v4431_v50, %v4430_v4  ;;  %v1784_v39 = vmax.f32 %v9137_v29, %v1559_v54  ;;  %v1577_v50 = vmul.f32 0.2, %v9149_v34  ;;  %v9550_v54 = vld [vmem:[#allocation2 + $0xf0] sm:$0xff]  ;;  %v11019_v26 = vld [vmem:[#allocation79_spill] sm:$0xff] }
 0x2fc   :  { %6518 = vmatprep.mubr.msk.f32.mxu1 %vm8059_vm0, %v10830_v58  ;;  %7514 = vmatpush1.bf16.msra.mxu1 %v7513_v2  ;;  %v4429_v2 = vld [vmem:[#allocation6 + $0x540] sm:$0xff] }
 0x2fd   :  { %7515 = vmatprep.subr.bf16.mxu1 %v10832_v13  ;;  %v7522_v56 = vpack.c.bf16 %v4429_v2, %v4428_v52  ;;  %v2801_v59 = vmax.f32 %v11012_v19, %v1766_v9  ;;  %v11015_v52 = vld [vmem:[#allocation71_spill] sm:$0xff]  ;;  %v9540_v9 = vld [vmem:[#allocation2 + $0xf8] sm:$0xff]  ;;  %v1802_v46 = vmax.f32 %v9149_v34, %v1577_v50 }
 0x2fe   :  { %v4440_v50 = vld [vmem:[#allocation6 + $0x598] sm:$0xff] }
 0x2ff   :  { %6519 = vmatmul.mubr.f32.gmra.mrb[112].mxu1 %v2822_v62  ;;  %v9511_v62 = vld [vmem:[#allocation2 + $0xc0] sm:$0xff]  ;;  %v2826_v2 = vmax.f32 %v11015_v52, %v2801_v59  ;;  %v4436_v59 = vld [vmem:[#allocation6 + $0x578] sm:$0xff] }
 0x300   :  { %6521 = vmatprep.mubr.msk.f32.mxu1 %vm8059_vm0, %v10830_v58  ;;  %7517 = vmatpush1.bf16.msra.mxu1 %v7516_v15  ;;  %v9514_v15 = vld [vmem:[#allocation2 + $0xd8] sm:$0xff]  ;;  %v9563_v52 = vld [vmem:[#allocation2 + $0x100] sm:$0xff] }
 0x301   :  { %7518 = vmatprep.subr.bf16.mxu1 %v10832_v13  ;;  %3283 = vmatmul.mubr.f32.gmra.mrb[174].mxu0 %v9511_v62 }
 0x302   :  { %3287 = vmatprep.mubr.f32.mxu0 %v9514_v15 }
 0x303   :  { %6522 = vmatmul.mubr.f32.gmra.mrb[114].mxu1 %v2823_v49  ;;  %v1568_v49 = vmul.f32 0.2, %v9143_v63 }
 0x304   :  { %6524 = vmatprep.mubr.msk.f32.mxu1 %vm8059_vm0, %v10830_v58  ;;  %7520 = vmatpush1.bf16.msra.mxu1 %v7519_v38  ;;  %v9524_v38 = vld [vmem:[#allocation2 + $0xd0] sm:$0xff] }
 0x305   :  { %7521 = vmatprep.subr.bf16.mxu1 %v10832_v13  ;;  %3288 = vmatmul.mubr.f32.gmra.mrb[176].mxu0 %v9524_v38  ;;  %v1793_v4 = vmax.f32 %v9143_v63, %v1568_v49  ;;  %v7534_v63 = vpack.c.bf16 %v4437_v36, %v4436_v59  ;;  %v4439_v49 = vld [vmem:[#allocation6 + $0x590] sm:$0xff]  ;;  %v9579_v59 = vld [vmem:[#allocation2 + $0x128] sm:$0xff]  ;;  %v11022_v36 = vld [vmem:[#allocation89_spill] sm:$0xff] }
 0x306   :  { %3292 = vmatprep.mubr.f32.mxu0 %v9527_v60 }
 0x307   :  { %6525 = vmatmul.mubr.f32.gmra.mrb[116].mxu1 %v2824_v28  ;;  %v2803_v28 = vmax.f32 %v11016_v7, %v1784_v39  ;;  %v4438_v39 = vld [vmem:[#allocation6 + $0x588] sm:$0xff]  ;;  %v1595_v7 = vmul.f32 0.2, %v9161_v17 }
 0x308   :  { %6527 = vmatprep.mubr.msk.f32.mxu1 %vm8059_vm0, %v10830_v58  ;;  %7523 = vmatpush1.bf16.msra.mxu1 %v7522_v56  ;;  %v4434_v56 = vld [vmem:[#allocation6 + $0x568] sm:$0xff]  ;;  %v7537_v34 = vpack.c.bf16 %v4439_v49, %v4438_v39  ;;  %v9589_v39 = vld [vmem:[#allocation2 + $0x120] sm:$0xff] }
 0x309   :  { %7524 = vmatprep.subr.bf16.mxu1 %v10832_v13  ;;  %3293 = vmatmul.mubr.f32.gmra.mrb[178].mxu0 %v9537_v22  ;;  %v7531_v29 = vpack.c.bf16 %v4435_v27, %v4434_v56  ;;  %v11020_v56 = vld [vmem:[#allocation85_spill] sm:$0xff] }
 0x30a   :  { %3297 = vmatprep.mubr.f32.mxu0 %v9540_v9  ;;  %v2805_v27 = vmax.f32 %v11020_v56, %v1802_v46  ;;  %v11023_v46 = vld [vmem:[#allocation87_spill] sm:$0xff]  ;;  %v9592_v49 = vld [vmem:[#allocation2 + $0x138] sm:$0xff] }
 0x30b   :  { %6528 = vmatmul.mubr.f32.gmra.mrb[118].mxu1 %v2825_v25  ;;  %v11018_v25 = vld [vmem:[#allocation81_spill] sm:$0xff] }
 0x30c   :  { %6530 = vmatprep.mubr.msk.f32.mxu1 %vm8059_vm0, %v10830_v58  ;;  %7526 = vmatpush1.bf16.msra.mxu1 %v7525_v11  ;;  %v11017_v11 = vld [vmem:[#allocation75_spill] sm:$0xff]  ;;  %v2804_v45 = vmax.f32 %v11018_v25, %v1793_v4  ;;  %v1820_v25 = vmax.f32 %v9161_v17, %v1595_v7 }
 0x30d   :  { %7527 = vmatprep.subr.bf16.mxu1 %v10832_v13  ;;  %v2827_v19 = vmax.f32 %v11017_v11, %v2802_v0  ;;  %3298 = vmatmul.mubr.f32.gmra.mrb[180].mxu0 %v9550_v54  ;;  %v2828_v0 = vmax.f32 %v11019_v26, %v2803_v28  ;;  %v11021_v28 = vld [vmem:[#allocation83_spill] sm:$0xff]  ;;  %v4441_v11 = vld [vmem:[#allocation6 + $0x5a0] sm:$0xff]  ;;  %v4442_v26 = vld [vmem:[#allocation6 + $0x5a8] sm:$0xff] }
 0x30e   :  { %3302 = vmatprep.mubr.f32.mxu0 %v9553_v55  ;;  %v2829_v4 = vmax.f32 %v11021_v28, %v2804_v45  ;;  %v1604_v45 = vmul.f32 0.2, %v9167_v21  ;;  %v11025_v7 = vld [vmem:[#allocation91_spill] sm:$0xff] }
 0x30f   :  { %6531 = vmatmul.mubr.f32.gmra.mrb[120].mxu1 %v2826_v2  ;;  %v9566_v2 = vld [vmem:[#allocation2 + $0x118] sm:$0xff] }
 0x310   :  { %6533 = vmatprep.mubr.msk.f32.mxu1 %vm8059_vm0, %v10830_v58  ;;  %7529 = vmatpush1.bf16.msra.mxu1 %v7528_v40  ;;  %v1586_v40 = vmul.f32 0.2, %v9155_v14 }
 0x311   :  { %7530 = vmatprep.subr.bf16.mxu1 %v10832_v13  ;;  %3303 = vmatmul.mubr.f32.gmra.mrb[182].mxu0 %v9563_v52 }
 0x312   :  { %3307 = vmatprep.mubr.f32.mxu0 %v9566_v2 }
 0x313   :  { %6534 = vmatmul.mubr.f32.gmra.mrb[122].mxu1 %v2827_v19  ;;  %v9576_v19 = vld [vmem:[#allocation2 + $0x110] sm:$0xff] }
 0x314   :  { %6536 = vmatprep.mubr.msk.f32.mxu1 %vm8059_vm0, %v10830_v58  ;;  %7532 = vmatpush1.bf16.msra.mxu1 %v7531_v29  ;;  %v1811_v29 = vmax.f32 %v9155_v14, %v1586_v40  ;;  %v7540_v14 = vpack.c.bf16 %v4441_v11, %v4440_v50  ;;  %v2830_v40 = vmax.f32 %v11023_v46, %v2805_v27  ;;  %v9605_v50 = vld [vmem:[#allocation2 + $0x148] sm:$0xff]  ;;  %v9618_v46 = vld [vmem:[#allocation2 + $0x158] sm:$0xff] }
 0x315   :  { %7533 = vmatprep.subr.bf16.mxu1 %v10832_v13  ;;  %3308 = vmatmul.mubr.f32.gmra.mrb[184].mxu0 %v9576_v19  ;;  %v1829_v27 = vmax.f32 %v9167_v21, %v1604_v45  ;;  %v11026_v21 = vld [vmem:[#allocation29_spill] sm:$0xff]  ;;  %v9615_v45 = vld [vmem:[#allocation2 + $0x140] sm:$0xff] }
 0x316   :  { %3312 = vmatprep.mubr.f32.mxu0 %v9579_v59 }
 0x317   :  { %6537 = vmatmul.mubr.f32.gmra.mrb[124].mxu1 %v2828_v0  ;;  %v4443_v0 = vld [vmem:[#allocation6 + $0x5b0] sm:$0xff]  ;;  %v2808_v11 = vmax.f32 %v11026_v21, %v1829_v27  ;;  %v9630_v27 = vld [vmem:[#allocation2 + $0x168] sm:$0xff]  ;;  %v11031_v21 = vld [vmem:[#allocation100_spill] sm:$0xff] }
 0x318   :  { %6539 = vmatprep.mubr.msk.f32.mxu1 %vm8059_vm0, %v10830_v58  ;;  %7535 = vmatpush1.bf16.msra.mxu1 %v7534_v63  ;;  %v2806_v63 = vmax.f32 %v11022_v36, %v1811_v29  ;;  %v7543_v17 = vpack.c.bf16 %v4443_v0, %v4442_v26  ;;  %v1613_v29 = vmul.f32 0.2, %v9173_v51  ;;  %v1622_v36 = vmul.f32 0.2, %v9179_v5 }
 0x319   :  { %7536 = vmatprep.subr.bf16.mxu1 %v10832_v13  ;;  %3313 = vmatmul.mubr.f32.gmra.mrb[186].mxu0 %v9589_v39  ;;  %v1631_v0 = vmul.f32 0.2, %v9185_v1 }
 0x31a   :  { %3317 = vmatprep.mubr.f32.mxu0 %v9592_v49  ;;  %v2831_v28 = vmax.f32 %v11025_v7, %v2806_v63  ;;  %v11027_v63 = vld [vmem:[#allocation95_spill] sm:$0xff]  ;;  %v1847_v26 = vmax.f32 %v9179_v5, %v1622_v36  ;;  %v9642_v36 = vld [vmem:[#allocation2 + $0x178] sm:$0xff] }
 0x31b   :  { %6540 = vmatmul.mubr.f32.gmra.mrb[126].mxu1 %v2829_v4  ;;  %v9602_v4 = vld [vmem:[#allocation2 + $0x130] sm:$0xff]  ;;  %v1856_v5 = vmax.f32 %v9185_v1, %v1631_v0  ;;  %v11034_v0 = vld [vmem:[#allocation102_spill] sm:$0xff] }
 0x31c   :  { %6542 = vmatprep.mubr.msk.f32.mxu1 %vm8059_vm0, %v10830_v58  ;;  %7538 = vmatpush1.bf16.msra.mxu1 %v7537_v34  ;;  %v11024_v34 = vld [vmem:[#allocation93_spill] sm:$0xff] }
 0x31d   :  { %7539 = vmatprep.subr.bf16.mxu1 %v10832_v13  ;;  %v2807_v56 = vmax.f32 %v11024_v34, %v1820_v25  ;;  %3318 = vmatmul.mubr.f32.gmra.mrb[188].mxu0 %v9602_v4 }
 0x31e   :  { %3322 = vmatprep.mubr.f32.mxu0 %v9605_v50 }
 0x31f   :  { %6543 = vmatmul.mubr.f32.gmra.mrb[128].mxu1 %v2830_v40  ;;  %v2832_v25 = vmax.f32 %v11027_v63, %v2807_v56  ;;  %v11028_v40 = vld [vmem:[#allocation27_spill] sm:$0xff]  ;;  %v9627_v56 = vld [vmem:[#allocation2 + $0x150] sm:$0xff]  ;;  %v11032_v63 = vld [vmem:[#allocation33_spill] sm:$0xff] }
 0x320   :  { %6545 = vmatprep.mubr.msk.f32.mxu1 %vm8059_vm0, %v10830_v58  ;;  %7541 = vmatpush1.bf16.msra.mxu1 %v7540_v14  ;;  %v1838_v14 = vmax.f32 %v9173_v51, %v1613_v29  ;;  %v11030_v29 = vld [vmem:[#allocation30_spill] sm:$0xff] }
 0x321   :  { %7542 = vmatprep.subr.bf16.mxu1 %v10832_v13  ;;  %3323 = vmatmul.mubr.f32.gmra.mrb[190].mxu0 %v9615_v45  ;;  %v2810_v7 = vmax.f32 %v11030_v29, %v1847_v26  ;;  %v11037_v29 = vld [vmem:[#allocation36_spill] sm:$0xff] }
 0x322   :  { %3327 = vmatprep.mubr.f32.mxu0 %v9618_v46  ;;  %v2809_v51 = vmax.f32 %v11028_v40, %v1838_v14  ;;  %v9639_v14 = vld [vmem:[#allocation2 + $0x160] sm:$0xff]  ;;  %v11033_v40 = vld [vmem:[#allocation49_spill] sm:$0xff] }
 0x323   :  { %6546 = vmatmul.mubr.f32.gmra.mrb[130].mxu1 %v2831_v28  ;;  %v1640_v28 = vmul.f32 0.2, %v9191_v12  ;;  %v1649_v26 = vmul.f32 0.2, %v11033_v40 }
 0x324   :  { %6548 = vmatprep.mubr.msk.f32.mxu1 %vm8059_vm0, %v10830_v58  ;;  %7544 = vmatpush1.bf16.msra.mxu1 %v7543_v17  ;;  %v11029_v17 = vld [vmem:[#allocation98_spill] sm:$0xff] }
 0x325   :  { %7566 = vmatprep.subr.bf16.mxu1 %v10832_v13  ;;  %v2833_v34 = vmax.f32 %v11029_v17, %v2808_v11  ;;  %3328 = vmatmul.mubr.f32.gmra.mrb[192].mxu0 %v9627_v56  ;;  %v2834_v11 = vmax.f32 %v11031_v21, %v2809_v51  ;;  %v1865_v1 = vmax.f32 %v9191_v12, %v1640_v28  ;;  %v9651_v17 = vld [vmem:[#allocation2 + $0x170] sm:$0xff]  ;;  %v11038_v28 = vld [vmem:[#allocation9_spill] sm:$0xff] }
 0x326   :  { %3332 = vmatprep.mubr.f32.mxu0 %v9630_v27  ;;  %v2835_v51 = vmax.f32 %v11034_v0, %v2810_v7  ;;  %11035 = vst [vmem:[#allocation11_spill] sm:$0xff] %v9651_v17  ;;  %v1874_v12 = vmax.f32 %v11033_v40, %v1649_v26  ;;  %v1658_v21 = vmul.f32 0.2, %v11038_v28  ;;  %v11041_v0 = vld [vmem:[#allocation39_spill] sm:$0xff]  ;;  %v11042_v40 = vld [vmem:[#allocation10_spill] sm:$0xff] }
 0x327   :  { %6549 = vmatmul.mubr.f32.gmra.mrb[132].mxu1 %v2832_v25  ;;  %v2811_v25 = vmax.f32 %v11032_v63, %v1856_v5  ;;  %v2812_v5 = vmax.f32 %v11037_v29, %v1865_v1  ;;  %v9663_v63 = vld [vmem:[#allocation2 + $0x180] sm:$0xff]  ;;  %v1667_v26 = vmul.f32 0.2, %v11042_v40  ;;  %v11043_v29 = vld [vmem:[#allocation41_spill] sm:$0xff] }
 0x328   :  { %6551 = vmatprep.mubr.msk.f32.mxu1 %vm8059_vm0, %v10830_v58  ;;  %11040 = vst [vmem:[#allocation13_spill] sm:$0xff] %v9663_v63  ;;  %v1883_v1 = vmax.f32 %v11038_v28, %v1658_v21  ;;  %v11047_v21 = vld [vmem:[#allocation107_spill] sm:$0xff] }
 0x329   :  { %3333 = vmatmul.mubr.f32.gmra.mrb[194].mxu0 %v9639_v14 }
 0x32a   :  { %3337 = vmatprep.mubr.f32.mxu0 %v9642_v36 }
 0x32b   :  { %6552 = vmatmul.mubr.f32.gmra.mrb[134].mxu1 %v2833_v34  ;;  %v9654_v34 = vld [vmem:[#allocation2 + $0x188] sm:$0xff] }
 0x32c   :  { %6554 = vmatprep.mubr.msk.f32.mxu1 %vm8059_vm0, %v10830_v58  ;;  %11036 = vst [vmem:[#allocation12_spill] sm:$0xff] %v9654_v34 }
 0x32d   :  { %3338 = vmatmul.mubr.f32.gmra.mrb[196].mxu0 %v9651_v17 }
 0x32e   :  { %3342 = vmatprep.mubr.f32.mxu0 %v9654_v34  ;;  %v2837_v34 = vmax.f32 %v11043_v29, %v2812_v5 }
 0x32f   :  { %6555 = vmatmul.mubr.f32.gmra.mrb[136].mxu1 %v2834_v11  ;;  %v11039_v11 = vld [vmem:[#allocation104_spill] sm:$0xff] }
 0x330   :  { %6557 = vmatprep.mubr.msk.f32.mxu1 %vm8059_vm0, %v10830_v58  ;;  %v2836_v7 = vmax.f32 %v11039_v11, %v2811_v25  ;;  %v11044_v25 = vld [vmem:[#allocation42_spill] sm:$0xff] }
 0x331   :  { %3343 = vmatmul.mubr.f32.gmra.mrb[198].mxu0 %v9663_v63  ;;  %v2814_v11 = vmax.f32 %v11044_v25, %v1883_v1  ;;  %v11045_v63 = vld [vmem:[#allocation44_spill] sm:$0xff]  ;;  %v7900_v1 = vld [vmem:[#allocation2 + $0x8] sm:$0xff] }
 0x332   :  { %6583 = vmatprep.mubr.msk.f32.mxu0 %vm8059_vm0, %v10830_v58 }
 0x333   :  { %6558 = vmatmul.mubr.f32.gmra.mrb[138].mxu1 %v2835_v51  ;;  %v2813_v51 = vmax.f32 %v11041_v0, %v1874_v12  ;;  %v11046_v12 = vld [vmem:[#allocation45_spill] sm:$0xff]  ;;  %v2839_v0 = vmax.f32 %v11047_v21, %v2814_v11 }
 0x334   :  { %6560 = vmatprep.mubr.msk.f32.mxu1 %vm8059_vm0, %v10830_v58 }
 0x335   :  { %v2838_v17 = vmax.f32 %v11045_v63, %v2813_v51 }
 0x337   :  { %6561 = vmatmul.mubr.f32.gmra.mrb[140].mxu1 %v2836_v7  ;;  %v1892_v7 = vmax.f32 %v11042_v40, %v1667_v26 }
 0x338   :  { %6563 = vmatprep.mubr.msk.f32.mxu1 %vm8059_vm0, %v10830_v58 }
 0x339   :  { %v2815_v28 = vmax.f32 %v11046_v12, %v1892_v7  ;;  %v3674_v7 = vld [vmem:[#allocation6 + $0x358] sm:$0xff]  ;;  %v3675_v12 = vld [vmem:[#allocation6 + $0x360] sm:$0xff] }
 0x33a   :  { %v7438_v21 = vpack.c.bf16 %v3675_v12, %v3674_v7 }
 0x33b   :  { %6564 = vmatmul.mubr.f32.gmra.mrb[142].mxu1 %v2837_v34  ;;  %v11048_v34 = vld [vmem:[#allocation108_spill] sm:$0xff] }
 0x33c   :  { %6566 = vmatprep.mubr.msk.f32.mxu1 %vm8059_vm0, %v10830_v58  ;;  %v2840_v5 = vmax.f32 %v11048_v34, %v2815_v28 }
 0x33f   :  { %6567 = vmatmul.mubr.f32.gmra.mrb[144].mxu1 %v2838_v17  ;;  %v3673_v17 = vld [vmem:[#allocation6 + $0x350] sm:$0xff] }
 0x340   :  { %6569 = vmatprep.mubr.msk.f32.mxu1 %vm8059_vm0, %v10830_v58 }
 0x343   :  { %6570 = vmatmul.mubr.f32.gmra.mrb[146].mxu1 %v2839_v0 }
 0x344   :  { %6572 = vmatprep.mubr.msk.f32.mxu1 %vm8059_vm0, %v10830_v58 }
 0x347   :  { %6573 = vmatmul.mubr.f32.gmra.mrb[148].mxu1 %v2840_v5 }
 0x348   :  { %4508 = vmatprep.mubr.f32.mxu1 %v7900_v1 }
 0x34b   :  { %4509 = vmatmul.mubr.f32.vlgmr.msra.gmra.mrb[150].mxu1 %v9350_v3  ;;  %v4684_v3 = vld [vmem:[#allocation6 + $0x5b8] sm:$0xff] }
 0x34c   :  { %4513 = vmatprep.mubr.f32.mxu1 %v9358_v42  ;;  %v4685_v42 = vld [vmem:[#allocation6 + $0x5c0] sm:$0xff] }
 0x34f   :  { %4514 = vmatmul.mubr.f32.gmra.mrb[152].mxu1 %v9363_v35  ;;  %v9725_v35 = vpack.c.bf16 %v4685_v42, %v4684_v3 }
 0x350   :  { %4518 = vmatprep.mubr.f32.mxu1 %v9369_v30  ;;  %v4686_v30 = vld [vmem:[#allocation6 + $0x5c8] sm:$0xff] }
 0x351   :  { %7568 = vmatpush3.bf16.msra.mxu1 %v9725_v35 }
 0x352   :  { %7569 = vmatprep.subr.bf16.mxu1 %v10832_v13 }
 0x353   :  { %4519 = vmatmul.mubr.f32.gmra.mrb[154].mxu1 %v9376_v48  ;;  %v4687_v48 = vld [vmem:[#allocation6 + $0x5d0] sm:$0xff] }
 0x354   :  { %4523 = vmatprep.mubr.f32.mxu1 %v9382_v23  ;;  %v9731_v23 = vpack.c.bf16 %v4687_v48, %v4686_v30 }
 0x356   :  { %7571 = vmatpush3.bf16.msra.mxu1 %v9731_v23 }
 0x357   :  { %4524 = vmatmul.mubr.f32.gmra.mrb[156].mxu1 %v9390_v33  ;;  %7572 = vmatprep.subr.bf16.mxu1 %v10832_v13  ;;  %v4688_v33 = vld [vmem:[#allocation6 + $0x5d8] sm:$0xff] }
 0x358   :  { %4528 = vmatprep.mubr.f32.mxu1 %v9396_v8  ;;  %v4689_v8 = vld [vmem:[#allocation6 + $0x5e0] sm:$0xff] }
 0x35b   :  { %4529 = vmatmul.mubr.f32.gmra.mrb[158].mxu1 %v9405_v61  ;;  %v9737_v61 = vpack.c.bf16 %v4689_v8, %v4688_v33 }
 0x35c   :  { %4533 = vmatprep.mubr.f32.mxu1 %v9408_v47  ;;  %v4690_v47 = vld [vmem:[#allocation6 + $0x5e8] sm:$0xff] }
 0x35d   :  { %7574 = vmatpush3.bf16.msra.mxu1 %v9737_v61 }
 0x35e   :  { %7575 = vmatprep.subr.bf16.mxu1 %v10832_v13 }
 0x35f   :  { %4534 = vmatmul.mubr.f32.gmra.mrb[160].mxu1 %v9418_v44  ;;  %v4691_v44 = vld [vmem:[#allocation6 + $0x5f0] sm:$0xff] }
 0x360   :  { %4538 = vmatprep.mubr.f32.mxu1 %v9421_v6  ;;  %v9742_v6 = vpack.c.bf16 %v4691_v44, %v4690_v47 }
 0x362   :  { %7577 = vmatpush3.bf16.msra.mxu1 %v9742_v6 }
 0x363   :  { %4539 = vmatmul.mubr.f32.gmra.mrb[162].mxu1 %v9431_v24  ;;  %v4692_v24 = vld [vmem:[#allocation6 + $0x5f8] sm:$0xff]  ;;  %7578 = vmatprep.subr.bf16.mxu1 %v10832_v13 }
 0x364   :  { %4543 = vmatprep.mubr.f32.mxu1 %v9434_v43  ;;  %v4693_v43 = vld [vmem:[#allocation6 + $0x600] sm:$0xff] }
 0x367   :  { %4544 = vmatmul.mubr.f32.gmra.mrb[164].mxu1 %v9444_v57  ;;  %v9747_v57 = vpack.c.bf16 %v4693_v43, %v4692_v24 }
 0x368   :  { %4548 = vmatprep.mubr.f32.mxu1 %v9447_v32  ;;  %v4694_v32 = vld [vmem:[#allocation6 + $0x608] sm:$0xff] }
 0x369   :  { %7580 = vmatpush3.bf16.msra.mxu1 %v9747_v57 }
 0x36a   :  { %7581 = vmatprep.subr.bf16.mxu1 %v10832_v13 }
 0x36b   :  { %4549 = vmatmul.mubr.f32.gmra.mrb[166].mxu1 %v9457_v10  ;;  %v4695_v10 = vld [vmem:[#allocation6 + $0x610] sm:$0xff] }
 0x36c   :  { %4553 = vmatprep.mubr.f32.mxu1 %v9460_v53  ;;  %v11049_v53 = vld [vmem:[#allocation11_spill] sm:$0xff] }
 0x36f   :  { %4554 = vmatmul.mubr.f32.gmra.mrb[168].mxu1 %v9470_v31  ;;  %v11050_v31 = vld [vmem:[#allocation12_spill] sm:$0xff] }
 0x370   :  { %4558 = vmatprep.mubr.f32.mxu1 %v9473_v18  ;;  %v9753_v18 = vpack.c.bf16 %v4695_v10, %v4694_v32  ;;  %v3676_v32 = vld [vmem:[#allocation6 + $0x368] sm:$0xff]  ;;  %v3677_v10 = vld [vmem:[#allocation6 + $0x370] sm:$0xff] }
 0x372   :  { %7583 = vmatpush3.bf16.msra.mxu1 %v9753_v18 }
 0x373   :  { %4559 = vmatmul.mubr.f32.gmra.mrb[170].mxu1 %v9483_v37  ;;  %v4696_v37 = vld [vmem:[#allocation6 + $0x618] sm:$0xff]  ;;  %7584 = vmatprep.subr.bf16.mxu1 %v10832_v13 }
 0x374   :  { %4563 = vmatprep.mubr.f32.mxu1 %v9487_v20  ;;  %v4697_v20 = vld [vmem:[#allocation6 + $0x620] sm:$0xff] }
 0x377   :  { %4564 = vmatmul.mubr.f32.gmra.mrb[172].mxu1 %v9497_v16  ;;  %v11051_v16 = vld [vmem:[#allocation13_spill] sm:$0xff] }
 0x378   :  { %4568 = vmatprep.mubr.f32.mxu1 %v9501_v41  ;;  %v9760_v41 = vpack.c.bf16 %v4697_v20, %v4696_v37 }
 0x37a   :  { %7586 = vmatpush3.bf16.msra.mxu1 %v9760_v41 }
 0x37b   :  { %4569 = vmatmul.mubr.f32.gmra.mrb[174].mxu1 %v9511_v62  ;;  %6896 = vmatprep.subr.mxu1 %v10830_v58  ;;  %v4698_v62 = vld [vmem:[#allocation6 + $0x628] sm:$0xff] }
 0x37c   :  { %4573 = vmatprep.mubr.f32.mxu1 %v9514_v15  ;;  %v9765_v15 = vld [vmem:[#allocation6 + $0x200] ss:$0 sm:$0xff] }
 0x37e   :  { %6897 = vmatpush3.msra.mxu1 %v4698_v62 }
 0x37f   :  { %4574 = vmatmul.mubr.f32.gmra.mrb[176].mxu1 %v9524_v38 }
 0x380   :  { %4578 = vmatprep.mubr.f32.mxu1 %v9527_v60 }
 0x383   :  { %4579 = vmatmul.mubr.f32.gmra.mrb[178].mxu1 %v9537_v22 }
 0x384   :  { %4583 = vmatprep.mubr.f32.mxu1 %v9540_v9  ;;  %v3668_v9 = vld [vmem:[#allocation6 + $0x328] sm:$0xff] }
 0x387   :  { %4584 = vmatmul.mubr.f32.gmra.mrb[180].mxu1 %v9550_v54  ;;  %v3669_v54 = vld [vmem:[#allocation6 + $0x330] sm:$0xff] }
 0x388   :  { %4588 = vmatprep.mubr.f32.mxu1 %v9553_v55 }
 0x38b   :  { %4589 = vmatmul.mubr.f32.gmra.mrb[182].mxu1 %v9563_v52 }
 0x38c   :  { %4593 = vmatprep.mubr.f32.mxu1 %v9566_v2  ;;  %v7429_v2 = vpack.c.bf16 %v3669_v54, %v3668_v9 }
 0x38f   :  { %4594 = vmatmul.mubr.f32.gmra.mrb[184].mxu1 %v9576_v19 }
 0x390   :  { %4598 = vmatprep.mubr.f32.mxu1 %v9579_v59 }
 0x393   :  { %4599 = vmatmul.mubr.f32.gmra.mrb[186].mxu1 %v9589_v39 }
 0x394   :  { %4603 = vmatprep.mubr.f32.mxu1 %v9592_v49  ;;  %v3670_v49 = vld [vmem:[#allocation6 + $0x338] sm:$0xff] }
 0x397   :  { %4604 = vmatmul.mubr.f32.gmra.mrb[188].mxu1 %v9602_v4  ;;  %v3671_v4 = vld [vmem:[#allocation6 + $0x340] sm:$0xff] }
 0x398   :  { %4608 = vmatprep.mubr.f32.mxu1 %v9605_v50 }
 0x39b   :  { %4609 = vmatmul.mubr.f32.gmra.mrb[190].mxu1 %v9615_v45 }
 0x39c   :  { %4613 = vmatprep.mubr.f32.mxu1 %v9618_v46  ;;  %v7432_v46 = vpack.c.bf16 %v3671_v4, %v3670_v49 }
 0x39f   :  { %4614 = vmatmul.mubr.f32.gmra.mrb[192].mxu1 %v9627_v56 }
 0x3a0   :  { %4618 = vmatprep.mubr.f32.mxu1 %v9630_v27 }
 0x3a3   :  { %4619 = vmatmul.mubr.f32.gmra.mrb[194].mxu1 %v9639_v14 }
 0x3a4   :  { %4623 = vmatprep.mubr.f32.mxu1 %v9642_v36  ;;  %v3672_v36 = vld [vmem:[#allocation6 + $0x348] sm:$0xff] }
 0x3a5   :  { %v7435_v40 = vpack.c.bf16 %v3673_v17, %v3672_v36 }
 0x3a7   :  { %4624 = vmatmul.mubr.f32.gmra.mrb[196].mxu1 %v11049_v53 }
 0x3a8   :  { %4628 = vmatprep.mubr.f32.mxu1 %v11050_v31  ;;  %v7441_v31 = vpack.c.bf16 %v3677_v10, %v3676_v32 }
 0x3ab   :  { %4629 = vmatmul.mubr.f32.gmra.mrb[198].mxu1 %v11051_v16 }
 0x3ac   :  { %6898 = vmatprep.mubr.msk.f32.mxu1 %vm8059_vm0, %v10830_v58 }
 0x3ba   :  { %v2923_v38 = vpop.f32.mrb[100].mxu1 }
 0x3bb   :  { %v7587_v60 = vadd.f32 %v9765_v15, %v2923_v38  ;;  %v6502_v22 = vpop.f32.mrb[101].mxu1 }
 0x3bd   :  { %v3072_v55 = vmul.f32 0.2, %v7587_v60 }
 0x3be   :  { %v2928_v52 = vpop.f32.mrb[102].mxu1 }
 0x3bf   :  { %v3097_v19 = vmax.f32 %v7587_v60, %v3072_v55  ;;  %v7588_v59 = vadd.f32 %v9765_v15, %v2928_v52  ;;  %v6505_v39 = vpop.f32.mrb[103].mxu1 }
 0x3c1   :  { %v3073_v50 = vmul.f32 0.2, %v7588_v59  ;;  %6584 = vmatmul.mubr.msk.f32.vlgmr.msra.gmra.mrb[150].mxu0 %vm3348_vm4, %v3097_v19 }
 0x3c2   :  { %v2933_v45 = vpop.f32.mrb[104].mxu1  ;;  %6586 = vmatprep.mubr.msk.f32.mxu0 %vm8059_vm0, %v10830_v58  ;;  %7430 = vmatpush3.bf16.msra.mxu0 %v7429_v2 }
 0x3c3   :  { %v3098_v56 = vmax.f32 %v7588_v59, %v3073_v50  ;;  %v7589_v27 = vadd.f32 %v9765_v15, %v2933_v45  ;;  %v6508_v14 = vpop.f32.mrb[105].mxu1  ;;  %7431 = vmatprep.subr.bf16.mxu0 %v10832_v13 }
 0x3c5   :  { %v3074_v63 = vmul.f32 0.2, %v7589_v27  ;;  %6587 = vmatmul.mubr.msk.f32.gmra.mrb[152].mxu0 %vm3348_vm4, %v3098_v56  ;;  %v3679_v56 = vld [vmem:[#allocation6 + $0x380] sm:$0xff] }
 0x3c6   :  { %v2938_v51 = vpop.f32.mrb[106].mxu1  ;;  %6589 = vmatprep.mubr.msk.f32.mxu0 %vm8059_vm0, %v10830_v58  ;;  %7433 = vmatpush3.bf16.msra.mxu0 %v7432_v46  ;;  %v3678_v46 = vld [vmem:[#allocation6 + $0x378] sm:$0xff] }
 0x3c7   :  { %v3099_v26 = vmax.f32 %v7589_v27, %v3074_v63  ;;  %v7590_v29 = vadd.f32 %v9765_v15, %v2938_v51  ;;  %v6511_v25 = vpop.f32.mrb[107].mxu1  ;;  %7434 = vmatprep.subr.bf16.mxu0 %v10832_v13  ;;  %v7444_v14 = vpack.c.bf16 %v3679_v56, %v3678_v46 }
 0x3c9   :  { %v3075_v11 = vmul.f32 0.2, %v7590_v29  ;;  %6590 = vmatmul.mubr.msk.f32.gmra.mrb[154].mxu0 %vm3348_vm4, %v3099_v26 }
 0x3ca   :  { %v2943_v28 = vpop.f32.mrb[108].mxu1  ;;  %6592 = vmatprep.mubr.msk.f32.mxu0 %vm8059_vm0, %v10830_v58  ;;  %7436 = vmatpush3.bf16.msra.mxu0 %v7435_v40 }
 0x3cb   :  { %v3100_v0 = vmax.f32 %v7590_v29, %v3075_v11  ;;  %v7591_v34 = vadd.f32 %v9765_v15, %v2943_v28  ;;  %v6514_v5 = vpop.f32.mrb[109].mxu1  ;;  %7437 = vmatprep.subr.bf16.mxu0 %v10832_v13 }
 0x3cc   :  { %v3681_v5 = vld [vmem:[#allocation6 + $0x390] sm:$0xff] }
 0x3cd   :  { %v3076_v1 = vmul.f32 0.2, %v7591_v34  ;;  %6593 = vmatmul.mubr.msk.f32.gmra.mrb[156].mxu0 %vm3348_vm4, %v3100_v0 }
 0x3ce   :  { %v2948_v3 = vpop.f32.mrb[110].mxu1  ;;  %6595 = vmatprep.mubr.msk.f32.mxu0 %vm8059_vm0, %v10830_v58  ;;  %7439 = vmatpush3.bf16.msra.mxu0 %v7438_v21 }
 0x3cf   :  { %v3101_v42 = vmax.f32 %v7591_v34, %v3076_v1  ;;  %v7592_v30 = vadd.f32 %v9765_v15, %v2948_v3  ;;  %v6517_v48 = vpop.f32.mrb[111].mxu1  ;;  %7440 = vmatprep.subr.bf16.mxu0 %v10832_v13  ;;  %v3680_v34 = vld [vmem:[#allocation6 + $0x388] sm:$0xff] }
 0x3d0   :  { %v7447_v3 = vpack.c.bf16 %v3681_v5, %v3680_v34 }
 0x3d1   :  { %v3077_v33 = vmul.f32 0.2, %v7592_v30  ;;  %6596 = vmatmul.mubr.msk.f32.gmra.mrb[158].mxu0 %vm3348_vm4, %v3101_v42 }
 0x3d2   :  { %v2953_v8 = vpop.f32.mrb[112].mxu1  ;;  %6598 = vmatprep.mubr.msk.f32.mxu0 %vm8059_vm0, %v10830_v58  ;;  %7442 = vmatpush3.bf16.msra.mxu0 %v7441_v31 }
 0x3d3   :  { %v3102_v47 = vmax.f32 %v7592_v30, %v3077_v33  ;;  %v7593_v44 = vadd.f32 %v9765_v15, %v2953_v8  ;;  %v6520_v24 = vpop.f32.mrb[113].mxu1  ;;  %7443 = vmatprep.subr.bf16.mxu0 %v10832_v13 }
 0x3d5   :  { %v3078_v43 = vmul.f32 0.2, %v7593_v44  ;;  %6599 = vmatmul.mubr.msk.f32.gmra.mrb[160].mxu0 %vm3348_vm4, %v3102_v47 }
 0x3d6   :  { %v2958_v53 = vpop.f32.mrb[114].mxu1  ;;  %6601 = vmatprep.mubr.msk.f32.mxu0 %vm8059_vm0, %v10830_v58  ;;  %7445 = vmatpush3.bf16.msra.mxu0 %v7444_v14 }
 0x3d7   :  { %v3103_v37 = vmax.f32 %v7593_v44, %v3078_v43  ;;  %v7594_v20 = vadd.f32 %v9765_v15, %v2958_v53  ;;  %v6523_v16 = vpop.f32.mrb[115].mxu1  ;;  %7446 = vmatprep.subr.bf16.mxu0 %v10832_v13 }
 0x3d9   :  { %v3079_v62 = vmul.f32 0.2, %v7594_v20  ;;  %6602 = vmatmul.mubr.msk.f32.gmra.mrb[162].mxu0 %vm3348_vm4, %v3103_v37 }
 0x3da   :  { %v2963_v38 = vpop.f32.mrb[116].mxu1  ;;  %6604 = vmatprep.mubr.msk.f32.mxu0 %vm8059_vm0, %v10830_v58  ;;  %7448 = vmatpush3.bf16.msra.mxu0 %v7447_v3 }
 0x3db   :  { %v3104_v60 = vmax.f32 %v7594_v20, %v3079_v62  ;;  %v7595_v22 = vadd.f32 %v9765_v15, %v2963_v38  ;;  %v6526_v9 = vpop.f32.mrb[117].mxu1  ;;  %6686 = vmatprep.subr.mxu0 %v10830_v58  ;;  %v3682_v20 = vld [vmem:[#allocation6 + $0x398] sm:$0xff] }
 0x3dd   :  { %v3080_v54 = vmul.f32 0.2, %v7595_v22  ;;  %6605 = vmatmul.mubr.msk.f32.gmra.mrb[164].mxu0 %vm3348_vm4, %v3104_v60 }
 0x3de   :  { %v2968_v55 = vpop.f32.mrb[118].mxu1  ;;  %6607 = vmatprep.mubr.msk.f32.mxu0 %vm8059_vm0, %v10830_v58  ;;  %6687 = vmatpush3.msra.mxu0 %v3682_v20 }
 0x3df   :  { %v3105_v52 = vmax.f32 %v7595_v22, %v3080_v54  ;;  %v7596_v2 = vadd.f32 %v9765_v15, %v2968_v55  ;;  %v6529_v19 = vpop.f32.mrb[119].mxu1  ;;  %7449 = vmatprep.subr.bf16.mxu0 %v10832_v13 }
 0x3e1   :  { %v3081_v59 = vmul.f32 0.2, %v7596_v2  ;;  %6608 = vmatmul.mubr.msk.f32.gmra.mrb[166].mxu0 %vm3348_vm4, %v3105_v52 }
 0x3e2   :  { %v2973_v39 = vpop.f32.mrb[120].mxu1  ;;  %6610 = vmatprep.mubr.msk.f32.mxu0 %vm8059_vm0, %v10830_v58 }
 0x3e3   :  { %v3106_v49 = vmax.f32 %v7596_v2, %v3081_v59  ;;  %v7597_v4 = vadd.f32 %v9765_v15, %v2973_v39  ;;  %v6532_v50 = vpop.f32.mrb[121].mxu1 }
 0x3e5   :  { %v3082_v45 = vmul.f32 0.2, %v7597_v4  ;;  %6611 = vmatmul.mubr.msk.f32.gmra.mrb[168].mxu0 %vm3348_vm4, %v3106_v49 }
 0x3e6   :  { %v2978_v27 = vpop.f32.mrb[122].mxu1  ;;  %6613 = vmatprep.mubr.msk.f32.mxu0 %vm8059_vm0, %v10830_v58 }
 0x3e7   :  { %v3107_v36 = vmax.f32 %v7597_v4, %v3082_v45  ;;  %v7598_v17 = vadd.f32 %v9765_v15, %v2978_v27  ;;  %v6535_v63 = vpop.f32.mrb[123].mxu1 }
 0x3e9   :  { %v3083_v51 = vmul.f32 0.2, %v7598_v17  ;;  %6614 = vmatmul.mubr.msk.f32.gmra.mrb[170].mxu0 %vm3348_vm4, %v3107_v36 }
 0x3ea   :  { %v2983_v40 = vpop.f32.mrb[124].mxu1  ;;  %6616 = vmatprep.mubr.msk.f32.mxu0 %vm8059_vm0, %v10830_v58 }
 0x3eb   :  { %v3108_v26 = vmax.f32 %v7598_v17, %v3083_v51  ;;  %v7599_v29 = vadd.f32 %v9765_v15, %v2983_v40  ;;  %v6538_v25 = vpop.f32.mrb[125].mxu1 }
 0x3ed   :  { %v3084_v11 = vmul.f32 0.2, %v7599_v29  ;;  %6617 = vmatmul.mubr.msk.f32.gmra.mrb[172].mxu0 %vm3348_vm4, %v3108_v26 }
 0x3ee   :  { %v2988_v7 = vpop.f32.mrb[126].mxu1  ;;  %6619 = vmatprep.mubr.msk.f32.mxu0 %vm8059_vm0, %v10830_v58 }
 0x3ef   :  { %v3109_v12 = vmax.f32 %v7599_v29, %v3084_v11  ;;  %v7600_v28 = vadd.f32 %v9765_v15, %v2988_v7  ;;  %v6541_v21 = vpop.f32.mrb[127].mxu1 }
 0x3f1   :  { %v3085_v0 = vmul.f32 0.2, %v7600_v28  ;;  %6620 = vmatmul.mubr.msk.f32.gmra.mrb[174].mxu0 %vm3348_vm4, %v3109_v12 }
 0x3f2   :  { %v2993_v1 = vpop.f32.mrb[128].mxu1  ;;  %6622 = vmatprep.mubr.msk.f32.mxu0 %vm8059_vm0, %v10830_v58 }
 0x3f3   :  { %v3110_v42 = vmax.f32 %v7600_v28, %v3085_v0  ;;  %v7601_v30 = vadd.f32 %v9765_v15, %v2993_v1  ;;  %v6544_v48 = vpop.f32.mrb[129].mxu1 }
 0x3f5   :  { %v3086_v33 = vmul.f32 0.2, %v7601_v30  ;;  %6623 = vmatmul.mubr.msk.f32.gmra.mrb[176].mxu0 %vm3348_vm4, %v3110_v42 }
 0x3f6   :  { %v2998_v8 = vpop.f32.mrb[130].mxu1  ;;  %6625 = vmatprep.mubr.msk.f32.mxu0 %vm8059_vm0, %v10830_v58 }
 0x3f7   :  { %v3111_v47 = vmax.f32 %v7601_v30, %v3086_v33  ;;  %v7602_v44 = vadd.f32 %v9765_v15, %v2998_v8  ;;  %v6547_v24 = vpop.f32.mrb[131].mxu1 }
 0x3f9   :  { %v3087_v43 = vmul.f32 0.2, %v7602_v44  ;;  %6626 = vmatmul.mubr.msk.f32.gmra.mrb[178].mxu0 %vm3348_vm4, %v3111_v47 }
 0x3fa   :  { %v3003_v32 = vpop.f32.mrb[132].mxu1  ;;  %6628 = vmatprep.mubr.msk.f32.mxu0 %vm8059_vm0, %v10830_v58 }
 0x3fb   :  { %v3112_v10 = vmax.f32 %v7602_v44, %v3087_v43  ;;  %v7603_v53 = vadd.f32 %v9765_v15, %v3003_v32  ;;  %v6550_v31 = vpop.f32.mrb[133].mxu1 }
 0x3fd   :  { %v3088_v37 = vmul.f32 0.2, %v7603_v53  ;;  %6629 = vmatmul.mubr.msk.f32.gmra.mrb[180].mxu0 %vm3348_vm4, %v3112_v10 }
 0x3fe   :  { %v3008_v16 = vpop.f32.mrb[134].mxu1  ;;  %6631 = vmatprep.mubr.msk.f32.mxu0 %vm8059_vm0, %v10830_v58 }
 0x3ff   :  { %v3113_v62 = vmax.f32 %v7603_v53, %v3088_v37  ;;  %v7604_v38 = vadd.f32 %v9765_v15, %v3008_v16  ;;  %v6553_v60 = vpop.f32.mrb[135].mxu1 }
 0x401   :  { %v3089_v22 = vmul.f32 0.2, %v7604_v38  ;;  %6632 = vmatmul.mubr.msk.f32.gmra.mrb[182].mxu0 %vm3348_vm4, %v3113_v62 }
 0x402   :  { %v3013_v9 = vpop.f32.mrb[136].mxu1  ;;  %6634 = vmatprep.mubr.msk.f32.mxu0 %vm8059_vm0, %v10830_v58 }
 0x403   :  { %v3114_v54 = vmax.f32 %v7604_v38, %v3089_v22  ;;  %v7605_v55 = vadd.f32 %v9765_v15, %v3013_v9  ;;  %v6556_v52 = vpop.f32.mrb[137].mxu1 }
 0x405   :  { %v3090_v2 = vmul.f32 0.2, %v7605_v55  ;;  %6635 = vmatmul.mubr.msk.f32.gmra.mrb[184].mxu0 %vm3348_vm4, %v3114_v54 }
 0x406   :  { %v3018_v19 = vpop.f32.mrb[138].mxu1  ;;  %6637 = vmatprep.mubr.msk.f32.mxu0 %vm8059_vm0, %v10830_v58 }
 0x407   :  { %v3115_v59 = vmax.f32 %v7605_v55, %v3090_v2  ;;  %v7606_v39 = vadd.f32 %v9765_v15, %v3018_v19  ;;  %v6559_v49 = vpop.f32.mrb[139].mxu1 }
 0x409   :  { %v3091_v4 = vmul.f32 0.2, %v7606_v39  ;;  %6638 = vmatmul.mubr.msk.f32.gmra.mrb[186].mxu0 %vm3348_vm4, %v3115_v59 }
 0x40a   :  { %v3023_v50 = vpop.f32.mrb[140].mxu1  ;;  %6640 = vmatprep.mubr.msk.f32.mxu0 %vm8059_vm0, %v10830_v58 }
 0x40b   :  { %v3116_v45 = vmax.f32 %v7606_v39, %v3091_v4  ;;  %v7607_v46 = vadd.f32 %v9765_v15, %v3023_v50  ;;  %v6562_v56 = vpop.f32.mrb[141].mxu1 }
 0x40d   :  { %v3092_v27 = vmul.f32 0.2, %v7607_v46  ;;  %6641 = vmatmul.mubr.msk.f32.gmra.mrb[188].mxu0 %vm3348_vm4, %v3116_v45 }
 0x40e   :  { %v3028_v14 = vpop.f32.mrb[142].mxu1  ;;  %6643 = vmatprep.mubr.msk.f32.mxu0 %vm8059_vm0, %v10830_v58 }
 0x40f   :  { %v3117_v36 = vmax.f32 %v7607_v46, %v3092_v27  ;;  %v7608_v17 = vadd.f32 %v9765_v15, %v3028_v14  ;;  %v6565_v63 = vpop.f32.mrb[143].mxu1 }
 0x411   :  { %v3093_v51 = vmul.f32 0.2, %v7608_v17  ;;  %6644 = vmatmul.mubr.msk.f32.gmra.mrb[190].mxu0 %vm3348_vm4, %v3117_v36 }
 0x412   :  { %v3033_v40 = vpop.f32.mrb[144].mxu1  ;;  %6646 = vmatprep.mubr.msk.f32.mxu0 %vm8059_vm0, %v10830_v58 }
 0x413   :  { %v3118_v26 = vmax.f32 %v7608_v17, %v3093_v51  ;;  %v7609_v29 = vadd.f32 %v9765_v15, %v3033_v40  ;;  %v6568_v25 = vpop.f32.mrb[145].mxu1 }
 0x415   :  { %v3094_v11 = vmul.f32 0.2, %v7609_v29  ;;  %6647 = vmatmul.mubr.msk.f32.gmra.mrb[192].mxu0 %vm3348_vm4, %v3118_v26 }
 0x416   :  { %v3038_v7 = vpop.f32.mrb[146].mxu1  ;;  %6649 = vmatprep.mubr.msk.f32.mxu0 %vm8059_vm0, %v10830_v58 }
 0x417   :  { %v3119_v12 = vmax.f32 %v7609_v29, %v3094_v11  ;;  %v7610_v28 = vadd.f32 %v9765_v15, %v3038_v7  ;;  %v6571_v21 = vpop.f32.mrb[147].mxu1 }
 0x419   :  { %v3095_v0 = vmul.f32 0.2, %v7610_v28  ;;  %6650 = vmatmul.mubr.msk.f32.gmra.mrb[194].mxu0 %vm3348_vm4, %v3119_v12 }
 0x41a   :  { %v3043_v34 = vpop.f32.mrb[148].mxu1  ;;  %6652 = vmatprep.mubr.msk.f32.mxu0 %vm8059_vm0, %v10830_v58 }
 0x41b   :  { %v3120_v5 = vmax.f32 %v7610_v28, %v3095_v0  ;;  %v7611_v1 = vadd.f32 %v9765_v15, %v3043_v34  ;;  %v6574_v3 = vpop.f32.mrb[149].mxu1 }
 0x41d   :  { %v3096_v42 = vmul.f32 0.2, %v7611_v1  ;;  %6653 = vmatmul.mubr.msk.f32.gmra.mrb[196].mxu0 %vm3348_vm4, %v3120_v5 }
 0x41e   :  { %6655 = vmatprep.mubr.msk.f32.mxu0 %vm8059_vm0, %v10830_v58  ;;  %v4510_v30 = vpop.f32.mrb[150].mxu1 }
 0x41f   :  { %v3121_v48 = vmax.f32 %v7611_v1, %v3096_v42  ;;  %v4634_v33 = vmul.f32 0.2, %v4510_v30  ;;  %v4512_v8 = vpop.f32.mrb[151].mxu1 }
 0x421   :  { %6656 = vmatmul.mubr.msk.f32.gmra.mrb[198].mxu0 %vm3348_vm4, %v3121_v48  ;;  %v4659_v47 = vmax.f32 %v4510_v30, %v4634_v33 }
 0x422   :  { %v4515_v44 = vpop.f32.mrb[152].mxu1  ;;  %6688 = vmatprep.mubr.msk.f32.mxu0 %vm8059_vm0, %v10830_v58 }
 0x423   :  { %v4635_v15 = vmul.f32 0.2, %v4515_v44  ;;  %6899 = vmatmul.mubr.msk.f32.vlgmr.msra.gmra.mrb[200].mxu1 %vm3688_vm5, %v4659_v47  ;;  %v4517_v24 = vpop.f32.mrb[153].mxu1 }
 0x424   :  { %6901 = vmatprep.mubr.msk.f32.mxu1 %vm8059_vm0, %v10830_v58 }
 0x425   :  { %v4660_v43 = vmax.f32 %v4515_v44, %v4635_v15 }
 0x426   :  { %v4520_v32 = vpop.f32.mrb[154].mxu1 }
 0x427   :  { %v4636_v10 = vmul.f32 0.2, %v4520_v32  ;;  %6902 = vmatmul.mubr.msk.f32.gmra.mrb[202].mxu1 %vm3688_vm5, %v4660_v43  ;;  %v4522_v53 = vpop.f32.mrb[155].mxu1 }
 0x428   :  { %6904 = vmatprep.mubr.msk.f32.mxu1 %vm8059_vm0, %v10830_v58 }
 0x429   :  { %v4661_v31 = vmax.f32 %v4520_v32, %v4636_v10 }
 0x42a   :  { %v4525_v37 = vpop.f32.mrb[156].mxu1 }
 0x42b   :  { %v4637_v20 = vmul.f32 0.2, %v4525_v37  ;;  %6905 = vmatmul.mubr.msk.f32.gmra.mrb[204].mxu1 %vm3688_vm5, %v4661_v31  ;;  %v4527_v16 = vpop.f32.mrb[157].mxu1 }
 0x42c   :  { %6907 = vmatprep.mubr.msk.f32.mxu1 %vm8059_vm0, %v10830_v58 }
 0x42d   :  { %v4662_v62 = vmax.f32 %v4525_v37, %v4637_v20 }
 0x42e   :  { %v4530_v38 = vpop.f32.mrb[158].mxu1 }
 0x42f   :  { %v4638_v60 = vmul.f32 0.2, %v4530_v38  ;;  %6908 = vmatmul.mubr.msk.f32.gmra.mrb[206].mxu1 %vm3688_vm5, %v4662_v62  ;;  %v4532_v22 = vpop.f32.mrb[159].mxu1 }
 0x430   :  { %6910 = vmatprep.mubr.msk.f32.mxu1 %vm8059_vm0, %v10830_v58 }
 0x431   :  { %v4663_v9 = vmax.f32 %v4530_v38, %v4638_v60 }
 0x432   :  { %v4535_v54 = vpop.f32.mrb[160].mxu1 }
 0x433   :  { %v4639_v55 = vmul.f32 0.2, %v4535_v54  ;;  %6911 = vmatmul.mubr.msk.f32.gmra.mrb[208].mxu1 %vm3688_vm5, %v4663_v9  ;;  %v4537_v52 = vpop.f32.mrb[161].mxu1 }
 0x434   :  { %6913 = vmatprep.mubr.msk.f32.mxu1 %vm8059_vm0, %v10830_v58 }
 0x435   :  { %v4664_v2 = vmax.f32 %v4535_v54, %v4639_v55 }
 0x436   :  { %v4540_v19 = vpop.f32.mrb[162].mxu1 }
 0x437   :  { %v4640_v59 = vmul.f32 0.2, %v4540_v19  ;;  %6914 = vmatmul.mubr.msk.f32.gmra.mrb[210].mxu1 %vm3688_vm5, %v4664_v2  ;;  %v4542_v39 = vpop.f32.mrb[163].mxu1 }
 0x438   :  { %6916 = vmatprep.mubr.msk.f32.mxu1 %vm8059_vm0, %v10830_v58 }
 0x439   :  { %v4665_v49 = vmax.f32 %v4540_v19, %v4640_v59 }
 0x43a   :  { %v4545_v4 = vpop.f32.mrb[164].mxu1 }
 0x43b   :  { %v4641_v50 = vmul.f32 0.2, %v4545_v4  ;;  %6917 = vmatmul.mubr.msk.f32.gmra.mrb[212].mxu1 %vm3688_vm5, %v4665_v49  ;;  %v4547_v45 = vpop.f32.mrb[165].mxu1 }
 0x43c   :  { %6919 = vmatprep.mubr.msk.f32.mxu1 %vm8059_vm0, %v10830_v58 }
 0x43d   :  { %v4666_v46 = vmax.f32 %v4545_v4, %v4641_v50 }
 0x43e   :  { %v4550_v56 = vpop.f32.mrb[166].mxu1 }
 0x43f   :  { %v4642_v27 = vmul.f32 0.2, %v4550_v56  ;;  %6920 = vmatmul.mubr.msk.f32.gmra.mrb[214].mxu1 %vm3688_vm5, %v4666_v46  ;;  %v4552_v14 = vpop.f32.mrb[167].mxu1 }
 0x440   :  { %6922 = vmatprep.mubr.msk.f32.mxu1 %vm8059_vm0, %v10830_v58 }
 0x441   :  { %v4667_v36 = vmax.f32 %v4550_v56, %v4642_v27 }
 0x442   :  { %v4555_v17 = vpop.f32.mrb[168].mxu1 }
 0x443   :  { %v4643_v63 = vmul.f32 0.2, %v4555_v17  ;;  %6923 = vmatmul.mubr.msk.f32.gmra.mrb[216].mxu1 %vm3688_vm5, %v4667_v36  ;;  %v4557_v51 = vpop.f32.mrb[169].mxu1 }
 0x444   :  { %6925 = vmatprep.mubr.msk.f32.mxu1 %vm8059_vm0, %v10830_v58 }
 0x445   :  { %v4668_v40 = vmax.f32 %v4555_v17, %v4643_v63 }
 0x446   :  { %v4560_v26 = vpop.f32.mrb[170].mxu1 }
 0x447   :  { %v4644_v29 = vmul.f32 0.2, %v4560_v26  ;;  %6926 = vmatmul.mubr.msk.f32.gmra.mrb[218].mxu1 %vm3688_vm5, %v4668_v40  ;;  %v4562_v25 = vpop.f32.mrb[171].mxu1 }
 0x448   :  { %6928 = vmatprep.mubr.msk.f32.mxu1 %vm8059_vm0, %v10830_v58 }
 0x449   :  { %v4669_v11 = vmax.f32 %v4560_v26, %v4644_v29 }
 0x44a   :  { %v4565_v7 = vpop.f32.mrb[172].mxu1 }
 0x44b   :  { %v4645_v12 = vmul.f32 0.2, %v4565_v7  ;;  %6929 = vmatmul.mubr.msk.f32.gmra.mrb[220].mxu1 %vm3688_vm5, %v4669_v11  ;;  %v4567_v28 = vpop.f32.mrb[173].mxu1 }
 0x44c   :  { %6931 = vmatprep.mubr.msk.f32.mxu1 %vm8059_vm0, %v10830_v58  ;;  %v4141_v28 = vld [vmem:[#allocation6 + $0x3c0] sm:$0xff] }
 0x44d   :  { %v4670_v21 = vmax.f32 %v4565_v7, %v4645_v12  ;;  %v4140_v12 = vld [vmem:[#allocation6 + $0x3b8] sm:$0xff] }
 0x44e   :  { %v4570_v0 = vpop.f32.mrb[174].mxu1 }
 0x44f   :  { %v4646_v34 = vmul.f32 0.2, %v4570_v0  ;;  %6932 = vmatmul.mubr.msk.f32.gmra.mrb[222].mxu1 %vm3688_vm5, %v4670_v21  ;;  %v4572_v5 = vpop.f32.mrb[175].mxu1 }
 0x450   :  { %6934 = vmatprep.mubr.msk.f32.mxu1 %vm8059_vm0, %v10830_v58  ;;  %v7450_v5 = vpack.c.bf16 %v4141_v28, %v4140_v12  ;;  %v4156_v28 = vld [vmem:[#allocation6 + $0x438] sm:$0xff] }
 0x451   :  { %v4671_v1 = vmax.f32 %v4570_v0, %v4646_v34 }
 0x452   :  { %v4575_v3 = vpop.f32.mrb[176].mxu1 }
 0x453   :  { %v4647_v42 = vmul.f32 0.2, %v4575_v3  ;;  %6935 = vmatmul.mubr.msk.f32.gmra.mrb[224].mxu1 %vm3688_vm5, %v4671_v1  ;;  %v4577_v30 = vpop.f32.mrb[177].mxu1 }
 0x454   :  { %6937 = vmatprep.mubr.msk.f32.mxu1 %vm8059_vm0, %v10830_v58 }
 0x455   :  { %v4672_v48 = vmax.f32 %v4575_v3, %v4647_v42  ;;  %v4142_v3 = vld [vmem:[#allocation6 + $0x3c8] sm:$0xff]  ;;  %v4143_v42 = vld [vmem:[#allocation6 + $0x3d0] sm:$0xff] }
 0x456   :  { %v4580_v33 = vpop.f32.mrb[178].mxu1 }
 0x457   :  { %v4648_v8 = vmul.f32 0.2, %v4580_v33  ;;  %6938 = vmatmul.mubr.msk.f32.gmra.mrb[226].mxu1 %vm3688_vm5, %v4672_v48  ;;  %v4582_v47 = vpop.f32.mrb[179].mxu1 }
 0x458   :  { %6940 = vmatprep.mubr.msk.f32.mxu1 %vm8059_vm0, %v10830_v58 }
 0x459   :  { %v4673_v44 = vmax.f32 %v4580_v33, %v4648_v8  ;;  %v7453_v8 = vpack.c.bf16 %v4143_v42, %v4142_v3  ;;  %v4158_v42 = vld [vmem:[#allocation6 + $0x448] sm:$0xff] }
 0x45a   :  { %v4585_v15 = vpop.f32.mrb[180].mxu1 }
 0x45b   :  { %v4649_v24 = vmul.f32 0.2, %v4585_v15  ;;  %6941 = vmatmul.mubr.msk.f32.gmra.mrb[228].mxu1 %vm3688_vm5, %v4673_v44  ;;  %v4587_v43 = vpop.f32.mrb[181].mxu1  ;;  %v4144_v44 = vld [vmem:[#allocation6 + $0x3d8] sm:$0xff] }
 0x45c   :  { %6943 = vmatprep.mubr.msk.f32.mxu1 %vm8059_vm0, %v10830_v58 }
 0x45d   :  { %v4674_v32 = vmax.f32 %v4585_v15, %v4649_v24  ;;  %v4145_v15 = vld [vmem:[#allocation6 + $0x3e0] sm:$0xff] }
 0x45e   :  { %v4590_v10 = vpop.f32.mrb[182].mxu1 }
 0x45f   :  { %v4650_v53 = vmul.f32 0.2, %v4590_v10  ;;  %6944 = vmatmul.mubr.msk.f32.gmra.mrb[230].mxu1 %vm3688_vm5, %v4674_v32  ;;  %v4592_v31 = vpop.f32.mrb[183].mxu1 }
 0x460   :  { %6946 = vmatprep.mubr.msk.f32.mxu1 %vm8059_vm0, %v10830_v58  ;;  %v4146_v31 = vld [vmem:[#allocation6 + $0x3e8] sm:$0xff] }
 0x461   :  { %v4675_v37 = vmax.f32 %v4590_v10, %v4650_v53  ;;  %v7456_v10 = vpack.c.bf16 %v4145_v15, %v4144_v44  ;;  %v4160_v15 = vld [vmem:[#allocation6 + $0x458] sm:$0xff] }
 0x462   :  { %v4595_v20 = vpop.f32.mrb[184].mxu1 }
 0x463   :  { %v4651_v16 = vmul.f32 0.2, %v4595_v20  ;;  %6947 = vmatmul.mubr.msk.f32.gmra.mrb[232].mxu1 %vm3688_vm5, %v4675_v37  ;;  %v4597_v62 = vpop.f32.mrb[185].mxu1  ;;  %v4147_v37 = vld [vmem:[#allocation6 + $0x3f0] sm:$0xff] }
 0x464   :  { %6949 = vmatprep.mubr.msk.f32.mxu1 %vm8059_vm0, %v10830_v58 }
 0x465   :  { %v4676_v38 = vmax.f32 %v4595_v20, %v4651_v16 }
 0x466   :  { %v4600_v60 = vpop.f32.mrb[186].mxu1 }
 0x467   :  { %v4652_v22 = vmul.f32 0.2, %v4600_v60  ;;  %6950 = vmatmul.mubr.msk.f32.gmra.mrb[234].mxu1 %vm3688_vm5, %v4676_v38  ;;  %v4602_v9 = vpop.f32.mrb[187].mxu1  ;;  %v7459_v38 = vpack.c.bf16 %v4147_v37, %v4146_v31  ;;  %v4162_v37 = vld [vmem:[#allocation6 + $0x468] sm:$0xff] }
 0x468   :  { %6952 = vmatprep.mubr.msk.f32.mxu1 %vm8059_vm0, %v10830_v58  ;;  %v4149_v9 = vld [vmem:[#allocation6 + $0x400] sm:$0xff] }
 0x469   :  { %v4677_v54 = vmax.f32 %v4600_v60, %v4652_v22  ;;  %v4148_v22 = vld [vmem:[#allocation6 + $0x3f8] sm:$0xff] }
 0x46a   :  { %v4605_v55 = vpop.f32.mrb[188].mxu1 }
 0x46b   :  { %v4653_v52 = vmul.f32 0.2, %v4605_v55  ;;  %6953 = vmatmul.mubr.msk.f32.gmra.mrb[236].mxu1 %vm3688_vm5, %v4677_v54  ;;  %v4607_v2 = vpop.f32.mrb[189].mxu1 }
 0x46c   :  { %6955 = vmatprep.mubr.msk.f32.mxu1 %vm8059_vm0, %v10830_v58  ;;  %v7462_v2 = vpack.c.bf16 %v4149_v9, %v4148_v22  ;;  %v4164_v9 = vld [vmem:[#allocation6 + $0x478] sm:$0xff] }
 0x46d   :  { %v4678_v19 = vmax.f32 %v4605_v55, %v4653_v52 }
 0x46e   :  { %v4610_v59 = vpop.f32.mrb[190].mxu1 }
 0x46f   :  { %v4654_v39 = vmul.f32 0.2, %v4610_v59  ;;  %6956 = vmatmul.mubr.msk.f32.gmra.mrb[238].mxu1 %vm3688_vm5, %v4678_v19  ;;  %v4612_v49 = vpop.f32.mrb[191].mxu1 }
 0x470   :  { %6958 = vmatprep.mubr.msk.f32.mxu1 %vm8059_vm0, %v10830_v58 }
 0x471   :  { %v4679_v4 = vmax.f32 %v4610_v59, %v4654_v39  ;;  %v4150_v59 = vld [vmem:[#allocation6 + $0x408] sm:$0xff]  ;;  %v4151_v39 = vld [vmem:[#allocation6 + $0x410] sm:$0xff] }
 0x472   :  { %v4615_v50 = vpop.f32.mrb[192].mxu1 }
 0x473   :  { %v4655_v45 = vmul.f32 0.2, %v4615_v50  ;;  %6959 = vmatmul.mubr.msk.f32.gmra.mrb[240].mxu1 %vm3688_vm5, %v4679_v4  ;;  %v4617_v46 = vpop.f32.mrb[193].mxu1 }
 0x474   :  { %6961 = vmatprep.mubr.msk.f32.mxu1 %vm8059_vm0, %v10830_v58 }
 0x475   :  { %v4680_v56 = vmax.f32 %v4615_v50, %v4655_v45  ;;  %v7465_v45 = vpack.c.bf16 %v4151_v39, %v4150_v59  ;;  %v4166_v39 = vld [vmem:[#allocation6 + $0x488] sm:$0xff] }
 0x476   :  { %v4620_v27 = vpop.f32.mrb[194].mxu1 }
 0x477   :  { %v4656_v14 = vmul.f32 0.2, %v4620_v27  ;;  %6962 = vmatmul.mubr.msk.f32.gmra.mrb[242].mxu1 %vm3688_vm5, %v4680_v56  ;;  %v4622_v36 = vpop.f32.mrb[195].mxu1  ;;  %v4152_v56 = vld [vmem:[#allocation6 + $0x418] sm:$0xff] }
 0x478   :  { %6964 = vmatprep.mubr.msk.f32.mxu1 %vm8059_vm0, %v10830_v58 }
 0x479   :  { %v4681_v17 = vmax.f32 %v4620_v27, %v4656_v14  ;;  %v4153_v27 = vld [vmem:[#allocation6 + $0x420] sm:$0xff] }
 0x47a   :  { %v4625_v63 = vpop.f32.mrb[196].mxu1 }
 0x47b   :  { %v4657_v51 = vmul.f32 0.2, %v4625_v63  ;;  %6965 = vmatmul.mubr.msk.f32.gmra.mrb[244].mxu1 %vm3688_vm5, %v4681_v17  ;;  %v4627_v40 = vpop.f32.mrb[197].mxu1 }
 0x47c   :  { %6967 = vmatprep.mubr.msk.f32.mxu1 %vm8059_vm0, %v10830_v58  ;;  %v4154_v40 = vld [vmem:[#allocation6 + $0x428] sm:$0xff] }
 0x47d   :  { %v4682_v26 = vmax.f32 %v4625_v63, %v4657_v51  ;;  %v7468_v63 = vpack.c.bf16 %v4153_v27, %v4152_v56  ;;  %v4168_v27 = vld [vmem:[#allocation6 + $0x498] sm:$0xff] }
 0x47e   :  { %v4630_v29 = vpop.f32.mrb[198].mxu1 }
 0x47f   :  { %v4658_v25 = vmul.f32 0.2, %v4630_v29  ;;  %6968 = vmatmul.mubr.msk.f32.gmra.mrb[246].mxu1 %vm3688_vm5, %v4682_v26  ;;  %v4632_v11 = vpop.f32.mrb[199].mxu1  ;;  %v4155_v26 = vld [vmem:[#allocation6 + $0x430] sm:$0xff] }
 0x480   :  { %6970 = vmatprep.mubr.msk.f32.mxu1 %vm8059_vm0, %v10830_v58 }
 0x481   :  { %v4683_v7 = vmax.f32 %v4630_v29, %v4658_v25 }
 0x483   :  { %6971 = vmatmul.mubr.msk.f32.gmra.mrb[248].mxu1 %vm3688_vm5, %v4683_v7  ;;  %v7471_v7 = vpack.c.bf16 %v4155_v26, %v4154_v40  ;;  %v4170_v26 = vld [vmem:[#allocation6 + $0x4a8] sm:$0xff] }
 0x494   :  { %v3494_v21 = vpop.f32.mrb[150].mxu0 }
 0x495   :  { %v3618_v0 = vmul.f32 0.2, %v3494_v21  ;;  %v6585_v34 = vpop.f32.mrb[151].mxu0 }
 0x497   :  { %v3643_v1 = vmax.f32 %v3494_v21, %v3618_v0  ;;  %v4157_v21 = vld [vmem:[#allocation6 + $0x440] sm:$0xff] }
 0x498   :  { %v3499_v30 = vpop.f32.mrb[152].mxu0 }
 0x499   :  { %v3619_v48 = vmul.f32 0.2, %v3499_v30  ;;  %v6588_v33 = vpop.f32.mrb[153].mxu0  ;;  %6689 = vmatmul.mubr.msk.f32.vlgmr.msra.gmra.mrb[200].mxu0 %vm3688_vm5, %v3643_v1  ;;  %v7474_v1 = vpack.c.bf16 %v4157_v21, %v4156_v28 }
 0x49a   :  { %7451 = vmatpush1.bf16.msra.mxu0 %v7450_v5  ;;  %6691 = vmatprep.mubr.msk.f32.mxu0 %vm8059_vm0, %v10830_v58 }
 0x49b   :  { %v3644_v47 = vmax.f32 %v3499_v30, %v3619_v48  ;;  %7452 = vmatprep.subr.bf16.mxu0 %v10832_v13  ;;  %v4159_v30 = vld [vmem:[#allocation6 + $0x450] sm:$0xff] }
 0x49c   :  { %v3504_v24 = vpop.f32.mrb[154].mxu0 }
 0x49d   :  { %v3620_v43 = vmul.f32 0.2, %v3504_v24  ;;  %v6591_v32 = vpop.f32.mrb[155].mxu0  ;;  %6692 = vmatmul.mubr.msk.f32.gmra.mrb[202].mxu0 %vm3688_vm5, %v3644_v47  ;;  %v7477_v47 = vpack.c.bf16 %v4159_v30, %v4158_v42 }
 0x49e   :  { %6694 = vmatprep.mubr.msk.f32.mxu0 %vm8059_vm0, %v10830_v58  ;;  %7454 = vmatpush1.bf16.msra.mxu0 %v7453_v8 }
 0x49f   :  { %v3645_v53 = vmax.f32 %v3504_v24, %v3620_v43  ;;  %7455 = vmatprep.subr.bf16.mxu0 %v10832_v13  ;;  %v4161_v24 = vld [vmem:[#allocation6 + $0x460] sm:$0xff] }
 0x4a0   :  { %v3509_v20 = vpop.f32.mrb[156].mxu0 }
 0x4a1   :  { %v3621_v16 = vmul.f32 0.2, %v3509_v20  ;;  %v6594_v62 = vpop.f32.mrb[157].mxu0  ;;  %6695 = vmatmul.mubr.msk.f32.gmra.mrb[204].mxu0 %vm3688_vm5, %v3645_v53  ;;  %v7480_v53 = vpack.c.bf16 %v4161_v24, %v4160_v15 }
 0x4a2   :  { %6697 = vmatprep.mubr.msk.f32.mxu0 %vm8059_vm0, %v10830_v58  ;;  %7457 = vmatpush1.bf16.msra.mxu0 %v7456_v10 }
 0x4a3   :  { %v3646_v60 = vmax.f32 %v3509_v20, %v3621_v16  ;;  %7458 = vmatprep.subr.bf16.mxu0 %v10832_v13  ;;  %v4163_v20 = vld [vmem:[#allocation6 + $0x470] sm:$0xff] }
 0x4a4   :  { %v3514_v54 = vpop.f32.mrb[158].mxu0 }
 0x4a5   :  { %v3622_v55 = vmul.f32 0.2, %v3514_v54  ;;  %v6597_v52 = vpop.f32.mrb[159].mxu0  ;;  %6698 = vmatmul.mubr.msk.f32.gmra.mrb[206].mxu0 %vm3688_vm5, %v3646_v60  ;;  %v7483_v60 = vpack.c.bf16 %v4163_v20, %v4162_v37 }
 0x4a6   :  { %6700 = vmatprep.mubr.msk.f32.mxu0 %vm8059_vm0, %v10830_v58  ;;  %7460 = vmatpush1.bf16.msra.mxu0 %v7459_v38 }
 0x4a7   :  { %v3647_v19 = vmax.f32 %v3514_v54, %v3622_v55  ;;  %7461 = vmatprep.subr.bf16.mxu0 %v10832_v13  ;;  %v4165_v54 = vld [vmem:[#allocation6 + $0x480] sm:$0xff] }
 0x4a8   :  { %v3519_v49 = vpop.f32.mrb[160].mxu0 }
 0x4a9   :  { %v3623_v4 = vmul.f32 0.2, %v3519_v49  ;;  %v6600_v50 = vpop.f32.mrb[161].mxu0  ;;  %6701 = vmatmul.mubr.msk.f32.gmra.mrb[208].mxu0 %vm3688_vm5, %v3647_v19  ;;  %v7486_v19 = vpack.c.bf16 %v4165_v54, %v4164_v9 }
 0x4aa   :  { %6703 = vmatprep.mubr.msk.f32.mxu0 %vm8059_vm0, %v10830_v58  ;;  %7463 = vmatpush1.bf16.msra.mxu0 %v7462_v2 }
 0x4ab   :  { %v3648_v46 = vmax.f32 %v3519_v49, %v3623_v4  ;;  %7464 = vmatprep.subr.bf16.mxu0 %v10832_v13  ;;  %v4167_v49 = vld [vmem:[#allocation6 + $0x490] sm:$0xff] }
 0x4ac   :  { %v3524_v14 = vpop.f32.mrb[162].mxu0 }
 0x4ad   :  { %v3624_v36 = vmul.f32 0.2, %v3524_v14  ;;  %v6603_v17 = vpop.f32.mrb[163].mxu0  ;;  %6704 = vmatmul.mubr.msk.f32.gmra.mrb[210].mxu0 %vm3688_vm5, %v3648_v46  ;;  %v7489_v46 = vpack.c.bf16 %v4167_v49, %v4166_v39 }
 0x4ae   :  { %6706 = vmatprep.mubr.msk.f32.mxu0 %vm8059_vm0, %v10830_v58  ;;  %7466 = vmatpush1.bf16.msra.mxu0 %v7465_v45 }
 0x4af   :  { %v3649_v51 = vmax.f32 %v3524_v14, %v3624_v36  ;;  %7467 = vmatprep.subr.bf16.mxu0 %v10832_v13  ;;  %v4169_v14 = vld [vmem:[#allocation6 + $0x4a0] sm:$0xff] }
 0x4b0   :  { %v3529_v29 = vpop.f32.mrb[164].mxu0 }
 0x4b1   :  { %v3625_v25 = vmul.f32 0.2, %v3529_v29  ;;  %v6606_v11 = vpop.f32.mrb[165].mxu0  ;;  %6707 = vmatmul.mubr.msk.f32.gmra.mrb[212].mxu0 %vm3688_vm5, %v3649_v51  ;;  %v7492_v51 = vpack.c.bf16 %v4169_v14, %v4168_v27  ;;  %v7901_v27 = vld [vmem:[#allocation2 + $0x8] sm:$0xff] }
 0x4b2   :  { %6709 = vmatprep.mubr.msk.f32.mxu0 %vm8059_vm0, %v10830_v58  ;;  %7469 = vmatpush1.bf16.msra.mxu0 %v7468_v63 }
 0x4b3   :  { %v3650_v12 = vmax.f32 %v3529_v29, %v3625_v25  ;;  %7470 = vmatprep.subr.bf16.mxu0 %v10832_v13  ;;  %v4171_v29 = vld [vmem:[#allocation6 + $0x4b0] sm:$0xff] }
 0x4b4   :  { %v3534_v0 = vpop.f32.mrb[166].mxu0 }
 0x4b5   :  { %v3626_v34 = vmul.f32 0.2, %v3534_v0  ;;  %v6609_v5 = vpop.f32.mrb[167].mxu0  ;;  %6710 = vmatmul.mubr.msk.f32.gmra.mrb[214].mxu0 %vm3688_vm5, %v3650_v12  ;;  %v7495_v12 = vpack.c.bf16 %v4171_v29, %v4170_v26 }
 0x4b6   :  { %6712 = vmatprep.mubr.msk.f32.mxu0 %vm8059_vm0, %v10830_v58  ;;  %7472 = vmatpush1.bf16.msra.mxu0 %v7471_v7 }
 0x4b7   :  { %v3651_v3 = vmax.f32 %v3534_v0, %v3626_v34  ;;  %7473 = vmatprep.subr.bf16.mxu0 %v10832_v13 }
 0x4b8   :  { %v3539_v48 = vpop.f32.mrb[168].mxu0 }
 0x4b9   :  { %v3627_v33 = vmul.f32 0.2, %v3539_v48  ;;  %v6612_v8 = vpop.f32.mrb[169].mxu0  ;;  %6713 = vmatmul.mubr.msk.f32.gmra.mrb[216].mxu0 %vm3688_vm5, %v3651_v3 }
 0x4ba   :  { %6715 = vmatprep.mubr.msk.f32.mxu0 %vm8059_vm0, %v10830_v58  ;;  %7475 = vmatpush1.bf16.msra.mxu0 %v7474_v1 }
 0x4bb   :  { %v3652_v44 = vmax.f32 %v3539_v48, %v3627_v33  ;;  %7476 = vmatprep.subr.bf16.mxu0 %v10832_v13 }
 0x4bc   :  { %v3544_v43 = vpop.f32.mrb[170].mxu0 }
 0x4bd   :  { %v3628_v32 = vmul.f32 0.2, %v3544_v43  ;;  %v6615_v10 = vpop.f32.mrb[171].mxu0  ;;  %6716 = vmatmul.mubr.msk.f32.gmra.mrb[218].mxu0 %vm3688_vm5, %v3652_v44 }
 0x4be   :  { %6718 = vmatprep.mubr.msk.f32.mxu0 %vm8059_vm0, %v10830_v58  ;;  %7478 = vmatpush1.bf16.msra.mxu0 %v7477_v47 }
 0x4bf   :  { %v3653_v31 = vmax.f32 %v3544_v43, %v3628_v32  ;;  %7479 = vmatprep.subr.bf16.mxu0 %v10832_v13 }
 0x4c0   :  { %v3549_v16 = vpop.f32.mrb[172].mxu0 }
 0x4c1   :  { %v3629_v62 = vmul.f32 0.2, %v3549_v16  ;;  %v6618_v38 = vpop.f32.mrb[173].mxu0  ;;  %6719 = vmatmul.mubr.msk.f32.gmra.mrb[220].mxu0 %vm3688_vm5, %v3653_v31 }
 0x4c2   :  { %6721 = vmatprep.mubr.msk.f32.mxu0 %vm8059_vm0, %v10830_v58  ;;  %7481 = vmatpush1.bf16.msra.mxu0 %v7480_v53 }
 0x4c3   :  { %v3654_v22 = vmax.f32 %v3549_v16, %v3629_v62  ;;  %7482 = vmatprep.subr.bf16.mxu0 %v10832_v13 }
 0x4c4   :  { %v3554_v55 = vpop.f32.mrb[174].mxu0 }
 0x4c5   :  { %v3630_v52 = vmul.f32 0.2, %v3554_v55  ;;  %v6621_v2 = vpop.f32.mrb[175].mxu0  ;;  %6722 = vmatmul.mubr.msk.f32.gmra.mrb[222].mxu0 %vm3688_vm5, %v3654_v22 }
 0x4c6   :  { %6724 = vmatprep.mubr.msk.f32.mxu0 %vm8059_vm0, %v10830_v58  ;;  %7484 = vmatpush1.bf16.msra.mxu0 %v7483_v60 }
 0x4c7   :  { %v3655_v59 = vmax.f32 %v3554_v55, %v3630_v52  ;;  %7485 = vmatprep.subr.bf16.mxu0 %v10832_v13 }
 0x4c8   :  { %v3559_v4 = vpop.f32.mrb[176].mxu0 }
 0x4c9   :  { %v3631_v50 = vmul.f32 0.2, %v3559_v4  ;;  %v6624_v45 = vpop.f32.mrb[177].mxu0  ;;  %6725 = vmatmul.mubr.msk.f32.gmra.mrb[224].mxu0 %vm3688_vm5, %v3655_v59  ;;  %v10033_v59 = vld [vmem:[#allocation6 + $0x630] ss:$0 sm:$0xff] }
 0x4ca   :  { %6727 = vmatprep.mubr.msk.f32.mxu0 %vm8059_vm0, %v10830_v58  ;;  %7487 = vmatpush1.bf16.msra.mxu0 %v7486_v19 }
 0x4cb   :  { %v3656_v56 = vmax.f32 %v3559_v4, %v3631_v50  ;;  %7488 = vmatprep.subr.bf16.mxu0 %v10832_v13 }
 0x4cc   :  { %v3564_v36 = vpop.f32.mrb[178].mxu0 }
 0x4cd   :  { %v3632_v17 = vmul.f32 0.2, %v3564_v36  ;;  %v6627_v63 = vpop.f32.mrb[179].mxu0  ;;  %6728 = vmatmul.mubr.msk.f32.gmra.mrb[226].mxu0 %vm3688_vm5, %v3656_v56 }
 0x4ce   :  { %6730 = vmatprep.mubr.msk.f32.mxu0 %vm8059_vm0, %v10830_v58  ;;  %7490 = vmatpush1.bf16.msra.mxu0 %v7489_v46 }
 0x4cf   :  { %v3657_v40 = vmax.f32 %v3564_v36, %v3632_v17  ;;  %7491 = vmatprep.subr.bf16.mxu0 %v10832_v13  ;;  %v10040_v36 = vld [vmem:[#allocation6 + $0x638] ss:$0 sm:$0xff] }
 0x4d0   :  { %v3569_v25 = vpop.f32.mrb[180].mxu0 }
 0x4d1   :  { %v3633_v11 = vmul.f32 0.2, %v3569_v25  ;;  %v6630_v7 = vpop.f32.mrb[181].mxu0  ;;  %6731 = vmatmul.mubr.msk.f32.gmra.mrb[228].mxu0 %vm3688_vm5, %v3657_v40  ;;  %v7902_v40 = vld [vmem:[#allocation2] sm:$0xff] }
 0x4d2   :  { %6733 = vmatprep.mubr.msk.f32.mxu0 %vm8059_vm0, %v10830_v58  ;;  %7493 = vmatpush1.bf16.msra.mxu0 %v7492_v51 }
 0x4d3   :  { %v3658_v28 = vmax.f32 %v3569_v25, %v3633_v11  ;;  %7494 = vmatprep.subr.bf16.mxu0 %v10832_v13  ;;  %v7903_v25 = vld [vmem:[#allocation2 + $0x18] sm:$0xff] }
 0x4d4   :  { %v3574_v21 = vpop.f32.mrb[182].mxu0 }
 0x4d5   :  { %v3634_v0 = vmul.f32 0.2, %v3574_v21  ;;  %v6633_v34 = vpop.f32.mrb[183].mxu0  ;;  %6734 = vmatmul.mubr.msk.f32.gmra.mrb[230].mxu0 %vm3688_vm5, %v3658_v28 }
 0x4d6   :  { %6736 = vmatprep.mubr.msk.f32.mxu0 %vm8059_vm0, %v10830_v58  ;;  %7496 = vmatpush1.bf16.msra.mxu0 %v7495_v12 }
 0x4d7   :  { %v3659_v5 = vmax.f32 %v3574_v21, %v3634_v0  ;;  %7545 = vmatprep.subr.bf16.mxu0 %v10832_v13  ;;  %v7904_v0 = vld [vmem:[#allocation2 + $0x10] sm:$0xff] }
 0x4d8   :  { %v3579_v1 = vpop.f32.mrb[184].mxu0 }
 0x4d9   :  { %v3635_v3 = vmul.f32 0.2, %v3579_v1  ;;  %v6636_v42 = vpop.f32.mrb[185].mxu0  ;;  %6737 = vmatmul.mubr.msk.f32.gmra.mrb[232].mxu0 %vm3688_vm5, %v3659_v5 }
 0x4da   :  { %6739 = vmatprep.mubr.msk.f32.mxu0 %vm8059_vm0, %v10830_v58 }
 0x4db   :  { %v3660_v30 = vmax.f32 %v3579_v1, %v3635_v3  ;;  %v7905_v1 = vld [vmem:[#allocation2 + $0x28] sm:$0xff] }
 0x4dc   :  { %v3584_v48 = vpop.f32.mrb[186].mxu0 }
 0x4dd   :  { %v3636_v33 = vmul.f32 0.2, %v3584_v48  ;;  %v6639_v8 = vpop.f32.mrb[187].mxu0  ;;  %6740 = vmatmul.mubr.msk.f32.gmra.mrb[234].mxu0 %vm3688_vm5, %v3660_v30 }
 0x4de   :  { %6742 = vmatprep.mubr.msk.f32.mxu0 %vm8059_vm0, %v10830_v58 }
 0x4df   :  { %v3661_v47 = vmax.f32 %v3584_v48, %v3636_v33  ;;  %v7906_v33 = vld [vmem:[#allocation2 + $0x20] sm:$0xff] }
 0x4e0   :  { %v3589_v44 = vpop.f32.mrb[188].mxu0 }
 0x4e1   :  { %v3637_v15 = vmul.f32 0.2, %v3589_v44  ;;  %v6642_v24 = vpop.f32.mrb[189].mxu0  ;;  %6743 = vmatmul.mubr.msk.f32.gmra.mrb[236].mxu0 %vm3688_vm5, %v3661_v47 }
 0x4e2   :  { %6745 = vmatprep.mubr.msk.f32.mxu0 %vm8059_vm0, %v10830_v58 }
 0x4e3   :  { %v3662_v43 = vmax.f32 %v3589_v44, %v3637_v15  ;;  %v7907_v44 = vld [vmem:[#allocation2 + $0x38] sm:$0xff] }
 0x4e4   :  { %v3594_v32 = vpop.f32.mrb[190].mxu0 }
 0x4e5   :  { %v3638_v10 = vmul.f32 0.2, %v3594_v32  ;;  %v6645_v53 = vpop.f32.mrb[191].mxu0  ;;  %6746 = vmatmul.mubr.msk.f32.gmra.mrb[238].mxu0 %vm3688_vm5, %v3662_v43 }
 0x4e6   :  { %6748 = vmatprep.mubr.msk.f32.mxu0 %vm8059_vm0, %v10830_v58 }
 0x4e7   :  { %v3663_v31 = vmax.f32 %v3594_v32, %v3638_v10  ;;  %v7908_v10 = vld [vmem:[#allocation2 + $0x30] sm:$0xff] }
 0x4e8   :  { %v3599_v37 = vpop.f32.mrb[192].mxu0 }
 0x4e9   :  { %v3639_v20 = vmul.f32 0.2, %v3599_v37  ;;  %v6648_v16 = vpop.f32.mrb[193].mxu0  ;;  %6749 = vmatmul.mubr.msk.f32.gmra.mrb[240].mxu0 %vm3688_vm5, %v3663_v31 }
 0x4ea   :  { %6751 = vmatprep.mubr.msk.f32.mxu0 %vm8059_vm0, %v10830_v58 }
 0x4eb   :  { %v3664_v62 = vmax.f32 %v3599_v37, %v3639_v20  ;;  %v7909_v37 = vld [vmem:[#allocation2 + $0x48] sm:$0xff] }
 0x4ec   :  { %v3604_v38 = vpop.f32.mrb[194].mxu0 }
 0x4ed   :  { %v3640_v60 = vmul.f32 0.2, %v3604_v38  ;;  %v6651_v22 = vpop.f32.mrb[195].mxu0  ;;  %6752 = vmatmul.mubr.msk.f32.gmra.mrb[242].mxu0 %vm3688_vm5, %v3664_v62 }
 0x4ee   :  { %6754 = vmatprep.mubr.msk.f32.mxu0 %vm8059_vm0, %v10830_v58 }
 0x4ef   :  { %v3665_v9 = vmax.f32 %v3604_v38, %v3640_v60  ;;  %v7910_v60 = vld [vmem:[#allocation2 + $0x40] sm:$0xff] }
 0x4f0   :  { %v3609_v54 = vpop.f32.mrb[196].mxu0 }
 0x4f1   :  { %v3641_v55 = vmul.f32 0.2, %v3609_v54  ;;  %v6654_v52 = vpop.f32.mrb[197].mxu0  ;;  %6755 = vmatmul.mubr.msk.f32.gmra.mrb[244].mxu0 %vm3688_vm5, %v3665_v9 }
 0x4f2   :  { %6757 = vmatprep.mubr.msk.f32.mxu0 %vm8059_vm0, %v10830_v58 }
 0x4f3   :  { %v3666_v2 = vmax.f32 %v3609_v54, %v3641_v55  ;;  %v7911_v54 = vld [vmem:[#allocation2 + $0x58] sm:$0xff] }
 0x4f4   :  { %v3614_v19 = vpop.f32.mrb[198].mxu0 }
 0x4f5   :  { %v3642_v39 = vmul.f32 0.2, %v3614_v19  ;;  %v6657_v49 = vpop.f32.mrb[199].mxu0  ;;  %6758 = vmatmul.mubr.msk.f32.gmra.mrb[246].mxu0 %vm3688_vm5, %v3666_v2 }
 0x4f6   :  { %6760 = vmatprep.mubr.msk.f32.mxu0 %vm8059_vm0, %v10830_v58  ;;  %v5160_v4 = vpop.f32.mrb[200].mxu1 }
 0x4f7   :  { %v3667_v50 = vmax.f32 %v3614_v19, %v3642_v39  ;;  %v5161_v45 = vadd.f32 %v10033_v59, %v5160_v4  ;;  %v6900_v46 = vpop.f32.mrb[201].mxu1  ;;  %v7912_v39 = vld [vmem:[#allocation2 + $0x50] sm:$0xff] }
 0x4f9   :  { %6761 = vmatmul.mubr.msk.f32.gmra.mrb[248].mxu0 %vm3688_vm5, %v3667_v50  ;;  %v5284_v56 = vmul.f32 0.2, %v5161_v45  ;;  %v7913_v50 = vld [vmem:[#allocation2 + $0x68] sm:$0xff] }
 0x4fa   :  { %4236 = vmatprep.mubr.f32.mxu0 %v7901_v27  ;;  %v5165_v14 = vpop.f32.mrb[202].mxu1 }
 0x4fb   :  { %v5309_v17 = vmax.f32 %v5161_v45, %v5284_v56  ;;  %v5166_v63 = vadd.f32 %v10033_v59, %v5165_v14  ;;  %v6903_v51 = vpop.f32.mrb[203].mxu1  ;;  %v7914_v14 = vld [vmem:[#allocation2 + $0x60] sm:$0xff] }
 0x4fc   :  { %v7915_v51 = vld [vmem:[#allocation2 + $0x78] sm:$0xff] }
 0x4fd   :  { %4237 = vmatmul.mubr.f32.vlgmr.msra.gmra.mrb[250].mxu0 %v7902_v40  ;;  %v5285_v26 = vmul.f32 0.2, %v5166_v63  ;;  %v5469_v29 = vmul.f32 %v10040_v36, %v5309_v17 }
 0x4fe   :  { %4241 = vmatprep.mubr.f32.mxu0 %v7903_v25  ;;  %v5170_v11 = vpop.f32.mrb[204].mxu1  ;;  %7547 = vmatpush3.bf16.msra.mxu0 %v9725_v35 }
 0x4ff   :  { %v5310_v7 = vmax.f32 %v5166_v63, %v5285_v26  ;;  %v5171_v12 = vadd.f32 %v10033_v59, %v5170_v11  ;;  %v6906_v28 = vpop.f32.mrb[205].mxu1  ;;  %v5494_v21 = vsel %vm4034_vm6, %v5469_v29, 0.0  ;;  %7548 = vmatprep.subr.bf16.mxu0 %v10832_v13 }
 0x500   :  { %5495 = vadd.xlane.f32.xlu0 %v5494_v21  ;;  %v7918_v21 = vld [vmem:[#allocation6 + $0x628] sm:$0xff] }
 0x501   :  { %4242 = vmatmul.mubr.f32.gmra.mrb[252].mxu0 %v7904_v0  ;;  %v5286_v34 = vmul.f32 0.2, %v5171_v12  ;;  %v5470_v5 = vmul.f32 %v10040_v36, %v5310_v7 }
 0x502   :  { %4246 = vmatprep.mubr.f32.mxu0 %v7905_v1  ;;  %v5175_v3 = vpop.f32.mrb[206].mxu1  ;;  %7550 = vmatpush3.bf16.msra.mxu0 %v9731_v23  ;;  %v7919_v1 = vld [vmem:[#allocation2 + $0x80] sm:$0xff] }
 0x503   :  { %v5311_v35 = vmax.f32 %v5171_v12, %v5286_v34  ;;  %v5176_v42 = vadd.f32 %v10033_v59, %v5175_v3  ;;  %v6909_v30 = vpop.f32.mrb[207].mxu1  ;;  %v5497_v48 = vsel %vm4034_vm6, %v5470_v5, 0.0  ;;  %7551 = vmatprep.subr.bf16.mxu0 %v10832_v13  ;;  %v7917_v12 = vld [vmem:[#allocation2 + $0x88] sm:$0xff] }
 0x504   :  { %5498 = vadd.xlane.f32.xlu1 %v5497_v48 }
 0x505   :  { %4247 = vmatmul.mubr.f32.gmra.mrb[254].mxu0 %v7906_v33  ;;  %v5287_v8 = vmul.f32 0.2, %v5176_v42  ;;  %v5471_v47 = vmul.f32 %v10040_v36, %v5311_v35 }
 0x506   :  { %4251 = vmatprep.mubr.f32.mxu0 %v7907_v44  ;;  %v5180_v15 = vpop.f32.mrb[208].mxu1  ;;  %7553 = vmatpush3.bf16.msra.mxu0 %v9737_v61  ;;  %v7921_v44 = vld [vmem:[#allocation2 + $0x90] sm:$0xff] }
 0x507   :  { %v5312_v23 = vmax.f32 %v5176_v42, %v5287_v8  ;;  %v5181_v24 = vadd.f32 %v10033_v59, %v5180_v15  ;;  %v6912_v43 = vpop.f32.mrb[209].mxu1  ;;  %v5500_v32 = vsel %vm4034_vm6, %v5471_v47, 0.0  ;;  %7554 = vmatprep.subr.bf16.mxu0 %v10832_v13  ;;  %v7920_v42 = vld [vmem:[#allocation2 + $0x98] sm:$0xff] }
 0x508   :  { %5501 = vadd.xlane.f32.xlu0 %v5500_v32 }
 0x509   :  { %4252 = vmatmul.mubr.f32.gmra.mrb[0].mxu0 %v7908_v10  ;;  %v5288_v53 = vmul.f32 0.2, %v5181_v24  ;;  %v5472_v31 = vmul.f32 %v10040_v36, %v5312_v23 }
 0x50a   :  { %4256 = vmatprep.mubr.f32.mxu0 %v7909_v37  ;;  %v5185_v20 = vpop.f32.mrb[210].mxu1  ;;  %7556 = vmatpush3.bf16.msra.mxu0 %v9742_v6  ;;  %v7923_v37 = vld [vmem:[#allocation2 + $0xa0] sm:$0xff] }
 0x50b   :  { %v5313_v61 = vmax.f32 %v5181_v24, %v5288_v53  ;;  %v5186_v16 = vadd.f32 %v10033_v59, %v5185_v20  ;;  %v6915_v62 = vpop.f32.mrb[211].mxu1  ;;  %v5503_v38 = vsel %vm4034_vm6, %v5472_v31, 0.0  ;;  %7557 = vmatprep.subr.bf16.mxu0 %v10832_v13  ;;  %v7922_v24 = vld [vmem:[#allocation2 + $0xa8] sm:$0xff] }
 0x50c   :  { %5504 = vadd.xlane.f32.xlu1 %v5503_v38 }
 0x50d   :  { %4257 = vmatmul.mubr.f32.gmra.mrb[2].mxu0 %v7910_v60  ;;  %v5289_v22 = vmul.f32 0.2, %v5186_v16  ;;  %v5473_v9 = vmul.f32 %v10040_v36, %v5313_v61 }
 0x50e   :  { %4261 = vmatprep.mubr.f32.mxu0 %v7911_v54  ;;  %v5190_v55 = vpop.f32.mrb[212].mxu1  ;;  %7559 = vmatpush3.bf16.msra.mxu0 %v9747_v57  ;;  %v7925_v54 = vld [vmem:[#allocation2 + $0xb0] sm:$0xff] }
 0x50f   :  { %v5314_v6 = vmax.f32 %v5186_v16, %v5289_v22  ;;  %v5191_v52 = vadd.f32 %v10033_v59, %v5190_v55  ;;  %v6918_v2 = vpop.f32.mrb[213].mxu1  ;;  %v5506_v19 = vsel %vm4034_vm6, %v5473_v9, 0.0  ;;  %7560 = vmatprep.subr.bf16.mxu0 %v10832_v13  ;;  %v7924_v16 = vld [vmem:[#allocation2 + $0xb8] sm:$0xff] }
 0x510   :  { %5507 = vadd.xlane.f32.xlu0 %v5506_v19 }
 0x511   :  { %4262 = vmatmul.mubr.f32.gmra.mrb[4].mxu0 %v7912_v39  ;;  %v5290_v49 = vmul.f32 0.2, %v5191_v52  ;;  %v5474_v4 = vmul.f32 %v10040_v36, %v5314_v6 }
 0x512   :  { %4266 = vmatprep.mubr.f32.mxu0 %v7913_v50  ;;  %v5195_v45 = vpop.f32.mrb[214].mxu1  ;;  %7562 = vmatpush3.bf16.msra.mxu0 %v9753_v18  ;;  %v7927_v50 = vld [vmem:[#allocation2 + $0xc0] sm:$0xff] }
 0x513   :  { %v5315_v57 = vmax.f32 %v5191_v52, %v5290_v49  ;;  %v5196_v46 = vadd.f32 %v10033_v59, %v5195_v45  ;;  %v6921_v56 = vpop.f32.mrb[215].mxu1  ;;  %v5509_v27 = vsel %vm4034_vm6, %v5474_v4, 0.0  ;;  %7563 = vmatprep.subr.bf16.mxu0 %v10832_v13  ;;  %v7916_v13 = vld [vmem:[#allocation2 + $0x70] sm:$0xff]  ;;  %v7926_v52 = vld [vmem:[#allocation2 + $0xc8] sm:$0xff] }
 0x514   :  { %5510 = vadd.xlane.f32.xlu1 %v5509_v27 }
 0x515   :  { %4267 = vmatmul.mubr.f32.gmra.mrb[6].mxu0 %v7914_v14  ;;  %v5291_v17 = vmul.f32 0.2, %v5196_v46  ;;  %v5475_v63 = vmul.f32 %v10040_v36, %v5315_v57 }
 0x516   :  { %4271 = vmatprep.mubr.f32.mxu0 %v7915_v51  ;;  %v5200_v40 = vpop.f32.mrb[216].mxu1  ;;  %7565 = vmatpush3.bf16.msra.mxu0 %v9760_v41  ;;  %v7929_v51 = vld [vmem:[#allocation2 + $0xd0] sm:$0xff] }
 0x517   :  { %v5316_v18 = vmax.f32 %v5196_v46, %v5291_v17  ;;  %v5201_v26 = vadd.f32 %v10033_v59, %v5200_v40  ;;  %v6924_v29 = vpop.f32.mrb[217].mxu1  ;;  %v5512_v25 = vsel %vm4034_vm6, %v5475_v63, 0.0  ;;  %6791 = vmatprep.subr.mxu0 %v10830_v58  ;;  %v7928_v46 = vld [vmem:[#allocation2 + $0xd8] sm:$0xff] }
 0x518   :  { %5513 = vadd.xlane.f32.xlu0 %v5512_v25 }
 0x519   :  { %4272 = vmatmul.mubr.f32.gmra.mrb[8].mxu0 %v7916_v13  ;;  %v5292_v11 = vmul.f32 0.2, %v5201_v26  ;;  %v5476_v7 = vmul.f32 %v10040_v36, %v5316_v18 }
 0x51a   :  { %4276 = vmatprep.mubr.f32.mxu0 %v7917_v12  ;;  %v5205_v28 = vpop.f32.mrb[218].mxu1  ;;  %6792 = vmatpush3.msra.mxu0 %v7918_v21  ;;  %v7931_v12 = vld [vmem:[#allocation2 + $0xe0] sm:$0xff] }
 0x51b   :  { %v5317_v41 = vmax.f32 %v5201_v26, %v5292_v11  ;;  %v5206_v0 = vadd.f32 %v10033_v59, %v5205_v28  ;;  %v6927_v34 = vpop.f32.mrb[219].mxu1  ;;  %v5515_v5 = vsel %vm4034_vm6, %v5476_v7, 0.0  ;;  %v7930_v26 = vld [vmem:[#allocation2 + $0xe8] sm:$0xff] }
 0x51c   :  { %5516 = vadd.xlane.f32.xlu1 %v5515_v5 }
 0x51d   :  { %4277 = vmatmul.mubr.f32.gmra.mrb[10].mxu0 %v7919_v1  ;;  %v5293_v3 = vmul.f32 0.2, %v5206_v0  ;;  %v5477_v35 = vmul.f32 %v10040_v36, %v5317_v41  ;;  %v7932_v41 = vld [vmem:[#allocation2 + $0xf8] sm:$0xff] }
 0x51e   :  { %4281 = vmatprep.mubr.f32.mxu0 %v7920_v42  ;;  %v5210_v30 = vpop.f32.mrb[220].mxu1 }
 0x51f   :  { %v5318_v48 = vmax.f32 %v5206_v0, %v5293_v3  ;;  %v5211_v33 = vadd.f32 %v10033_v59, %v5210_v30  ;;  %v6930_v8 = vpop.f32.mrb[221].mxu1  ;;  %v5518_v47 = vsel %vm4034_vm6, %v5477_v35, 0.0  ;;  %v7933_v35 = vld [vmem:[#allocation2 + $0xf0] sm:$0xff] }
 0x520   :  { %5519 = vadd.xlane.f32.xlu0 %v5518_v47 }
 0x521   :  { %4282 = vmatmul.mubr.f32.gmra.mrb[12].mxu0 %v7921_v44  ;;  %v5294_v15 = vmul.f32 0.2, %v5211_v33  ;;  %v5478_v23 = vmul.f32 %v10040_v36, %v5318_v48  ;;  %v7934_v48 = vld [vmem:[#allocation2 + $0x108] sm:$0xff] }
 0x522   :  { %4286 = vmatprep.mubr.f32.mxu0 %v7922_v24  ;;  %v5215_v43 = vpop.f32.mrb[222].mxu1 }
 0x523   :  { %v5319_v32 = vmax.f32 %v5211_v33, %v5294_v15  ;;  %v5216_v10 = vadd.f32 %v10033_v59, %v5215_v43  ;;  %v6933_v53 = vpop.f32.mrb[223].mxu1  ;;  %v5521_v31 = vsel %vm4034_vm6, %v5478_v23, 0.0  ;;  %v7935_v23 = vld [vmem:[#allocation2 + $0x100] sm:$0xff] }
 0x524   :  { %5522 = vadd.xlane.f32.xlu1 %v5521_v31 }
 0x525   :  { %4287 = vmatmul.mubr.f32.gmra.mrb[14].mxu0 %v7923_v37  ;;  %v5295_v20 = vmul.f32 0.2, %v5216_v10  ;;  %v5479_v61 = vmul.f32 %v10040_v36, %v5319_v32  ;;  %v7936_v32 = vld [vmem:[#allocation2 + $0x118] sm:$0xff] }
 0x526   :  { %4291 = vmatprep.mubr.f32.mxu0 %v7924_v16  ;;  %v5220_v62 = vpop.f32.mrb[224].mxu1 }
 0x527   :  { %v5320_v38 = vmax.f32 %v5216_v10, %v5295_v20  ;;  %v5221_v60 = vadd.f32 %v10033_v59, %v5220_v62  ;;  %v6936_v22 = vpop.f32.mrb[225].mxu1  ;;  %v5524_v9 = vsel %vm4034_vm6, %v5479_v61, 0.0  ;;  %v7937_v61 = vld [vmem:[#allocation2 + $0x110] sm:$0xff] }
 0x528   :  { %5525 = vadd.xlane.f32.xlu0 %v5524_v9 }
 0x529   :  { %4292 = vmatmul.mubr.f32.gmra.mrb[16].mxu0 %v7925_v54  ;;  %v5296_v55 = vmul.f32 0.2, %v5221_v60  ;;  %v5480_v6 = vmul.f32 %v10040_v36, %v5320_v38  ;;  %v7938_v38 = vld [vmem:[#allocation2 + $0x128] sm:$0xff] }
 0x52a   :  { %4296 = vmatprep.mubr.f32.mxu0 %v7926_v52  ;;  %v5225_v2 = vpop.f32.mrb[226].mxu1 }
 0x52b   :  { %v5321_v19 = vmax.f32 %v5221_v60, %v5296_v55  ;;  %v5226_v39 = vadd.f32 %v10033_v59, %v5225_v2  ;;  %v6939_v49 = vpop.f32.mrb[227].mxu1  ;;  %v5527_v4 = vsel %vm4034_vm6, %v5480_v6, 0.0  ;;  %v7939_v6 = vld [vmem:[#allocation2 + $0x120] sm:$0xff] }
 0x52c   :  { %5528 = vadd.xlane.f32.xlu1 %v5527_v4 }
 0x52d   :  { %4297 = vmatmul.mubr.f32.gmra.mrb[18].mxu0 %v7927_v50  ;;  %v5297_v45 = vmul.f32 0.2, %v5226_v39  ;;  %v5481_v57 = vmul.f32 %v10040_v36, %v5321_v19  ;;  %v7940_v19 = vld [vmem:[#allocation2 + $0x138] sm:$0xff] }
 0x52e   :  { %4301 = vmatprep.mubr.f32.mxu0 %v7928_v46  ;;  %v5230_v56 = vpop.f32.mrb[228].mxu1 }
 0x52f   :  { %v5322_v27 = vmax.f32 %v5226_v39, %v5297_v45  ;;  %v5231_v14 = vadd.f32 %v10033_v59, %v5230_v56  ;;  %v6942_v17 = vpop.f32.mrb[229].mxu1  ;;  %v5530_v63 = vsel %vm4034_vm6, %v5481_v57, 0.0  ;;  %v7941_v57 = vld [vmem:[#allocation2 + $0x130] sm:$0xff] }
 0x530   :  { %5531 = vadd.xlane.f32.xlu0 %v5530_v63 }
 0x531   :  { %4302 = vmatmul.mubr.f32.gmra.mrb[20].mxu0 %v7929_v51  ;;  %v5298_v40 = vmul.f32 0.2, %v5231_v14  ;;  %v5482_v18 = vmul.f32 %v10040_v36, %v5322_v27  ;;  %v7942_v27 = vld [vmem:[#allocation2 + $0x148] sm:$0xff] }
 0x532   :  { %4306 = vmatprep.mubr.f32.mxu0 %v7930_v26  ;;  %v5235_v29 = vpop.f32.mrb[230].mxu1 }
 0x533   :  { %v5323_v25 = vmax.f32 %v5231_v14, %v5298_v40  ;;  %v5236_v13 = vadd.f32 %v10033_v59, %v5235_v29  ;;  %v6945_v11 = vpop.f32.mrb[231].mxu1  ;;  %v5533_v7 = vsel %vm4034_vm6, %v5482_v18, 0.0  ;;  %v7943_v18 = vld [vmem:[#allocation2 + $0x140] sm:$0xff] }
 0x534   :  { %5534 = vadd.xlane.f32.xlu1 %v5533_v7 }
 0x535   :  { %4307 = vmatmul.mubr.f32.gmra.mrb[22].mxu0 %v7931_v12  ;;  %v5299_v28 = vmul.f32 0.2, %v5236_v13  ;;  %v5483_v21 = vmul.f32 %v10040_v36, %v5323_v25  ;;  %v7944_v25 = vld [vmem:[#allocation2 + $0x158] sm:$0xff] }
 0x536   :  { %4311 = vmatprep.mubr.f32.mxu0 %v7932_v41  ;;  %v5240_v0 = vpop.f32.mrb[232].mxu1 }
 0x537   :  { %v5324_v34 = vmax.f32 %v5236_v13, %v5299_v28  ;;  %v5241_v5 = vadd.f32 %v10033_v59, %v5240_v0  ;;  %v6948_v1 = vpop.f32.mrb[233].mxu1  ;;  %v5536_v3 = vsel %vm4034_vm6, %v5483_v21, 0.0  ;;  %v7945_v21 = vld [vmem:[#allocation2 + $0x150] sm:$0xff] }
 0x538   :  { %5537 = vadd.xlane.f32.xlu0 %v5536_v3 }
 0x539   :  { %4312 = vmatmul.mubr.f32.gmra.mrb[24].mxu0 %v7933_v35  ;;  %v5300_v42 = vmul.f32 0.2, %v5241_v5  ;;  %v5484_v30 = vmul.f32 %v10040_v36, %v5324_v34  ;;  %v7946_v34 = vld [vmem:[#allocation2 + $0x168] sm:$0xff] }
 0x53a   :  { %4316 = vmatprep.mubr.f32.mxu0 %v7934_v48  ;;  %v5245_v33 = vpop.f32.mrb[234].mxu1 }
 0x53b   :  { %v5325_v8 = vmax.f32 %v5241_v5, %v5300_v42  ;;  %v5246_v47 = vadd.f32 %v10033_v59, %v5245_v33  ;;  %v6951_v44 = vpop.f32.mrb[235].mxu1  ;;  %v5539_v15 = vsel %vm4034_vm6, %v5484_v30, 0.0  ;;  %v7947_v30 = vld [vmem:[#allocation2 + $0x160] sm:$0xff] }
 0x53c   :  { %5540 = vadd.xlane.f32.xlu1 %v5539_v15 }
 0x53d   :  { %4317 = vmatmul.mubr.f32.gmra.mrb[26].mxu0 %v7935_v23  ;;  %v5301_v24 = vmul.f32 0.2, %v5246_v47  ;;  %v5485_v43 = vmul.f32 %v10040_v36, %v5325_v8  ;;  %v7948_v8 = vld [vmem:[#allocation2 + $0x178] sm:$0xff] }
 0x53e   :  { %4321 = vmatprep.mubr.f32.mxu0 %v7936_v32  ;;  %v5250_v10 = vpop.f32.mrb[236].mxu1 }
 0x53f   :  { %v5326_v53 = vmax.f32 %v5246_v47, %v5301_v24  ;;  %v5251_v31 = vadd.f32 %v10033_v59, %v5250_v10  ;;  %v6954_v37 = vpop.f32.mrb[237].mxu1  ;;  %v5542_v20 = vsel %vm4034_vm6, %v5485_v43, 0.0  ;;  %v7949_v43 = vld [vmem:[#allocation2 + $0x170] sm:$0xff] }
 0x540   :  { %5543 = vadd.xlane.f32.xlu0 %v5542_v20  ;;  %v7951_v20 = vld [vmem:[#allocation2 + $0x180] sm:$0xff] }
 0x541   :  { %4322 = vmatmul.mubr.f32.gmra.mrb[28].mxu0 %v7937_v61  ;;  %v5302_v16 = vmul.f32 0.2, %v5251_v31  ;;  %v5486_v62 = vmul.f32 %v10040_v36, %v5326_v53  ;;  %v7950_v53 = vld [vmem:[#allocation2 + $0x188] sm:$0xff] }
 0x542   :  { %4326 = vmatprep.mubr.f32.mxu0 %v7938_v38  ;;  %v5255_v60 = vpop.f32.mrb[238].mxu1 }
 0x543   :  { %v5327_v22 = vmax.f32 %v5251_v31, %v5302_v16  ;;  %v5256_v9 = vadd.f32 %v10033_v59, %v5255_v60  ;;  %v6957_v54 = vpop.f32.mrb[239].mxu1  ;;  %v5545_v55 = vsel %vm4034_vm6, %v5486_v62, 0.0  ;;  %v10132_v16 = vld [vmem:[#allocation6 + $0x3a0] ss:$0 sm:$0xff] }
 0x544   :  { %5546 = vadd.xlane.f32.xlu1 %v5545_v55  ;;  %v10135_v54 = vld [vmem:[#allocation6 + $0x3a8] ss:$0 sm:$0xff] }
 0x545   :  { %4327 = vmatmul.mubr.f32.gmra.mrb[30].mxu0 %v7939_v6  ;;  %v5303_v52 = vmul.f32 0.2, %v5256_v9  ;;  %v5487_v2 = vmul.f32 %v10040_v36, %v5327_v22 }
 0x546   :  { %4331 = vmatprep.mubr.f32.mxu0 %v7940_v19  ;;  %v5260_v39 = vpop.f32.mrb[240].mxu1 }
 0x547   :  { %v5328_v49 = vmax.f32 %v5256_v9, %v5303_v52  ;;  %v5261_v4 = vadd.f32 %v10033_v59, %v5260_v39  ;;  %v6960_v50 = vpop.f32.mrb[241].mxu1  ;;  %v5548_v45 = vsel %vm4034_vm6, %v5487_v2, 0.0 }
 0x548   :  { %5549 = vadd.xlane.f32.xlu0 %v5548_v45 }
 0x549   :  { %4332 = vmatmul.mubr.f32.gmra.mrb[32].mxu0 %v7941_v57  ;;  %v5304_v46 = vmul.f32 0.2, %v5261_v4  ;;  %v5488_v56 = vmul.f32 %v10040_v36, %v5328_v49 }
 0x54a   :  { %4336 = vmatprep.mubr.f32.mxu0 %v7942_v27  ;;  %v5265_v14 = vpop.f32.mrb[242].mxu1 }
 0x54b   :  { %v5329_v17 = vmax.f32 %v5261_v4, %v5304_v46  ;;  %v5266_v63 = vadd.f32 %v10033_v59, %v5265_v14  ;;  %v6963_v51 = vpop.f32.mrb[243].mxu1  ;;  %v5551_v40 = vsel %vm4034_vm6, %v5488_v56, 0.0 }
 0x54c   :  { %5552 = vadd.xlane.f32.xlu1 %v5551_v40 }
 0x54d   :  { %4337 = vmatmul.mubr.f32.gmra.mrb[34].mxu0 %v7943_v18  ;;  %v5305_v26 = vmul.f32 0.2, %v5266_v63  ;;  %v5489_v29 = vmul.f32 %v10040_v36, %v5329_v17 }
 0x54e   :  { %4341 = vmatprep.mubr.f32.mxu0 %v7944_v25  ;;  %v5270_v13 = vpop.f32.mrb[244].mxu1 }
 0x54f   :  { %v5330_v11 = vmax.f32 %v5266_v63, %v5305_v26  ;;  %v5271_v7 = vadd.f32 %v10033_v59, %v5270_v13  ;;  %v6966_v12 = vpop.f32.mrb[245].mxu1  ;;  %v5554_v28 = vsel %vm4034_vm6, %v5489_v29, 0.0 }
 0x550   :  { %5555 = vadd.xlane.f32.xlu0 %v5554_v28 }
 0x551   :  { %4342 = vmatmul.mubr.f32.gmra.mrb[36].mxu0 %v7945_v21  ;;  %v5306_v41 = vmul.f32 0.2, %v5271_v7  ;;  %v5490_v0 = vmul.f32 %v10040_v36, %v5330_v11 }
 0x552   :  { %4346 = vmatprep.mubr.f32.mxu0 %v7946_v34  ;;  %v5275_v5 = vpop.f32.mrb[246].mxu1 }
 0x553   :  { %v5331_v1 = vmax.f32 %v5271_v7, %v5306_v41  ;;  %v5276_v3 = vadd.f32 %v10033_v59, %v5275_v5  ;;  %v6969_v35 = vpop.f32.mrb[247].mxu1  ;;  %v5557_v42 = vsel %vm4034_vm6, %v5490_v0, 0.0 }
 0x554   :  { %5558 = vadd.xlane.f32.xlu1 %v5557_v42 }
 0x555   :  { %4347 = vmatmul.mubr.f32.gmra.mrb[38].mxu0 %v7947_v30  ;;  %v5307_v48 = vmul.f32 0.2, %v5276_v3  ;;  %v5491_v33 = vmul.f32 %v10040_v36, %v5331_v1 }
 0x556   :  { %4351 = vmatprep.mubr.f32.mxu0 %v7948_v8  ;;  %v5280_v47 = vpop.f32.mrb[248].mxu1 }
 0x557   :  { %v5332_v44 = vmax.f32 %v5276_v3, %v5307_v48  ;;  %v5281_v15 = vadd.f32 %v10033_v59, %v5280_v47  ;;  %v5560_v23 = vsel %vm4034_vm6, %v5491_v33, 0.0  ;;  %v6972_v24 = vpop.f32.mrb[249].mxu1 }
 0x558   :  { %5561 = vadd.xlane.f32.xlu0 %v5560_v23 }
 0x559   :  { %4352 = vmatmul.mubr.f32.gmra.mrb[40].mxu0 %v7949_v43  ;;  %v5308_v32 = vmul.f32 0.2, %v5281_v15  ;;  %v5492_v10 = vmul.f32 %v10040_v36, %v5332_v44 }
 0x55a   :  { %4356 = vmatprep.mubr.f32.mxu0 %v7950_v53 }
 0x55b   :  { %v5333_v31 = vmax.f32 %v5281_v15, %v5308_v32  ;;  %v5563_v37 = vsel %vm4034_vm6, %v5492_v10, 0.0 }
 0x55c   :  { %5564 = vadd.xlane.f32.xlu1 %v5563_v37 }
 0x55d   :  { %4357 = vmatmul.mubr.f32.gmra.mrb[42].mxu0 %v7951_v20  ;;  %v5493_v61 = vmul.f32 %v10040_v36, %v5333_v31 }
 0x55e   :  { %6793 = vmatprep.mubr.msk.f32.mxu0 %vm8059_vm0, %v10830_v58 }
 0x55f   :  { %v5566_v59 = vsel %vm4034_vm6, %v5493_v61, 0.0 }
 0x560   :  { %5567 = vadd.xlane.f32.xlu0 %v5566_v59 }
 0x56c   :  { %v3830_v62 = vpop.f32.mrb[200].mxu0 }
 0x56d   :  { %v3831_v38 = vadd.f32 %v10132_v16, %v3830_v62  ;;  %v6690_v60 = vpop.f32.mrb[201].mxu0 }
 0x56f   :  { %v3954_v22 = vmul.f32 0.2, %v3831_v38 }
 0x570   :  { %v3835_v9 = vpop.f32.mrb[202].mxu0 }
 0x571   :  { %v3979_v55 = vmax.f32 %v3831_v38, %v3954_v22  ;;  %v3836_v6 = vadd.f32 %v10132_v16, %v3835_v9  ;;  %v6693_v36 = vpop.f32.mrb[203].mxu0 }
 0x573   :  { %v3955_v52 = vmul.f32 0.2, %v3836_v6  ;;  %v4009_v2 = vmul.f32 %v10135_v54, %v3979_v55 }
 0x574   :  { %v3840_v19 = vpop.f32.mrb[204].mxu0 }
 0x575   :  { %v3980_v39 = vmax.f32 %v3836_v6, %v3955_v52  ;;  %v3841_v49 = vadd.f32 %v10132_v16, %v3840_v19  ;;  %v6696_v4 = vpop.f32.mrb[205].mxu0  ;;  %v4035_v50 = vsel %vm4034_vm6, %v4009_v2, 0.0 }
 0x576   :  { %4036 = vadd.xlane.f32.xlu0 %v4035_v50 }
 0x577   :  { %v3956_v45 = vmul.f32 0.2, %v3841_v49  ;;  %v4010_v57 = vmul.f32 %v10135_v54, %v3980_v39 }
 0x578   :  { %v3845_v46 = vpop.f32.mrb[206].mxu0 }
 0x579   :  { %v3981_v56 = vmax.f32 %v3841_v49, %v3956_v45  ;;  %v3846_v27 = vadd.f32 %v10132_v16, %v3845_v46  ;;  %v6699_v14 = vpop.f32.mrb[207].mxu0  ;;  %v4038_v17 = vsel %vm4034_vm6, %v4010_v57, 0.0 }
 0x57a   :  { %4039 = vadd.xlane.f32.xlu0 %v4038_v17 }
 0x57b   :  { %v3957_v63 = vmul.f32 0.2, %v3846_v27  ;;  %v4011_v51 = vmul.f32 %v10135_v54, %v3981_v56 }
 0x57c   :  { %v3850_v40 = vpop.f32.mrb[208].mxu0 }
 0x57d   :  { %v3982_v18 = vmax.f32 %v3846_v27, %v3957_v63  ;;  %v3851_v26 = vadd.f32 %v10132_v16, %v3850_v40  ;;  %v6702_v29 = vpop.f32.mrb[209].mxu0  ;;  %v4041_v25 = vsel %vm4034_vm6, %v4011_v51, 0.0 }
 0x57e   :  { %4042 = vadd.xlane.f32.xlu1 %v4041_v25 }
 0x57f   :  { %v3958_v13 = vmul.f32 0.2, %v3851_v26  ;;  %v4012_v11 = vmul.f32 %v10135_v54, %v3982_v18 }
 0x580   :  { %v3855_v7 = vpop.f32.mrb[210].mxu0 }
 0x581   :  { %v3983_v12 = vmax.f32 %v3851_v26, %v3958_v13  ;;  %v3856_v28 = vadd.f32 %v10132_v16, %v3855_v7  ;;  %v6705_v21 = vpop.f32.mrb[211].mxu0  ;;  %v4044_v41 = vsel %vm4034_vm6, %v4012_v11, 0.0 }
 0x582   :  { %4045 = vadd.xlane.f32.xlu1 %v4044_v41 }
 0x583   :  { %v3959_v0 = vmul.f32 0.2, %v3856_v28  ;;  %v4013_v34 = vmul.f32 %v10135_v54, %v3983_v12 }
 0x584   :  { %v3860_v5 = vpop.f32.mrb[212].mxu0 }
 0x585   :  { %v3984_v1 = vmax.f32 %v3856_v28, %v3959_v0  ;;  %v3861_v3 = vadd.f32 %v10132_v16, %v3860_v5  ;;  %v6708_v35 = vpop.f32.mrb[213].mxu0  ;;  %v4047_v42 = vsel %vm4034_vm6, %v4013_v34, 0.0 }
 0x586   :  { %4048 = vadd.xlane.f32.xlu0 %v4047_v42 }
 0x587   :  { %v3960_v30 = vmul.f32 0.2, %v3861_v3  ;;  %v4014_v48 = vmul.f32 %v10135_v54, %v3984_v1 }
 0x588   :  { %v3865_v33 = vpop.f32.mrb[214].mxu0 }
 0x589   :  { %v3985_v8 = vmax.f32 %v3861_v3, %v3960_v30  ;;  %v3866_v47 = vadd.f32 %v10132_v16, %v3865_v33  ;;  %v6711_v44 = vpop.f32.mrb[215].mxu0  ;;  %v4050_v15 = vsel %vm4034_vm6, %v4014_v48, 0.0 }
 0x58a   :  { %4051 = vadd.xlane.f32.xlu1 %v4050_v15 }
 0x58b   :  { %v3961_v23 = vmul.f32 0.2, %v3866_v47  ;;  %v4015_v24 = vmul.f32 %v10135_v54, %v3985_v8 }
 0x58c   :  { %v3870_v43 = vpop.f32.mrb[216].mxu0 }
 0x58d   :  { %v3986_v32 = vmax.f32 %v3866_v47, %v3961_v23  ;;  %v3871_v10 = vadd.f32 %v10132_v16, %v3870_v43  ;;  %v6714_v53 = vpop.f32.mrb[217].mxu0  ;;  %v4053_v31 = vsel %vm4034_vm6, %v4015_v24, 0.0 }
 0x58e   :  { %4054 = vadd.xlane.f32.xlu0 %v4053_v31 }
 0x58f   :  { %v3962_v37 = vmul.f32 0.2, %v3871_v10  ;;  %v4016_v20 = vmul.f32 %v10135_v54, %v3986_v32 }
 0x590   :  { %v3875_v61 = vpop.f32.mrb[218].mxu0 }
 0x591   :  { %v3987_v59 = vmax.f32 %v3871_v10, %v3962_v37  ;;  %v3876_v62 = vadd.f32 %v10132_v16, %v3875_v61  ;;  %v6717_v38 = vpop.f32.mrb[219].mxu0  ;;  %v4056_v60 = vsel %vm4034_vm6, %v4016_v20, 0.0 }
 0x592   :  { %4057 = vadd.xlane.f32.xlu1 %v4056_v60 }
 0x593   :  { %v3963_v22 = vmul.f32 0.2, %v3876_v62  ;;  %v4017_v9 = vmul.f32 %v10135_v54, %v3987_v59 }
 0x594   :  { %v3880_v55 = vpop.f32.mrb[220].mxu0 }
 0x595   :  { %v3988_v6 = vmax.f32 %v3876_v62, %v3963_v22  ;;  %v3881_v36 = vadd.f32 %v10132_v16, %v3880_v55  ;;  %v6720_v52 = vpop.f32.mrb[221].mxu0  ;;  %v4059_v2 = vsel %vm4034_vm6, %v4017_v9, 0.0 }
 0x596   :  { %4060 = vadd.xlane.f32.xlu0 %v4059_v2 }
 0x597   :  { %v3964_v19 = vmul.f32 0.2, %v3881_v36  ;;  %v4018_v39 = vmul.f32 %v10135_v54, %v3988_v6 }
 0x598   :  { %v3885_v49 = vpop.f32.mrb[222].mxu0 }
 0x599   :  { %v3989_v4 = vmax.f32 %v3881_v36, %v3964_v19  ;;  %v3886_v50 = vadd.f32 %v10132_v16, %v3885_v49  ;;  %v6723_v45 = vpop.f32.mrb[223].mxu0  ;;  %v4062_v57 = vsel %vm4034_vm6, %v4018_v39, 0.0 }
 0x59a   :  { %4063 = vadd.xlane.f32.xlu1 %v4062_v57 }
 0x59b   :  { %v3965_v46 = vmul.f32 0.2, %v3886_v50  ;;  %v4019_v56 = vmul.f32 %v10135_v54, %v3989_v4 }
 0x59c   :  { %v3890_v27 = vpop.f32.mrb[224].mxu0 }
 0x59d   :  { %v3990_v14 = vmax.f32 %v3886_v50, %v3965_v46  ;;  %v3891_v17 = vadd.f32 %v10132_v16, %v3890_v27  ;;  %v6726_v63 = vpop.f32.mrb[225].mxu0  ;;  %v4065_v51 = vsel %vm4034_vm6, %v4019_v56, 0.0 }
 0x59e   :  { %4066 = vadd.xlane.f32.xlu0 %v4065_v51 }
 0x59f   :  { %v3966_v40 = vmul.f32 0.2, %v3891_v17  ;;  %v4020_v18 = vmul.f32 %v10135_v54, %v3990_v14 }
 0x5a0   :  { %v3895_v26 = vpop.f32.mrb[226].mxu0 }
 0x5a1   :  { %v3991_v29 = vmax.f32 %v3891_v17, %v3966_v40  ;;  %v3896_v25 = vadd.f32 %v10132_v16, %v3895_v26  ;;  %v6729_v13 = vpop.f32.mrb[227].mxu0  ;;  %v4068_v11 = vsel %vm4034_vm6, %v4020_v18, 0.0 }
 0x5a2   :  { %4069 = vadd.xlane.f32.xlu1 %v4068_v11 }
 0x5a3   :  { %v3967_v7 = vmul.f32 0.2, %v3896_v25  ;;  %v4021_v12 = vmul.f32 %v10135_v54, %v3991_v29 }
 0x5a4   :  { %v3900_v28 = vpop.f32.mrb[228].mxu0 }
 0x5a5   :  { %v3992_v21 = vmax.f32 %v3896_v25, %v3967_v7  ;;  %v3901_v41 = vadd.f32 %v10132_v16, %v3900_v28  ;;  %v6732_v0 = vpop.f32.mrb[229].mxu0  ;;  %v4071_v34 = vsel %vm4034_vm6, %v4021_v12, 0.0  ;;  %v10201_v28 = vpop.xlane.xlu0 %5495 }
 0x5a6   :  { %4072 = vadd.xlane.f32.xlu0 %v4071_v34 }
 0x5a7   :  { %v3968_v5 = vmul.f32 0.2, %v3901_v41  ;;  %v4022_v1 = vmul.f32 %v10135_v54, %v3992_v21 }
 0x5a8   :  { %v3905_v3 = vpop.f32.mrb[230].mxu0 }
 0x5a9   :  { %v3993_v35 = vmax.f32 %v3901_v41, %v3968_v5  ;;  %v3906_v42 = vadd.f32 %v10132_v16, %v3905_v3  ;;  %v6735_v30 = vpop.f32.mrb[231].mxu0  ;;  %v4074_v48 = vsel %vm4034_vm6, %v4022_v1, 0.0 }
 0x5aa   :  { %4075 = vadd.xlane.f32.xlu1 %v4074_v48  ;;  %v10207_v48 = vpop.xlane.xlu0 %5501 }
 0x5ab   :  { %v3969_v33 = vmul.f32 0.2, %v3906_v42  ;;  %v4023_v8 = vmul.f32 %v10135_v54, %v3993_v35 }
 0x5ac   :  { %v3910_v47 = vpop.f32.mrb[232].mxu0 }
 0x5ad   :  { %v3994_v44 = vmax.f32 %v3906_v42, %v3969_v33  ;;  %v3911_v15 = vadd.f32 %v10132_v16, %v3910_v47  ;;  %v6738_v23 = vpop.f32.mrb[233].mxu0  ;;  %v4077_v24 = vsel %vm4034_vm6, %v4023_v8, 0.0 }
 0x5ae   :  { %4078 = vadd.xlane.f32.xlu0 %v4077_v24 }
 0x5af   :  { %v3970_v43 = vmul.f32 0.2, %v3911_v15  ;;  %v4024_v32 = vmul.f32 %v10135_v54, %v3994_v44 }
 0x5b0   :  { %v3915_v10 = vpop.f32.mrb[234].mxu0 }
 0x5b1   :  { %v3995_v53 = vmax.f32 %v3911_v15, %v3970_v43  ;;  %v3916_v31 = vadd.f32 %v10132_v16, %v3915_v10  ;;  %v6741_v37 = vpop.f32.mrb[235].mxu0  ;;  %v4080_v20 = vsel %vm4034_vm6, %v4024_v32, 0.0  ;;  %v10211_v15 = vpop.xlane.xlu1 %5498 }
 0x5b2   :  { %4081 = vadd.xlane.f32.xlu1 %v4080_v20  ;;  %v10215_v37 = vpop.xlane.xlu0 %5507 }
 0x5b3   :  { %v3971_v61 = vmul.f32 0.2, %v3916_v31  ;;  %v4025_v59 = vmul.f32 %v10135_v54, %v3995_v53 }
 0x5b4   :  { %v3920_v62 = vpop.f32.mrb[236].mxu0 }
 0x5b5   :  { %v3996_v38 = vmax.f32 %v3916_v31, %v3971_v61  ;;  %v3921_v60 = vadd.f32 %v10132_v16, %v3920_v62  ;;  %v6744_v22 = vpop.f32.mrb[237].mxu0  ;;  %v4083_v9 = vsel %vm4034_vm6, %v4025_v59, 0.0  ;;  %v10218_v61 = vpop.xlane.xlu1 %5504 }
 0x5b6   :  { %4084 = vadd.xlane.f32.xlu0 %v4083_v9 }
 0x5b7   :  { %v3972_v55 = vmul.f32 0.2, %v3921_v60  ;;  %v4026_v6 = vmul.f32 %v10135_v54, %v3996_v38 }
 0x5b8   :  { %v3925_v36 = vpop.f32.mrb[238].mxu0 }
 0x5b9   :  { %v3997_v52 = vmax.f32 %v3921_v60, %v3972_v55  ;;  %v3926_v2 = vadd.f32 %v10132_v16, %v3925_v36  ;;  %v6747_v19 = vpop.f32.mrb[239].mxu0  ;;  %v4086_v39 = vsel %vm4034_vm6, %v4026_v6, 0.0  ;;  %v10224_v55 = vpop.xlane.xlu0 %5513 }
 0x5ba   :  { %4087 = vadd.xlane.f32.xlu1 %v4086_v39 }
 0x5bb   :  { %v3973_v49 = vmul.f32 0.2, %v3926_v2  ;;  %v4027_v4 = vmul.f32 %v10135_v54, %v3997_v52 }
 0x5bc   :  { %v3930_v50 = vpop.f32.mrb[240].mxu0 }
 0x5bd   :  { %v3998_v45 = vmax.f32 %v3926_v2, %v3973_v49  ;;  %v3931_v57 = vadd.f32 %v10132_v16, %v3930_v50  ;;  %v6750_v46 = vpop.f32.mrb[241].mxu0  ;;  %v4089_v56 = vsel %vm4034_vm6, %v4027_v4, 0.0  ;;  %v10232_v49 = vpop.xlane.xlu0 %5519 }
 0x5be   :  { %4090 = vadd.xlane.f32.xlu0 %v4089_v56 }
 0x5bf   :  { %v3974_v27 = vmul.f32 0.2, %v3931_v57  ;;  %v4028_v14 = vmul.f32 %v10135_v54, %v3998_v45 }
 0x5c0   :  { %v3935_v17 = vpop.f32.mrb[242].mxu0 }
 0x5c1   :  { %v3999_v63 = vmax.f32 %v3931_v57, %v3974_v27  ;;  %v3936_v51 = vadd.f32 %v10132_v16, %v3935_v17  ;;  %v6753_v40 = vpop.f32.mrb[243].mxu0  ;;  %v4092_v18 = vsel %vm4034_vm6, %v4028_v14, 0.0  ;;  %v10241_v27 = vpop.xlane.xlu0 %5525 }
 0x5c2   :  { %4093 = vadd.xlane.f32.xlu1 %v4092_v18 }
 0x5c3   :  { %v3975_v26 = vmul.f32 0.2, %v3936_v51  ;;  %v4029_v29 = vmul.f32 %v10135_v54, %v3999_v63 }
 0x5c4   :  { %v3940_v25 = vpop.f32.mrb[244].mxu0 }
 0x5c5   :  { %v4000_v13 = vmax.f32 %v3936_v51, %v3975_v26  ;;  %v3941_v11 = vadd.f32 %v10132_v16, %v3940_v25  ;;  %v6756_v7 = vpop.f32.mrb[245].mxu0  ;;  %v4095_v12 = vsel %vm4034_vm6, %v4029_v29, 0.0  ;;  %v10249_v25 = vpop.xlane.xlu0 %5531 }
 0x5c6   :  { %4096 = vadd.xlane.f32.xlu0 %v4095_v12 }
 0x5c7   :  { %v3976_v21 = vmul.f32 0.2, %v3941_v11  ;;  %v4030_v41 = vmul.f32 %v10135_v54, %v4000_v13 }
 0x5c8   :  { %v3945_v0 = vpop.f32.mrb[246].mxu0 }
 0x5c9   :  { %v4001_v34 = vmax.f32 %v3941_v11, %v3976_v21  ;;  %v3946_v5 = vadd.f32 %v10132_v16, %v3945_v0  ;;  %v6759_v1 = vpop.f32.mrb[247].mxu0  ;;  %v4098_v3 = vsel %vm4034_vm6, %v4030_v41, 0.0  ;;  %v10258_v0 = vpop.xlane.xlu0 %5537 }
 0x5ca   :  { %4099 = vadd.xlane.f32.xlu1 %v4098_v3 }
 0x5cb   :  { %v3977_v35 = vmul.f32 0.2, %v3946_v5  ;;  %v4031_v42 = vmul.f32 %v10135_v54, %v4001_v34 }
 0x5cc   :  { %v3950_v30 = vpop.f32.mrb[248].mxu0 }
 0x5cd   :  { %v4002_v33 = vmax.f32 %v3946_v5, %v3977_v35  ;;  %v3951_v8 = vadd.f32 %v10132_v16, %v3950_v30  ;;  %v6762_v47 = vpop.f32.mrb[249].mxu0  ;;  %v4101_v44 = vsel %vm4034_vm6, %v4031_v42, 0.0 }
 0x5ce   :  { %4102 = vadd.xlane.f32.xlu0 %v4101_v44 }
 0x5cf   :  { %v3978_v23 = vmul.f32 0.2, %v3951_v8  ;;  %v4032_v24 = vmul.f32 %v10135_v54, %v4002_v33 }
 0x5d0   :  { %v4238_v43 = vpop.f32.mrb[250].mxu0 }
 0x5d1   :  { %v4003_v32 = vmax.f32 %v3951_v8, %v3978_v23  ;;  %v4362_v10 = vmul.f32 0.2, %v4238_v43  ;;  %v4240_v53 = vpop.f32.mrb[251].mxu0  ;;  %v4104_v31 = vsel %vm4034_vm6, %v4032_v24, 0.0  ;;  %v10266_v8 = vpop.xlane.xlu0 %5543 }
 0x5d2   :  { %4105 = vadd.xlane.f32.xlu1 %v4104_v31 }
 0x5d3   :  { %v4387_v20 = vmax.f32 %v4238_v43, %v4362_v10  ;;  %v4033_v16 = vmul.f32 %v10135_v54, %v4003_v32  ;;  %v10227_v54 = vpop.xlane.xlu1 %5510 }
 0x5d4   :  { %v4243_v59 = vpop.f32.mrb[252].mxu0 }
 0x5d5   :  { %v4363_v62 = vmul.f32 0.2, %v4243_v59  ;;  %v4245_v38 = vpop.f32.mrb[253].mxu0  ;;  %6794 = vmatmul.mubr.msk.f32.vlgmr.msra.gmra.mrb[44].mxu0 %vm3688_vm5, %v4387_v20  ;;  %v4107_v60 = vsel %vm4034_vm6, %v4033_v16, 0.0  ;;  %v10275_v10 = vpop.xlane.xlu0 %5549 }
 0x5d6   :  { %4108 = vadd.xlane.f32.xlu0 %v4107_v60  ;;  %6796 = vmatprep.mubr.msk.f32.mxu0 %vm8059_vm0, %v10830_v58 }
 0x5d7   :  { %v4388_v22 = vmax.f32 %v4243_v59, %v4363_v62  ;;  %v10236_v50 = vpop.xlane.xlu1 %5516 }
 0x5d8   :  { %v4248_v9 = vpop.f32.mrb[254].mxu0 }
 0x5d9   :  { %v4364_v6 = vmul.f32 0.2, %v4248_v9  ;;  %v4250_v36 = vpop.f32.mrb[255].mxu0  ;;  %6797 = vmatmul.mubr.msk.f32.gmra.mrb[46].mxu0 %vm3688_vm5, %v4388_v22 }
 0x5da   :  { %6799 = vmatprep.mubr.msk.f32.mxu0 %vm8059_vm0, %v10830_v58 }
 0x5db   :  { %v4389_v52 = vmax.f32 %v4248_v9, %v4364_v6  ;;  %v10244_v51 = vpop.xlane.xlu1 %5522 }
 0x5dc   :  { %v4253_v2 = vpop.f32.mrb[0].mxu0 }
 0x5dd   :  { %v4365_v19 = vmul.f32 0.2, %v4253_v2  ;;  %v4255_v39 = vpop.f32.mrb[1].mxu0  ;;  %6800 = vmatmul.mubr.msk.f32.gmra.mrb[48].mxu0 %vm3688_vm5, %v4389_v52  ;;  %v10283_v22 = vpop.xlane.xlu0 %5555 }
 0x5de   :  { %6802 = vmatprep.mubr.msk.f32.mxu0 %vm8059_vm0, %v10830_v58 }
 0x5df   :  { %v4390_v4 = vmax.f32 %v4253_v2, %v4365_v19  ;;  %v10253_v11 = vpop.xlane.xlu1 %5528 }
 0x5e0   :  { %v4258_v45 = vpop.f32.mrb[2].mxu0 }
 0x5e1   :  { %v4366_v57 = vmul.f32 0.2, %v4258_v45  ;;  %v4260_v46 = vpop.f32.mrb[3].mxu0  ;;  %6803 = vmatmul.mubr.msk.f32.gmra.mrb[50].mxu0 %vm3688_vm5, %v4390_v4 }
 0x5e2   :  { %6805 = vmatprep.mubr.msk.f32.mxu0 %vm8059_vm0, %v10830_v58 }
 0x5e3   :  { %v4391_v56 = vmax.f32 %v4258_v45, %v4366_v57  ;;  %v10261_v3 = vpop.xlane.xlu1 %5534 }
 0x5e4   :  { %v4263_v14 = vpop.f32.mrb[4].mxu0 }
 0x5e5   :  { %v4367_v17 = vmul.f32 0.2, %v4263_v14  ;;  %v4265_v63 = vpop.f32.mrb[5].mxu0  ;;  %6806 = vmatmul.mubr.msk.f32.gmra.mrb[52].mxu0 %vm3688_vm5, %v4391_v56  ;;  %v10292_v39 = vpop.xlane.xlu0 %5561 }
 0x5e6   :  { %6808 = vmatprep.mubr.msk.f32.mxu0 %vm8059_vm0, %v10830_v58 }
 0x5e7   :  { %v4392_v40 = vmax.f32 %v4263_v14, %v4367_v17  ;;  %v10270_v44 = vpop.xlane.xlu1 %5540 }
 0x5e8   :  { %v4268_v18 = vpop.f32.mrb[6].mxu0 }
 0x5e9   :  { %v4368_v26 = vmul.f32 0.2, %v4268_v18  ;;  %v4270_v29 = vpop.f32.mrb[7].mxu0  ;;  %6809 = vmatmul.mubr.msk.f32.gmra.mrb[54].mxu0 %vm3688_vm5, %v4392_v40 }
 0x5ea   :  { %6811 = vmatprep.mubr.msk.f32.mxu0 %vm8059_vm0, %v10830_v58 }
 0x5eb   :  { %v4393_v13 = vmax.f32 %v4268_v18, %v4368_v26  ;;  %v10277_v31 = vpop.xlane.xlu1 %5546 }
 0x5ec   :  { %v4273_v7 = vpop.f32.mrb[8].mxu0 }
 0x5ed   :  { %v4369_v12 = vmul.f32 0.2, %v4273_v7  ;;  %v4275_v21 = vpop.f32.mrb[9].mxu0  ;;  %6812 = vmatmul.mubr.msk.f32.gmra.mrb[56].mxu0 %vm3688_vm5, %v4393_v13  ;;  %v10300_v40 = vpop.xlane.xlu0 %5567 }
 0x5ee   :  { %6814 = vmatprep.mubr.msk.f32.mxu0 %vm8059_vm0, %v10830_v58 }
 0x5ef   :  { %v4394_v41 = vmax.f32 %v4273_v7, %v4369_v12  ;;  %v10287_v9 = vpop.xlane.xlu1 %5552 }
 0x5f0   :  { %v4278_v34 = vpop.f32.mrb[10].mxu0 }
 0x5f1   :  { %v4370_v5 = vmul.f32 0.2, %v4278_v34  ;;  %v4280_v1 = vpop.f32.mrb[11].mxu0  ;;  %6815 = vmatmul.mubr.msk.f32.gmra.mrb[58].mxu0 %vm3688_vm5, %v4394_v41 }
 0x5f2   :  { %6817 = vmatprep.mubr.msk.f32.mxu0 %vm8059_vm0, %v10830_v58 }
 0x5f3   :  { %v4395_v35 = vmax.f32 %v4278_v34, %v4370_v5  ;;  %v10294_v45 = vpop.xlane.xlu1 %5558 }
 0x5f4   :  { %v4283_v42 = vpop.f32.mrb[12].mxu0 }
 0x5f5   :  { %v4371_v30 = vmul.f32 0.2, %v4283_v42  ;;  %v4285_v33 = vpop.f32.mrb[13].mxu0  ;;  %6818 = vmatmul.mubr.msk.f32.gmra.mrb[60].mxu0 %vm3688_vm5, %v4395_v35 }
 0x5f6   :  { %6820 = vmatprep.mubr.msk.f32.mxu0 %vm8059_vm0, %v10830_v58 }
 0x5f7   :  { %v4396_v47 = vmax.f32 %v4283_v42, %v4371_v30  ;;  %v10304_v18 = vpop.xlane.xlu1 %5564 }
 0x5f8   :  { %v4288_v23 = vpop.f32.mrb[14].mxu0 }
 0x5f9   :  { %v4372_v24 = vmul.f32 0.2, %v4288_v23  ;;  %v4290_v43 = vpop.f32.mrb[15].mxu0  ;;  %6821 = vmatmul.mubr.msk.f32.gmra.mrb[62].mxu0 %vm3688_vm5, %v4396_v47 }
 0x5fa   :  { %6823 = vmatprep.mubr.msk.f32.mxu0 %vm8059_vm0, %v10830_v58 }
 0x5fb   :  { %v4397_v32 = vmax.f32 %v4288_v23, %v4372_v24 }
 0x5fc   :  { %v4293_v53 = vpop.f32.mrb[16].mxu0 }
 0x5fd   :  { %v4373_v20 = vmul.f32 0.2, %v4293_v53  ;;  %v4295_v16 = vpop.f32.mrb[17].mxu0  ;;  %6824 = vmatmul.mubr.msk.f32.gmra.mrb[64].mxu0 %vm3688_vm5, %v4397_v32 }
 0x5fe   :  { %6826 = vmatprep.mubr.msk.f32.mxu0 %vm8059_vm0, %v10830_v58 }
 0x5ff   :  { %v4398_v59 = vmax.f32 %v4293_v53, %v4373_v20 }
 0x600   :  { %v4298_v62 = vpop.f32.mrb[18].mxu0 }
 0x601   :  { %v4374_v38 = vmul.f32 0.2, %v4298_v62  ;;  %v4300_v60 = vpop.f32.mrb[19].mxu0  ;;  %6827 = vmatmul.mubr.msk.f32.gmra.mrb[66].mxu0 %vm3688_vm5, %v4398_v59 }
 0x602   :  { %6829 = vmatprep.mubr.msk.f32.mxu0 %vm8059_vm0, %v10830_v58 }
 0x603   :  { %v4399_v6 = vmax.f32 %v4298_v62, %v4374_v38  ;;  %v10309_v21 = vpop.xlane.xlu0 %4036  ;;  %v10330_v38 = vld [vmem:[#allocation6 + $0x640] ss:$0 sm:$0xff] }
 0x604   :  { %v4303_v36 = vpop.f32.mrb[20].mxu0 }
 0x605   :  { %v4375_v52 = vmul.f32 0.2, %v4303_v36  ;;  %v4305_v2 = vpop.f32.mrb[21].mxu0  ;;  %6830 = vmatmul.mubr.msk.f32.gmra.mrb[68].mxu0 %vm3688_vm5, %v4399_v6 }
 0x606   :  { %6832 = vmatprep.mubr.msk.f32.mxu0 %vm8059_vm0, %v10830_v58 }
 0x607   :  { %v4400_v19 = vmax.f32 %v4303_v36, %v4375_v52  ;;  %v10319_v47 = vpop.xlane.xlu0 %4039  ;;  %v5578_v36 = vadd.f32 %v10330_v38, %v10244_v51  ;;  %v10346_v51 = vld [vmem:[#allocation6 + $0x3b0] ss:$0 sm:$0xff] }
 0x608   :  { %v4308_v4 = vpop.f32.mrb[22].mxu0 }
 0x609   :  { %v4376_v57 = vmul.f32 0.2, %v4308_v4  ;;  %v4310_v46 = vpop.f32.mrb[23].mxu0  ;;  %6833 = vmatmul.mubr.msk.f32.gmra.mrb[70].mxu0 %vm3688_vm5, %v4400_v19 }
 0x60a   :  { %6835 = vmatprep.mubr.msk.f32.mxu0 %vm8059_vm0, %v10830_v58 }
 0x60b   :  { %v4401_v56 = vmax.f32 %v4308_v4, %v4376_v57  ;;  %v10311_v34 = vpop.xlane.xlu1 %4042 }
 0x60c   :  { %v4313_v14 = vpop.f32.mrb[24].mxu0 }
 0x60d   :  { %v4377_v17 = vmul.f32 0.2, %v4313_v14  ;;  %v4315_v63 = vpop.f32.mrb[25].mxu0  ;;  %6836 = vmatmul.mubr.msk.f32.gmra.mrb[72].mxu0 %vm3688_vm5, %v4401_v56  ;;  %v5579_v56 = vadd.f32 %v10330_v38, %v10241_v27  ;;  %v5580_v27 = vadd.f32 %v10330_v38, %v10253_v11 }
 0x60e   :  { %6838 = vmatprep.mubr.msk.f32.mxu0 %vm8059_vm0, %v10830_v58 }
 0x60f   :  { %v4402_v26 = vmax.f32 %v4313_v14, %v4377_v17  ;;  %v10321_v23 = vpop.xlane.xlu1 %4045  ;;  %v5603_v14 = vmul.f32 0.99, %v5578_v36 }
 0x610   :  { %v4318_v29 = vpop.f32.mrb[26].mxu0 }
 0x611   :  { %v4378_v13 = vmul.f32 0.2, %v4318_v29  ;;  %v4320_v7 = vpop.f32.mrb[27].mxu0  ;;  %6839 = vmatmul.mubr.msk.f32.gmra.mrb[74].mxu0 %vm3688_vm5, %v4402_v26 }
 0x612   :  { %6841 = vmatprep.mubr.msk.f32.mxu0 %vm8059_vm0, %v10830_v58 }
 0x613   :  { %v4403_v12 = vmax.f32 %v4318_v29, %v4378_v13  ;;  %v10326_v20 = vpop.xlane.xlu0 %4048 }
 0x614   :  { %v4323_v41 = vpop.f32.mrb[28].mxu0 }
 0x615   :  { %v4379_v5 = vmul.f32 0.2, %v4323_v41  ;;  %v4325_v1 = vpop.f32.mrb[29].mxu0  ;;  %6842 = vmatmul.mubr.msk.f32.gmra.mrb[76].mxu0 %vm3688_vm5, %v4403_v12 }
 0x616   :  { %6844 = vmatprep.mubr.msk.f32.mxu0 %vm8059_vm0, %v10830_v58 }
 0x617   :  { %v4404_v35 = vmax.f32 %v4323_v41, %v4379_v5  ;;  %v10328_v16 = vpop.xlane.xlu1 %4051  ;;  %v5604_v41 = vmul.f32 0.99, %v5579_v56 }
 0x618   :  { %v4328_v42 = vpop.f32.mrb[30].mxu0 }
 0x619   :  { %v4380_v30 = vmul.f32 0.2, %v4328_v42  ;;  %v4330_v33 = vpop.f32.mrb[31].mxu0  ;;  %6845 = vmatmul.mubr.msk.f32.gmra.mrb[78].mxu0 %vm3688_vm5, %v4404_v35 }
 0x61a   :  { %6847 = vmatprep.mubr.msk.f32.mxu0 %vm8059_vm0, %v10830_v58 }
 0x61b   :  { %v4405_v24 = vmax.f32 %v4328_v42, %v4380_v30  ;;  %v10337_v52 = vpop.xlane.xlu0 %4054 }
 0x61c   :  { %v4333_v43 = vpop.f32.mrb[32].mxu0 }
 0x61d   :  { %v4381_v32 = vmul.f32 0.2, %v4333_v43  ;;  %v4335_v53 = vpop.f32.mrb[33].mxu0  ;;  %6848 = vmatmul.mubr.msk.f32.gmra.mrb[80].mxu0 %vm3688_vm5, %v4405_v24 }
 0x61e   :  { %6850 = vmatprep.mubr.msk.f32.mxu0 %vm8059_vm0, %v10830_v58 }
 0x61f   :  { %v4406_v59 = vmax.f32 %v4333_v43, %v4381_v32  ;;  %v10339_v2 = vpop.xlane.xlu1 %4057  ;;  %v5581_v43 = vadd.f32 %v10330_v38, %v10249_v25  ;;  %v5605_v32 = vmul.f32 0.99, %v5580_v27  ;;  %v5585_v27 = vadd.f32 %v10330_v38, %v10266_v8 }
 0x620   :  { %v4338_v62 = vpop.f32.mrb[34].mxu0 }
 0x621   :  { %v4382_v60 = vmul.f32 0.2, %v4338_v62  ;;  %v4340_v6 = vpop.f32.mrb[35].mxu0  ;;  %6851 = vmatmul.mubr.msk.f32.gmra.mrb[82].mxu0 %vm3688_vm5, %v4406_v59 }
 0x622   :  { %6853 = vmatprep.mubr.msk.f32.mxu0 %vm8059_vm0, %v10830_v58 }
 0x623   :  { %v4407_v19 = vmax.f32 %v4338_v62, %v4382_v60  ;;  %v10348_v17 = vpop.xlane.xlu0 %4060 }
 0x624   :  { %v4343_v4 = vpop.f32.mrb[36].mxu0 }
 0x625   :  { %v4383_v57 = vmul.f32 0.2, %v4343_v4  ;;  %v4345_v46 = vpop.f32.mrb[37].mxu0  ;;  %6854 = vmatmul.mubr.msk.f32.gmra.mrb[84].mxu0 %vm3688_vm5, %v4407_v19  ;;  %v5606_v19 = vmul.f32 0.99, %v5581_v43 }
 0x626   :  { %6856 = vmatprep.mubr.msk.f32.mxu0 %vm8059_vm0, %v10830_v58 }
 0x627   :  { %v4408_v63 = vmax.f32 %v4343_v4, %v4383_v57  ;;  %v4064_v26 = vpop.xlane.xlu1 %4063  ;;  %v5582_v4 = vadd.f32 %v10330_v38, %v10261_v3 }
 0x628   :  { %v4124_v29 = vadd.f32 %v10346_v51, %v4064_v26  ;;  %v4348_v13 = vpop.f32.mrb[38].mxu0 }
 0x629   :  { %v4384_v7 = vmul.f32 0.2, %v4348_v13  ;;  %v4350_v12 = vpop.f32.mrb[39].mxu0  ;;  %6857 = vmatmul.mubr.msk.f32.gmra.mrb[86].mxu0 %vm3688_vm5, %v4408_v63  ;;  %v5607_v63 = vmul.f32 0.99, %v5582_v4  ;;  %v5589_v4 = vadd.f32 %v10330_v38, %v10283_v22 }
 0x62a   :  { %v10354_v5 = vadd.f32 %v5603_v14, %v4124_v29  ;;  %6859 = vmatprep.mubr.msk.f32.mxu0 %vm8059_vm0, %v10830_v58  ;;  %v5583_v14 = vadd.f32 %v10330_v38, %v10258_v0 }
 0x62b   :  { %v4409_v1 = vmax.f32 %v4348_v13, %v4384_v7  ;;  %v4067_v35 = vpop.xlane.xlu0 %4066  ;;  %v5584_v7 = vadd.f32 %v10330_v38, %v10270_v44 }
 0x62c   :  { %v4125_v42 = vadd.f32 %v10346_v51, %v4067_v35  ;;  %v4353_v30 = vpop.f32.mrb[40].mxu0  ;;  %v5608_v13 = vmul.f32 0.99, %v5583_v14  ;;  %v5614_v14 = vmul.f32 0.99, %v5589_v4 }
 0x62d   :  { %v4385_v33 = vmul.f32 0.2, %v4353_v30  ;;  %v4355_v24 = vpop.f32.mrb[41].mxu0  ;;  %6860 = vmatmul.mubr.msk.f32.gmra.mrb[88].mxu0 %vm3688_vm5, %v4409_v1  ;;  %v5609_v1 = vmul.f32 0.99, %v5584_v7 }
 0x62e   :  { %v10362_v53 = vadd.f32 %v5604_v41, %v4125_v42  ;;  %6862 = vmatprep.mubr.msk.f32.mxu0 %vm8059_vm0, %v10830_v58 }
 0x62f   :  { %v4410_v11 = vmax.f32 %v4353_v30, %v4385_v33  ;;  %v4070_v59 = vpop.xlane.xlu1 %4069  ;;  %v5610_v30 = vmul.f32 0.99, %v5585_v27  ;;  %v5586_v33 = vadd.f32 %v10330_v38, %v10277_v31 }
 0x630   :  { %v4126_v62 = vadd.f32 %v10346_v51, %v4070_v59  ;;  %v4358_v60 = vpop.f32.mrb[42].mxu0 }
 0x631   :  { %v4386_v6 = vmul.f32 0.2, %v4358_v60  ;;  %v4360_v36 = vpop.f32.mrb[43].mxu0  ;;  %6863 = vmatmul.mubr.msk.f32.gmra.mrb[90].mxu0 %vm3688_vm5, %v4410_v11  ;;  %v5611_v11 = vmul.f32 0.99, %v5586_v33 }
 0x632   :  { %v10370_v25 = vadd.f32 %v5605_v32, %v4126_v62  ;;  %6865 = vmatprep.mubr.msk.f32.mxu0 %vm8059_vm0, %v10830_v58  ;;  %v5587_v32 = vadd.f32 %v10330_v38, %v10275_v10  ;;  %v10426_v33 = vld [vmem:[#allocation6 + $0x630] ss:$0 sm:$0xff] }
 0x633   :  { %v4411_v57 = vmax.f32 %v4358_v60, %v4386_v6  ;;  %v4073_v46 = vpop.xlane.xlu0 %4072  ;;  %v5588_v6 = vadd.f32 %v10330_v38, %v10287_v9 }
 0x634   :  { %v4127_v56 = vadd.f32 %v10346_v51, %v4073_v46  ;;  %v5612_v60 = vmul.f32 0.99, %v5587_v32 }
 0x635   :  { %6866 = vmatmul.mubr.msk.f32.gmra.mrb[92].mxu0 %vm3688_vm5, %v4411_v57  ;;  %v5613_v57 = vmul.f32 0.99, %v5588_v6  ;;  %v10430_v6 = vld [vmem:[#allocation6 + $0x638] ss:$0 sm:$0xff] }
 0x636   :  { %v10378_v26 = vadd.f32 %v5606_v19, %v4127_v56 }
 0x637   :  { %v4076_v29 = vpop.xlane.xlu1 %4075 }
 0x638   :  { %v4128_v3 = vadd.f32 %v10346_v51, %v4076_v29 }
 0x63a   :  { %v10383_v58 = vadd.f32 %v5607_v63, %v4128_v3  ;;  %v5590_v63 = vadd.f32 %v10330_v38, %v10294_v45 }
 0x63b   :  { %v4079_v12 = vpop.xlane.xlu0 %4078 }
 0x63c   :  { %v4129_v41 = vadd.f32 %v10346_v51, %v4079_v12  ;;  %v5615_v7 = vmul.f32 0.99, %v5590_v63 }
 0x63e   :  { %v10388_v0 = vadd.f32 %v5608_v13, %v4129_v41  ;;  %v5591_v13 = vadd.f32 %v10330_v38, %v10292_v39 }
 0x63f   :  { %v4082_v35 = vpop.xlane.xlu1 %4081 }
 0x640   :  { %v4130_v42 = vadd.f32 %v10346_v51, %v4082_v35  ;;  %v5616_v27 = vmul.f32 0.99, %v5591_v13 }
 0x642   :  { %v10393_v24 = vadd.f32 %v5609_v1, %v4130_v42 }
 0x643   :  { %v4085_v44 = vpop.xlane.xlu0 %4084 }
 0x644   :  { %v4131_v43 = vadd.f32 %v10346_v51, %v4085_v44 }
 0x646   :  { %v10398_v8 = vadd.f32 %v5610_v30, %v4131_v43 }
 0x647   :  { %v4088_v59 = vpop.xlane.xlu1 %4087 }
 0x648   :  { %v4132_v62 = vadd.f32 %v10346_v51, %v4088_v59 }
 0x64a   :  { %v10403_v36 = vadd.f32 %v5611_v11, %v4132_v62 }
 0x64b   :  { %v4091_v31 = vpop.xlane.xlu0 %4090 }
 0x64c   :  { %v4133_v19 = vadd.f32 %v10346_v51, %v4091_v31 }
 0x64e   :  { %v10408_v10 = vadd.f32 %v5612_v60, %v4133_v19 }
 0x64f   :  { %v4094_v46 = vpop.xlane.xlu1 %4093 }
 0x650   :  { %v4134_v56 = vadd.f32 %v10346_v51, %v4094_v46 }
 0x652   :  { %v10413_v29 = vadd.f32 %v5613_v57, %v4134_v56 }
 0x653   :  { %v4097_v9 = vpop.xlane.xlu0 %4096 }
 0x654   :  { %v4135_v3 = vadd.f32 %v10346_v51, %v4097_v9 }
 0x656   :  { %v10418_v22 = vadd.f32 %v5614_v14, %v4135_v3 }
 0x657   :  { %v4100_v12 = vpop.xlane.xlu1 %4099 }
 0x658   :  { %v4136_v41 = vadd.f32 %v10346_v51, %v4100_v12 }
 0x65a   :  { %v10421_v1 = vadd.f32 %v5615_v7, %v4136_v41 }
 0x65b   :  { %v4103_v35 = vpop.xlane.xlu0 %4102 }
 0x65c   :  { %v4137_v45 = vadd.f32 %v10346_v51, %v4103_v35 }
 0x65e   :  { %v10424_v42 = vadd.f32 %v5616_v27, %v4137_v45 }
 0x6a8   :  { %v4845_v30 = vpop.f32.mrb[44].mxu0 }
 0x6a9   :  { %v4846_v44 = vadd.f32 %v10426_v33, %v4845_v30  ;;  %v6795_v39 = vpop.f32.mrb[45].mxu0 }
 0x6ab   :  { %v4969_v43 = vmul.f32 0.2, %v4846_v44 }
 0x6ac   :  { %v4850_v32 = vpop.f32.mrb[46].mxu0 }
 0x6ad   :  { %v4994_v11 = vmax.f32 %v4846_v44, %v4969_v43  ;;  %v4851_v59 = vadd.f32 %v10426_v33, %v4850_v32  ;;  %v6798_v62 = vpop.f32.mrb[47].mxu0 }
 0x6af   :  { %v4970_v60 = vmul.f32 0.2, %v4851_v59  ;;  %v5340_v31 = vmul.f32 %v10430_v6, %v4994_v11 }
 0x6b0   :  { %v4855_v19 = vpop.f32.mrb[48].mxu0 }
 0x6b1   :  { %v4995_v4 = vmax.f32 %v4851_v59, %v4970_v60  ;;  %v4856_v57 = vadd.f32 %v10426_v33, %v4855_v19  ;;  %v6801_v46 = vpop.f32.mrb[49].mxu0  ;;  %v5365_v56 = vsel %vm4034_vm6, %v5340_v31, 0.0 }
 0x6b2   :  { %5366 = vadd.xlane.f32.xlu1 %v5365_v56 }
 0x6b3   :  { %v4971_v14 = vmul.f32 0.2, %v4856_v57  ;;  %v5341_v63 = vmul.f32 %v10430_v6, %v4995_v4 }
 0x6b4   :  { %v4860_v9 = vpop.f32.mrb[50].mxu0 }
 0x6b5   :  { %v4996_v3 = vmax.f32 %v4856_v57, %v4971_v14  ;;  %v4861_v13 = vadd.f32 %v10426_v33, %v4860_v9  ;;  %v6804_v7 = vpop.f32.mrb[51].mxu0  ;;  %v5368_v12 = vsel %vm4034_vm6, %v5341_v63, 0.0 }
 0x6b6   :  { %5369 = vadd.xlane.f32.xlu0 %v5368_v12 }
 0x6b7   :  { %v4972_v41 = vmul.f32 0.2, %v4861_v13  ;;  %v5342_v27 = vmul.f32 %v10430_v6, %v4996_v3 }
 0x6b8   :  { %v4865_v35 = vpop.f32.mrb[52].mxu0 }
 0x6b9   :  { %v4997_v45 = vmax.f32 %v4861_v13, %v4972_v41  ;;  %v4866_v30 = vadd.f32 %v10426_v33, %v4865_v35  ;;  %v6807_v44 = vpop.f32.mrb[53].mxu0  ;;  %v5371_v39 = vsel %vm4034_vm6, %v5342_v27, 0.0 }
 0x6ba   :  { %5372 = vadd.xlane.f32.xlu1 %v5371_v39 }
 0x6bb   :  { %v4973_v43 = vmul.f32 0.2, %v4866_v30  ;;  %v5343_v32 = vmul.f32 %v10430_v6, %v4997_v45 }
 0x6bc   :  { %v4870_v11 = vpop.f32.mrb[54].mxu0 }
 0x6bd   :  { %v4998_v59 = vmax.f32 %v4866_v30, %v4973_v43  ;;  %v4871_v62 = vadd.f32 %v10426_v33, %v4870_v11  ;;  %v6810_v60 = vpop.f32.mrb[55].mxu0  ;;  %v5374_v31 = vsel %vm4034_vm6, %v5343_v32, 0.0 }
 0x6be   :  { %5375 = vadd.xlane.f32.xlu0 %v5374_v31 }
 0x6bf   :  { %v4974_v19 = vmul.f32 0.2, %v4871_v62  ;;  %v5344_v4 = vmul.f32 %v10430_v6, %v4998_v59 }
 0x6c0   :  { %v4875_v57 = vpop.f32.mrb[56].mxu0 }
 0x6c1   :  { %v4999_v46 = vmax.f32 %v4871_v62, %v4974_v19  ;;  %v4876_v56 = vadd.f32 %v10426_v33, %v4875_v57  ;;  %v6813_v14 = vpop.f32.mrb[57].mxu0  ;;  %v5377_v63 = vsel %vm4034_vm6, %v5344_v4, 0.0 }
 0x6c2   :  { %5378 = vadd.xlane.f32.xlu1 %v5377_v63 }
 0x6c3   :  { %v4975_v9 = vmul.f32 0.2, %v4876_v56  ;;  %v5345_v3 = vmul.f32 %v10430_v6, %v4999_v46 }
 0x6c4   :  { %v4880_v13 = vpop.f32.mrb[58].mxu0 }
 0x6c5   :  { %v5000_v7 = vmax.f32 %v4876_v56, %v4975_v9  ;;  %v4881_v12 = vadd.f32 %v10426_v33, %v4880_v13  ;;  %v6816_v41 = vpop.f32.mrb[59].mxu0  ;;  %v5380_v27 = vsel %vm4034_vm6, %v5345_v3, 0.0 }
 0x6c6   :  { %5381 = vadd.xlane.f32.xlu0 %v5380_v27 }
 0x6c7   :  { %v4976_v35 = vmul.f32 0.2, %v4881_v12  ;;  %v5346_v45 = vmul.f32 %v10430_v6, %v5000_v7 }
 0x6c8   :  { %v4885_v30 = vpop.f32.mrb[60].mxu0 }
 0x6c9   :  { %v5001_v44 = vmax.f32 %v4881_v12, %v4976_v35  ;;  %v4886_v39 = vadd.f32 %v10426_v33, %v4885_v30  ;;  %v6819_v43 = vpop.f32.mrb[61].mxu0  ;;  %v5383_v32 = vsel %vm4034_vm6, %v5346_v45, 0.0 }
 0x6ca   :  { %5384 = vadd.xlane.f32.xlu1 %v5383_v32 }
 0x6cb   :  { %v4977_v11 = vmul.f32 0.2, %v4886_v39  ;;  %v5347_v59 = vmul.f32 %v10430_v6, %v5001_v44 }
 0x6cc   :  { %v4890_v62 = vpop.f32.mrb[62].mxu0 }
 0x6cd   :  { %v5002_v60 = vmax.f32 %v4886_v39, %v4977_v11  ;;  %v4891_v31 = vadd.f32 %v10426_v33, %v4890_v62  ;;  %v6822_v19 = vpop.f32.mrb[63].mxu0  ;;  %v5386_v4 = vsel %vm4034_vm6, %v5347_v59, 0.0 }
 0x6ce   :  { %5387 = vadd.xlane.f32.xlu0 %v5386_v4 }
 0x6cf   :  { %v4978_v57 = vmul.f32 0.2, %v4891_v31  ;;  %v5348_v46 = vmul.f32 %v10430_v6, %v5002_v60 }
 0x6d0   :  { %v4895_v56 = vpop.f32.mrb[64].mxu0 }
 0x6d1   :  { %v5003_v14 = vmax.f32 %v4891_v31, %v4978_v57  ;;  %v4896_v63 = vadd.f32 %v10426_v33, %v4895_v56  ;;  %v6825_v9 = vpop.f32.mrb[65].mxu0  ;;  %v5389_v3 = vsel %vm4034_vm6, %v5348_v46, 0.0 }
 0x6d2   :  { %5390 = vadd.xlane.f32.xlu1 %v5389_v3 }
 0x6d3   :  { %v4979_v13 = vmul.f32 0.2, %v4896_v63  ;;  %v5349_v7 = vmul.f32 %v10430_v6, %v5003_v14 }
 0x6d4   :  { %v4900_v12 = vpop.f32.mrb[66].mxu0 }
 0x6d5   :  { %v5004_v41 = vmax.f32 %v4896_v63, %v4979_v13  ;;  %v4901_v27 = vadd.f32 %v10426_v33, %v4900_v12  ;;  %v6828_v35 = vpop.f32.mrb[67].mxu0  ;;  %v5392_v45 = vsel %vm4034_vm6, %v5349_v7, 0.0 }
 0x6d6   :  { %5393 = vadd.xlane.f32.xlu1 %v5392_v45 }
 0x6d7   :  { %v4980_v30 = vmul.f32 0.2, %v4901_v27  ;;  %v5350_v44 = vmul.f32 %v10430_v6, %v5004_v41 }
 0x6d8   :  { %v4905_v39 = vpop.f32.mrb[68].mxu0 }
 0x6d9   :  { %v5005_v43 = vmax.f32 %v4901_v27, %v4980_v30  ;;  %v4906_v32 = vadd.f32 %v10426_v33, %v4905_v39  ;;  %v6831_v11 = vpop.f32.mrb[69].mxu0  ;;  %v5395_v59 = vsel %vm4034_vm6, %v5350_v44, 0.0 }
 0x6da   :  { %5396 = vadd.xlane.f32.xlu0 %v5395_v59 }
 0x6db   :  { %v4981_v62 = vmul.f32 0.2, %v4906_v32  ;;  %v5351_v60 = vmul.f32 %v10430_v6, %v5005_v43 }
 0x6dc   :  { %v4910_v31 = vpop.f32.mrb[70].mxu0 }
 0x6dd   :  { %v5006_v19 = vmax.f32 %v4906_v32, %v4981_v62  ;;  %v4911_v4 = vadd.f32 %v10426_v33, %v4910_v31  ;;  %v6834_v57 = vpop.f32.mrb[71].mxu0  ;;  %v5398_v46 = vsel %vm4034_vm6, %v5351_v60, 0.0 }
 0x6de   :  { %5399 = vadd.xlane.f32.xlu1 %v5398_v46 }
 0x6df   :  { %v4982_v56 = vmul.f32 0.2, %v4911_v4  ;;  %v5352_v14 = vmul.f32 %v10430_v6, %v5006_v19 }
 0x6e0   :  { %v4915_v63 = vpop.f32.mrb[72].mxu0 }
 0x6e1   :  { %v5007_v9 = vmax.f32 %v4911_v4, %v4982_v56  ;;  %v4916_v3 = vadd.f32 %v10426_v33, %v4915_v63  ;;  %v6837_v13 = vpop.f32.mrb[73].mxu0  ;;  %v5401_v7 = vsel %vm4034_vm6, %v5352_v14, 0.0 }
 0x6e2   :  { %5402 = vadd.xlane.f32.xlu0 %v5401_v7 }
 0x6e3   :  { %v4983_v12 = vmul.f32 0.2, %v4916_v3  ;;  %v5353_v41 = vmul.f32 %v10430_v6, %v5007_v9 }
 0x6e4   :  { %v4920_v27 = vpop.f32.mrb[74].mxu0 }
 0x6e5   :  { %v5008_v35 = vmax.f32 %v4916_v3, %v4983_v12  ;;  %v4921_v45 = vadd.f32 %v10426_v33, %v4920_v27  ;;  %v6840_v30 = vpop.f32.mrb[75].mxu0  ;;  %v5404_v44 = vsel %vm4034_vm6, %v5353_v41, 0.0 }
 0x6e6   :  { %5405 = vadd.xlane.f32.xlu1 %v5404_v44 }
 0x6e7   :  { %v4984_v39 = vmul.f32 0.2, %v4921_v45  ;;  %v5354_v43 = vmul.f32 %v10430_v6, %v5008_v35 }
 0x6e8   :  { %v4925_v32 = vpop.f32.mrb[76].mxu0 }
 0x6e9   :  { %v5009_v11 = vmax.f32 %v4921_v45, %v4984_v39  ;;  %v4926_v59 = vadd.f32 %v10426_v33, %v4925_v32  ;;  %v6843_v62 = vpop.f32.mrb[77].mxu0  ;;  %v5407_v60 = vsel %vm4034_vm6, %v5354_v43, 0.0 }
 0x6ea   :  { %5408 = vadd.xlane.f32.xlu0 %v5407_v60 }
 0x6eb   :  { %v4985_v31 = vmul.f32 0.2, %v4926_v59  ;;  %v5355_v19 = vmul.f32 %v10430_v6, %v5009_v11 }
 0x6ec   :  { %v4930_v4 = vpop.f32.mrb[78].mxu0 }
 0x6ed   :  { %v5010_v57 = vmax.f32 %v4926_v59, %v4985_v31  ;;  %v4931_v46 = vadd.f32 %v10426_v33, %v4930_v4  ;;  %v6846_v56 = vpop.f32.mrb[79].mxu0  ;;  %v5410_v14 = vsel %vm4034_vm6, %v5355_v19, 0.0 }
 0x6ee   :  { %5411 = vadd.xlane.f32.xlu1 %v5410_v14 }
 0x6ef   :  { %v4986_v63 = vmul.f32 0.2, %v4931_v46  ;;  %v5356_v9 = vmul.f32 %v10430_v6, %v5010_v57 }
 0x6f0   :  { %v4935_v3 = vpop.f32.mrb[80].mxu0 }
 0x6f1   :  { %v5011_v13 = vmax.f32 %v4931_v46, %v4986_v63  ;;  %v4936_v7 = vadd.f32 %v10426_v33, %v4935_v3  ;;  %v6849_v12 = vpop.f32.mrb[81].mxu0  ;;  %v5413_v41 = vsel %vm4034_vm6, %v5356_v9, 0.0 }
 0x6f2   :  { %5414 = vadd.xlane.f32.xlu0 %v5413_v41 }
 0x6f3   :  { %v4987_v27 = vmul.f32 0.2, %v4936_v7  ;;  %v5357_v35 = vmul.f32 %v10430_v6, %v5011_v13 }
 0x6f4   :  { %v4940_v45 = vpop.f32.mrb[82].mxu0 }
 0x6f5   :  { %v5012_v30 = vmax.f32 %v4936_v7, %v4987_v27  ;;  %v4941_v44 = vadd.f32 %v10426_v33, %v4940_v45  ;;  %v6852_v39 = vpop.f32.mrb[83].mxu0  ;;  %v5416_v43 = vsel %vm4034_vm6, %v5357_v35, 0.0 }
 0x6f6   :  { %5417 = vadd.xlane.f32.xlu1 %v5416_v43 }
 0x6f7   :  { %v4988_v32 = vmul.f32 0.2, %v4941_v44  ;;  %v5358_v11 = vmul.f32 %v10430_v6, %v5012_v30 }
 0x6f8   :  { %v4945_v59 = vpop.f32.mrb[84].mxu0 }
 0x6f9   :  { %v5013_v62 = vmax.f32 %v4941_v44, %v4988_v32  ;;  %v4946_v60 = vadd.f32 %v10426_v33, %v4945_v59  ;;  %v6855_v31 = vpop.f32.mrb[85].mxu0  ;;  %v5419_v19 = vsel %vm4034_vm6, %v5358_v11, 0.0 }
 0x6fa   :  { %5420 = vadd.xlane.f32.xlu0 %v5419_v19 }
 0x6fb   :  { %v4989_v4 = vmul.f32 0.2, %v4946_v60  ;;  %v5359_v57 = vmul.f32 %v10430_v6, %v5013_v62 }
 0x6fc   :  { %v4950_v46 = vpop.f32.mrb[86].mxu0 }
 0x6fd   :  { %v5014_v56 = vmax.f32 %v4946_v60, %v4989_v4  ;;  %v4951_v14 = vadd.f32 %v10426_v33, %v4950_v46  ;;  %v6858_v63 = vpop.f32.mrb[87].mxu0  ;;  %v5422_v9 = vsel %vm4034_vm6, %v5359_v57, 0.0 }
 0x6fe   :  { %5423 = vadd.xlane.f32.xlu1 %v5422_v9 }
 0x6ff   :  { %v4990_v3 = vmul.f32 0.2, %v4951_v14  ;;  %v5360_v13 = vmul.f32 %v10430_v6, %v5014_v56 }
 0x700   :  { %v4955_v7 = vpop.f32.mrb[88].mxu0 }
 0x701   :  { %v5015_v12 = vmax.f32 %v4951_v14, %v4990_v3  ;;  %v4956_v41 = vadd.f32 %v10426_v33, %v4955_v7  ;;  %v6861_v27 = vpop.f32.mrb[89].mxu0  ;;  %v5425_v35 = vsel %vm4034_vm6, %v5360_v13, 0.0  ;;  %v5569_v13 = vadd.f32 %v10330_v38, %v10201_v28 }
 0x702   :  { %5426 = vadd.xlane.f32.xlu0 %v5425_v35  ;;  %v5571_v27 = vadd.f32 %v10330_v38, %v10207_v48  ;;  %v10515_v35 = vpop.xlane.xlu0 %4108  ;;  %v4116_v28 = vadd.f32 %v10346_v51, %v10319_v47  ;;  %v4117_v48 = vadd.f32 %v10346_v51, %v10311_v34  ;;  %v7955_v34 = vld [vmem:[#allocation2 + $0x10] sm:$0xff] }
 0x703   :  { %v4991_v45 = vmul.f32 0.2, %v4956_v41  ;;  %v5361_v30 = vmul.f32 %v10430_v6, %v5015_v12  ;;  %v5594_v7 = vmul.f32 0.99, %v5569_v13  ;;  %v5570_v12 = vadd.f32 %v10330_v38, %v10211_v15 }
 0x704   :  { %v4960_v44 = vpop.f32.mrb[90].mxu0  ;;  %v5572_v15 = vadd.f32 %v10330_v38, %v10218_v61 }
 0x705   :  { %v5016_v39 = vmax.f32 %v4956_v41, %v4991_v45  ;;  %v4961_v43 = vadd.f32 %v10426_v33, %v4960_v44  ;;  %v6864_v32 = vpop.f32.mrb[91].mxu0  ;;  %v5428_v11 = vsel %vm4034_vm6, %v5361_v30, 0.0  ;;  %v4115_v41 = vadd.f32 %v10346_v51, %v10309_v21 }
 0x706   :  { %5429 = vadd.xlane.f32.xlu1 %v5428_v11  ;;  %v5595_v45 = vmul.f32 0.99, %v5570_v12  ;;  %v7954_v11 = vld [vmem:[#allocation2] sm:$0xff]  ;;  %v5597_v61 = vmul.f32 0.99, %v5572_v15 }
 0x707   :  { %v4992_v59 = vmul.f32 0.2, %v4961_v43  ;;  %v5362_v62 = vmul.f32 %v10430_v6, %v5016_v39  ;;  %v5619_v30 = vadd.f32 %v5594_v7, %v4115_v41  ;;  %v5575_v41 = vadd.f32 %v10330_v38, %v10224_v55 }
 0x708   :  { %v4965_v60 = vpop.f32.mrb[92].mxu0  ;;  %v5620_v32 = vadd.f32 %v5595_v45, %v4116_v28  ;;  %v4120_v45 = vadd.f32 %v10346_v51, %v10328_v16  ;;  %v5576_v55 = vadd.f32 %v10330_v38, %v10236_v50  ;;  %v7958_v16 = vld [vmem:[#allocation2 + $0x40] sm:$0xff] }
 0x709   :  { %v5017_v31 = vmax.f32 %v4961_v43, %v4992_v59  ;;  %v4966_v19 = vadd.f32 %v10426_v33, %v4965_v60  ;;  %v6867_v4 = vpop.f32.mrb[93].mxu0  ;;  %v5431_v57 = vsel %vm4034_vm6, %v5362_v62, 0.0  ;;  %v10507_v33 = vpop.xlane.xlu1 %4105  ;;  %v5596_v43 = vmul.f32 0.99, %v5571_v27 }
 0x70a   :  { %5432 = vadd.xlane.f32.xlu0 %v5431_v57  ;;  %v5573_v60 = vadd.f32 %v10330_v38, %v10215_v37  ;;  %v4118_v4 = vadd.f32 %v10346_v51, %v10321_v23  ;;  %v5574_v37 = vadd.f32 %v10330_v38, %v10227_v54  ;;  %v7956_v23 = vld [vmem:[#allocation2 + $0x20] sm:$0xff] }
 0x70b   :  { %v4993_v46 = vmul.f32 0.2, %v4966_v19  ;;  %v5363_v56 = vmul.f32 %v10430_v6, %v5017_v31 }
 0x70c   :  { %v5599_v27 = vmul.f32 0.99, %v5574_v37 }
 0x70d   :  { %v5018_v14 = vmax.f32 %v4966_v19, %v4993_v46  ;;  %v5434_v63 = vsel %vm4034_vm6, %v5363_v56, 0.0  ;;  %v5621_v19 = vadd.f32 %v5596_v43, %v4117_v48 }
 0x70e   :  { %5435 = vadd.xlane.f32.xlu1 %v5434_v63  ;;  %v5624_v15 = vadd.f32 %v5599_v27, %v4120_v45 }
 0x70f   :  { %v5364_v9 = vmul.f32 %v10430_v6, %v5018_v14  ;;  %v5598_v14 = vmul.f32 0.99, %v5573_v60  ;;  %v4122_v60 = vadd.f32 %v10346_v51, %v10339_v2 }
 0x711   :  { %v5437_v3 = vsel %vm4034_vm6, %v5364_v9, 0.0  ;;  %v5622_v9 = vadd.f32 %v5597_v61, %v4118_v4 }
 0x712   :  { %5438 = vadd.xlane.f32.xlu0 %v5437_v3  ;;  %v4119_v3 = vadd.f32 %v10346_v51, %v10326_v20  ;;  %v7957_v20 = vld [vmem:[#allocation2 + $0x30] sm:$0xff] }
 0x73f   :  { %v5367_v6 = vpop.xlane.xlu1 %5366 }
 0x740   :  { %v5444_v44 = vadd.f32 %v10330_v38, %v5367_v6  ;;  %v5623_v6 = vadd.f32 %v5598_v14, %v4119_v3 }
 0x742   :  { %v5644_v39 = vsub.f32 %v5619_v30, %v5444_v44 }
 0x743   :  { %v5370_v21 = vpop.xlane.xlu0 %5369 }
 0x744   :  { %v5669_v59 = vsub.f32 %v5644_v39, %v7954_v11  ;;  %v5445_v62 = vadd.f32 %v10330_v38, %v5370_v21  ;;  %v5600_v39 = vmul.f32 0.99, %v5575_v41  ;;  %v4121_v21 = vadd.f32 %v10346_v51, %v10337_v52  ;;  %v7959_v52 = vld [vmem:[#allocation2 + $0x50] sm:$0xff] }
 0x746   :  { %5695 = vst.msk [vmem:[%s10695_s3] sm:$0xff] %vm5694_vm7, %v5669_v59  ;;  %v5645_v47 = vsub.f32 %v5620_v32, %v5445_v62  ;;  %v5577_v59 = vadd.f32 %v10330_v38, %v10232_v49  ;;  %v5601_v62 = vmul.f32 0.99, %v5576_v55  ;;  %v4123_v49 = vadd.f32 %v10346_v51, %v10348_v17 }
 0x747   :  { %v5373_v31 = vpop.xlane.xlu1 %5372 }
 0x748   :  { %v5670_v57 = vsub.f32 %v5645_v47, %v7955_v34  ;;  %v5446_v46 = vadd.f32 %v10330_v38, %v5373_v31  ;;  %v5625_v47 = vadd.f32 %v5600_v39, %v4121_v21  ;;  %v5602_v4 = vmul.f32 0.99, %v5577_v59 }
 0x74a   :  { %5696 = vst.msk [vmem:[%s10695_s3 + $0x8] sm:$0xff] %vm5694_vm7, %v5670_v57  ;;  %v5646_v56 = vsub.f32 %v5621_v19, %v5446_v46  ;;  %v5626_v57 = vadd.f32 %v5601_v62, %v4122_v60  ;;  %v7960_v46 = vld [vmem:[#allocation2 + $0x60] sm:$0xff] }
 0x74b   :  { %v5376_v63 = vpop.xlane.xlu0 %5375 }
 0x74c   :  { %v5671_v13 = vsub.f32 %v5646_v56, %v7956_v23  ;;  %v5447_v7 = vadd.f32 %v10330_v38, %v5376_v63  ;;  %v5627_v63 = vadd.f32 %v5602_v4, %v4123_v49 }
 0x74e   :  { %5697 = vst.msk [vmem:[%s10695_s3 + $0x10] sm:$0xff] %vm5694_vm7, %v5671_v13  ;;  %v5647_v12 = vsub.f32 %v5622_v9, %v5447_v7  ;;  %v7961_v9 = vld [vmem:[#allocation2 + $0x70] sm:$0xff]  ;;  %v7962_v7 = vld [vmem:[#allocation2 + $0x80] sm:$0xff] }
 0x74f   :  { %v5379_v54 = vpop.xlane.xlu1 %5378 }
 0x750   :  { %v5672_v30 = vsub.f32 %v5647_v12, %v7957_v20  ;;  %v5448_v28 = vadd.f32 %v10330_v38, %v5379_v54 }
 0x752   :  { %5698 = vst.msk [vmem:[%s10695_s3 + $0x18] sm:$0xff] %vm5694_vm7, %v5672_v30  ;;  %v5648_v44 = vsub.f32 %v5623_v6, %v5448_v28  ;;  %v7963_v6 = vld [vmem:[#allocation2 + $0x90] sm:$0xff] }
 0x753   :  { %v5382_v43 = vpop.xlane.xlu0 %5381 }
 0x754   :  { %v5673_v32 = vsub.f32 %v5648_v44, %v7958_v16  ;;  %v5449_v48 = vadd.f32 %v10330_v38, %v5382_v43  ;;  %v7964_v44 = vld [vmem:[#allocation2 + $0xa0] sm:$0xff] }
 0x756   :  { %5699 = vst.msk [vmem:[%s10695_s3 + $0x20] sm:$0xff] %vm5694_vm7, %v5673_v32  ;;  %v5649_v11 = vsub.f32 %v5624_v15, %v5449_v48  ;;  %v7965_v15 = vld [vmem:[#allocation2 + $0xb0] sm:$0xff]  ;;  %v7966_v48 = vld [vmem:[#allocation2 + $0xc0] sm:$0xff] }
 0x757   :  { %v5385_v50 = vpop.xlane.xlu1 %5384 }
 0x758   :  { %v5674_v61 = vsub.f32 %v5649_v11, %v7959_v52  ;;  %v5450_v31 = vadd.f32 %v10330_v38, %v5385_v50  ;;  %v7967_v50 = vld [vmem:[#allocation2 + $0xd0] sm:$0xff] }
 0x75a   :  { %5700 = vst.msk [vmem:[%s10695_s3 + $0x28] sm:$0xff] %vm5694_vm7, %v5674_v61  ;;  %v5650_v19 = vsub.f32 %v5625_v47, %v5450_v31  ;;  %v7968_v61 = vld [vmem:[#allocation2 + $0xe0] sm:$0xff] }
 0x75b   :  { %v5388_v34 = vpop.xlane.xlu0 %5387 }
 0x75c   :  { %v5675_v56 = vsub.f32 %v5650_v19, %v7960_v46  ;;  %v5451_v2 = vadd.f32 %v10330_v38, %v5388_v34  ;;  %v7969_v34 = vld [vmem:[#allocation2 + $0xf0] sm:$0xff] }
 0x75e   :  { %5701 = vst.msk [vmem:[%s10695_s3 + $0x30] sm:$0xff] %vm5694_vm7, %v5675_v56  ;;  %v5651_v14 = vsub.f32 %v5626_v57, %v5451_v2  ;;  %v7970_v56 = vld [vmem:[#allocation2 + $0x100] sm:$0xff] }
 0x75f   :  { %v5391_v37 = vpop.xlane.xlu1 %5390 }
 0x760   :  { %v5676_v3 = vsub.f32 %v5651_v14, %v7961_v9  ;;  %v5452_v23 = vadd.f32 %v10330_v38, %v5391_v37 }
 0x762   :  { %5702 = vst.msk [vmem:[%s10695_s3 + $0x38] sm:$0xff] %vm5694_vm7, %v5676_v3  ;;  %v5652_v17 = vsub.f32 %v5627_v63, %v5452_v23  ;;  %v7971_v63 = vld [vmem:[#allocation2 + $0x110] sm:$0xff] }
 0x763   :  { %v5394_v13 = vpop.xlane.xlu1 %5393 }
 0x764   :  { %v5677_v12 = vsub.f32 %v5652_v17, %v7962_v7  ;;  %v5453_v41 = vadd.f32 %v10330_v38, %v5394_v13  ;;  %v7972_v17 = vld [vmem:[#allocation2 + $0x120] sm:$0xff] }
 0x766   :  { %5703 = vst.msk [vmem:[%s10695_s3 + $0x40] sm:$0xff] %vm5694_vm7, %v5677_v12  ;;  %v5653_v27 = vsub.f32 %v10354_v5, %v5453_v41  ;;  %v7973_v41 = vld [vmem:[#allocation2 + $0x130] sm:$0xff] }
 0x767   :  { %v5397_v54 = vpop.xlane.xlu0 %5396 }
 0x768   :  { %v5678_v45 = vsub.f32 %v5653_v27, %v7963_v6  ;;  %v5454_v20 = vadd.f32 %v10330_v38, %v5397_v54 }
 0x76a   :  { %5704 = vst.msk [vmem:[%s10695_s3 + $0x48] sm:$0xff] %vm5694_vm7, %v5678_v45  ;;  %v5654_v30 = vsub.f32 %v10362_v53, %v5454_v20  ;;  %v5592_v45 = vadd.f32 %v10330_v38, %v10304_v18  ;;  %v7974_v20 = vld [vmem:[#allocation2 + $0x140] sm:$0xff]  ;;  %v7975_v18 = vld [vmem:[#allocation2 + $0x150] sm:$0xff] }
 0x76b   :  { %v5400_v28 = vpop.xlane.xlu1 %5399 }
 0x76c   :  { %v5679_v39 = vsub.f32 %v5654_v30, %v7964_v44  ;;  %v5455_v55 = vadd.f32 %v10330_v38, %v5400_v28  ;;  %v5593_v44 = vadd.f32 %v10330_v38, %v10300_v40  ;;  %v4139_v40 = vadd.f32 %v10346_v51, %v10515_v35  ;;  %v7978_v35 = vld [vmem:[#allocation2 + $0x180] sm:$0xff] }
 0x76e   :  { %5705 = vst.msk [vmem:[%s10695_s3 + $0x50] sm:$0xff] %vm5694_vm7, %v5679_v39  ;;  %v5655_v5 = vsub.f32 %v10370_v25, %v5455_v55  ;;  %v4138_v55 = vadd.f32 %v10346_v51, %v10507_v33 }
 0x76f   :  { %v5403_v43 = vpop.xlane.xlu0 %5402 }
 0x770   :  { %v5680_v21 = vsub.f32 %v5655_v5, %v7965_v15  ;;  %v5456_v16 = vadd.f32 %v10330_v38, %v5403_v43 }
 0x772   :  { %5706 = vst.msk [vmem:[%s10695_s3 + $0x58] sm:$0xff] %vm5694_vm7, %v5680_v21  ;;  %v5656_v53 = vsub.f32 %v10378_v26, %v5456_v16 }
 0x773   :  { %v5406_v32 = vpop.xlane.xlu1 %5405 }
 0x774   :  { %v5681_v11 = vsub.f32 %v5656_v53, %v7966_v48  ;;  %v5457_v59 = vadd.f32 %v10330_v38, %v5406_v32  ;;  %v7976_v53 = vld [vmem:[#allocation2 + $0x160] sm:$0xff] }
 0x776   :  { %5707 = vst.msk [vmem:[%s10695_s3 + $0x60] sm:$0xff] %vm5694_vm7, %v5681_v11  ;;  %v5657_v25 = vsub.f32 %v10383_v58, %v5457_v59 }
 0x777   :  { %v5409_v62 = vpop.xlane.xlu0 %5408 }
 0x778   :  { %v5682_v47 = vsub.f32 %v5657_v25, %v7967_v50  ;;  %v5458_v60 = vadd.f32 %v10330_v38, %v5409_v62  ;;  %v7977_v25 = vld [vmem:[#allocation2 + $0x170] sm:$0xff] }
 0x77a   :  { %5708 = vst.msk [vmem:[%s10695_s3 + $0x68] sm:$0xff] %vm5694_vm7, %v5682_v47  ;;  %v5658_v26 = vsub.f32 %v10388_v0, %v5458_v60 }
 0x77b   :  { %v5412_v52 = vpop.xlane.xlu1 %5411 }
 0x77c   :  { %v5683_v31 = vsub.f32 %v5658_v26, %v7968_v61  ;;  %v5459_v19 = vadd.f32 %v10330_v38, %v5412_v52 }
 0x77e   :  { %5709 = vst.msk [vmem:[%s10695_s3 + $0x70] sm:$0xff] %vm5694_vm7, %v5683_v31  ;;  %v5659_v58 = vsub.f32 %v10393_v24, %v5459_v19 }
 0x77f   :  { %v5415_v4 = vpop.xlane.xlu0 %5414 }
 0x780   :  { %v5684_v57 = vsub.f32 %v5659_v58, %v7969_v34  ;;  %v5460_v49 = vadd.f32 %v10330_v38, %v5415_v4 }
 0x782   :  { %5710 = vst.msk [vmem:[%s10695_s3 + $0x78] sm:$0xff] %vm5694_vm7, %v5684_v57  ;;  %v5660_v0 = vsub.f32 %v10398_v8, %v5460_v49 }
 0x783   :  { %v5418_v46 = vpop.xlane.xlu1 %5417 }
 0x784   :  { %v5685_v2 = vsub.f32 %v5660_v0, %v7970_v56  ;;  %v5461_v14 = vadd.f32 %v10330_v38, %v5418_v46 }
 0x786   :  { %5711 = vst.msk [vmem:[%s10695_s3 + $0x80] sm:$0xff] %vm5694_vm7, %v5685_v2  ;;  %v5661_v24 = vsub.f32 %v10403_v36, %v5461_v14 }
 0x787   :  { %v5421_v37 = vpop.xlane.xlu0 %5420 }
 0x788   :  { %v5686_v9 = vsub.f32 %v5661_v24, %v7971_v63  ;;  %v5462_v3 = vadd.f32 %v10330_v38, %v5421_v37 }
 0x78a   :  { %5712 = vst.msk [vmem:[%s10695_s3 + $0x88] sm:$0xff] %vm5694_vm7, %v5686_v9  ;;  %v5662_v8 = vsub.f32 %v10408_v10, %v5462_v3 }
 0x78b   :  { %v5424_v23 = vpop.xlane.xlu1 %5423 }
 0x78c   :  { %v5687_v13 = vsub.f32 %v5662_v8, %v7972_v17  ;;  %v5463_v7 = vadd.f32 %v10330_v38, %v5424_v23 }
 0x78e   :  { %5713 = vst.msk [vmem:[%s10695_s3 + $0x90] sm:$0xff] %vm5694_vm7, %v5687_v13  ;;  %v5663_v36 = vsub.f32 %v10413_v29, %v5463_v7 }
 0x78f   :  { %v5427_v12 = vpop.xlane.xlu0 %5426 }
 0x790   :  { %v5688_v27 = vsub.f32 %v5663_v36, %v7973_v41  ;;  %v5464_v54 = vadd.f32 %v10330_v38, %v5427_v12 }
 0x792   :  { %5714 = vst.msk [vmem:[%s10695_s3 + $0x98] sm:$0xff] %vm5694_vm7, %v5688_v27  ;;  %v5664_v10 = vsub.f32 %v10418_v22, %v5464_v54  ;;  %v5617_v22 = vmul.f32 0.99, %v5592_v45 }
 0x793   :  { %v5430_v6 = vpop.xlane.xlu1 %5429 }
 0x794   :  { %v5689_v30 = vsub.f32 %v5664_v10, %v7974_v20  ;;  %v5465_v29 = vadd.f32 %v10330_v38, %v5430_v6  ;;  %v5642_v16 = vadd.f32 %v5617_v22, %v4138_v55 }
 0x796   :  { %5715 = vst.msk [vmem:[%s10695_s3 + $0xa0] sm:$0xff] %vm5694_vm7, %v5689_v30  ;;  %v5665_v28 = vsub.f32 %v10421_v1, %v5465_v29  ;;  %v5618_v1 = vmul.f32 0.99, %v5593_v44 }
 0x797   :  { %v5433_v39 = vpop.xlane.xlu0 %5432 }
 0x798   :  { %v5690_v5 = vsub.f32 %v5665_v28, %v7975_v18  ;;  %v5466_v43 = vadd.f32 %v10330_v38, %v5433_v39  ;;  %v5643_v59 = vadd.f32 %v5618_v1, %v4139_v40 }
 0x79a   :  { %5716 = vst.msk [vmem:[%s10695_s3 + $0xa8] sm:$0xff] %vm5694_vm7, %v5690_v5  ;;  %v5666_v15 = vsub.f32 %v10424_v42, %v5466_v43 }
 0x79b   :  { %v5436_v21 = vpop.xlane.xlu1 %5435 }
 0x79c   :  { %v5691_v32 = vsub.f32 %v5666_v15, %v7976_v53  ;;  %v5467_v33 = vadd.f32 %v10330_v38, %v5436_v21 }
 0x79e   :  { %5717 = vst.msk [vmem:[%s10695_s3 + $0xb0] sm:$0xff] %vm5694_vm7, %v5691_v32  ;;  %v5667_v48 = vsub.f32 %v5642_v16, %v5467_v33 }
 0x79f   :  { %v5439_v11 = vpop.xlane.xlu0 %5438 }
 0x7a0   :  { %v5692_v42 = vsub.f32 %v5667_v48, %v7977_v25  ;;  %v5468_v62 = vadd.f32 %v10330_v38, %v5439_v11 }
 0x7a2   :  { %5718 = vst.msk [vmem:[%s10695_s3 + $0xb8] sm:$0xff] %vm5694_vm7, %v5692_v42  ;;  %v5668_v51 = vsub.f32 %v5643_v59, %v5468_v62 }
 0x7a4   :  { %v5693_v50 = vsub.f32 %v5668_v51, %v7978_v35 }
 0x7a6   :  { %5719 = vst.msk [vmem:[%s10695_s3 + $0xc0] sm:$0xff] %vm5694_vm7, %v5693_v50 }
 0x7a7   :  { %5724 = vsyncpa [#allocation3], 1 }
 0x7a8   :  { %5725 = vsyncpa [#allocation5], 1 }

</bundles_post_ra>
